<compile_context>
chip_gen: v7x
topology: tpu7x:2x2x1
jax: 0.10.0
libtpu: 0.0.40
codegen_flags: <defaults>
</compile_context>

<pallas_src>
import jax
import jax.numpy as jnp
from jax.experimental import pallas as pl
from jax.experimental.pallas import tpu as pltpu


_LAYER_DIMS = [(100, 2048), (2048, 1024), (1024, 512), (512, 256),
               (256, 128), (128, 64), (64, 32), (32, 86)]
_NUM_LAYERS = len(_LAYER_DIMS)
_NUM_BIG = 3            # layers 0..2 keep their own weight refs
_TAIL_LANES = 256       # max padded N among tail layers (layer 3: N=256)


def _round_up(v, m):
    return (v + m - 1) // m * m


# Bias slab: each segment starts at a 128-lane-aligned offset.
_BIAS_OFFS = []
_off = 0
for (_, _n) in _LAYER_DIMS:
    _BIAS_OFFS.append(_off)
    _off += _round_up(_n, 128)
_BIAS_TOTAL = _off          # 4352 lanes of f32 (~17 KiB)

# Tail weight slab: layers 3..7 stacked along K (row offsets all multiples of 16,
# so bf16 sublane packing stays aligned).
_TAIL_OFFS = []
_roff = 0
for (_k, _n) in _LAYER_DIMS[_NUM_BIG:]:
    _TAIL_OFFS.append(_roff)
    _roff += _k
_TAIL_ROWS = _roff          # 992


# ----------------------------------------------------------------------------
# Fused kernel: the whole network in one body, everything VMEM-resident.
# refs = (x, w0, w1, w2, w_tail_slab, bias_slab, out).
# The per-layer loop is unrolled in Python (shapes differ per layer), giving
# the scheduler full visibility; bias-add + ReLU run on the VPU under MXU work.
# ----------------------------------------------------------------------------
def _dnn_fused_kernel(x_ref, w0_ref, w1_ref, w2_ref, wt_ref, b_ref, o_ref):
    h = x_ref[...].astype(jnp.bfloat16)                    # (B, 100)

    big_w_refs = (w0_ref, w1_ref, w2_ref)
    for i in range(_NUM_BIG):
        _, n = _LAYER_DIMS[i]
        y = jnp.dot(h, big_w_refs[i][...],
                    preferred_element_type=jnp.float32)    # MXU, f32 accumulate
        y = y + b_ref[:, _BIAS_OFFS[i]:_BIAS_OFFS[i] + n]  # (1, N) broadcast
        y = jnp.maximum(y, 0.0)
        h = y.astype(jnp.bfloat16)                         # bf16 activations

    for j, (k, n) in enumerate(_LAYER_DIMS[_NUM_BIG:]):
        i = _NUM_BIG + j
        r0 = _TAIL_OFFS[j]
        w = wt_ref[r0:r0 + k, 0:n]                         # static view slice
        y = jnp.dot(h, w, preferred_element_type=jnp.float32)
        y = y + b_ref[:, _BIAS_OFFS[i]:_BIAS_OFFS[i] + n]
        if i < _NUM_LAYERS - 1:
            y = jnp.maximum(y, 0.0)
            h = y.astype(jnp.bfloat16)
        else:
            o_ref[...] = y.astype(o_ref.dtype)             # final layer: no ReLU


def dnn_forward_pallas(x, prepared):
    """Single fused Pallas launch for the whole 8-layer MLP."""
    w0, w1, w2, wt, bias = prepared
    B = x.shape[0]
    n_out = _LAYER_DIMS[-1][1]

    vmem_spec = pl.BlockSpec(memory_space=pltpu.MemorySpace.VMEM)

    flops = 2 * B * sum(k * n for k, n in _LAYER_DIMS)
    bytes_accessed = (x.size * x.dtype.itemsize
                      + sum(a.size * a.dtype.itemsize for a in prepared)
                      + B * n_out * 4)

    return pl.pallas_call(
        _dnn_fused_kernel,
        out_shape=jax.ShapeDtypeStruct((B, n_out), jnp.float32),
        in_specs=[vmem_spec] * 6,
        out_specs=vmem_spec,
        compiler_params=pltpu.CompilerParams(
            vmem_limit_bytes=24 << 20,      # keep: v5e default scoped VMEM is 16 MiB
        ),
        cost_estimate=pl.CostEstimate(
            flops=flops, transcendentals=0, bytes_accessed=bytes_accessed),
    )(x, w0, w1, w2, wt, bias)


# ----------------------------------------------------------------------------
# One-time parameter preparation (OUTSIDE the jitted forward): bf16 weights
# (big ones separate, tail packed), one lane-aligned f32 bias slab.
# ----------------------------------------------------------------------------
def prepare_params(params):
    ws_big = tuple(w.astype(jnp.bfloat16) for (w, _) in params[:_NUM_BIG])

    tail = jnp.zeros((_TAIL_ROWS, _TAIL_LANES), jnp.bfloat16)
    for j, (k, n) in enumerate(_LAYER_DIMS[_NUM_BIG:]):
        w = params[_NUM_BIG + j][0].astype(jnp.bfloat16)
        tail = tail.at[_TAIL_OFFS[j]:_TAIL_OFFS[j] + k, 0:n].set(w)

    bias = jnp.zeros((1, _BIAS_TOTAL), jnp.float32)
    for i, (_, n) in enumerate(_LAYER_DIMS):
        b = params[i][1].reshape(1, -1).astype(jnp.float32)
        bias = bias.at[:, _BIAS_OFFS[i]:_BIAS_OFFS[i] + n].set(b)

    return ws_big + (tail, bias)


# ----------------------------------------------------------------------------
# Params + driver
# ----------------------------------------------------------------------------
def init_params(key):
    """Deterministic init mimicking torch.nn.Linear's U(-1/sqrt(fan_in), +...)."""
    params = []
    for (fan_in, fan_out) in _LAYER_DIMS:
        key, kw, kb = jax.random.split(key, 3)
        bound = 1.0 / jnp.sqrt(jnp.float32(fan_in))
        w = jax.random.uniform(kw, (fan_in, fan_out), jnp.float32, -bound, bound)
        b = jax.random.uniform(kb, (fan_out,), jnp.float32, -bound, bound)
        params.append((w, b))
    return params


@jax.jit
def dnn_forward(x, prepared):
    return dnn_forward_pallas(x, prepared)


def dnn_forward_ref(x, params):
    """Pure-JAX reference using the same bf16-weight / f32-accumulate recipe."""
    # TODO(synk): this validates the kernel against an identical bf16 recipe,
    # not the exact f32 PyTorch numerics; bf16 error through 8 layers is small
    # but nonzero versus a pure-f32 baseline.
    h = x.astype(jnp.bfloat16)
    for i, (w, b) in enumerate(params):
        y = jnp.dot(h, w.astype(jnp.bfloat16),
                    preferred_element_type=jnp.float32) + b.astype(jnp.float32)
        if i < _NUM_LAYERS - 1:
            y = jnp.maximum(y, 0.0)
            h = y.astype(jnp.bfloat16)
        else:
            return y


if __name__ == "__main__":
    key = jax.random.PRNGKey(0)
    kp, kx = jax.random.split(key)
    params = init_params(kp)
    prepared = prepare_params(params)      # one-time bf16 cast + packing

    batch = 2
    x = jax.random.normal(kx, (batch, 100), jnp.float32)

    out = dnn_forward(x, prepared)
    out = jax.block_until_ready(out)

    ref = dnn_forward_ref(x, params)
    assert out.shape == (batch, 86), out.shape
    assert jnp.allclose(out, ref, atol=1e-2, rtol=1e-2), "mismatch vs reference"

    print("KERNEL_OK")
</pallas_src>

<mosaic_0001>
module attributes {stable_mosaic.version = 11 : i64} {
  func.func @_dnn_fused_kernel(%arg0: memref<2x100xf32, #tpu.memory_space<vmem>>, %arg1: memref<100x2048xbf16, #tpu.memory_space<vmem>>, %arg2: memref<2048x1024xbf16, #tpu.memory_space<vmem>>, %arg3: memref<1024x512xbf16, #tpu.memory_space<vmem>>, %arg4: memref<992x256xbf16, #tpu.memory_space<vmem>>, %arg5: memref<1x4352xf32, #tpu.memory_space<vmem>>, %arg6: memref<2x86xf32, #tpu.memory_space<vmem>>) attributes {dimension_semantics = [], scalar_prefetch = 0 : i64, scratch_operands = 0 : i64, tpu.core_type = #tpu.core_type<tc>} {
    %c0 = arith.constant 0 : index
    %c0_0 = arith.constant 0 : index
    %0 = vector.load %arg0[%c0, %c0_0] : memref<2x100xf32, #tpu.memory_space<vmem>>, vector<2x100xf32>
    %1 = arith.truncf %0 : vector<2x100xf32> to vector<2x100xbf16>
    %c0_1 = arith.constant 0 : index
    %c0_2 = arith.constant 0 : index
    %2 = vector.load %arg1[%c0_1, %c0_2] : memref<100x2048xbf16, #tpu.memory_space<vmem>>, vector<100x2048xbf16>
    %cst = arith.constant dense<0.000000e+00> : vector<2x2048xf32>
    %3 = tpu.matmul %1, %2, %cst {dimension_numbers = #tpu.dot_dimension_numbers<[1], [0], [0], [1], [0, 0, 1, 1], [], []>} : vector<2x100xbf16>, vector<100x2048xbf16>, vector<2x2048xf32> -> vector<2x2048xf32>
    %c0_3 = arith.constant 0 : index
    %c0_4 = arith.constant 0 : index
    %4 = vector.load %arg5[%c0_3, %c0_4] : memref<1x4352xf32, #tpu.memory_space<vmem>>, vector<1x2048xf32>
    %5 = vector.broadcast %4 : vector<1x2048xf32> to vector<2x2048xf32>
    %6 = arith.addf %3, %5 : vector<2x2048xf32>
    %cst_5 = arith.constant 0.000000e+00 : f32
    %7 = vector.broadcast %cst_5 : f32 to vector<2x2048xf32>
    %8 = arith.maximumf %6, %7 : vector<2x2048xf32>
    %9 = arith.truncf %8 : vector<2x2048xf32> to vector<2x2048xbf16>
    %c0_6 = arith.constant 0 : index
    %c0_7 = arith.constant 0 : index
    %10 = vector.load %arg2[%c0_6, %c0_7] : memref<2048x1024xbf16, #tpu.memory_space<vmem>>, vector<2048x1024xbf16>
    %cst_8 = arith.constant dense<0.000000e+00> : vector<2x1024xf32>
    %11 = tpu.matmul %9, %10, %cst_8 {dimension_numbers = #tpu.dot_dimension_numbers<[1], [0], [0], [1], [0, 0, 1, 1], [], []>} : vector<2x2048xbf16>, vector<2048x1024xbf16>, vector<2x1024xf32> -> vector<2x1024xf32>
    %c0_9 = arith.constant 0 : index
    %c2048 = arith.constant 2048 : index
    %12 = vector.load %arg5[%c0_9, %c2048] : memref<1x4352xf32, #tpu.memory_space<vmem>>, vector<1x1024xf32>
    %13 = vector.broadcast %12 : vector<1x1024xf32> to vector<2x1024xf32>
    %14 = arith.addf %11, %13 : vector<2x1024xf32>
    %cst_10 = arith.constant 0.000000e+00 : f32
    %15 = vector.broadcast %cst_10 : f32 to vector<2x1024xf32>
    %16 = arith.maximumf %14, %15 : vector<2x1024xf32>
    %17 = arith.truncf %16 : vector<2x1024xf32> to vector<2x1024xbf16>
    %c0_11 = arith.constant 0 : index
    %c0_12 = arith.constant 0 : index
    %18 = vector.load %arg3[%c0_11, %c0_12] : memref<1024x512xbf16, #tpu.memory_space<vmem>>, vector<1024x512xbf16>
    %cst_13 = arith.constant dense<0.000000e+00> : vector<2x512xf32>
    %19 = tpu.matmul %17, %18, %cst_13 {dimension_numbers = #tpu.dot_dimension_numbers<[1], [0], [0], [1], [0, 0, 1, 1], [], []>} : vector<2x1024xbf16>, vector<1024x512xbf16>, vector<2x512xf32> -> vector<2x512xf32>
    %c0_14 = arith.constant 0 : index
    %c3072 = arith.constant 3072 : index
    %20 = vector.load %arg5[%c0_14, %c3072] : memref<1x4352xf32, #tpu.memory_space<vmem>>, vector<1x512xf32>
    %21 = vector.broadcast %20 : vector<1x512xf32> to vector<2x512xf32>
    %22 = arith.addf %19, %21 : vector<2x512xf32>
    %cst_15 = arith.constant 0.000000e+00 : f32
    %23 = vector.broadcast %cst_15 : f32 to vector<2x512xf32>
    %24 = arith.maximumf %22, %23 : vector<2x512xf32>
    %25 = arith.truncf %24 : vector<2x512xf32> to vector<2x512xbf16>
    %c0_16 = arith.constant 0 : index
    %c0_17 = arith.constant 0 : index
    %26 = vector.load %arg4[%c0_16, %c0_17] : memref<992x256xbf16, #tpu.memory_space<vmem>>, vector<512x256xbf16>
    %cst_18 = arith.constant dense<0.000000e+00> : vector<2x256xf32>
    %27 = tpu.matmul %25, %26, %cst_18 {dimension_numbers = #tpu.dot_dimension_numbers<[1], [0], [0], [1], [0, 0, 1, 1], [], []>} : vector<2x512xbf16>, vector<512x256xbf16>, vector<2x256xf32> -> vector<2x256xf32>
    %c0_19 = arith.constant 0 : index
    %c3584 = arith.constant 3584 : index
    %28 = vector.load %arg5[%c0_19, %c3584] : memref<1x4352xf32, #tpu.memory_space<vmem>>, vector<1x256xf32>
    %29 = vector.broadcast %28 : vector<1x256xf32> to vector<2x256xf32>
    %30 = arith.addf %27, %29 : vector<2x256xf32>
    %cst_20 = arith.constant 0.000000e+00 : f32
    %31 = vector.broadcast %cst_20 : f32 to vector<2x256xf32>
    %32 = arith.maximumf %30, %31 : vector<2x256xf32>
    %33 = arith.truncf %32 : vector<2x256xf32> to vector<2x256xbf16>
    %c512 = arith.constant 512 : index
    %c0_21 = arith.constant 0 : index
    %34 = vector.load %arg4[%c512, %c0_21] : memref<992x256xbf16, #tpu.memory_space<vmem>>, vector<256x128xbf16>
    %cst_22 = arith.constant dense<0.000000e+00> : vector<2x128xf32>
    %35 = tpu.matmul %33, %34, %cst_22 {dimension_numbers = #tpu.dot_dimension_numbers<[1], [0], [0], [1], [0, 0, 1, 1], [], []>} : vector<2x256xbf16>, vector<256x128xbf16>, vector<2x128xf32> -> vector<2x128xf32>
    %c0_23 = arith.constant 0 : index
    %c3840 = arith.constant 3840 : index
    %36 = vector.load %arg5[%c0_23, %c3840] : memref<1x4352xf32, #tpu.memory_space<vmem>>, vector<1x128xf32>
    %37 = vector.broadcast %36 : vector<1x128xf32> to vector<2x128xf32>
    %38 = arith.addf %35, %37 : vector<2x128xf32>
    %cst_24 = arith.constant 0.000000e+00 : f32
    %39 = vector.broadcast %cst_24 : f32 to vector<2x128xf32>
    %40 = arith.maximumf %38, %39 : vector<2x128xf32>
    %41 = arith.truncf %40 : vector<2x128xf32> to vector<2x128xbf16>
    %c768 = arith.constant 768 : index
    %c0_25 = arith.constant 0 : index
    %42 = vector.load %arg4[%c768, %c0_25] : memref<992x256xbf16, #tpu.memory_space<vmem>>, vector<128x64xbf16>
    %cst_26 = arith.constant dense<0.000000e+00> : vector<2x64xf32>
    %43 = tpu.matmul %41, %42, %cst_26 {dimension_numbers = #tpu.dot_dimension_numbers<[1], [0], [0], [1], [0, 0, 1, 1], [], []>} : vector<2x128xbf16>, vector<128x64xbf16>, vector<2x64xf32> -> vector<2x64xf32>
    %c0_27 = arith.constant 0 : index
    %c3968 = arith.constant 3968 : index
    %44 = vector.load %arg5[%c0_27, %c3968] : memref<1x4352xf32, #tpu.memory_space<vmem>>, vector<1x64xf32>
    %45 = vector.broadcast %44 : vector<1x64xf32> to vector<2x64xf32>
    %46 = arith.addf %43, %45 : vector<2x64xf32>
    %cst_28 = arith.constant 0.000000e+00 : f32
    %47 = vector.broadcast %cst_28 : f32 to vector<2x64xf32>
    %48 = arith.maximumf %46, %47 : vector<2x64xf32>
    %49 = arith.truncf %48 : vector<2x64xf32> to vector<2x64xbf16>
    %c896 = arith.constant 896 : index
    %c0_29 = arith.constant 0 : index
    %50 = vector.load %arg4[%c896, %c0_29] : memref<992x256xbf16, #tpu.memory_space<vmem>>, vector<64x32xbf16>
    %cst_30 = arith.constant dense<0.000000e+00> : vector<2x32xf32>
    %51 = tpu.matmul %49, %50, %cst_30 {dimension_numbers = #tpu.dot_dimension_numbers<[1], [0], [0], [1], [0, 0, 1, 1], [], []>} : vector<2x64xbf16>, vector<64x32xbf16>, vector<2x32xf32> -> vector<2x32xf32>
    %c0_31 = arith.constant 0 : index
    %c4096 = arith.constant 4096 : index
    %52 = vector.load %arg5[%c0_31, %c4096] : memref<1x4352xf32, #tpu.memory_space<vmem>>, vector<1x32xf32>
    %53 = vector.broadcast %52 : vector<1x32xf32> to vector<2x32xf32>
    %54 = arith.addf %51, %53 : vector<2x32xf32>
    %cst_32 = arith.constant 0.000000e+00 : f32
    %55 = vector.broadcast %cst_32 : f32 to vector<2x32xf32>
    %56 = arith.maximumf %54, %55 : vector<2x32xf32>
    %57 = arith.truncf %56 : vector<2x32xf32> to vector<2x32xbf16>
    %c960 = arith.constant 960 : index
    %c0_33 = arith.constant 0 : index
    %58 = vector.load %arg4[%c960, %c0_33] : memref<992x256xbf16, #tpu.memory_space<vmem>>, vector<32x86xbf16>
    %cst_34 = arith.constant dense<0.000000e+00> : vector<2x86xf32>
    %59 = tpu.matmul %57, %58, %cst_34 {dimension_numbers = #tpu.dot_dimension_numbers<[1], [0], [0], [1], [0, 0, 1, 1], [], []>} : vector<2x32xbf16>, vector<32x86xbf16>, vector<2x86xf32> -> vector<2x86xf32>
    %c0_35 = arith.constant 0 : index
    %c4224 = arith.constant 4224 : index
    %60 = vector.load %arg5[%c0_35, %c4224] : memref<1x4352xf32, #tpu.memory_space<vmem>>, vector<1x86xf32>
    %61 = vector.broadcast %60 : vector<1x86xf32> to vector<2x86xf32>
    %62 = arith.addf %59, %61 : vector<2x86xf32>
    %c0_36 = arith.constant 0 : index
    %c0_37 = arith.constant 0 : index
    %63 = vector.load %arg6[%c0_36, %c0_37] : memref<2x86xf32, #tpu.memory_space<vmem>>, vector<2x86xf32>
    tpu.vector_store %arg6[%c0_36, %c0_37], %62 {strides = array<i32>} : memref<2x86xf32, #tpu.memory_space<vmem>>, vector<2x86xf32>,
    return
  }
}

</mosaic_0001>

<bundles_post_ra>
// kernel: dnn_forward.1
= control target key start
LH: loop header
LB: loop body
LE: loop exit
PB: predicated region body
PF: predicated region fallthrough
CT: control target
= control target key end

     0   :  { %11 = vsyncpa [#allocation3], 0  ;;  %s14492_s0 = inlined_call_operand.hbm [shape: f32[2,100], index: 0, kind: input, shape index: {}]   ;;  %s14493_s1 = inlined_call_operand.hbm [shape: bf16[100,2048], index: 1, kind: input, shape index: {}]   ;;  %s14494_s2 = inlined_call_operand.hbm [shape: bf16[2048,1024], index: 2, kind: input, shape index: {}]   ;;  %s14495_s3 = inlined_call_operand.hbm [shape: bf16[1024,512], index: 3, kind: input, shape index: {}]   ;;  %s14496_s4 = inlined_call_operand.hbm [shape: bf16[992,256], index: 4, kind: input, shape index: {}]   ;;  %s14497_s5 = inlined_call_operand.hbm [shape: f32[1,4352], index: 5, kind: input, shape index: {}]   ;;  %s14498_s6 = inlined_call_operand.hbm [shape: f32[2,86], index: 6, kind: output, shape index: {}]  }
   0x1   :  { %12 = vsyncpa [#allocation6], 0 }
   0x2   :  { %13 = vsyncpa [#allocation9], 0 }
   0x3   :  { %14 = vsyncpa [#allocation12], 0 }
   0x4   :  { %15 = vsyncpa [#allocation4], 0  ;;  %s14030_s21 = smov [#allocation5]   ;;  %s13866_s25 = scalar_lea.hbm %s14493_s1, 13312 }
   0x5   :  { %s31_s22 = sshll.u32 %s14030_s21, 4  ;;  %p13867_p0 = scmp.ne.s32.totalorder %s14493_s1, %s13866_s25  ;;  %s32_s22 = int_to_ptr.vmem [resolvable:$true] %s31_s22 }
   0x6   :  { %p13870_p1 = scmp.lt.u32.totalorder %s13866_s25, %s14493_s1 }
   0x8   :  { %p13872_p2 = pnand %p13870_p1, %p13867_p0 }
   0xa   :  { %13875 = shalt.err (!%p13872_p2)
}
   0xb   :  { %s13876_s30 = scalar_lea.vmem %s32_s22, 13312  ;;  %p13881_p4 = scmp.lt.s32.totalorder %s32_s22, %s32_s22 }
   0xc   :  { %p13877_p3 = scmp.ne.s32.totalorder %s32_s22, %s13876_s30  ;;  %p13882_p5 = scmp.lt.s32.totalorder %s13876_s30, %s13876_s30 }
   0xe   :  { %p13883_p6 = por %p13882_p5, %p13881_p4 }
  0x10   :  { %p13884_p7 = pnand %p13883_p6, %p13877_p3 }
  0x12   :  { %13887 = shalt.err (!%p13884_p7)
}
  0x13   :  { %s14031_s7 = smov 1024   ;;  %s14032_s8 = smov 64  }
  0x14   :  { %37 = dma.hbm_to_vmem [thread:$0]  %s14493_s1, 13312, %s32_s22, [#allocation6], %s14031_s7, %s14031_s7, %s14032_s8  }
  0x15   :  { %s14033_s11 = smov [#allocation8]   ;;  %s13888_s15 = scalar_lea.hbm %s14495_s3, 32768 }
  0x16   :  { %s55_s12 = sshll.u32 %s14033_s11, 4  ;;  %p13889_p8 = scmp.ne.s32.totalorder %s14495_s3, %s13888_s15  ;;  %s56_s12 = int_to_ptr.vmem [resolvable:$true] %s55_s12 }
  0x17   :  { %p13892_p9 = scmp.lt.u32.totalorder %s13888_s15, %s14495_s3 }
  0x19   :  { %p13894_p10 = pnand %p13892_p9, %p13889_p8 }
  0x1b   :  { %13897 = shalt.err (!%p13894_p10)
}
  0x1c   :  { %s13898_s20 = scalar_lea.vmem %s56_s12, 32768  ;;  %p13903_p12 = scmp.lt.s32.totalorder %s56_s12, %s56_s12 }
  0x1d   :  { %p13899_p11 = scmp.ne.s32.totalorder %s56_s12, %s13898_s20  ;;  %p13904_p13 = scmp.lt.s32.totalorder %s13898_s20, %s13898_s20 }
  0x1f   :  { %p13905_p0 = por %p13904_p13, %p13903_p12 }
  0x21   :  { %p13906_p1 = pnand %p13905_p0, %p13899_p11 }
  0x23   :  { %13909 = shalt.err (!%p13906_p1)
}
  0x24   :  { %s14034_s1 = smov 256   ;;  %s14035_s21 = smov 16  }
  0x25   :  { %61 = dma.hbm_to_vmem [thread:$0]  %s14495_s3, 32768, %s56_s12, [#allocation9], %s14034_s1, %s14034_s1, %s14035_s21  }
  0x26   :  { %s14036_s24 = smov [#allocation2]   ;;  %s14037_s26 = smov [#allocation7]  }
  0x27   :  { %s22_s25 = sshll.u32 %s14036_s24, 4  ;;  %s43_s27 = sshll.u32 %s14037_s26, 4  ;;  %s23_s25 = int_to_ptr.vmem [resolvable:$true] %s22_s25  ;;  %s14107_s27 = int_to_ptr.vmem [resolvable:$true] %s43_s27 }
  0x28   :  { %s13910_s30 = scalar_lea.hbm %s14492_s0, 32 }
  0x29   :  { %p13911_p2 = scmp.ne.s32.totalorder %s14492_s0, %s13910_s30  ;;  %p13914_p3 = scmp.lt.u32.totalorder %s13910_s30, %s14492_s0 }
  0x2b   :  { %p13916_p4 = pnand %p13914_p3, %p13911_p2 }
  0x2d   :  { %13919 = shalt.err (!%p13916_p4)
}
  0x2e   :  { %s13920_s3 = scalar_lea.vmem %s23_s25, 32  ;;  %p13925_p6 = scmp.lt.s32.totalorder %s23_s25, %s23_s25 }
  0x2f   :  { %p13921_p5 = scmp.ne.s32.totalorder %s23_s25, %s13920_s3  ;;  %p13926_p7 = scmp.lt.s32.totalorder %s13920_s3, %s13920_s3 }
  0x31   :  { %p13927_p8 = por %p13926_p7, %p13925_p6 }
  0x33   :  { %p13928_p9 = pnand %p13927_p8, %p13921_p5 }
  0x35   :  { %13931 = shalt.err (!%p13928_p9)
}
  0x36   :  { %25 = dma.hbm_to_vmem [thread:$0]  %s14492_s0, 32, %s23_s25, [#allocation3]  }
  0x37   :  { %s13932_s15 = scalar_lea.hbm %s14494_s2, 131072 }
  0x38   :  { %p13933_p10 = scmp.ne.s32.totalorder %s14494_s2, %s13932_s15  ;;  %p13936_p11 = scmp.lt.u32.totalorder %s13932_s15, %s14494_s2 }
  0x3a   :  { %p13938_p12 = pnand %p13936_p11, %p13933_p10 }
  0x3c   :  { %13941 = shalt.err (!%p13938_p12)
}
  0x3d   :  { %s13942_s20 = scalar_lea.vmem %s14107_s27, 131072  ;;  %p13947_p0 = scmp.lt.s32.totalorder %s14107_s27, %s14107_s27 }
  0x3e   :  { %p13943_p13 = scmp.ne.s32.totalorder %s14107_s27, %s13942_s20  ;;  %p13948_p1 = scmp.lt.s32.totalorder %s13942_s20, %s13942_s20 }
  0x40   :  { %p13949_p2 = por %p13948_p1, %p13947_p0 }
  0x42   :  { %p13950_p3 = pnand %p13949_p2, %p13943_p13 }
  0x44   :  { %13953 = shalt.err (!%p13950_p3)
}
  0x45   :  { %s14038_s0 = smov 512   ;;  %s14039_s1 = smov 32  }
  0x46   :  { %49 = dma.hbm_to_vmem [thread:$0]  %s14494_s2, 131072, %s14107_s27, [#allocation6], %s14038_s0, %s14038_s0, %s14039_s1  }
  0x47   :  { %s14040_s23 = smov [#allocation10]   ;;  %s13954_s28 = scalar_lea.hbm %s14496_s4, 15872 }
  0x48   :  { %s67_s24 = sshll.u32 %s14040_s23, 4  ;;  %p13955_p4 = scmp.ne.s32.totalorder %s14496_s4, %s13954_s28  ;;  %s68_s24 = int_to_ptr.vmem [resolvable:$true] %s67_s24 }
  0x49   :  { %p13958_p5 = scmp.lt.u32.totalorder %s13954_s28, %s14496_s4 }
  0x4b   :  { %p13960_p6 = pnand %p13958_p5, %p13955_p4 }
  0x4d   :  { %13963 = shalt.err (!%p13960_p6)
}
  0x4e   :  { %s13964_s9 = scalar_lea.vmem %s68_s24, 15872  ;;  %p13969_p8 = scmp.lt.s32.totalorder %s68_s24, %s68_s24 }
  0x4f   :  { %p13965_p7 = scmp.ne.s32.totalorder %s68_s24, %s13964_s9  ;;  %p13970_p9 = scmp.lt.s32.totalorder %s13964_s9, %s13964_s9 }
  0x51   :  { %p13971_p10 = por %p13970_p9, %p13969_p8 }
  0x53   :  { %p13972_p11 = pnand %p13971_p10, %p13965_p7 }
  0x55   :  { %13975 = shalt.err (!%p13972_p11)
}
  0x56   :  { %s14041_s2 = smov 128   ;;  %s14042_s27 = smov 8  }
  0x57   :  { %73 = dma.hbm_to_vmem [thread:$0]  %s14496_s4, 15872, %s68_s24, [#allocation9], %s14041_s2, %s14041_s2, %s14042_s27  }
  0x58   :  { %s14043_s11 = smov [#allocation11]   ;;  %s13976_s15 = scalar_lea.hbm %s14497_s5, 544 }
  0x59   :  { %s80_s12 = sshll.u32 %s14043_s11, 4  ;;  %p13977_p12 = scmp.ne.s32.totalorder %s14497_s5, %s13976_s15  ;;  %s81_s12 = int_to_ptr.vmem [resolvable:$true] %s80_s12 }
  0x5a   :  { %p13980_p13 = scmp.lt.u32.totalorder %s13976_s15, %s14497_s5 }
  0x5c   :  { %p13982_p0 = pnand %p13980_p13, %p13977_p12 }
  0x5e   :  { %13985 = shalt.err (!%p13982_p0)
}
  0x5f   :  { %s13986_s20 = scalar_lea.vmem %s81_s12, 544  ;;  %p13991_p2 = scmp.lt.s32.totalorder %s81_s12, %s81_s12 }
  0x60   :  { %p13987_p1 = scmp.ne.s32.totalorder %s81_s12, %s13986_s20  ;;  %p13992_p3 = scmp.lt.s32.totalorder %s13986_s20, %s13986_s20 }
  0x62   :  { %p13993_p4 = por %p13992_p3, %p13991_p2 }
  0x64   :  { %p13994_p5 = pnand %p13993_p4, %p13987_p1 }
  0x66   :  { %13997 = shalt.err (!%p13994_p5)
}
  0x67   :  { %83 = dma.hbm_to_vmem [thread:$0]  %s14497_s5, 544, %s81_s12, [#allocation12]  }
  0x68   :  { %14020 = dma.done.wait [#allocation3], 32  }
  0x69   :  { %14021 = vsyncadd [#allocation3], 4294967264 }
  0x6a   :  { %14022 = dma.done.wait [#allocation6], 144384  }
  0x6b   :  { %14023 = vsyncadd [#allocation6], 4294822912 }
  0x6c   :  { %14024 = dma.done.wait [#allocation9], 48640  }
  0x6d   :  { %14025 = vsyncadd [#allocation9], 4294918656 }
  0x6e   :  { %14026 = dma.done.wait [#allocation12], 544  }
  0x6f   :  { %14027 = vsyncadd [#allocation12], 4294966752  ;;  %v14044_v0 = vmov 0   ;;  %v105_v1 = vld [vmem:[#allocation5] sm:$0xff]  ;;  %v107_v17 = vld [vmem:[#allocation5 + $0x10] sm:$0xff]  ;;  %vm817_vm0 = vcmask 1041408  }
  0x70   :  { %898 = vmatprep.mubr.bf16.mxu1 %v14044_v0  ;;  %980 = vmatprep.mubr.bf16.mxu0 %v14044_v0  ;;  %v113_v2 = vld [vmem:[#allocation5 + $0x40] sm:$0xff]  ;;  %v115_v18 = vld [vmem:[#allocation5 + $0x50] sm:$0xff]  ;;  %v106_v46 = vld [vmem:[#allocation5 + $0x8] sm:$0xff]  ;;  %vm813_vm1 = vcmask 818176   ;;  %vm14046_vm2 = vmmov 0   ;;  %vm11445_vm3 = vcmask 523264  }
  0x71   :  { %v121_v3 = vld [vmem:[#allocation5 + $0x80] sm:$0xff]  ;;  %v11579_v4 = vcombine.high %v105_v1, %v113_v2  ;;  %v11578_v5 = vcombine.low %v105_v1, %v113_v2  ;;  %v11583_v20 = vcombine.high %v107_v17, %v115_v18  ;;  %v11582_v21 = vcombine.low %v107_v17, %v115_v18  ;;  %v123_v22 = vld [vmem:[#allocation5 + $0x90] sm:$0xff]  ;;  %v114_v47 = vld [vmem:[#allocation5 + $0x48] sm:$0xff]  ;;  %s14047_s5 = smov [#allocation13]  }
  0x72   :  { %v129_v6 = vld [vmem:[#allocation5 + $0xc0] sm:$0xff]  ;;  %v131_v23 = vld [vmem:[#allocation5 + $0xd0] sm:$0xff]  ;;  %v103_v51 = vld [vmem:[#allocation2] sm:$0x3]  ;;  %v11581_v53 = vcombine.high %v106_v46, %v114_v47  ;;  %v11580_v60 = vcombine.low %v106_v46, %v114_v47  ;;  %vm11514_vm4 = vcmask 261120   ;;  %s11566_s1 = sshll.u32 %s14047_s5, 4  ;;  %s11567_s1 = int_to_ptr.vmem [resolvable:$true] %s11566_s1 }
  0x73   :  { %v11595_v7 = vcombine.high %v121_v3, %v129_v6  ;;  %v137_v8 = vld [vmem:[#allocation5 + $0x100] sm:$0xff]  ;;  %866 = vmatprep.subr.bf16.mxu1 %v11579_v4  ;;  %v11594_v10 = vcombine.low %v121_v3, %v129_v6  ;;  %v11599_v24 = vcombine.high %v123_v22, %v131_v23  ;;  %v139_v25 = vld [vmem:[#allocation5 + $0x110] sm:$0xff]  ;;  %948 = vmatprep.subr.bf16.mxu0 %v11583_v20  ;;  %v122_v55 = vld [vmem:[#allocation5 + $0x88] sm:$0xff]  ;;  %vm11558_vm5 = vcmask 697344   ;;  %s13998_s21 = scalar_lea.vmem %s11567_s1, 32  ;;  %p14003_p7 = scmp.lt.s32.totalorder %s11567_s1, %s11567_s1 }
  0x74   :  { %v145_v9 = vld [vmem:[#allocation5 + $0x140] sm:$0xff]  ;;  %867 = vmatpush1.bf16.msra.mxu1 %v11578_v5  ;;  %v147_v27 = vld [vmem:[#allocation5 + $0x150] sm:$0xff]  ;;  %949 = vmatpush1.bf16.msra.mxu0 %v11582_v21  ;;  %v11598_v29 = vcombine.low %v123_v22, %v131_v23  ;;  %v130_v56 = vld [vmem:[#allocation5 + $0xc8] sm:$0xff]  ;;  %v14166_v58 = vpack.c.bf16 %v103_v51, %v103_v51  ;;  %p13999_p6 = scmp.ne.s32.totalorder %s11567_s1, %s13998_s21  ;;  %p14004_p8 = scmp.lt.s32.totalorder %s13998_s21, %s13998_s21 }
  0x75   :  { %868 = vmatprep.subr.bf16.mxu1 %v11595_v7  ;;  %v11611_v11 = vcombine.high %v137_v8, %v145_v9  ;;  %v153_v12 = vld [vmem:[#allocation5 + $0x180] sm:$0xff]  ;;  %v11610_v14 = vcombine.low %v137_v8, %v145_v9  ;;  %950 = vmatprep.subr.bf16.mxu0 %v11599_v24  ;;  %v11615_v32 = vcombine.high %v139_v25, %v147_v27  ;;  %v155_v33 = vld [vmem:[#allocation5 + $0x190] sm:$0xff]  ;;  %v138_v63 = vld [vmem:[#allocation5 + $0x108] sm:$0xff] }
  0x76   :  { %v161_v13 = vld [vmem:[#allocation5 + $0x1c0] sm:$0xff]  ;;  %v163_v34 = vld [vmem:[#allocation5 + $0x1d0] sm:$0xff]  ;;  %v11614_v37 = vcombine.low %v139_v25, %v147_v27  ;;  %v11597_v61 = vcombine.high %v122_v55, %v130_v56  ;;  %v146_v1 = vld [vmem:[#allocation5 + $0x148] sm:$0xff]  ;;  %v11596_v6 = vcombine.low %v122_v55, %v130_v56  ;;  %p14005_p9 = por %p14004_p8, %p14003_p7 }
  0x77   :  { %v11627_v15 = vcombine.high %v153_v12, %v161_v13  ;;  %v169_v16 = vld [vmem:[#allocation5 + $0x200] sm:$0xff]  ;;  %v11626_v26 = vcombine.low %v153_v12, %v161_v13  ;;  %v11631_v39 = vcombine.high %v155_v33, %v163_v34  ;;  %v171_v40 = vld [vmem:[#allocation5 + $0x210] sm:$0xff]  ;;  %v11630_v45 = vcombine.low %v155_v33, %v163_v34  ;;  %v154_v8 = vld [vmem:[#allocation5 + $0x188] sm:$0xff] }
  0x78   :  { %869 = vmatpush1.bf16.msra.mxu1 %v11594_v10  ;;  %v177_v19 = vld [vmem:[#allocation5 + $0x240] sm:$0xff]  ;;  %951 = vmatpush1.bf16.msra.mxu0 %v11598_v29  ;;  %v179_v41 = vld [vmem:[#allocation5 + $0x250] sm:$0xff]  ;;  %v11613_v7 = vcombine.high %v138_v63, %v146_v1  ;;  %v162_v9 = vld [vmem:[#allocation5 + $0x1c8] sm:$0xff]  ;;  %p14006_p10 = pnand %p14005_p9, %p13999_p6 }
  0x79   :  { %870 = vmatprep.subr.bf16.mxu1 %v11611_v11  ;;  %v11643_v28 = vcombine.high %v169_v16, %v177_v19  ;;  %v185_v30 = vld [vmem:[#allocation5 + $0x280] sm:$0xff]  ;;  %v11642_v35 = vcombine.low %v169_v16, %v177_v19  ;;  %952 = vmatprep.subr.bf16.mxu0 %v11615_v32  ;;  %v11647_v48 = vcombine.high %v171_v40, %v179_v41  ;;  %v187_v49 = vld [vmem:[#allocation5 + $0x290] sm:$0xff]  ;;  %v170_v17 = vld [vmem:[#allocation5 + $0x208] sm:$0xff] }
  0x7a   :  { %v193_v31 = vld [vmem:[#allocation5 + $0x2c0] sm:$0xff]  ;;  %v195_v50 = vld [vmem:[#allocation5 + $0x2d0] sm:$0xff]  ;;  %v11646_v54 = vcombine.low %v171_v40, %v179_v41  ;;  %v178_v18 = vld [vmem:[#allocation5 + $0x248] sm:$0xff]  ;;  %v11628_v22 = vcombine.low %v154_v8, %v162_v9 }
  0x7b   :  { %v11659_v36 = vcombine.high %v185_v30, %v193_v31  ;;  %v201_v38 = vld [vmem:[#allocation5 + $0x300] sm:$0x33]  ;;  %v11658_v42 = vcombine.low %v185_v30, %v193_v31  ;;  %v11663_v57 = vcombine.high %v187_v49, %v195_v50  ;;  %v203_v59 = vld [vmem:[#allocation5 + $0x310] sm:$0x33]  ;;  %v11662_v62 = vcombine.low %v187_v49, %v195_v50  ;;  %v186_v25 = vld [vmem:[#allocation5 + $0x288] sm:$0xff] }
  0x7c   :  { %871 = vmatpush1.bf16.msra.mxu1 %v11610_v14  ;;  %v11675_v43 = vcombine.high %v201_v38, %v201_v38  ;;  %v11674_v44 = vcombine.low %v201_v38, %v201_v38  ;;  %953 = vmatpush1.bf16.msra.mxu0 %v11614_v37  ;;  %v11679_v2 = vcombine.high %v203_v59, %v203_v59  ;;  %v109_v4 = vld [vmem:[#allocation5 + $0x20] sm:$0xff]  ;;  %v202_v33 = vld [vmem:[#allocation5 + $0x308] sm:$0x33]  ;;  %v108_v38 = vld [vmem:[#allocation5 + $0x18] sm:$0xff] }
  0x7d   :  { %872 = vmatprep.subr.bf16.mxu1 %v11627_v15  ;;  %954 = vmatprep.subr.bf16.mxu0 %v11631_v39  ;;  %v11678_v3 = vcombine.low %v203_v59, %v203_v59  ;;  %v117_v5 = vld [vmem:[#allocation5 + $0x60] sm:$0xff]  ;;  %v11612_v14 = vcombine.low %v138_v63, %v146_v1  ;;  %v11629_v15 = vcombine.high %v154_v8, %v162_v9  ;;  %v116_v39 = vld [vmem:[#allocation5 + $0x58] sm:$0xff]  ;;  %v111_v59 = vld [vmem:[#allocation5 + $0x30] sm:$0xff] }
  0x7e   :  { %v819_v52 = vsel %vm817_vm0, %v11674_v44, 0  ;;  %v11587_v11 = vcombine.high %v109_v4, %v117_v5  ;;  %v125_v12 = vld [vmem:[#allocation5 + $0xa0] sm:$0xff]  ;;  %v11586_v16 = vcombine.low %v109_v4, %v117_v5  ;;  %v11645_v23 = vcombine.high %v170_v17, %v178_v18  ;;  %v124_v46 = vld [vmem:[#allocation5 + $0x98] sm:$0xff]  ;;  %v127_v4 = vld [vmem:[#allocation5 + $0xb0] sm:$0xff] }
  0x7f   :  { %v831_v10 = vsel %vm817_vm0, %v11678_v3, 0  ;;  %v133_v13 = vld [vmem:[#allocation5 + $0xe0] sm:$0xff]  ;;  %v11644_v30 = vcombine.low %v170_v17, %v178_v18  ;;  %v11677_v40 = vcombine.high %v202_v33, %v202_v33  ;;  %v11676_v41 = vcombine.low %v202_v33, %v202_v33  ;;  %v132_v47 = vld [vmem:[#allocation5 + $0xd8] sm:$0xff]  ;;  %v135_v5 = vld [vmem:[#allocation5 + $0xf0] sm:$0xff] }
  0x80   :  { %873 = vmatpush1.bf16.msra.mxu1 %v11626_v26  ;;  %955 = vmatpush1.bf16.msra.mxu0 %v11630_v45  ;;  %v11603_v19 = vcombine.high %v125_v12, %v133_v13  ;;  %v141_v20 = vld [vmem:[#allocation5 + $0x120] sm:$0xff]  ;;  %v11602_v24 = vcombine.low %v125_v12, %v133_v13  ;;  %v194_v26 = vld [vmem:[#allocation5 + $0x2c8] sm:$0xff]  ;;  %v11585_v49 = vcombine.high %v108_v38, %v116_v39  ;;  %v148_v55 = vld [vmem:[#allocation5 + $0x158] sm:$0xff] }
  0x81   :  { %874 = vmatprep.subr.bf16.mxu1 %v11643_v28  ;;  %956 = vmatprep.subr.bf16.mxu0 %v11647_v48  ;;  %v149_v21 = vld [vmem:[#allocation5 + $0x160] sm:$0xff]  ;;  %v11661_v31 = vcombine.high %v186_v25, %v194_v26  ;;  %v11660_v37 = vcombine.low %v186_v25, %v194_v26  ;;  %v825_v48 = vsel %vm817_vm0, %v11676_v41, 0  ;;  %v11601_v56 = vcombine.high %v124_v46, %v132_v47  ;;  %v156_v1 = vld [vmem:[#allocation5 + $0x198] sm:$0xff]  ;;  %v143_v13 = vld [vmem:[#allocation5 + $0x130] sm:$0xff] }
  0x82   :  { %v11619_v27 = vcombine.high %v141_v20, %v149_v21  ;;  %v157_v28 = vld [vmem:[#allocation5 + $0x1a0] sm:$0xff]  ;;  %v11618_v32 = vcombine.low %v141_v20, %v149_v21  ;;  %v11600_v63 = vcombine.low %v124_v46, %v132_v47  ;;  %v172_v9 = vld [vmem:[#allocation5 + $0x218] sm:$0xff]  ;;  %v11606_v20 = vcombine.low %v127_v4, %v135_v5  ;;  %v159_v21 = vld [vmem:[#allocation5 + $0x1b0] sm:$0xff] }
  0x83   :  { %v165_v29 = vld [vmem:[#allocation5 + $0x1e0] sm:$0xff]  ;;  %v188_v17 = vld [vmem:[#allocation5 + $0x298] sm:$0xff]  ;;  %v118_v33 = vld [vmem:[#allocation5 + $0x68] sm:$0xff] }
  0x84   :  { %875 = vmatpush1.bf16.msra.mxu1 %v11642_v35  ;;  %957 = vmatpush1.bf16.msra.mxu0 %v11646_v54  ;;  %v11635_v34 = vcombine.high %v157_v28, %v165_v29  ;;  %v173_v35 = vld [vmem:[#allocation5 + $0x220] sm:$0xff]  ;;  %v140_v54 = vld [vmem:[#allocation5 + $0x118] sm:$0xff]  ;;  %v134_v41 = vld [vmem:[#allocation5 + $0xe8] sm:$0xff] }
  0x85   :  { %876 = vmatprep.subr.bf16.mxu1 %v11659_v36  ;;  %958 = vmatprep.subr.bf16.mxu0 %v11663_v57  ;;  %v181_v36 = vld [vmem:[#allocation5 + $0x260] sm:$0xff]  ;;  %v11617_v3 = vcombine.high %v140_v54, %v148_v55  ;;  %v11616_v8 = vcombine.low %v140_v54, %v148_v55  ;;  %v196_v18 = vld [vmem:[#allocation5 + $0x2d8] sm:$0xff] }
  0x86   :  { %v197_v44 = vld [vmem:[#allocation5 + $0x2e0] sm:$0xff]  ;;  %v11651_v45 = vcombine.high %v173_v35, %v181_v36  ;;  %v11650_v50 = vcombine.low %v173_v35, %v181_v36  ;;  %v204_v25 = vld [vmem:[#allocation5 + $0x318] sm:$0x33]  ;;  %v11665_v26 = vcombine.high %v188_v17, %v196_v18 }
  0x87   :  { %v205_v51 = vld [vmem:[#allocation5 + $0x320] sm:$0x33]  ;;  %v11680_v35 = vcombine.low %v204_v25, %v204_v25 }
  0x88   :  { %877 = vmatpush1.bf16.msra.mxu1 %v11658_v42  ;;  %959 = vmatpush1.bf16.msra.mxu0 %v11662_v62  ;;  %v11634_v42 = vcombine.low %v157_v28, %v165_v29  ;;  %v11682_v62 = vcombine.low %v205_v51, %v205_v51  ;;  %v175_v28 = vld [vmem:[#allocation5 + $0x230] sm:$0xff] }
  0x89   :  { %11690 = vmatprep.subr.msk.bf16.mxu1 %vm817_vm0, %v11675_v43  ;;  %11694 = vmatprep.subr.msk.bf16.mxu0 %vm817_vm0, %v11679_v2  ;;  %v189_v43 = vld [vmem:[#allocation5 + $0x2a0] sm:$0xff]  ;;  %v164_v2 = vld [vmem:[#allocation5 + $0x1d8] sm:$0xff]  ;;  %v183_v29 = vld [vmem:[#allocation5 + $0x270] sm:$0xff] }
  0x8a   :  { %v11666_v57 = vcombine.low %v189_v43, %v197_v44 }
  0x8c   :  { %879 = vmatpush1.bf16.msra.mxu1 %v819_v52  ;;  %961 = vmatpush1.bf16.msra.mxu0 %v831_v10  ;;  %v11667_v52 = vcombine.high %v189_v43, %v197_v44  ;;  %v180_v10 = vld [vmem:[#allocation5 + $0x258] sm:$0xff]  ;;  %v11654_v44 = vcombine.low %v175_v28, %v183_v29 }
  0x8d   :  { %907 = vmatprep.subr.bf16.mxu1 %v11581_v53  ;;  %1030 = vmatprep.subr.bf16.mxu0 %v11587_v11  ;;  %v11584_v53 = vcombine.low %v108_v38, %v116_v39  ;;  %v11633_v11 = vcombine.high %v156_v1, %v164_v2  ;;  %v199_v38 = vld [vmem:[#allocation5 + $0x2f0] sm:$0xff]  ;;  %v11655_v39 = vcombine.high %v175_v28, %v183_v29 }
  0x8f   :  { %11691 = vmatmul.mubr.msk.bf16.vlgmr.msra.gmra.mrb[0].mxu1 %vm813_vm1, %v14166_v58  ;;  %11695 = vmatmul.mubr.msk.bf16.vlgmr.msra.gmra.mrb[0].mxu0 %vm813_vm1, %v14166_v58 }
  0x90   :  { %908 = vmatpush1.bf16.msra.mxu1 %v11580_v60  ;;  %939 = vmatprep.mubr.bf16.mxu1 %v14044_v0  ;;  %v119_v60 = vld [vmem:[#allocation5 + $0x70] sm:$0xff] }
  0x91   :  { %909 = vmatprep.subr.bf16.mxu1 %v11597_v61  ;;  %1031 = vmatpush1.bf16.msra.mxu0 %v11586_v16  ;;  %v11683_v61 = vcombine.high %v205_v51, %v205_v51  ;;  %v11590_v12 = vcombine.low %v111_v59, %v119_v60  ;;  %v11632_v16 = vcombine.low %v156_v1, %v164_v2 }
  0x92   :  { %1032 = vmatprep.subr.bf16.mxu0 %v11603_v19  ;;  %1062 = vmatprep.mubr.bf16.mxu0 %v14044_v0  ;;  %v11649_v19 = vcombine.high %v172_v9, %v180_v10 }
  0x94   :  { %910 = vmatpush1.bf16.msra.mxu1 %v11596_v6  ;;  %v843_v6 = vsel %vm817_vm0, %v11682_v62, 0  ;;  %v1238_v62 = vld [vmem:[#allocation7 + $0x60] sm:$0xff] }
  0x95   :  { %911 = vmatprep.subr.bf16.mxu1 %v11613_v7  ;;  %1033 = vmatpush1.bf16.msra.mxu0 %v11602_v24  ;;  %v11591_v7 = vcombine.high %v111_v59, %v119_v60  ;;  %v11648_v24 = vcombine.low %v172_v9, %v180_v10  ;;  %v166_v59 = vld [vmem:[#allocation5 + $0x1e8] sm:$0xff] }
  0x96   :  { %1034 = vmatprep.subr.bf16.mxu0 %v11619_v27 }
  0x98   :  { %912 = vmatpush1.bf16.msra.mxu1 %v11612_v14  ;;  %v151_v14 = vld [vmem:[#allocation5 + $0x170] sm:$0xff] }
  0x99   :  { %913 = vmatprep.subr.bf16.mxu1 %v11629_v15  ;;  %1035 = vmatpush1.bf16.msra.mxu0 %v11618_v32  ;;  %v11607_v15 = vcombine.high %v127_v4, %v135_v5  ;;  %v11622_v27 = vcombine.low %v143_v13, %v151_v14  ;;  %v110_v32 = vld [vmem:[#allocation5 + $0x28] sm:$0xff] }
  0x9a   :  { %1036 = vmatprep.subr.bf16.mxu0 %v11635_v34  ;;  %v11681_v34 = vcombine.high %v204_v25, %v204_v25  ;;  %v11589_v43 = vcombine.high %v110_v32, %v118_v33  ;;  %v11588_v47 = vcombine.low %v110_v32, %v118_v33  ;;  %v182_v4 = vld [vmem:[#allocation5 + $0x268] sm:$0xff]  ;;  %v1270_v32 = vld [vmem:[#allocation7 + $0x160] sm:$0xff] }
  0x9c   :  { %914 = vmatpush1.bf16.msra.mxu1 %v11628_v22  ;;  %v167_v22 = vld [vmem:[#allocation5 + $0x1f0] sm:$0xff] }
  0x9d   :  { %915 = vmatprep.subr.bf16.mxu1 %v11645_v23  ;;  %1037 = vmatpush1.bf16.msra.mxu0 %v11634_v42  ;;  %v11623_v23 = vcombine.high %v143_v13, %v151_v14  ;;  %v11638_v36 = vcombine.low %v159_v21, %v167_v22  ;;  %v837_v42 = vsel %vm817_vm0, %v11680_v35, 0  ;;  %v136_v35 = vld [vmem:[#allocation5 + $0xf8] sm:$0xff] }
  0x9e   :  { %1038 = vmatprep.subr.bf16.mxu0 %v11651_v45  ;;  %v207_v45 = vld [vmem:[#allocation5 + $0x330] sm:$0x33] }
  0x9f   :  { %v11687_v54 = vcombine.high %v207_v45, %v207_v45  ;;  %v11686_v55 = vcombine.low %v207_v45, %v207_v45 }
  0xa0   :  { %916 = vmatpush1.bf16.msra.mxu1 %v11644_v30  ;;  %v11639_v30 = vcombine.high %v159_v21, %v167_v22  ;;  %v1258_v22 = vld [vmem:[#allocation7 + $0x100] sm:$0xff] }
  0xa1   :  { %917 = vmatprep.subr.bf16.mxu1 %v11661_v31  ;;  %1039 = vmatpush1.bf16.msra.mxu0 %v11650_v50  ;;  %v11664_v31 = vcombine.low %v188_v17, %v196_v18 }
  0xa2   :  { %1040 = vmatprep.subr.bf16.mxu0 %v11667_v52  ;;  %v1226_v52 = vld [vmem:[#allocation7] sm:$0xff] }
  0xa4   :  { %918 = vmatpush1.bf16.msra.mxu1 %v11660_v37  ;;  %v191_v37 = vld [vmem:[#allocation5 + $0x2b0] sm:$0xff] }
  0xa5   :  { %11692 = vmatprep.subr.msk.bf16.mxu1 %vm817_vm0, %v11677_v40  ;;  %1041 = vmatpush1.bf16.msra.mxu0 %v11666_v57  ;;  %v126_v40 = vld [vmem:[#allocation5 + $0xa8] sm:$0xff]  ;;  %v11671_v46 = vcombine.high %v191_v37, %v199_v38  ;;  %v11670_v51 = vcombine.low %v191_v37, %v199_v38 }
  0xa6   :  { %11698 = vmatprep.subr.msk.bf16.mxu0 %vm817_vm0, %v11683_v61  ;;  %v11605_v50 = vcombine.high %v126_v40, %v134_v41  ;;  %v158_v57 = vld [vmem:[#allocation5 + $0x1a8] sm:$0xff]  ;;  %v1234_v61 = vld [vmem:[#allocation7 + $0x40] sm:$0xff] }
  0xa7   :  { %v11637_v5 = vcombine.high %v158_v57, %v166_v59  ;;  %v11715_v9 = vcombine.high %v1234_v61, %v1238_v62  ;;  %v11636_v10 = vcombine.low %v158_v57, %v166_v59  ;;  %v11714_v14 = vcombine.low %v1234_v61, %v1238_v62  ;;  %v1294_v57 = vld [vmem:[#allocation7 + $0x220] sm:$0xff]  ;;  %v176_v62 = vld [vmem:[#allocation5 + $0x238] sm:$0xff] }
  0xa8   :  { %920 = vmatpush1.bf16.msra.mxu1 %v825_v48  ;;  %v142_v48 = vld [vmem:[#allocation5 + $0x128] sm:$0xff]  ;;  %v14200_v59 = vld [vmem:[#allocation7 + $0x400] sm:$0xff] }
  0xa9   :  { %989 = vmatprep.subr.bf16.mxu1 %v11585_v49  ;;  %1043 = vmatpush1.bf16.msra.mxu0 %v843_v6  ;;  %v150_v49 = vld [vmem:[#allocation5 + $0x168] sm:$0xff] }
  0xaa   :  { %1112 = vmatprep.subr.bf16.mxu0 %v11591_v7  ;;  %v11621_v60 = vcombine.high %v142_v48, %v150_v49  ;;  %v11620_v2 = vcombine.low %v142_v48, %v150_v49  ;;  %v1242_v7 = vld [vmem:[#allocation7 + $0x80] sm:$0xff] }
  0xab   :  { %11693 = vmatmul.mubr.msk.bf16.vlgmr.msra.gmra.mrb[4].mxu1 %vm813_vm1, %v14166_v58  ;;  %v1282_v48 = vld [vmem:[#allocation7 + $0x1c0] sm:$0xff] }
  0xac   :  { %990 = vmatpush1.bf16.msra.mxu1 %v11584_v53  ;;  %1021 = vmatprep.mubr.bf16.mxu1 %v14044_v0  ;;  %v1230_v53 = vld [vmem:[#allocation7 + $0x20] sm:$0xff] }
  0xad   :  { %991 = vmatprep.subr.bf16.mxu1 %v11601_v56  ;;  %11699 = vmatmul.mubr.msk.bf16.vlgmr.msra.gmra.mrb[4].mxu0 %vm813_vm1, %v14166_v58  ;;  %v11604_v56 = vcombine.low %v126_v40, %v134_v41  ;;  %v11707_v1 = vcombine.high %v1226_v52, %v1230_v53  ;;  %v11706_v6 = vcombine.low %v1226_v52, %v1230_v53  ;;  %v1274_v40 = vld [vmem:[#allocation7 + $0x180] sm:$0xff]  ;;  %v168_v52 = vld [vmem:[#allocation5 + $0x1f8] sm:$0xff] }
  0xae   :  { %1113 = vmatpush1.bf16.msra.mxu0 %v11590_v12  ;;  %1144 = vmatprep.mubr.bf16.mxu0 %v14044_v0  ;;  %v198_v12 = vld [vmem:[#allocation5 + $0x2e8] sm:$0xff]  ;;  %v1278_v41 = vld [vmem:[#allocation7 + $0x1a0] sm:$0xff] }
  0xaf   :  { %1114 = vmatprep.subr.bf16.mxu0 %v11607_v15  ;;  %v1250_v15 = vld [vmem:[#allocation7 + $0xc0] sm:$0xff] }
  0xb0   :  { %992 = vmatpush1.bf16.msra.mxu1 %v11600_v63  ;;  %v855_v63 = vsel %vm817_vm0, %v11686_v55, 0  ;;  %v1286_v49 = vld [vmem:[#allocation7 + $0x1e0] sm:$0xff] }
  0xb1   :  { %993 = vmatprep.subr.bf16.mxu1 %v11617_v3  ;;  %v174_v3 = vld [vmem:[#allocation5 + $0x228] sm:$0xff]  ;;  %v1290_v55 = vld [vmem:[#allocation7 + $0x200] sm:$0xff] }
  0xb2   :  { %1115 = vmatpush1.bf16.msra.mxu0 %v11606_v20  ;;  %v11653_v13 = vcombine.high %v174_v3, %v182_v4  ;;  %v11652_v18 = vcombine.low %v174_v3, %v182_v4  ;;  %v1302_v3 = vld [vmem:[#allocation7 + $0x260] sm:$0xff] }
  0xb3   :  { %1116 = vmatprep.subr.bf16.mxu0 %v11623_v23  ;;  %v1262_v23 = vld [vmem:[#allocation7 + $0x120] sm:$0xff] }
  0xb4   :  { %994 = vmatpush1.bf16.msra.mxu1 %v11616_v8  ;;  %v1246_v8 = vld [vmem:[#allocation7 + $0xa0] sm:$0xff]  ;;  %v11739_v33 = vcombine.high %v1258_v22, %v1262_v23  ;;  %v11738_v38 = vcombine.low %v1258_v22, %v1262_v23  ;;  %v1227_v22 = vld [vmem:[#allocation7 + $0x8] sm:$0xff] }
  0xb5   :  { %995 = vmatprep.subr.bf16.mxu1 %v11633_v11  ;;  %v190_v11 = vld [vmem:[#allocation5 + $0x2a8] sm:$0xff]  ;;  %v11723_v17 = vcombine.high %v1242_v7, %v1246_v8  ;;  %v11722_v21 = vcombine.low %v1242_v7, %v1246_v8  ;;  %v192_v7 = vld [vmem:[#allocation5 + $0x2b8] sm:$0xff] }
  0xb6   :  { %1117 = vmatpush1.bf16.msra.mxu0 %v11622_v27  ;;  %v11669_v20 = vcombine.high %v190_v11, %v198_v12  ;;  %v11668_v25 = vcombine.low %v190_v11, %v198_v12  ;;  %v120_v27 = vld [vmem:[#allocation5 + $0x78] sm:$0xff]  ;;  %v1306_v11 = vld [vmem:[#allocation7 + $0x280] sm:$0xff]  ;;  %v1231_v23 = vld [vmem:[#allocation7 + $0x28] sm:$0xff] }
  0xb7   :  { %1118 = vmatprep.subr.bf16.mxu0 %v11639_v30  ;;  %v200_v8 = vld [vmem:[#allocation5 + $0x2f8] sm:$0xff]  ;;  %v1310_v12 = vld [vmem:[#allocation7 + $0x2a0] sm:$0xff] }
  0xb8   :  { %996 = vmatpush1.bf16.msra.mxu1 %v11632_v16  ;;  %v1254_v16 = vld [vmem:[#allocation7 + $0xe0] sm:$0xff] }
  0xb9   :  { %997 = vmatprep.subr.bf16.mxu1 %v11649_v19  ;;  %v206_v19 = vld [vmem:[#allocation5 + $0x328] sm:$0x33]  ;;  %v11730_v30 = vcombine.low %v1250_v15, %v1254_v16 }
  0xba   :  { %1119 = vmatpush1.bf16.msra.mxu0 %v11638_v36  ;;  %v11685_v28 = vcombine.high %v206_v19, %v206_v19  ;;  %v11684_v29 = vcombine.low %v206_v19, %v206_v19  ;;  %v1318_v19 = vld [vmem:[#allocation7 + $0x2e0] sm:$0xff] }
  0xbb   :  { %1120 = vmatprep.subr.bf16.mxu0 %v11655_v39 }
  0xbc   :  { %998 = vmatpush1.bf16.msra.mxu1 %v11648_v24  ;;  %v11731_v24 = vcombine.high %v1250_v15, %v1254_v16  ;;  %v849_v36 = vsel %vm817_vm0, %v11684_v29, 0  ;;  %v208_v15 = vld [vmem:[#allocation5 + $0x338] sm:$0x33]  ;;  %v11673_v16 = vcombine.high %v192_v7, %v200_v8 }
  0xbd   :  { %999 = vmatprep.subr.bf16.mxu1 %v11665_v26  ;;  %v112_v26 = vld [vmem:[#allocation5 + $0x38] sm:$0xff] }
  0xbe   :  { %1121 = vmatpush1.bf16.msra.mxu0 %v11654_v44  ;;  %v11593_v37 = vcombine.high %v112_v26, %v120_v27  ;;  %v152_v44 = vld [vmem:[#allocation5 + $0x178] sm:$0xff] }
  0xbf   :  { %1122 = vmatprep.subr.bf16.mxu0 %v11671_v46 }
  0xc0   :  { %1000 = vmatpush1.bf16.msra.mxu1 %v11664_v31  ;;  %v1266_v31 = vld [vmem:[#allocation7 + $0x140] sm:$0xff] }
  0xc1   :  { %11696 = vmatprep.subr.msk.bf16.mxu1 %vm817_vm0, %v11681_v34  ;;  %v128_v34 = vld [vmem:[#allocation5 + $0xb8] sm:$0xff]  ;;  %v11747_v39 = vcombine.high %v1266_v31, %v1270_v32  ;;  %v11746_v46 = vcombine.low %v1266_v31, %v1270_v32  ;;  %v1239_v31 = vld [vmem:[#allocation7 + $0x68] sm:$0xff] }
  0xc2   :  { %1123 = vmatpush1.bf16.msra.mxu0 %v11670_v51  ;;  %v11609_v45 = vcombine.high %v128_v34, %v136_v35  ;;  %v160_v51 = vld [vmem:[#allocation5 + $0x1b8] sm:$0xff] }
  0xc3   :  { %11702 = vmatprep.subr.msk.bf16.mxu0 %vm817_vm0, %v11687_v54  ;;  %v11754_v54 = vcombine.low %v1274_v40, %v1278_v41 }
  0xc4   :  { %1002 = vmatpush1.bf16.msra.mxu1 %v837_v42  ;;  %v11592_v42 = vcombine.low %v112_v26, %v120_v27  ;;  %v11786_v26 = vcombine.low %v1306_v11, %v1310_v12  ;;  %v1322_v27 = vld [vmem:[#allocation7 + $0x300] sm:$0xff] }
  0xc5   :  { %1071 = vmatprep.subr.bf16.mxu1 %v11589_v43  ;;  %v144_v43 = vld [vmem:[#allocation5 + $0x138] sm:$0xff] }
  0xc6   :  { %1125 = vmatpush1.bf16.msra.mxu0 %v855_v63  ;;  %v11625_v53 = vcombine.high %v144_v43, %v152_v44  ;;  %v11624_v61 = vcombine.low %v144_v43, %v152_v44  ;;  %v184_v63 = vld [vmem:[#allocation5 + $0x278] sm:$0xff]  ;;  %v1338_v43 = vld [vmem:[#allocation7 + $0x380] sm:$0xff] }
  0xc7   :  { %11697 = vmatmul.mubr.msk.bf16.vlgmr.msra.gmra.mrb[8].mxu1 %vm813_vm1, %v14166_v58  ;;  %7412 = vmatprep.subr.bf16.mxu0 %v11707_v1  ;;  %v11641_v1 = vcombine.high %v160_v51, %v168_v52  ;;  %v1342_v44 = vld [vmem:[#allocation7 + $0x3a0] sm:$0xff] }
  0xc8   :  { %1072 = vmatpush1.bf16.msra.mxu1 %v11588_v47  ;;  %1103 = vmatprep.mubr.bf16.mxu1 %v14044_v0  ;;  %v11755_v47 = vcombine.high %v1274_v40, %v1278_v41  ;;  %v1247_v40 = vld [vmem:[#allocation7 + $0xa8] sm:$0xff] }
  0xc9   :  { %1073 = vmatprep.subr.bf16.mxu1 %v11605_v50  ;;  %11703 = vmatmul.mubr.msk.bf16.vlgmr.msra.gmra.mrb[8].mxu0 %vm813_vm1, %v14166_v58  ;;  %v11608_v50 = vcombine.low %v128_v34, %v136_v35  ;;  %v1330_v35 = vld [vmem:[#allocation7 + $0x340] sm:$0xff] }
  0xca   :  { %7413 = vmatpush1.bf16.msra.mxu0 %v11706_v6  ;;  %v11640_v6 = vcombine.low %v160_v51, %v168_v52  ;;  %v1346_v51 = vld [vmem:[#allocation7 + $0x3c0] sm:$0xff] }
  0xcb   :  { %7414 = vmatprep.subr.bf16.mxu0 %v11715_v9  ;;  %v11657_v9 = vcombine.high %v176_v62, %v184_v63  ;;  %v1350_v52 = vld [vmem:[#allocation7 + $0x3e0] sm:$0xff] }
  0xcc   :  { %1074 = vmatpush1.bf16.msra.mxu1 %v11604_v56  ;;  %v11763_v56 = vcombine.high %v1282_v48, %v1286_v49 }
  0xcd   :  { %1075 = vmatprep.subr.bf16.mxu1 %v11621_v60  ;;  %v14202_v60 = vld [vmem:[#allocation7 + $0x420] sm:$0xff] }
  0xce   :  { %7415 = vmatpush1.bf16.msra.mxu0 %v11714_v14  ;;  %v11834_v4 = vcombine.low %v14200_v59, %v14202_v60  ;;  %v11656_v14 = vcombine.low %v176_v62, %v184_v63  ;;  %v1267_v63 = vld [vmem:[#allocation7 + $0x148] sm:$0xff] }
  0xcf   :  { %7416 = vmatprep.subr.bf16.mxu0 %v11723_v17 }
  0xd0   :  { %1076 = vmatpush1.bf16.msra.mxu1 %v11620_v2  ;;  %v1298_v2 = vld [vmem:[#allocation7 + $0x240] sm:$0xff] }
  0xd1   :  { %1077 = vmatprep.subr.bf16.mxu1 %v11637_v5  ;;  %v11771_v5 = vcombine.high %v1290_v55, %v1294_v57  ;;  %v11778_v17 = vcombine.low %v1298_v2, %v1302_v3 }
  0xd2   :  { %7417 = vmatpush1.bf16.msra.mxu0 %v11722_v21  ;;  %v11672_v21 = vcombine.low %v192_v7, %v200_v8  ;;  %v1279_v8 = vld [vmem:[#allocation7 + $0x1a8] sm:$0xff] }
  0xd3   :  { %7418 = vmatprep.subr.bf16.mxu0 %v11731_v24  ;;  %v11689_v24 = vcombine.high %v208_v15, %v208_v15 }
  0xd4   :  { %1078 = vmatpush1.bf16.msra.mxu1 %v11636_v10  ;;  %v11770_v10 = vcombine.low %v1290_v55, %v1294_v57  ;;  %v1259_v55 = vld [vmem:[#allocation7 + $0x108] sm:$0xff] }
  0xd5   :  { %1079 = vmatprep.subr.bf16.mxu1 %v11653_v13  ;;  %v11779_v13 = vcombine.high %v1298_v2, %v1302_v3  ;;  %v1263_v57 = vld [vmem:[#allocation7 + $0x128] sm:$0xff]  ;;  %v11826_v2 = vcombine.low %v1346_v51, %v1350_v52  ;;  %v11835_v3 = vcombine.high %v14200_v59, %v14202_v60 }
  0xd6   :  { %7419 = vmatpush1.bf16.msra.mxu0 %v11730_v30  ;;  %v1235_v30 = vld [vmem:[#allocation7 + $0x48] sm:$0xff] }
  0xd7   :  { %7420 = vmatprep.subr.bf16.mxu0 %v11739_v33  ;;  %v11709_v33 = vcombine.high %v1227_v22, %v1231_v23  ;;  %v11717_v41 = vcombine.high %v1235_v30, %v1239_v31 }
  0xd8   :  { %1080 = vmatpush1.bf16.msra.mxu1 %v11652_v18  ;;  %v1314_v18 = vld [vmem:[#allocation7 + $0x2c0] sm:$0xff] }
  0xd9   :  { %1081 = vmatprep.subr.bf16.mxu1 %v11669_v20  ;;  %v11787_v20 = vcombine.high %v1306_v11, %v1310_v12  ;;  %v11795_v29 = vcombine.high %v1314_v18, %v1318_v19  ;;  %v11794_v34 = vcombine.low %v1314_v18, %v1318_v19  ;;  %v1287_v12 = vld [vmem:[#allocation7 + $0x1e8] sm:$0xff] }
  0xda   :  { %7421 = vmatpush1.bf16.msra.mxu0 %v11738_v38  ;;  %v11708_v38 = vcombine.low %v1227_v22, %v1231_v23  ;;  %v1299_v18 = vld [vmem:[#allocation7 + $0x248] sm:$0xff] }
  0xdb   :  { %7422 = vmatprep.subr.bf16.mxu0 %v11747_v39  ;;  %v1243_v39 = vld [vmem:[#allocation7 + $0x88] sm:$0xff] }
  0xdc   :  { %1082 = vmatpush1.bf16.msra.mxu1 %v11668_v25  ;;  %v11688_v25 = vcombine.low %v208_v15, %v208_v15  ;;  %v1307_v22 = vld [vmem:[#allocation7 + $0x288] sm:$0xff] }
  0xdd   :  { %11700 = vmatprep.subr.msk.bf16.mxu1 %vm817_vm0, %v11685_v28  ;;  %v1326_v28 = vld [vmem:[#allocation7 + $0x320] sm:$0xff] }
  0xde   :  { %7423 = vmatpush1.bf16.msra.mxu0 %v11746_v46  ;;  %v861_v32 = vsel %vm817_vm0, %v11688_v25, 0  ;;  %v11716_v46 = vcombine.low %v1235_v30, %v1239_v31  ;;  %v1323_v30 = vld [vmem:[#allocation7 + $0x308] sm:$0xff] }
  0xdf   :  { %7424 = vmatprep.subr.bf16.mxu0 %v11755_v47  ;;  %v1251_v47 = vld [vmem:[#allocation7 + $0xc8] sm:$0xff] }
  0xe0   :  { %1084 = vmatpush1.bf16.msra.mxu1 %v849_v36  ;;  %v1334_v36 = vld [vmem:[#allocation7 + $0x360] sm:$0xff] }
  0xe1   :  { %1153 = vmatprep.subr.bf16.mxu1 %v11593_v37  ;;  %v11803_v37 = vcombine.high %v1322_v27, %v1326_v28 }
  0xe2   :  { %7425 = vmatpush1.bf16.msra.mxu0 %v11754_v54  ;;  %v11724_v54 = vcombine.low %v1243_v39, %v1247_v40 }
  0xe3   :  { %11701 = vmatmul.mubr.msk.bf16.vlgmr.msra.gmra.mrb[12].mxu1 %vm813_vm1, %v14166_v58  ;;  %7426 = vmatprep.subr.bf16.mxu0 %v11763_v56 }
  0xe4   :  { %1154 = vmatpush1.bf16.msra.mxu1 %v11592_v42  ;;  %1185 = vmatprep.mubr.bf16.mxu1 %v14044_v0  ;;  %v11762_v0 = vcombine.low %v1282_v48, %v1286_v49  ;;  %v11802_v42 = vcombine.low %v1322_v27, %v1326_v28  ;;  %v1255_v48 = vld [vmem:[#allocation7 + $0xe8] sm:$0xff]  ;;  %v11725_v49 = vcombine.high %v1243_v39, %v1247_v40 }
  0xe5   :  { %1155 = vmatprep.subr.bf16.mxu1 %v11609_v45  ;;  %v11811_v45 = vcombine.high %v1330_v35, %v1334_v36  ;;  %v11733_v56 = vcombine.high %v1251_v47, %v1255_v48  ;;  %v11732_v62 = vcombine.low %v1251_v47, %v1255_v48  ;;  %v1319_v28 = vld [vmem:[#allocation7 + $0x2e8] sm:$0xff] }
  0xe6   :  { %7427 = vmatpush1.bf16.msra.mxu0 %v11762_v0  ;;  %v1271_v0 = vld [vmem:[#allocation7 + $0x168] sm:$0xff] }
  0xe7   :  { %7428 = vmatprep.subr.bf16.mxu0 %v11771_v5  ;;  %v11740_v5 = vcombine.low %v1259_v55, %v1263_v57  ;;  %v11749_v7 = vcombine.high %v1267_v63, %v1271_v0  ;;  %v1343_v40 = vld [vmem:[#allocation7 + $0x3a8] sm:$0xff] }
  0xe8   :  { %1156 = vmatpush1.bf16.msra.mxu1 %v11608_v50  ;;  %v11810_v50 = vcombine.low %v1330_v35, %v1334_v36  ;;  %v1335_v36 = vld [vmem:[#allocation7 + $0x368] sm:$0xff] }
  0xe9   :  { %1157 = vmatprep.subr.bf16.mxu1 %v11625_v53  ;;  %v11819_v53 = vcombine.high %v1338_v43, %v1342_v44  ;;  %v1359_v48 = vld [vmem:[#allocation7 + $0x428] sm:$0xff] }
  0xea   :  { %7429 = vmatpush1.bf16.msra.mxu0 %v11770_v10  ;;  %v1283_v10 = vld [vmem:[#allocation7 + $0x1c8] sm:$0xff] }
  0xeb   :  { %7430 = vmatprep.subr.bf16.mxu0 %v11779_v13  ;;  %v11765_v15 = vcombine.high %v1283_v10, %v1287_v12 }
  0xec   :  { %1158 = vmatpush1.bf16.msra.mxu1 %v11624_v61  ;;  %v11827_v61 = vcombine.high %v1346_v51, %v1350_v52  ;;  %v213_v51 = vlaneseq }
  0xed   :  { %1159 = vmatprep.subr.bf16.mxu1 %v11641_v1  ;;  %v11741_v1 = vcombine.high %v1259_v55, %v1263_v57 }
  0xee   :  { %7431 = vmatpush1.bf16.msra.mxu0 %v11778_v17  ;;  %v11764_v17 = vcombine.low %v1283_v10, %v1287_v12  ;;  %v14212_v52 = vshrl.u32 %v213_v51, 7  ;;  %v1407_v51 = vld [vmem:[#allocation7 + $0x5a8] sm:$0xff] }
  0xef   :  { %7432 = vmatprep.subr.bf16.mxu0 %v11787_v20  ;;  %v1303_v20 = vld [vmem:[#allocation7 + $0x268] sm:$0xff] }
  0xf0   :  { %1160 = vmatpush1.bf16.msra.mxu1 %v11640_v6  ;;  %v1275_v6 = vld [vmem:[#allocation7 + $0x188] sm:$0xff]  ;;  %v11781_v23 = vcombine.high %v1299_v18, %v1303_v20  ;;  %v11780_v25 = vcombine.low %v1299_v18, %v1303_v20  ;;  %v14220_v55 = vsub.s32 1, %v14212_v52 }
  0xf1   :  { %1161 = vmatprep.subr.bf16.mxu1 %v11657_v9  ;;  %v11748_v9 = vcombine.low %v1267_v63, %v1271_v0  ;;  %v11757_v11 = vcombine.high %v1275_v6, %v1279_v8  ;;  %v11756_v13 = vcombine.low %v1275_v6, %v1279_v8  ;;  %v1366_v6 = vld [vmem:[#allocation7 + $0x460] sm:$0xff]  ;;  %v1367_v8 = vld [vmem:[#allocation7 + $0x468] sm:$0xff] }
  0xf2   :  { %7433 = vmatpush1.bf16.msra.mxu0 %v11786_v26  ;;  %v1315_v26 = vld [vmem:[#allocation7 + $0x2c8] sm:$0xff] }
  0xf3   :  { %7434 = vmatprep.subr.bf16.mxu0 %v11795_v29  ;;  %v11797_v31 = vcombine.high %v1315_v26, %v1319_v28 }
  0xf4   :  { %1162 = vmatpush1.bf16.msra.mxu1 %v11656_v14  ;;  %v1291_v14 = vld [vmem:[#allocation7 + $0x208] sm:$0xff] }
  0xf5   :  { %1163 = vmatprep.subr.bf16.mxu1 %v11673_v16  ;;  %v1295_v16 = vld [vmem:[#allocation7 + $0x228] sm:$0xff] }
  0xf6   :  { %7435 = vmatpush1.bf16.msra.mxu0 %v11794_v34  ;;  %v11773_v19 = vcombine.high %v1291_v14, %v1295_v16  ;;  %v1331_v34 = vld [vmem:[#allocation7 + $0x348] sm:$0xff] }
  0xf7   :  { %7436 = vmatprep.subr.bf16.mxu0 %v11803_v37  ;;  %v11813_v39 = vcombine.high %v1331_v34, %v1335_v36 }
  0xf8   :  { %1164 = vmatpush1.bf16.msra.mxu1 %v11672_v21  ;;  %v11772_v21 = vcombine.low %v1291_v14, %v1295_v16  ;;  %v1370_v14 = vld [vmem:[#allocation7 + $0x480] sm:$0xff]  ;;  %v1371_v16 = vld [vmem:[#allocation7 + $0x488] sm:$0xff] }
  0xf9   :  { %11704 = vmatprep.subr.msk.bf16.mxu1 %vm817_vm0, %v11689_v24  ;;  %v1311_v24 = vld [vmem:[#allocation7 + $0x2a8] sm:$0xff] }
  0xfa   :  { %7437 = vmatpush1.bf16.msra.mxu0 %v11802_v42  ;;  %v11789_v27 = vcombine.high %v1307_v22, %v1311_v24  ;;  %v11788_v29 = vcombine.low %v1307_v22, %v1311_v24  ;;  %v1347_v42 = vld [vmem:[#allocation7 + $0x3c8] sm:$0xff]  ;;  %v1378_v24 = vld [vmem:[#allocation7 + $0x4c0] sm:$0xff] }
  0xfb   :  { %7438 = vmatprep.subr.bf16.mxu0 %v11811_v45 }
  0xfc   :  { %1166 = vmatpush1.bf16.msra.mxu1 %v861_v32  ;;  %v1327_v32 = vld [vmem:[#allocation7 + $0x328] sm:$0xff] }
  0xfd   :  { %7740 = vmatprep.subr.bf16.mxu1 %v11709_v33  ;;  %v11796_v33 = vcombine.low %v1315_v26, %v1319_v28  ;;  %v11805_v35 = vcombine.high %v1323_v30, %v1327_v32  ;;  %v11804_v37 = vcombine.low %v1323_v30, %v1327_v32  ;;  %v1382_v26 = vld [vmem:[#allocation7 + $0x4e0] sm:$0xff]  ;;  %v1383_v28 = vld [vmem:[#allocation7 + $0x4e8] sm:$0xff] }
  0xfe   :  { %7439 = vmatpush1.bf16.msra.mxu0 %v11810_v50  ;;  %v11859_v60 = vcombine.high %v1378_v24, %v1382_v26  ;;  %v1390_v32 = vld [vmem:[#allocation7 + $0x520] sm:$0xff] }
  0xff   :  { %11705 = vmatmul.mubr.msk.bf16.vlgmr.msra.gmra.mrb[16].mxu1 %vm813_vm1, %v14166_v58  ;;  %v11818_v58 = vcombine.low %v1338_v43, %v1342_v44  ;;  %7440 = vmatprep.subr.bf16.mxu0 %v11819_v53  ;;  %v1351_v44 = vld [vmem:[#allocation7 + $0x3e8] sm:$0xff]  ;;  %v14215_v53 = vsub.s32 0, %v14212_v52 }
 0x100   :  { %7741 = vmatpush1.bf16.msra.mxu1 %v11708_v38  ;;  %v1339_v38 = vld [vmem:[#allocation7 + $0x388] sm:$0xff]  ;;  %v11829_v47 = vcombine.high %v1347_v42, %v1351_v44 }
 0x101   :  { %7742 = vmatprep.subr.bf16.mxu1 %v11717_v41  ;;  %v11812_v41 = vcombine.low %v1331_v34, %v1335_v36  ;;  %v11821_v43 = vcombine.high %v1339_v38, %v1343_v40  ;;  %v11820_v45 = vcombine.low %v1339_v38, %v1343_v40  ;;  %v1391_v34 = vld [vmem:[#allocation7 + $0x528] sm:$0xff]  ;;  %v1398_v40 = vld [vmem:[#allocation7 + $0x560] sm:$0xff] }
 0x102   :  { %7441 = vmatpush1.bf16.msra.mxu0 %v11818_v58 }
 0x103   :  { %7442 = vmatprep.subr.bf16.mxu0 %v11827_v61 }
 0x104   :  { %7743 = vmatpush1.bf16.msra.mxu1 %v11716_v46  ;;  %v1355_v46 = vld [vmem:[#allocation7 + $0x408] sm:$0xff] }
 0x105   :  { %7744 = vmatprep.subr.bf16.mxu1 %v11725_v49  ;;  %v11828_v49 = vcombine.low %v1347_v42, %v1351_v44  ;;  %v11837_v50 = vcombine.high %v1355_v46, %v1359_v48  ;;  %v11836_v10 = vcombine.low %v1355_v46, %v1359_v48  ;;  %v1399_v42 = vld [vmem:[#allocation7 + $0x568] sm:$0xff]  ;;  %v1402_v48 = vld [vmem:[#allocation7 + $0x580] sm:$0xff] }
 0x106   :  { %7443 = vmatpush1.bf16.msra.mxu0 %v11826_v2 }
 0x107   :  { %7453 = vmatprep.subr.bf16.mxu0 %v11835_v3  ;;  %v1362_v3 = vld [vmem:[#allocation7 + $0x440] sm:$0xff] }
 0x108   :  { %7745 = vmatpush1.bf16.msra.mxu1 %v11724_v54  ;;  %v14217_v54 = vld [vmem:[#allocation11] sm:$0xff]  ;;  %v11843_v12 = vcombine.high %v1362_v3, %v1366_v6 }
 0x109   :  { %7746 = vmatprep.subr.bf16.mxu1 %v11733_v56  ;;  %v216_v56 = vrot.slane %v14217_v54, %v14215_v53  ;;  %v220_v57 = vrot.slane %v14217_v54, %v14220_v55 }
 0x10c   :  { %7747 = vmatpush1.bf16.msra.mxu1 %v11732_v62 }
 0x10d   :  { %7748 = vmatprep.subr.bf16.mxu1 %v11741_v1 }
 0x110   :  { %7749 = vmatpush1.bf16.msra.mxu1 %v11740_v5 }
 0x111   :  { %7750 = vmatprep.subr.bf16.mxu1 %v11749_v7  ;;  %v1363_v7 = vld [vmem:[#allocation7 + $0x448] sm:$0xff] }
 0x112   :  { %v11844_v20 = vcombine.low %v1363_v7, %v1367_v8 }
 0x114   :  { %7751 = vmatpush1.bf16.msra.mxu1 %v11748_v9 }
 0x115   :  { %7752 = vmatprep.subr.bf16.mxu1 %v11757_v11 }
 0x118   :  { %7753 = vmatpush1.bf16.msra.mxu1 %v11756_v13  ;;  %v11845_v13 = vcombine.high %v1363_v7, %v1367_v8 }
 0x119   :  { %7754 = vmatprep.subr.bf16.mxu1 %v11765_v15  ;;  %v1374_v15 = vld [vmem:[#allocation7 + $0x4a0] sm:$0xff] }
 0x11a   :  { %v11851_v22 = vcombine.high %v1370_v14, %v1374_v15  ;;  %v11850_v30 = vcombine.low %v1370_v14, %v1374_v15  ;;  %v1418_v14 = vld [vmem:[#allocation7 + $0x600] sm:$0xff] }
 0x11c   :  { %7755 = vmatpush1.bf16.msra.mxu1 %v11764_v17  ;;  %v1375_v17 = vld [vmem:[#allocation7 + $0x4a8] sm:$0xff] }
 0x11d   :  { %7756 = vmatprep.subr.bf16.mxu1 %v11773_v19  ;;  %v11842_v19 = vcombine.low %v1362_v3, %v1366_v6  ;;  %v11852_v59 = vcombine.low %v1371_v16, %v1375_v17 }
 0x120   :  { %7757 = vmatpush1.bf16.msra.mxu1 %v11772_v21 }
 0x121   :  { %7758 = vmatprep.subr.bf16.mxu1 %v11781_v23  ;;  %v11853_v23 = vcombine.high %v1371_v16, %v1375_v17  ;;  %v1422_v16 = vld [vmem:[#allocation7 + $0x620] sm:$0xff]  ;;  %v1419_v17 = vld [vmem:[#allocation7 + $0x608] sm:$0xff] }
 0x124   :  { %7759 = vmatpush1.bf16.msra.mxu1 %v11780_v25 }
 0x125   :  { %7760 = vmatprep.subr.bf16.mxu1 %v11789_v27  ;;  %v1379_v27 = vld [vmem:[#allocation7 + $0x4c8] sm:$0xff] }
 0x126   :  { %v11860_v36 = vcombine.low %v1379_v27, %v1383_v28 }
 0x128   :  { %7761 = vmatpush1.bf16.msra.mxu1 %v11788_v29 }
 0x129   :  { %7762 = vmatprep.subr.bf16.mxu1 %v11797_v31  ;;  %v1386_v31 = vld [vmem:[#allocation7 + $0x500] sm:$0xff] }
 0x12c   :  { %7763 = vmatpush1.bf16.msra.mxu1 %v11796_v33  ;;  %v1387_v33 = vld [vmem:[#allocation7 + $0x508] sm:$0xff] }
 0x12d   :  { %7764 = vmatprep.subr.bf16.mxu1 %v11805_v35  ;;  %v11858_v35 = vcombine.low %v1378_v24, %v1382_v26  ;;  %v11869_v38 = vcombine.high %v1387_v33, %v1391_v34  ;;  %v11868_v44 = vcombine.low %v1387_v33, %v1391_v34  ;;  %v1434_v34 = vld [vmem:[#allocation7 + $0x680] sm:$0xff] }
 0x130   :  { %7765 = vmatpush1.bf16.msra.mxu1 %v11804_v37  ;;  %v11867_v37 = vcombine.high %v1386_v31, %v1390_v32 }
 0x131   :  { %7766 = vmatprep.subr.bf16.mxu1 %v11813_v39  ;;  %v1394_v39 = vld [vmem:[#allocation7 + $0x540] sm:$0xff] }
 0x132   :  { %v11875_v46 = vcombine.high %v1394_v39, %v1398_v40 }
 0x134   :  { %7767 = vmatpush1.bf16.msra.mxu1 %v11812_v41  ;;  %v1395_v41 = vld [vmem:[#allocation7 + $0x548] sm:$0xff] }
 0x135   :  { %7768 = vmatprep.subr.bf16.mxu1 %v11821_v43  ;;  %v11866_v43 = vcombine.low %v1386_v31, %v1390_v32 }
 0x138   :  { %7769 = vmatpush1.bf16.msra.mxu1 %v11820_v45  ;;  %v14242_v45 = vsub.s32 3, %v14212_v52 }
 0x139   :  { %7770 = vmatprep.subr.bf16.mxu1 %v11829_v47  ;;  %v11877_v47 = vcombine.high %v1395_v41, %v1399_v42 }
 0x13c   :  { %7771 = vmatpush1.bf16.msra.mxu1 %v11828_v49  ;;  %v1406_v49 = vld [vmem:[#allocation7 + $0x5a0] sm:$0xff] }
 0x13d   :  { %7781 = vmatprep.subr.bf16.mxu1 %v11837_v50  ;;  %v1403_v50 = vld [vmem:[#allocation7 + $0x588] sm:$0xff]  ;;  %v11882_v6 = vcombine.low %v1402_v48, %v1406_v49 }
 0x13e   :  { %v11884_v7 = vcombine.low %v1403_v50, %v1407_v51 }
 0x162   :  { %v900_v58 = vpop.f32.mrb[0].mxu1  ;;  %v14234_v18 = vpop.f32.mrb[0].mxu0 }
 0x163   :  { %v901_v61 = vadd.f32 %v900_v58, %v216_v56  ;;  %v902_v62 = vpop.f32.mrb[1].mxu1  ;;  %v14239_v21 = vpop.f32.mrb[1].mxu0  ;;  %v11874_v56 = vcombine.low %v1394_v39, %v1398_v40  ;;  %v228_v58 = vrot.slane %v14217_v54, %v14242_v45 }
 0x164   :  { %v903_v63 = vadd.f32 %v902_v62, %v220_v57  ;;  %v904_v1 = vpop.f32.mrb[2].mxu1  ;;  %v986_v25 = vpop.f32.mrb[2].mxu0  ;;  %v11876_v57 = vcombine.low %v1395_v41, %v1399_v42  ;;  %v11885_v62 = vcombine.high %v1403_v50, %v1407_v51 }
 0x165   :  { %v1194_v0 = vmax.f32 %v901_v61, 0.0  ;;  %v905_v2 = vpop.f32.mrb[3].mxu1  ;;  %v987_v29 = vpop.f32.mrb[3].mxu0  ;;  %v11883_v61 = vcombine.high %v1402_v48, %v1406_v49  ;;  %v1414_v1 = vld [vmem:[#allocation7 + $0x5e0] sm:$0xff]  ;;  %v11899_v25 = vcombine.high %v1418_v14, %v1422_v16  ;;  %v1447_v48 = vld [vmem:[#allocation7 + $0x6e8] sm:$0xff] }
 0x166   :  { %v1195_v5 = vmax.f32 %v903_v63, 0.0  ;;  %v1410_v63 = vld [vmem:[#allocation7 + $0x5c0] sm:$0xff]  ;;  %v1415_v2 = vld [vmem:[#allocation7 + $0x5e8] sm:$0xff] }
 0x167   :  { %v14228_v11 = vpack.c.bf16 %v1194_v0, %v1194_v0  ;;  %v1411_v0 = vld [vmem:[#allocation7 + $0x5c8] sm:$0xff] }
 0x168   :  { %v14226_v9 = vpack.c.bf16 %v1195_v5, %v1195_v5  ;;  %v1427_v29 = vld [vmem:[#allocation7 + $0x648] sm:$0xff] }
 0x16a   :  { %7444 = vmatprep.mubr.bf16.mxu0 %v14226_v9  ;;  %7772 = vmatprep.mubr.bf16.mxu1 %v14226_v9 }
 0x16b   :  { %7445 = vmatmul.mubr.bf16.vlgmr.msra.gmra.mrb[12].mxu0 %v14228_v11  ;;  %7773 = vmatmul.mubr.bf16.vlgmr.msra.gmra.mrb[20].mxu1 %v14228_v11 }
 0x16c   :  { %7454 = vmatpush1.bf16.msra.mxu0 %v11834_v4  ;;  %7782 = vmatpush1.bf16.msra.mxu1 %v11836_v10  ;;  %v11861_v4 = vcombine.high %v1379_v27, %v1383_v28  ;;  %v1426_v27 = vld [vmem:[#allocation7 + $0x640] sm:$0xff] }
 0x16d   :  { %7455 = vmatprep.subr.bf16.mxu0 %v11843_v12  ;;  %7783 = vmatprep.subr.bf16.mxu1 %v11845_v13  ;;  %v11891_v12 = vcombine.high %v1410_v63, %v1414_v1  ;;  %v11893_v13 = vcombine.high %v1411_v0, %v1415_v2  ;;  %v1430_v28 = vld [vmem:[#allocation7 + $0x660] sm:$0xff] }
 0x16e   :  { %v11907_v32 = vcombine.high %v1426_v27, %v1430_v28  ;;  %v11906_v40 = vcombine.low %v1426_v27, %v1430_v28 }
 0x170   :  { %7456 = vmatpush1.bf16.msra.mxu0 %v11842_v19  ;;  %7784 = vmatpush1.bf16.msra.mxu1 %v11844_v20  ;;  %v1423_v19 = vld [vmem:[#allocation7 + $0x628] sm:$0xff] }
 0x171   :  { %7457 = vmatprep.subr.bf16.mxu0 %v11851_v22  ;;  %7785 = vmatprep.subr.bf16.mxu1 %v11853_v23  ;;  %v11890_v22 = vcombine.low %v1410_v63, %v1414_v1  ;;  %v11892_v23 = vcombine.low %v1411_v0, %v1415_v2  ;;  %v11901_v26 = vcombine.high %v1419_v17, %v1423_v19 }
 0x174   :  { %7458 = vmatpush1.bf16.msra.mxu0 %v11850_v30  ;;  %7786 = vmatpush1.bf16.msra.mxu1 %v11852_v59  ;;  %v1431_v30 = vld [vmem:[#allocation7 + $0x668] sm:$0xff] }
 0x175   :  { %7459 = vmatprep.subr.bf16.mxu0 %v11859_v60  ;;  %7787 = vmatprep.subr.bf16.mxu1 %v11861_v4  ;;  %v11898_v60 = vcombine.low %v1418_v14, %v1422_v16  ;;  %v11900_v4 = vcombine.low %v1419_v17, %v1423_v19  ;;  %v11909_v33 = vcombine.high %v1427_v29, %v1431_v30  ;;  %v1466_v16 = vld [vmem:[#allocation7 + $0x780] sm:$0xff]  ;;  %v1467_v19 = vld [vmem:[#allocation7 + $0x788] sm:$0xff] }
 0x176   :  { %v11908_v41 = vcombine.low %v1427_v29, %v1431_v30  ;;  %v1470_v17 = vld [vmem:[#allocation7 + $0x7a0] sm:$0xff] }
 0x177   :  { %v11947_v30 = vcombine.high %v1466_v16, %v1470_v17 }
 0x178   :  { %7460 = vmatpush1.bf16.msra.mxu0 %v11858_v35  ;;  %7788 = vmatpush1.bf16.msra.mxu1 %v11860_v36  ;;  %v1438_v36 = vld [vmem:[#allocation7 + $0x6a0] sm:$0xff] }
 0x179   :  { %7461 = vmatprep.subr.bf16.mxu0 %v11867_v37  ;;  %7789 = vmatprep.subr.bf16.mxu1 %v11869_v38  ;;  %v1435_v37 = vld [vmem:[#allocation7 + $0x688] sm:$0xff]  ;;  %v11915_v42 = vcombine.high %v1434_v34, %v1438_v36  ;;  %v11914_v49 = vcombine.low %v1434_v34, %v1438_v36 }
 0x17a   :  { %v1439_v38 = vld [vmem:[#allocation7 + $0x6a8] sm:$0xff] }
 0x17b   :  { %v11916_v50 = vcombine.low %v1435_v37, %v1439_v38  ;;  %v1475_v34 = vld [vmem:[#allocation7 + $0x7c8] sm:$0xff] }
 0x17c   :  { %7462 = vmatpush1.bf16.msra.mxu0 %v11866_v43  ;;  %7790 = vmatpush1.bf16.msra.mxu1 %v11868_v44  ;;  %v11917_v43 = vcombine.high %v1435_v37, %v1439_v38  ;;  %v1442_v44 = vld [vmem:[#allocation7 + $0x6c0] sm:$0xff]  ;;  %v11946_v38 = vcombine.low %v1466_v16, %v1470_v17 }
 0x17d   :  { %7463 = vmatprep.subr.bf16.mxu0 %v11875_v46  ;;  %7791 = vmatprep.subr.bf16.mxu1 %v11877_v47  ;;  %v1446_v46 = vld [vmem:[#allocation7 + $0x6e0] sm:$0xff]  ;;  %v1443_v47 = vld [vmem:[#allocation7 + $0x6c8] sm:$0xff] }
 0x17e   :  { %v14246_v3 = vpop.f32.mrb[4].mxu1  ;;  %v11923_v51 = vcombine.high %v1442_v44, %v1446_v46  ;;  %v11922_v63 = vcombine.low %v1442_v44, %v1446_v46  ;;  %v11924_v1 = vcombine.low %v1443_v47, %v1447_v48  ;;  %v1483_v44 = vld [vmem:[#allocation7 + $0x808] sm:$0xff] }
 0x17f   :  { %v943_v5 = vpop.f32.mrb[5].mxu1  ;;  %v1487_v46 = vld [vmem:[#allocation7 + $0x828] sm:$0xff] }
 0x180   :  { %7464 = vmatpush1.bf16.msra.mxu0 %v11874_v56  ;;  %7792 = vmatpush1.bf16.msra.mxu1 %v11876_v57  ;;  %v944_v8 = vadd.f32 %v943_v5, %v228_v58  ;;  %v945_v10 = vpop.f32.mrb[6].mxu1  ;;  %v14252_v59 = vpop.f32.mrb[4].mxu0  ;;  %v11925_v56 = vcombine.high %v1443_v47, %v1447_v48  ;;  %v1450_v57 = vld [vmem:[#allocation7 + $0x700] sm:$0xff] }
 0x181   :  { %7465 = vmatprep.subr.bf16.mxu0 %v11883_v61  ;;  %7793 = vmatprep.subr.bf16.mxu1 %v11885_v62  ;;  %v946_v15 = vpop.f32.mrb[7].mxu1  ;;  %v14254_v31 = vpop.f32.mrb[5].mxu0  ;;  %v1454_v58 = vld [vmem:[#allocation7 + $0x720] sm:$0xff]  ;;  %v1451_v61 = vld [vmem:[#allocation7 + $0x708] sm:$0xff]  ;;  %v14257_v10 = vsub.s32 2, %v14212_v52 }
 0x182   :  { %v1197_v20 = vmax.f32 %v944_v8, 0.0  ;;  %v1068_v35 = vpop.f32.mrb[6].mxu0  ;;  %v1455_v62 = vld [vmem:[#allocation7 + $0x728] sm:$0xff]  ;;  %v11931_v0 = vcombine.high %v1450_v57, %v1454_v58  ;;  %v1458_v5 = vld [vmem:[#allocation7 + $0x740] sm:$0xff] }
 0x183   :  { %v1069_v39 = vpop.f32.mrb[7].mxu0  ;;  %v11933_v2 = vcombine.high %v1451_v61, %v1455_v62  ;;  %v1463_v8 = vld [vmem:[#allocation7 + $0x768] sm:$0xff] }
 0x184   :  { %7466 = vmatpush1.bf16.msra.mxu0 %v11882_v6  ;;  %7794 = vmatpush1.bf16.msra.mxu1 %v11884_v7  ;;  %v14248_v24 = vpack.c.bf16 %v1197_v20, %v1197_v20  ;;  %v1462_v6 = vld [vmem:[#allocation7 + $0x760] sm:$0xff]  ;;  %v1459_v7 = vld [vmem:[#allocation7 + $0x748] sm:$0xff] }
 0x185   :  { %7467 = vmatprep.subr.bf16.mxu0 %v11891_v12  ;;  %7795 = vmatprep.subr.bf16.mxu1 %v11893_v13  ;;  %v11930_v12 = vcombine.low %v1450_v57, %v1454_v58  ;;  %v11932_v13 = vcombine.low %v1451_v61, %v1455_v62  ;;  %v11939_v14 = vcombine.high %v1458_v5, %v1462_v6  ;;  %v1471_v20 = vld [vmem:[#allocation7 + $0x7a8] sm:$0xff]  ;;  %v1490_v58 = vld [vmem:[#allocation7 + $0x840] sm:$0xff] }
 0x186   :  { %7485 = vmatprep.mubr.bf16.mxu0 %v14248_v24  ;;  %7813 = vmatprep.mubr.bf16.mxu1 %v14248_v24  ;;  %v11941_v15 = vcombine.high %v1459_v7, %v1463_v8  ;;  %v11938_v27 = vcombine.low %v1458_v5, %v1462_v6  ;;  %v11940_v28 = vcombine.low %v1459_v7, %v1463_v8  ;;  %v1479_v35 = vld [vmem:[#allocation7 + $0x7e8] sm:$0xff]  ;;  %v1494_v62 = vld [vmem:[#allocation7 + $0x860] sm:$0xff] }
 0x187   :  { %v11948_v39 = vcombine.low %v1467_v19, %v1471_v20  ;;  %v11965_v57 = vcombine.high %v1483_v44, %v1487_v46  ;;  %v11964_v6 = vcombine.low %v1483_v44, %v1487_v46  ;;  %v11971_v7 = vcombine.high %v1490_v58, %v1494_v62  ;;  %v1523_v44 = vld [vmem:[#allocation7 + $0x948] sm:$0xff] }
 0x188   :  { %7468 = vmatpush1.bf16.msra.mxu0 %v11890_v22  ;;  %7796 = vmatpush1.bf16.msra.mxu1 %v11892_v23  ;;  %v14260_v22 = vsub.s32 5, %v14212_v52  ;;  %v11970_v17 = vcombine.low %v1490_v58, %v1494_v62  ;;  %v1527_v46 = vld [vmem:[#allocation7 + $0x968] sm:$0xff] }
 0x189   :  { %7469 = vmatprep.subr.bf16.mxu0 %v11899_v25  ;;  %7797 = vmatprep.subr.bf16.mxu1 %v11901_v26  ;;  %v224_v25 = vrot.slane %v14217_v54, %v14257_v10  ;;  %v12005_v58 = vcombine.high %v1523_v44, %v1527_v46 }
 0x18a   :  { %v236_v36 = vrot.slane %v14217_v54, %v14260_v22 }
 0x18b   :  { %v942_v37 = vadd.f32 %v14246_v3, %v224_v25 }
 0x18c   :  { %7470 = vmatpush1.bf16.msra.mxu0 %v11898_v60  ;;  %7798 = vmatpush1.bf16.msra.mxu1 %v11900_v4  ;;  %v11949_v60 = vcombine.high %v1467_v19, %v1471_v20  ;;  %v1474_v4 = vld [vmem:[#allocation7 + $0x7c0] sm:$0xff]  ;;  %v985_v47 = vadd.f32 %v14239_v21, %v236_v36  ;;  %v1515_v36 = vld [vmem:[#allocation7 + $0x908] sm:$0xff] }
 0x18d   :  { %7471 = vmatprep.subr.bf16.mxu0 %v11907_v32  ;;  %7799 = vmatprep.subr.bf16.mxu1 %v11909_v33  ;;  %v1478_v33 = vld [vmem:[#allocation7 + $0x7e0] sm:$0xff]  ;;  %v1196_v48 = vmax.f32 %v942_v37, 0.0  ;;  %v1519_v37 = vld [vmem:[#allocation7 + $0x928] sm:$0xff] }
 0x18e   :  { %v11954_v3 = vcombine.low %v1474_v4, %v1478_v33 }
 0x190   :  { %7472 = vmatpush1.bf16.msra.mxu0 %v11906_v40  ;;  %7800 = vmatpush1.bf16.msra.mxu1 %v11908_v41  ;;  %v11955_v40 = vcombine.high %v1474_v4, %v1478_v33  ;;  %v11957_v41 = vcombine.high %v1475_v34, %v1479_v35 }
 0x191   :  { %7473 = vmatprep.subr.bf16.mxu0 %v11915_v42  ;;  %7801 = vmatprep.subr.bf16.mxu1 %v11917_v43  ;;  %v1482_v42 = vld [vmem:[#allocation7 + $0x800] sm:$0xff] }
 0x192   :  { %v1486_v43 = vld [vmem:[#allocation7 + $0x820] sm:$0xff] }
 0x193   :  { %v11962_v5 = vcombine.low %v1482_v42, %v1486_v43 }
 0x194   :  { %7474 = vmatpush1.bf16.msra.mxu0 %v11914_v49  ;;  %7802 = vmatpush1.bf16.msra.mxu1 %v11916_v50  ;;  %v11956_v50 = vcombine.low %v1475_v34, %v1479_v35  ;;  %v1514_v34 = vld [vmem:[#allocation7 + $0x900] sm:$0xff] }
 0x195   :  { %7475 = vmatprep.subr.bf16.mxu0 %v11923_v51  ;;  %7803 = vmatprep.subr.bf16.mxu1 %v11925_v56  ;;  %v11963_v56 = vcombine.high %v1482_v42, %v1486_v43  ;;  %v1518_v35 = vld [vmem:[#allocation7 + $0x920] sm:$0xff] }
 0x196   :  { %v1522_v42 = vld [vmem:[#allocation7 + $0x940] sm:$0xff] }
 0x197   :  { %v1526_v43 = vld [vmem:[#allocation7 + $0x960] sm:$0xff] }
 0x198   :  { %7476 = vmatpush1.bf16.msra.mxu0 %v11922_v63  ;;  %7804 = vmatpush1.bf16.msra.mxu1 %v11924_v1  ;;  %v1491_v63 = vld [vmem:[#allocation7 + $0x848] sm:$0xff] }
 0x199   :  { %7477 = vmatprep.subr.bf16.mxu0 %v11931_v0  ;;  %7805 = vmatprep.subr.bf16.mxu1 %v11933_v2  ;;  %v1495_v1 = vld [vmem:[#allocation7 + $0x868] sm:$0xff]  ;;  %v1199_v0 = vmax.f32 %v985_v47, 0.0  ;;  %v14276_v2 = vpack.c.bf16 %v1196_v48, %v1196_v48 }
 0x19a   :  { %v14262_v23 = vpop.f32.mrb[8].mxu1  ;;  %v11973_v8 = vcombine.high %v1491_v63, %v1495_v1  ;;  %v11972_v19 = vcombine.low %v1491_v63, %v1495_v1  ;;  %v1534_v63 = vld [vmem:[#allocation7 + $0x9a0] sm:$0xff]  ;;  %v1531_v1 = vld [vmem:[#allocation7 + $0x988] sm:$0xff] }
 0x19b   :  { %v14266_v26 = vpop.f32.mrb[9].mxu1  ;;  %v14278_v16 = vpack.c.bf16 %v1199_v0, %v1199_v0  ;;  %v1535_v0 = vld [vmem:[#allocation7 + $0x9a8] sm:$0xff] }
 0x19c   :  { %7478 = vmatpush1.bf16.msra.mxu0 %v11930_v12  ;;  %7806 = vmatpush1.bf16.msra.mxu1 %v11932_v13  ;;  %v1027_v29 = vpop.f32.mrb[10].mxu1  ;;  %v14272_v49 = vpop.f32.mrb[8].mxu0  ;;  %v1498_v12 = vld [vmem:[#allocation7 + $0x880] sm:$0xff] }
 0x19d   :  { %7479 = vmatprep.subr.bf16.mxu0 %v11939_v14  ;;  %7807 = vmatprep.subr.bf16.mxu1 %v11941_v15  ;;  %v1028_v32 = vpop.f32.mrb[11].mxu1  ;;  %v14274_v51 = vpop.f32.mrb[9].mxu0  ;;  %v1502_v13 = vld [vmem:[#allocation7 + $0x8a0] sm:$0xff]  ;;  %v1499_v14 = vld [vmem:[#allocation7 + $0x888] sm:$0xff] }
 0x19e   :  { %v1150_v61 = vpop.f32.mrb[10].mxu0  ;;  %v1503_v15 = vld [vmem:[#allocation7 + $0x8a8] sm:$0xff]  ;;  %v11979_v20 = vcombine.high %v1498_v12, %v1502_v13 }
 0x19f   :  { %v1151_v21 = vpop.f32.mrb[11].mxu0  ;;  %v11981_v25 = vcombine.high %v1499_v14, %v1503_v15  ;;  %v1507_v29 = vld [vmem:[#allocation7 + $0x8c8] sm:$0xff]  ;;  %v11980_v4 = vcombine.low %v1499_v14, %v1503_v15  ;;  %v1530_v61 = vld [vmem:[#allocation7 + $0x980] sm:$0xff] }
 0x1a0   :  { %7480 = vmatpush1.bf16.msra.mxu0 %v11938_v27  ;;  %7808 = vmatpush1.bf16.msra.mxu1 %v11940_v28  ;;  %v1506_v27 = vld [vmem:[#allocation7 + $0x8c0] sm:$0xff]  ;;  %v12002_v21 = vcombine.low %v1522_v42, %v1526_v43  ;;  %v1543_v14 = vld [vmem:[#allocation7 + $0x9e8] sm:$0xff]  ;;  %v12010_v15 = vcombine.low %v1530_v61, %v1534_v63 }
 0x1a1   :  { %7481 = vmatprep.subr.bf16.mxu0 %v11947_v30  ;;  %7809 = vmatprep.subr.bf16.mxu1 %v11949_v60  ;;  %v1510_v28 = vld [vmem:[#allocation7 + $0x8e0] sm:$0xff]  ;;  %v1511_v30 = vld [vmem:[#allocation7 + $0x8e8] sm:$0xff]  ;;  %v11978_v60 = vcombine.low %v1498_v12, %v1502_v13 }
 0x1a2   :  { %v11987_v32 = vcombine.high %v1506_v27, %v1510_v28  ;;  %v11989_v33 = vcombine.high %v1507_v29, %v1511_v30  ;;  %v1542_v12 = vld [vmem:[#allocation7 + $0x9e0] sm:$0xff]  ;;  %v1539_v13 = vld [vmem:[#allocation7 + $0x9c8] sm:$0xff] }
 0x1a4   :  { %7482 = vmatpush1.bf16.msra.mxu0 %v11946_v38  ;;  %7810 = vmatpush1.bf16.msra.mxu1 %v11948_v39  ;;  %v11986_v38 = vcombine.low %v1506_v27, %v1510_v28  ;;  %v11988_v39 = vcombine.low %v1507_v29, %v1511_v30  ;;  %v1550_v27 = vld [vmem:[#allocation7 + $0xa20] sm:$0xff]  ;;  %v1547_v28 = vld [vmem:[#allocation7 + $0xa08] sm:$0xff] }
 0x1a5   :  { %7483 = vmatprep.subr.bf16.mxu0 %v11955_v40  ;;  %7811 = vmatprep.subr.bf16.mxu1 %v11957_v41  ;;  %v11995_v40 = vcombine.high %v1514_v34, %v1518_v35  ;;  %v11997_v41 = vcombine.high %v1515_v36, %v1519_v37  ;;  %v1551_v29 = vld [vmem:[#allocation7 + $0xa28] sm:$0xff] }
 0x1a8   :  { %7484 = vmatpush1.bf16.msra.mxu0 %v11954_v3  ;;  %7812 = vmatpush1.bf16.msra.mxu1 %v11956_v50  ;;  %v11994_v3 = vcombine.low %v1514_v34, %v1518_v35  ;;  %v11996_v50 = vcombine.low %v1515_v36, %v1519_v37  ;;  %v1558_v34 = vld [vmem:[#allocation7 + $0xa60] sm:$0xff]  ;;  %v1555_v35 = vld [vmem:[#allocation7 + $0xa48] sm:$0xff] }
 0x1a9   :  { %7494 = vmatprep.subr.bf16.mxu0 %v11963_v56  ;;  %7822 = vmatprep.subr.bf16.mxu1 %v11965_v57  ;;  %v12003_v57 = vcombine.high %v1522_v42, %v1526_v43  ;;  %v1559_v36 = vld [vmem:[#allocation7 + $0xa68] sm:$0xff]  ;;  %v1566_v42 = vld [vmem:[#allocation7 + $0xaa0] sm:$0xff] }
 0x1aa   :  { %v1563_v43 = vld [vmem:[#allocation7 + $0xa88] sm:$0xff] }
 0x1ab   :  { %7486 = vmatmul.mubr.bf16.vlgmr.msra.gmra.mrb[12].mxu0 %v14276_v2  ;;  %7814 = vmatmul.mubr.bf16.vlgmr.msra.gmra.mrb[20].mxu1 %v14276_v2 }
 0x1ac   :  { %7495 = vmatpush1.bf16.msra.mxu0 %v11962_v5  ;;  %7823 = vmatpush1.bf16.msra.mxu1 %v11964_v6  ;;  %v12004_v5 = vcombine.low %v1523_v44, %v1527_v46  ;;  %v12011_v6 = vcombine.high %v1530_v61, %v1534_v63  ;;  %v1567_v44 = vld [vmem:[#allocation7 + $0xaa8] sm:$0xff] }
 0x1ad   :  { %7496 = vmatprep.subr.bf16.mxu0 %v11971_v7  ;;  %7824 = vmatprep.subr.bf16.mxu1 %v11973_v8  ;;  %v12013_v7 = vcombine.high %v1531_v1, %v1535_v0  ;;  %v1538_v8 = vld [vmem:[#allocation7 + $0x9c0] sm:$0xff]  ;;  %v1571_v61 = vld [vmem:[#allocation7 + $0xac8] sm:$0xff] }
 0x1ae   :  { %7526 = vmatprep.mubr.bf16.mxu0 %v14278_v16  ;;  %7854 = vmatprep.mubr.bf16.mxu1 %v14278_v16  ;;  %v12018_v30 = vcombine.low %v1538_v8, %v1542_v12 }
 0x1b0   :  { %7497 = vmatpush1.bf16.msra.mxu0 %v11970_v17  ;;  %7825 = vmatpush1.bf16.msra.mxu1 %v11972_v19  ;;  %v12012_v17 = vcombine.low %v1531_v1, %v1535_v0  ;;  %v12019_v19 = vcombine.high %v1538_v8, %v1542_v12  ;;  %v12044_v1 = vcombine.low %v1563_v43, %v1567_v44  ;;  %v1583_v8 = vld [vmem:[#allocation7 + $0xb28] sm:$0xff] }
 0x1b1   :  { %7498 = vmatprep.subr.bf16.mxu0 %v11979_v20  ;;  %7826 = vmatprep.subr.bf16.mxu1 %v11981_v25  ;;  %v12021_v20 = vcombine.high %v1539_v13, %v1543_v14  ;;  %v1546_v25 = vld [vmem:[#allocation7 + $0xa00] sm:$0xff] }
 0x1b2   :  { %v12026_v37 = vcombine.low %v1546_v25, %v1550_v27 }
 0x1b4   :  { %7499 = vmatpush1.bf16.msra.mxu0 %v11978_v60  ;;  %7827 = vmatpush1.bf16.msra.mxu1 %v11980_v4  ;;  %v12020_v60 = vcombine.low %v1539_v13, %v1543_v14  ;;  %v12027_v4 = vcombine.high %v1546_v25, %v1550_v27  ;;  %v1586_v25 = vld [vmem:[#allocation7 + $0xb40] sm:$0xff] }
 0x1b5   :  { %7500 = vmatprep.subr.bf16.mxu0 %v11987_v32  ;;  %7828 = vmatprep.subr.bf16.mxu1 %v11989_v33  ;;  %v12029_v32 = vcombine.high %v1547_v28, %v1551_v29  ;;  %v1554_v33 = vld [vmem:[#allocation7 + $0xa40] sm:$0xff] }
 0x1b6   :  { %v14284_v47 = vpop.f32.mrb[12].mxu1  ;;  %v12034_v46 = vcombine.low %v1554_v33, %v1558_v34 }
 0x1b7   :  { %v14286_v48 = vpop.f32.mrb[13].mxu1 }
 0x1b8   :  { %7501 = vmatpush1.bf16.msra.mxu0 %v11986_v38  ;;  %7829 = vmatpush1.bf16.msra.mxu1 %v11988_v39  ;;  %v1109_v56 = vpop.f32.mrb[14].mxu1  ;;  %v12028_v38 = vcombine.low %v1547_v28, %v1551_v29  ;;  %v12035_v39 = vcombine.high %v1554_v33, %v1558_v34  ;;  %v1590_v28 = vld [vmem:[#allocation7 + $0xb60] sm:$0xff]  ;;  %v1587_v29 = vld [vmem:[#allocation7 + $0xb48] sm:$0xff] }
 0x1b9   :  { %7502 = vmatprep.subr.bf16.mxu0 %v11995_v40  ;;  %7830 = vmatprep.subr.bf16.mxu1 %v11997_v41  ;;  %v1110_v62 = vpop.f32.mrb[15].mxu1  ;;  %v12037_v40 = vcombine.high %v1555_v35, %v1559_v36  ;;  %v1562_v41 = vld [vmem:[#allocation7 + $0xa80] sm:$0xff]  ;;  %v12045_v56 = vcombine.high %v1563_v43, %v1567_v44  ;;  %v12067_v33 = vcombine.high %v1586_v25, %v1590_v28 }
 0x1ba   :  { %v1575_v62 = vld [vmem:[#allocation7 + $0xae8] sm:$0xff]  ;;  %v12042_v63 = vcombine.low %v1562_v41, %v1566_v42 }
 0x1bc   :  { %7503 = vmatpush1.bf16.msra.mxu0 %v11994_v3  ;;  %7831 = vmatpush1.bf16.msra.mxu1 %v11996_v50  ;;  %v12036_v3 = vcombine.low %v1555_v35, %v1559_v36  ;;  %v12043_v50 = vcombine.high %v1562_v41, %v1566_v42  ;;  %v1594_v35 = vld [vmem:[#allocation7 + $0xb80] sm:$0xff] }
 0x1bd   :  { %7504 = vmatprep.subr.bf16.mxu0 %v12003_v57  ;;  %7832 = vmatprep.subr.bf16.mxu1 %v12005_v58  ;;  %v1570_v57 = vld [vmem:[#allocation7 + $0xac0] sm:$0xff] }
 0x1be   :  { %v1574_v58 = vld [vmem:[#allocation7 + $0xae0] sm:$0xff] }
 0x1bf   :  { %v12051_v0 = vcombine.high %v1570_v57, %v1574_v58  ;;  %v12050_v14 = vcombine.low %v1570_v57, %v1574_v58  ;;  %v1598_v36 = vld [vmem:[#allocation7 + $0xba0] sm:$0xff] }
 0x1c0   :  { %7505 = vmatpush1.bf16.msra.mxu0 %v12002_v21  ;;  %7833 = vmatpush1.bf16.msra.mxu1 %v12004_v5  ;;  %v12053_v21 = vcombine.high %v1571_v61, %v1575_v62  ;;  %v1578_v5 = vld [vmem:[#allocation7 + $0xb00] sm:$0xff]  ;;  %v12075_v43 = vcombine.high %v1594_v35, %v1598_v36  ;;  %v12074_v58 = vcombine.low %v1594_v35, %v1598_v36  ;;  %v1631_v35 = vld [vmem:[#allocation7 + $0xca8] sm:$0xff] }
 0x1c1   :  { %7506 = vmatprep.subr.bf16.mxu0 %v12011_v6  ;;  %7834 = vmatprep.subr.bf16.mxu1 %v12013_v7  ;;  %v1582_v6 = vld [vmem:[#allocation7 + $0xb20] sm:$0xff]  ;;  %v1579_v7 = vld [vmem:[#allocation7 + $0xb08] sm:$0xff] }
 0x1c4   :  { %7507 = vmatpush1.bf16.msra.mxu0 %v12010_v15  ;;  %7835 = vmatpush1.bf16.msra.mxu1 %v12012_v17  ;;  %v12052_v15 = vcombine.low %v1571_v61, %v1575_v62 }
 0x1c5   :  { %7508 = vmatprep.subr.bf16.mxu0 %v12019_v19  ;;  %7836 = vmatprep.subr.bf16.mxu1 %v12021_v20  ;;  %v12059_v19 = vcombine.high %v1578_v5, %v1582_v6  ;;  %v12061_v20 = vcombine.high %v1579_v7, %v1583_v8 }
 0x1c8   :  { %7509 = vmatpush1.bf16.msra.mxu0 %v12018_v30  ;;  %7837 = vmatpush1.bf16.msra.mxu1 %v12020_v60  ;;  %v1591_v30 = vld [vmem:[#allocation7 + $0xb68] sm:$0xff]  ;;  %v12058_v60 = vcombine.low %v1578_v5, %v1582_v6 }
 0x1c9   :  { %7510 = vmatprep.subr.bf16.mxu0 %v12027_v4  ;;  %7838 = vmatprep.subr.bf16.mxu1 %v12029_v32  ;;  %v12060_v4 = vcombine.low %v1579_v7, %v1583_v8  ;;  %v14293_v32 = vsub.s32 4, %v14212_v52  ;;  %v12069_v34 = vcombine.high %v1587_v29, %v1591_v30  ;;  %v12068_v41 = vcombine.low %v1587_v29, %v1591_v30  ;;  %v1611_v5 = vld [vmem:[#allocation7 + $0xc08] sm:$0xff] }
 0x1ca   :  { %v1615_v6 = vld [vmem:[#allocation7 + $0xc28] sm:$0xff] }
 0x1cb   :  { %v232_v42 = vrot.slane %v14217_v54, %v14293_v32  ;;  %v12092_v29 = vcombine.low %v1611_v5, %v1615_v6 }
 0x1cc   :  { %7511 = vmatpush1.bf16.msra.mxu0 %v12026_v37  ;;  %7839 = vmatpush1.bf16.msra.mxu1 %v12028_v38  ;;  %v1595_v37 = vld [vmem:[#allocation7 + $0xb88] sm:$0xff] }
 0x1cd   :  { %7512 = vmatprep.subr.bf16.mxu0 %v12035_v39  ;;  %7840 = vmatprep.subr.bf16.mxu1 %v12037_v40  ;;  %v1599_v38 = vld [vmem:[#allocation7 + $0xba8] sm:$0xff]  ;;  %v14296_v39 = vsub.s32 7, %v14212_v52  ;;  %v12066_v40 = vcombine.low %v1586_v25, %v1590_v28  ;;  %v983_v62 = vadd.f32 %v14234_v18, %v232_v42  ;;  %v1618_v18 = vld [vmem:[#allocation7 + $0xc40] sm:$0xff] }
 0x1ce   :  { %v12077_v44 = vcombine.high %v1595_v37, %v1599_v38  ;;  %v12076_v61 = vcombine.low %v1595_v37, %v1599_v38  ;;  %v1623_v25 = vld [vmem:[#allocation7 + $0xc68] sm:$0xff]  ;;  %v1634_v42 = vld [vmem:[#allocation7 + $0xcc0] sm:$0xff] }
 0x1cf   :  { %v244_v57 = vrot.slane %v14217_v54, %v14296_v39 }
 0x1d0   :  { %7513 = vmatpush1.bf16.msra.mxu0 %v12034_v46  ;;  %7841 = vmatpush1.bf16.msra.mxu1 %v12036_v3  ;;  %v1602_v46 = vld [vmem:[#allocation7 + $0xbc0] sm:$0xff] }
 0x1d1   :  { %7514 = vmatprep.subr.bf16.mxu0 %v12043_v50  ;;  %7842 = vmatprep.subr.bf16.mxu1 %v12045_v56  ;;  %v1606_v3 = vld [vmem:[#allocation7 + $0xbe0] sm:$0xff]  ;;  %v1603_v50 = vld [vmem:[#allocation7 + $0xbc8] sm:$0xff]  ;;  %v1026_v7 = vadd.f32 %v14266_v26, %v244_v57 }
 0x1d2   :  { %v14288_v12 = vpop.f32.mrb[16].mxu1  ;;  %v1607_v56 = vld [vmem:[#allocation7 + $0xbe8] sm:$0xff]  ;;  %v12082_v8 = vcombine.low %v1602_v46, %v1606_v3 }
 0x1d3   :  { %v14290_v13 = vpop.f32.mrb[17].mxu1  ;;  %v12084_v54 = vcombine.low %v1603_v50, %v1607_v56 }
 0x1d4   :  { %7515 = vmatpush1.bf16.msra.mxu0 %v12042_v63  ;;  %7843 = vmatpush1.bf16.msra.mxu1 %v12044_v1  ;;  %v1191_v17 = vpop.f32.mrb[18].mxu1  ;;  %v12083_v63 = vcombine.high %v1602_v46, %v1606_v3  ;;  %v12085_v1 = vcombine.high %v1603_v50, %v1607_v56  ;;  %v1639_v46 = vld [vmem:[#allocation7 + $0xce8] sm:$0xff] }
 0x1d5   :  { %7516 = vmatprep.subr.bf16.mxu0 %v12051_v0  ;;  %7844 = vmatprep.subr.bf16.mxu1 %v12053_v21  ;;  %v1192_v27 = vpop.f32.mrb[19].mxu1  ;;  %v1610_v0 = vld [vmem:[#allocation7 + $0xc00] sm:$0xff]  ;;  %v12093_v17 = vcombine.high %v1611_v5, %v1615_v6 }
 0x1d6   :  { %v1614_v21 = vld [vmem:[#allocation7 + $0xc20] sm:$0xff]  ;;  %v1201_v27 = vmax.f32 %v1026_v7, 0.0 }
 0x1d7   :  { %v12090_v28 = vcombine.low %v1610_v0, %v1614_v21  ;;  %v1650_v6 = vld [vmem:[#allocation7 + $0xd40] sm:$0xff] }
 0x1d8   :  { %7517 = vmatpush1.bf16.msra.mxu0 %v12050_v14  ;;  %7845 = vmatpush1.bf16.msra.mxu1 %v12052_v15  ;;  %v1198_v14 = vmax.f32 %v983_v62, 0.0  ;;  %v12091_v15 = vcombine.high %v1610_v0, %v1614_v21  ;;  %v14306_v36 = vpack.c.bf16 %v1201_v27, %v1201_v27  ;;  %v1643_v62 = vld [vmem:[#allocation7 + $0xd08] sm:$0xff]  ;;  %v1654_v7 = vld [vmem:[#allocation7 + $0xd60] sm:$0xff] }
 0x1d9   :  { %7518 = vmatprep.subr.bf16.mxu0 %v12059_v19  ;;  %7846 = vmatprep.subr.bf16.mxu1 %v12061_v20  ;;  %v1622_v19 = vld [vmem:[#allocation7 + $0xc60] sm:$0xff]  ;;  %v1619_v20 = vld [vmem:[#allocation7 + $0xc48] sm:$0xff] }
 0x1da   :  { %v14304_v30 = vpack.c.bf16 %v1198_v14, %v1198_v14  ;;  %v12099_v26 = vcombine.high %v1618_v18, %v1622_v19  ;;  %v12098_v37 = vcombine.low %v1618_v18, %v1622_v19  ;;  %v12100_v38 = vcombine.low %v1619_v20, %v1623_v25  ;;  %v1658_v19 = vld [vmem:[#allocation7 + $0xd80] sm:$0xff]  ;;  %v1663_v27 = vld [vmem:[#allocation7 + $0xda8] sm:$0xff] }
 0x1dc   :  { %7519 = vmatpush1.bf16.msra.mxu0 %v12058_v60  ;;  %7847 = vmatpush1.bf16.msra.mxu1 %v12060_v4  ;;  %v12101_v60 = vcombine.high %v1619_v20, %v1623_v25  ;;  %v1626_v4 = vld [vmem:[#allocation7 + $0xc80] sm:$0xff]  ;;  %v1659_v25 = vld [vmem:[#allocation7 + $0xd88] sm:$0xff] }
 0x1dd   :  { %7520 = vmatprep.subr.bf16.mxu0 %v12067_v33  ;;  %7848 = vmatprep.subr.bf16.mxu1 %v12069_v34  ;;  %v1630_v33 = vld [vmem:[#allocation7 + $0xca0] sm:$0xff]  ;;  %v1627_v34 = vld [vmem:[#allocation7 + $0xc88] sm:$0xff] }
 0x1de   :  { %v12106_v3 = vcombine.low %v1626_v4, %v1630_v33  ;;  %v12108_v50 = vcombine.low %v1627_v34, %v1631_v35  ;;  %v1662_v20 = vld [vmem:[#allocation7 + $0xda0] sm:$0xff] }
 0x1e0   :  { %7521 = vmatpush1.bf16.msra.mxu0 %v12066_v40  ;;  %7849 = vmatpush1.bf16.msra.mxu1 %v12068_v41  ;;  %v12107_v40 = vcombine.high %v1626_v4, %v1630_v33  ;;  %v12109_v41 = vcombine.high %v1627_v34, %v1631_v35  ;;  %v1666_v4 = vld [vmem:[#allocation7 + $0xdc0] sm:$0xff]  ;;  %v1667_v34 = vld [vmem:[#allocation7 + $0xdc8] sm:$0xff] }
 0x1e1   :  { %7522 = vmatprep.subr.bf16.mxu0 %v12075_v43  ;;  %7850 = vmatprep.subr.bf16.mxu1 %v12077_v44  ;;  %v1638_v43 = vld [vmem:[#allocation7 + $0xce0] sm:$0xff]  ;;  %v1635_v44 = vld [vmem:[#allocation7 + $0xcc8] sm:$0xff] }
 0x1e2   :  { %v12115_v56 = vcombine.high %v1634_v42, %v1638_v43  ;;  %v12117_v57 = vcombine.high %v1635_v44, %v1639_v46  ;;  %v12116_v0 = vcombine.low %v1635_v44, %v1639_v46  ;;  %v1670_v33 = vld [vmem:[#allocation7 + $0xde0] sm:$0xff]  ;;  %v1671_v35 = vld [vmem:[#allocation7 + $0xde8] sm:$0xff] }
 0x1e3   :  { %v1675_v44 = vld [vmem:[#allocation7 + $0xe08] sm:$0xff] }
 0x1e4   :  { %7523 = vmatpush1.bf16.msra.mxu0 %v12074_v58  ;;  %7851 = vmatpush1.bf16.msra.mxu1 %v12076_v61  ;;  %v1642_v58 = vld [vmem:[#allocation7 + $0xd00] sm:$0xff]  ;;  %v1679_v46 = vld [vmem:[#allocation7 + $0xe28] sm:$0xff] }
 0x1e5   :  { %7524 = vmatprep.subr.bf16.mxu0 %v12083_v63  ;;  %7852 = vmatprep.subr.bf16.mxu1 %v12085_v1  ;;  %v1646_v61 = vld [vmem:[#allocation7 + $0xd20] sm:$0xff]  ;;  %v1647_v63 = vld [vmem:[#allocation7 + $0xd28] sm:$0xff]  ;;  %v12114_v1 = vcombine.low %v1634_v42, %v1638_v43 }
 0x1e6   :  { %v12123_v21 = vcombine.high %v1642_v58, %v1646_v61  ;;  %v12125_v5 = vcombine.high %v1643_v62, %v1647_v63  ;;  %v12122_v14 = vcombine.low %v1642_v58, %v1646_v61  ;;  %v1674_v42 = vld [vmem:[#allocation7 + $0xe00] sm:$0xff] }
 0x1e7   :  { %v1678_v43 = vld [vmem:[#allocation7 + $0xe20] sm:$0xff] }
 0x1e8   :  { %7525 = vmatpush1.bf16.msra.mxu0 %v12082_v8  ;;  %7853 = vmatpush1.bf16.msra.mxu1 %v12084_v54  ;;  %v1651_v8 = vld [vmem:[#allocation7 + $0xd48] sm:$0xff]  ;;  %v1682_v58 = vld [vmem:[#allocation7 + $0xe40] sm:$0xff] }
 0x1e9   :  { %7535 = vmatprep.subr.bf16.mxu0 %v12091_v15  ;;  %7863 = vmatprep.subr.bf16.mxu1 %v12093_v17  ;;  %v1655_v54 = vld [vmem:[#allocation7 + $0xd68] sm:$0xff]  ;;  %v12124_v15 = vcombine.low %v1643_v62, %v1647_v63  ;;  %v12131_v17 = vcombine.high %v1650_v6, %v1654_v7  ;;  %v1686_v61 = vld [vmem:[#allocation7 + $0xe60] sm:$0xff] }
 0x1ea   :  { %v12133_v18 = vcombine.high %v1651_v8, %v1655_v54  ;;  %v1683_v62 = vld [vmem:[#allocation7 + $0xe48] sm:$0xff] }
 0x1eb   :  { %7527 = vmatmul.mubr.bf16.vlgmr.msra.gmra.mrb[12].mxu0 %v14304_v30  ;;  %7855 = vmatmul.mubr.bf16.vlgmr.msra.gmra.mrb[20].mxu1 %v14304_v30  ;;  %v1687_v63 = vld [vmem:[#allocation7 + $0xe68] sm:$0xff] }
 0x1ec   :  { %7536 = vmatpush1.bf16.msra.mxu0 %v12090_v28  ;;  %7864 = vmatpush1.bf16.msra.mxu1 %v12092_v29  ;;  %v12130_v28 = vcombine.low %v1650_v6, %v1654_v7  ;;  %v12132_v29 = vcombine.low %v1651_v8, %v1655_v54  ;;  %v1690_v6 = vld [vmem:[#allocation7 + $0xe80] sm:$0xff]  ;;  %v1691_v8 = vld [vmem:[#allocation7 + $0xe88] sm:$0xff] }
 0x1ed   :  { %7537 = vmatprep.subr.bf16.mxu0 %v12099_v26  ;;  %7865 = vmatprep.subr.bf16.mxu1 %v12101_v60  ;;  %v12139_v26 = vcombine.high %v1658_v19, %v1662_v20  ;;  %v12141_v60 = vcombine.high %v1659_v25, %v1663_v27  ;;  %v1694_v7 = vld [vmem:[#allocation7 + $0xea0] sm:$0xff]  ;;  %v1695_v54 = vld [vmem:[#allocation7 + $0xea8] sm:$0xff] }
 0x1ee   :  { %7567 = vmatprep.mubr.bf16.mxu0 %v14306_v36  ;;  %7895 = vmatprep.mubr.bf16.mxu1 %v14306_v36 }
 0x1f0   :  { %7538 = vmatpush1.bf16.msra.mxu0 %v12098_v37  ;;  %7866 = vmatpush1.bf16.msra.mxu1 %v12100_v38  ;;  %v12138_v37 = vcombine.low %v1658_v19, %v1662_v20  ;;  %v12140_v38 = vcombine.low %v1659_v25, %v1663_v27  ;;  %v1698_v19 = vld [vmem:[#allocation7 + $0xec0] sm:$0xff]  ;;  %v1699_v25 = vld [vmem:[#allocation7 + $0xec8] sm:$0xff] }
 0x1f1   :  { %7539 = vmatprep.subr.bf16.mxu0 %v12107_v40  ;;  %7867 = vmatprep.subr.bf16.mxu1 %v12109_v41  ;;  %v12147_v40 = vcombine.high %v1666_v4, %v1670_v33  ;;  %v12149_v41 = vcombine.high %v1667_v34, %v1671_v35  ;;  %v1702_v20 = vld [vmem:[#allocation7 + $0xee0] sm:$0xff]  ;;  %v1703_v27 = vld [vmem:[#allocation7 + $0xee8] sm:$0xff] }
 0x1f4   :  { %7540 = vmatpush1.bf16.msra.mxu0 %v12106_v3  ;;  %7868 = vmatpush1.bf16.msra.mxu1 %v12108_v50  ;;  %v12146_v3 = vcombine.low %v1666_v4, %v1670_v33  ;;  %v12148_v50 = vcombine.low %v1667_v34, %v1671_v35  ;;  %v1706_v4 = vld [vmem:[#allocation7 + $0xf00] sm:$0xff]  ;;  %v1707_v34 = vld [vmem:[#allocation7 + $0xf08] sm:$0xff] }
 0x1f5   :  { %7541 = vmatprep.subr.bf16.mxu0 %v12115_v56  ;;  %7869 = vmatprep.subr.bf16.mxu1 %v12117_v57  ;;  %v12155_v56 = vcombine.high %v1674_v42, %v1678_v43  ;;  %v12157_v57 = vcombine.high %v1675_v44, %v1679_v46  ;;  %v1710_v33 = vld [vmem:[#allocation7 + $0xf20] sm:$0xff]  ;;  %v1711_v35 = vld [vmem:[#allocation7 + $0xf28] sm:$0xff] }
 0x1f8   :  { %7542 = vmatpush1.bf16.msra.mxu0 %v12114_v1  ;;  %7870 = vmatpush1.bf16.msra.mxu1 %v12116_v0  ;;  %v12154_v1 = vcombine.low %v1674_v42, %v1678_v43  ;;  %v12156_v0 = vcombine.low %v1675_v44, %v1679_v46  ;;  %v1714_v42 = vld [vmem:[#allocation7 + $0xf40] sm:$0xff]  ;;  %v1715_v44 = vld [vmem:[#allocation7 + $0xf48] sm:$0xff] }
 0x1f9   :  { %7543 = vmatprep.subr.bf16.mxu0 %v12123_v21  ;;  %7871 = vmatprep.subr.bf16.mxu1 %v12125_v5  ;;  %v12163_v21 = vcombine.high %v1682_v58, %v1686_v61  ;;  %v12165_v5 = vcombine.high %v1683_v62, %v1687_v63  ;;  %v1718_v43 = vld [vmem:[#allocation7 + $0xf60] sm:$0xff]  ;;  %v1719_v46 = vld [vmem:[#allocation7 + $0xf68] sm:$0xff] }
 0x1fc   :  { %7544 = vmatpush1.bf16.msra.mxu0 %v12122_v14  ;;  %7872 = vmatpush1.bf16.msra.mxu1 %v12124_v15  ;;  %v12162_v14 = vcombine.low %v1682_v58, %v1686_v61  ;;  %v12164_v15 = vcombine.low %v1683_v62, %v1687_v63  ;;  %v12197_v58 = vcombine.high %v1715_v44, %v1719_v46  ;;  %v1722_v61 = vld [vmem:[#allocation7 + $0xf80] sm:$0xff]  ;;  %v1723_v63 = vld [vmem:[#allocation7 + $0xf88] sm:$0xff] }
 0x1fd   :  { %7545 = vmatprep.subr.bf16.mxu0 %v12131_v17  ;;  %7873 = vmatprep.subr.bf16.mxu1 %v12133_v18  ;;  %v12171_v17 = vcombine.high %v1690_v6, %v1694_v7  ;;  %v12173_v18 = vcombine.high %v1691_v8, %v1695_v54  ;;  %v1726_v62 = vld [vmem:[#allocation7 + $0xfa0] sm:$0xff] }
 0x200   :  { %7546 = vmatpush1.bf16.msra.mxu0 %v12130_v28  ;;  %7874 = vmatpush1.bf16.msra.mxu1 %v12132_v29  ;;  %v12170_v28 = vcombine.low %v1690_v6, %v1694_v7  ;;  %v12172_v29 = vcombine.low %v1691_v8, %v1695_v54  ;;  %v13863_v6 = vld [vmem:[#allocation11] sm:$0xff] }
 0x201   :  { %7547 = vmatprep.subr.bf16.mxu0 %v12139_v26  ;;  %7875 = vmatprep.subr.bf16.mxu1 %v12141_v60  ;;  %v12179_v26 = vcombine.high %v1698_v19, %v1702_v20  ;;  %v12181_v60 = vcombine.high %v1699_v25, %v1703_v27  ;;  %v1730_v54 = vld [vmem:[#allocation7 + $0xfc0] sm:$0xff] }
 0x204   :  { %7548 = vmatpush1.bf16.msra.mxu0 %v12138_v37  ;;  %7876 = vmatpush1.bf16.msra.mxu1 %v12140_v38  ;;  %v12178_v37 = vcombine.low %v1698_v19, %v1702_v20  ;;  %v12180_v38 = vcombine.low %v1699_v25, %v1703_v27  ;;  %v12202_v19 = vcombine.low %v1722_v61, %v1726_v62 }
 0x205   :  { %7549 = vmatprep.subr.bf16.mxu0 %v12147_v40  ;;  %7877 = vmatprep.subr.bf16.mxu1 %v12149_v41  ;;  %v12187_v40 = vcombine.high %v1706_v4, %v1710_v33  ;;  %v12189_v41 = vcombine.high %v1707_v34, %v1711_v35 }
 0x208   :  { %7550 = vmatpush1.bf16.msra.mxu0 %v12146_v3  ;;  %7878 = vmatpush1.bf16.msra.mxu1 %v12148_v50  ;;  %v12186_v3 = vcombine.low %v1706_v4, %v1710_v33  ;;  %v12188_v50 = vcombine.low %v1707_v34, %v1711_v35  ;;  %v1739_v4 = vld [vmem:[#allocation7 + $0x1008] sm:$0xff] }
 0x209   :  { %7551 = vmatprep.subr.bf16.mxu0 %v12155_v56  ;;  %7879 = vmatprep.subr.bf16.mxu1 %v12157_v57  ;;  %v14313_v56 = vsub.s32 6, %v14212_v52  ;;  %v12195_v57 = vcombine.high %v1714_v42, %v1718_v43  ;;  %v12203_v52 = vcombine.high %v1722_v61, %v1726_v62  ;;  %v1743_v33 = vld [vmem:[#allocation7 + $0x1028] sm:$0xff]  ;;  %v1754_v61 = vld [vmem:[#allocation7 + $0x1080] sm:$0xff] }
 0x20a   :  { %v1758_v62 = vld [vmem:[#allocation7 + $0x10a0] sm:$0xff] }
 0x20b   :  { %v240_v7 = vrot.slane %v13863_v6, %v14313_v56  ;;  %v12235_v6 = vcombine.high %v1754_v61, %v1758_v62 }
 0x20c   :  { %7552 = vmatpush1.bf16.msra.mxu0 %v12154_v1  ;;  %7880 = vmatpush1.bf16.msra.mxu1 %v12156_v0  ;;  %v1727_v1 = vld [vmem:[#allocation7 + $0xfa8] sm:$0xff] }
 0x20d   :  { %7553 = vmatprep.subr.bf16.mxu0 %v12163_v21  ;;  %7881 = vmatprep.subr.bf16.mxu1 %v12165_v5  ;;  %v14315_v0 = vld [vmem:[#allocation11 + $0x8] sm:$0xff]  ;;  %v12194_v21 = vcombine.low %v1714_v42, %v1718_v43  ;;  %v12196_v5 = vcombine.low %v1715_v44, %v1719_v46  ;;  %v12205_v8 = vcombine.high %v1723_v63, %v1727_v1  ;;  %v1750_v42 = vld [vmem:[#allocation7 + $0x1060] sm:$0xff] }
 0x20e   :  { %v12204_v20 = vcombine.low %v1723_v63, %v1727_v1  ;;  %v1024_v25 = vadd.f32 %v14262_v23, %v240_v7  ;;  %v1747_v43 = vld [vmem:[#allocation7 + $0x1048] sm:$0xff] }
 0x20f   :  { %v1751_v44 = vld [vmem:[#allocation7 + $0x1068] sm:$0xff] }
 0x210   :  { %7554 = vmatpush1.bf16.msra.mxu0 %v12162_v14  ;;  %7882 = vmatpush1.bf16.msra.mxu1 %v12164_v15  ;;  %v252_v14 = vrot.slane %v14315_v0, %v14220_v55  ;;  %v1734_v15 = vld [vmem:[#allocation7 + $0xfe0] sm:$0xff]  ;;  %v1755_v63 = vld [vmem:[#allocation7 + $0x1088] sm:$0xff] }
 0x211   :  { %7555 = vmatprep.subr.bf16.mxu0 %v12171_v17  ;;  %7883 = vmatprep.subr.bf16.mxu1 %v12173_v18  ;;  %v1731_v17 = vld [vmem:[#allocation7 + $0xfc8] sm:$0xff]  ;;  %v12211_v27 = vcombine.high %v1730_v54, %v1734_v15  ;;  %v12210_v34 = vcombine.low %v1730_v54, %v1734_v15  ;;  %v12234_v15 = vcombine.low %v1754_v61, %v1758_v62  ;;  %v1794_v62 = vld [vmem:[#allocation7 + $0x11c0] sm:$0xff] }
 0x212   :  { %v1735_v18 = vld [vmem:[#allocation7 + $0xfe8] sm:$0xff] }
 0x213   :  { %v12212_v35 = vcombine.low %v1731_v17, %v1735_v18  ;;  %v1759_v1 = vld [vmem:[#allocation7 + $0x10a8] sm:$0xff] }
 0x214   :  { %7556 = vmatpush1.bf16.msra.mxu0 %v12170_v28  ;;  %7884 = vmatpush1.bf16.msra.mxu1 %v12172_v29  ;;  %v12213_v28 = vcombine.high %v1731_v17, %v1735_v18  ;;  %v1738_v29 = vld [vmem:[#allocation7 + $0x1000] sm:$0xff]  ;;  %v12237_v7 = vcombine.high %v1755_v63, %v1759_v1  ;;  %v1763_v54 = vld [vmem:[#allocation7 + $0x10c8] sm:$0xff]  ;;  %v12236_v17 = vcombine.low %v1755_v63, %v1759_v1 }
 0x215   :  { %7557 = vmatprep.subr.bf16.mxu0 %v12179_v26  ;;  %7885 = vmatprep.subr.bf16.mxu1 %v12181_v60  ;;  %v1067_v26 = vadd.f32 %v14254_v31, %v252_v14  ;;  %v1742_v60 = vld [vmem:[#allocation7 + $0x1020] sm:$0xff]  ;;  %v1767_v14 = vld [vmem:[#allocation7 + $0x10e8] sm:$0xff] }
 0x216   :  { %v12218_v31 = vcombine.low %v1738_v29, %v1742_v60  ;;  %v1798_v63 = vld [vmem:[#allocation7 + $0x11e0] sm:$0xff]  ;;  %v1795_v1 = vld [vmem:[#allocation7 + $0x11c8] sm:$0xff] }
 0x217   :  { %v1203_v23 = vmax.f32 %v1067_v26, 0.0  ;;  %v12244_v26 = vcombine.low %v1763_v54, %v1767_v14 }
 0x218   :  { %7558 = vmatpush1.bf16.msra.mxu0 %v12178_v37  ;;  %7886 = vmatpush1.bf16.msra.mxu1 %v12180_v38  ;;  %v1200_v37 = vmax.f32 %v1024_v25, 0.0  ;;  %v12219_v38 = vcombine.high %v1738_v29, %v1742_v60  ;;  %v1774_v25 = vld [vmem:[#allocation7 + $0x1120] sm:$0xff] }
 0x219   :  { %7559 = vmatprep.subr.bf16.mxu0 %v12187_v40  ;;  %7887 = vmatprep.subr.bf16.mxu1 %v12189_v41  ;;  %v12221_v40 = vcombine.high %v1739_v4, %v1743_v33  ;;  %v1746_v41 = vld [vmem:[#allocation7 + $0x1040] sm:$0xff] }
 0x21a   :  { %v14322_v46 = vpack.c.bf16 %v1200_v37, %v1200_v37  ;;  %v1783_v37 = vld [vmem:[#allocation7 + $0x1168] sm:$0xff] }
 0x21c   :  { %7560 = vmatpush1.bf16.msra.mxu0 %v12186_v3  ;;  %7888 = vmatpush1.bf16.msra.mxu1 %v12188_v50  ;;  %v12220_v3 = vcombine.low %v1739_v4, %v1743_v33  ;;  %v14324_v50 = vpack.c.bf16 %v1203_v23, %v1203_v23  ;;  %v1778_v33 = vld [vmem:[#allocation7 + $0x1140] sm:$0xff] }
 0x21d   :  { %7561 = vmatprep.subr.bf16.mxu0 %v12195_v57  ;;  %7889 = vmatprep.subr.bf16.mxu1 %v12197_v58  ;;  %v12227_v57 = vcombine.high %v1746_v41, %v1750_v42  ;;  %v12229_v58 = vcombine.high %v1747_v43, %v1751_v44 }
 0x220   :  { %7562 = vmatpush1.bf16.msra.mxu0 %v12194_v21  ;;  %7890 = vmatpush1.bf16.msra.mxu1 %v12196_v5  ;;  %v12226_v21 = vcombine.low %v1746_v41, %v1750_v42  ;;  %v12228_v5 = vcombine.low %v1747_v43, %v1751_v44  ;;  %v1786_v42 = vld [vmem:[#allocation7 + $0x1180] sm:$0xff]  ;;  %v1787_v44 = vld [vmem:[#allocation7 + $0x1188] sm:$0xff] }
 0x221   :  { %7563 = vmatprep.subr.bf16.mxu0 %v12203_v52  ;;  %7891 = vmatprep.subr.bf16.mxu1 %v12205_v8  ;;  %v1762_v52 = vld [vmem:[#allocation7 + $0x10c0] sm:$0xff] }
 0x222   :  { %v1766_v8 = vld [vmem:[#allocation7 + $0x10e0] sm:$0xff] }
 0x223   :  { %v12243_v18 = vcombine.high %v1762_v52, %v1766_v8  ;;  %v12242_v29 = vcombine.low %v1762_v52, %v1766_v8  ;;  %v1790_v43 = vld [vmem:[#allocation7 + $0x11a0] sm:$0xff] }
 0x224   :  { %7564 = vmatpush1.bf16.msra.mxu0 %v12202_v19  ;;  %7892 = vmatpush1.bf16.msra.mxu1 %v12204_v20  ;;  %v12245_v19 = vcombine.high %v1763_v54, %v1767_v14  ;;  %v1770_v20 = vld [vmem:[#allocation7 + $0x1100] sm:$0xff]  ;;  %v1803_v14 = vld [vmem:[#allocation7 + $0x1208] sm:$0xff] }
 0x225   :  { %7565 = vmatprep.subr.bf16.mxu0 %v12211_v27  ;;  %7893 = vmatprep.subr.bf16.mxu1 %v12213_v28  ;;  %v1771_v27 = vld [vmem:[#allocation7 + $0x1108] sm:$0xff]  ;;  %v12251_v60 = vcombine.high %v1770_v20, %v1774_v25  ;;  %v1802_v8 = vld [vmem:[#allocation7 + $0x1200] sm:$0xff] }
 0x226   :  { %v1775_v28 = vld [vmem:[#allocation7 + $0x1128] sm:$0xff]  ;;  %v1806_v54 = vld [vmem:[#allocation7 + $0x1220] sm:$0xff] }
 0x227   :  { %v12253_v4 = vcombine.high %v1771_v27, %v1775_v28 }
 0x228   :  { %7566 = vmatpush1.bf16.msra.mxu0 %v12210_v34  ;;  %7894 = vmatpush1.bf16.msra.mxu1 %v12212_v35  ;;  %v1782_v34 = vld [vmem:[#allocation7 + $0x1160] sm:$0xff]  ;;  %v1779_v35 = vld [vmem:[#allocation7 + $0x1148] sm:$0xff] }
 0x229   :  { %7576 = vmatprep.subr.bf16.mxu0 %v12219_v38  ;;  %7904 = vmatprep.subr.bf16.mxu1 %v12221_v40  ;;  %v12250_v38 = vcombine.low %v1770_v20, %v1774_v25  ;;  %v12252_v40 = vcombine.low %v1771_v27, %v1775_v28  ;;  %v12259_v23 = vcombine.high %v1778_v33, %v1782_v34  ;;  %v1810_v25 = vld [vmem:[#allocation7 + $0x1240] sm:$0xff]  ;;  %v1811_v28 = vld [vmem:[#allocation7 + $0x1248] sm:$0xff] }
 0x22a   :  { %v12261_v41 = vcombine.high %v1779_v35, %v1783_v37  ;;  %v1814_v27 = vld [vmem:[#allocation7 + $0x1260] sm:$0xff] }
 0x22b   :  { %7568 = vmatmul.mubr.bf16.vlgmr.msra.gmra.mrb[12].mxu0 %v14322_v46  ;;  %7896 = vmatmul.mubr.bf16.vlgmr.msra.gmra.mrb[20].mxu1 %v14322_v46 }
 0x22c   :  { %7577 = vmatpush1.bf16.msra.mxu0 %v12218_v31  ;;  %7608 = vmatprep.mubr.bf16.mxu0 %v14324_v50  ;;  %v1791_v31 = vld [vmem:[#allocation7 + $0x11a8] sm:$0xff] }
 0x22d   :  { %7905 = vmatpush1.bf16.msra.mxu1 %v12220_v3  ;;  %7936 = vmatprep.mubr.bf16.mxu1 %v14324_v50  ;;  %v12258_v3 = vcombine.low %v1778_v33, %v1782_v34  ;;  %v12269_v61 = vcombine.high %v1787_v44, %v1791_v31  ;;  %v1818_v34 = vld [vmem:[#allocation7 + $0x1280] sm:$0xff] }
 0x22e   :  { %7578 = vmatprep.subr.bf16.mxu0 %v12227_v57  ;;  %7906 = vmatprep.subr.bf16.mxu1 %v12229_v58  ;;  %v12260_v57 = vcombine.low %v1779_v35, %v1783_v37  ;;  %v12267_v58 = vcombine.high %v1786_v42, %v1790_v43  ;;  %v1822_v35 = vld [vmem:[#allocation7 + $0x12a0] sm:$0xff]  ;;  %v1819_v37 = vld [vmem:[#allocation7 + $0x1288] sm:$0xff] }
 0x230   :  { %7579 = vmatpush1.bf16.msra.mxu0 %v12226_v21  ;;  %v1799_v21 = vld [vmem:[#allocation7 + $0x11e8] sm:$0xff] }
 0x231   :  { %7907 = vmatpush1.bf16.msra.mxu1 %v12228_v5  ;;  %7580 = vmatprep.subr.bf16.mxu0 %v12235_v6  ;;  %v12266_v5 = vcombine.low %v1786_v42, %v1790_v43  ;;  %v12268_v6 = vcombine.low %v1787_v44, %v1791_v31  ;;  %v12277_v52 = vcombine.high %v1795_v1, %v1799_v21  ;;  %v1826_v43 = vld [vmem:[#allocation7 + $0x12c0] sm:$0xff]  ;;  %v1827_v31 = vld [vmem:[#allocation7 + $0x12c8] sm:$0xff] }
 0x232   :  { %7908 = vmatprep.subr.bf16.mxu1 %v12237_v7  ;;  %v12275_v7 = vcombine.high %v1794_v62, %v1798_v63  ;;  %v1830_v44 = vld [vmem:[#allocation7 + $0x12e0] sm:$0xff] }
 0x234   :  { %7581 = vmatpush1.bf16.msra.mxu0 %v12234_v15  ;;  %v1807_v15 = vld [vmem:[#allocation7 + $0x1228] sm:$0xff] }
 0x235   :  { %7909 = vmatpush1.bf16.msra.mxu1 %v12236_v17  ;;  %7582 = vmatprep.subr.bf16.mxu0 %v12243_v18  ;;  %v12274_v17 = vcombine.low %v1794_v62, %v1798_v63  ;;  %v12276_v18 = vcombine.low %v1795_v1, %v1799_v21  ;;  %v12285_v20 = vcombine.high %v1803_v14, %v1807_v15  ;;  %v1834_v63 = vld [vmem:[#allocation7 + $0x1300] sm:$0xff]  ;;  %v1835_v21 = vld [vmem:[#allocation7 + $0x1308] sm:$0xff] }
 0x236   :  { %7910 = vmatprep.subr.bf16.mxu1 %v12245_v19  ;;  %v12283_v19 = vcombine.high %v1802_v8, %v1806_v54  ;;  %v1838_v1 = vld [vmem:[#allocation7 + $0x1320] sm:$0xff] }
 0x238   :  { %7583 = vmatpush1.bf16.msra.mxu0 %v12242_v29  ;;  %v1815_v29 = vld [vmem:[#allocation7 + $0x1268] sm:$0xff] }
 0x239   :  { %7911 = vmatpush1.bf16.msra.mxu1 %v12244_v26  ;;  %7584 = vmatprep.subr.bf16.mxu0 %v12251_v60  ;;  %v12282_v26 = vcombine.low %v1802_v8, %v1806_v54  ;;  %v12284_v60 = vcombine.low %v1803_v14, %v1807_v15  ;;  %v12293_v33 = vcombine.high %v1811_v28, %v1815_v29  ;;  %v1842_v54 = vld [vmem:[#allocation7 + $0x1340] sm:$0xff]  ;;  %v1843_v15 = vld [vmem:[#allocation7 + $0x1348] sm:$0xff] }
 0x23a   :  { %7912 = vmatprep.subr.bf16.mxu1 %v12253_v4  ;;  %v12291_v4 = vcombine.high %v1810_v25, %v1814_v27  ;;  %v1846_v14 = vld [vmem:[#allocation7 + $0x1360] sm:$0xff] }
 0x23c   :  { %7585 = vmatpush1.bf16.msra.mxu0 %v12250_v38  ;;  %v1823_v38 = vld [vmem:[#allocation7 + $0x12a8] sm:$0xff] }
 0x23d   :  { %7913 = vmatpush1.bf16.msra.mxu1 %v12252_v40  ;;  %7586 = vmatprep.subr.bf16.mxu0 %v12259_v23  ;;  %v12290_v40 = vcombine.low %v1810_v25, %v1814_v27  ;;  %v12292_v23 = vcombine.low %v1811_v28, %v1815_v29  ;;  %v12301_v42 = vcombine.high %v1819_v37, %v1823_v38  ;;  %v1850_v27 = vld [vmem:[#allocation7 + $0x1380] sm:$0xff]  ;;  %v1851_v29 = vld [vmem:[#allocation7 + $0x1388] sm:$0xff] }
 0x23e   :  { %7914 = vmatprep.subr.bf16.mxu1 %v12261_v41  ;;  %v12299_v41 = vcombine.high %v1818_v34, %v1822_v35  ;;  %v1854_v28 = vld [vmem:[#allocation7 + $0x13a0] sm:$0xff] }
 0x240   :  { %7587 = vmatpush1.bf16.msra.mxu0 %v12258_v3  ;;  %v1831_v3 = vld [vmem:[#allocation7 + $0x12e8] sm:$0xff] }
 0x241   :  { %7915 = vmatpush1.bf16.msra.mxu1 %v12260_v57  ;;  %7588 = vmatprep.subr.bf16.mxu0 %v12267_v58  ;;  %v12298_v57 = vcombine.low %v1818_v34, %v1822_v35  ;;  %v12300_v58 = vcombine.low %v1819_v37, %v1823_v38  ;;  %v12309_v62 = vcombine.high %v1827_v31, %v1831_v3  ;;  %v1858_v37 = vld [vmem:[#allocation7 + $0x13c0] sm:$0xff] }
 0x242   :  { %7916 = vmatprep.subr.bf16.mxu1 %v12269_v61  ;;  %v12307_v61 = vcombine.high %v1826_v43, %v1830_v44  ;;  %v12331_v34 = vcombine.high %v1850_v27, %v1854_v28  ;;  %v1862_v38 = vld [vmem:[#allocation7 + $0x13e0] sm:$0xff] }
 0x244   :  { %7589 = vmatpush1.bf16.msra.mxu0 %v12266_v5  ;;  %v1839_v5 = vld [vmem:[#allocation7 + $0x1328] sm:$0xff] }
 0x245   :  { %7917 = vmatpush1.bf16.msra.mxu1 %v12268_v6  ;;  %7590 = vmatprep.subr.bf16.mxu0 %v12275_v7  ;;  %v12306_v6 = vcombine.low %v1826_v43, %v1830_v44  ;;  %v12308_v7 = vcombine.low %v1827_v31, %v1831_v3  ;;  %v12317_v8 = vcombine.high %v1835_v21, %v1839_v5 }
 0x246   :  { %7918 = vmatprep.subr.bf16.mxu1 %v12277_v52  ;;  %v12315_v52 = vcombine.high %v1834_v63, %v1838_v1  ;;  %v12339_v31 = vcombine.high %v1858_v37, %v1862_v38 }
 0x248   :  { %7591 = vmatpush1.bf16.msra.mxu0 %v12274_v17  ;;  %v1847_v17 = vld [vmem:[#allocation7 + $0x1368] sm:$0xff] }
 0x249   :  { %7919 = vmatpush1.bf16.msra.mxu1 %v12276_v18  ;;  %7592 = vmatprep.subr.bf16.mxu0 %v12283_v19  ;;  %v12314_v18 = vcombine.low %v1834_v63, %v1838_v1  ;;  %v12316_v19 = vcombine.low %v1835_v21, %v1839_v5  ;;  %v12325_v25 = vcombine.high %v1843_v15, %v1847_v17  ;;  %v1871_v63 = vld [vmem:[#allocation7 + $0x1428] sm:$0xff] }
 0x24a   :  { %7920 = vmatprep.subr.bf16.mxu1 %v12285_v20  ;;  %v12323_v20 = vcombine.high %v1842_v54, %v1846_v14  ;;  %v12338_v1 = vcombine.low %v1858_v37, %v1862_v38  ;;  %v1891_v37 = vld [vmem:[#allocation7 + $0x14c8] sm:$0xff] }
 0x24b   :  { %v1895_v38 = vld [vmem:[#allocation7 + $0x14e8] sm:$0xff] }
 0x24c   :  { %7593 = vmatpush1.bf16.msra.mxu0 %v12282_v26  ;;  %v1855_v26 = vld [vmem:[#allocation7 + $0x13a8] sm:$0xff] }
 0x24d   :  { %7921 = vmatpush1.bf16.msra.mxu1 %v12284_v60  ;;  %7594 = vmatprep.subr.bf16.mxu0 %v12291_v4  ;;  %v12322_v60 = vcombine.low %v1842_v54, %v1846_v14  ;;  %v248_v4 = vrot.slane %v14315_v0, %v14215_v53  ;;  %v12333_v35 = vcombine.high %v1851_v29, %v1855_v26  ;;  %v1875_v14 = vld [vmem:[#allocation7 + $0x1448] sm:$0xff] }
 0x24e   :  { %7922 = vmatprep.subr.bf16.mxu1 %v12293_v33  ;;  %v12324_v33 = vcombine.low %v1843_v15, %v1847_v17  ;;  %v12332_v44 = vcombine.low %v1851_v29, %v1855_v26  ;;  %v1879_v15 = vld [vmem:[#allocation7 + $0x1468] sm:$0xff] }
 0x24f   :  { %v1065_v43 = vadd.f32 %v14252_v59, %v248_v4  ;;  %v1887_v29 = vld [vmem:[#allocation7 + $0x14a8] sm:$0xff] }
 0x250   :  { %7595 = vmatpush1.bf16.msra.mxu0 %v12290_v40  ;;  %v260_v40 = vrot.slane %v14315_v0, %v14242_v45 }
 0x251   :  { %7923 = vmatpush1.bf16.msra.mxu1 %v12292_v23  ;;  %7596 = vmatprep.subr.bf16.mxu0 %v12299_v41  ;;  %v1859_v23 = vld [vmem:[#allocation7 + $0x13c8] sm:$0xff]  ;;  %v1202_v21 = vmax.f32 %v1065_v43, 0.0  ;;  %v1898_v43 = vld [vmem:[#allocation7 + $0x1500] sm:$0xff] }
 0x252   :  { %7924 = vmatprep.subr.bf16.mxu1 %v12301_v42  ;;  %v1863_v41 = vld [vmem:[#allocation7 + $0x13e8] sm:$0xff]  ;;  %v12330_v42 = vcombine.low %v1850_v27, %v1854_v28  ;;  %v12357_v27 = vcombine.high %v1875_v14, %v1879_v15 }
 0x253   :  { %v12341_v3 = vcombine.high %v1859_v23, %v1863_v41  ;;  %v12340_v5 = vcombine.low %v1859_v23, %v1863_v41  ;;  %v14336_v17 = vpack.c.bf16 %v1202_v21, %v1202_v21  ;;  %v1883_v28 = vld [vmem:[#allocation7 + $0x1488] sm:$0xff] }
 0x254   :  { %7597 = vmatpush1.bf16.msra.mxu0 %v12298_v57  ;;  %v1866_v57 = vld [vmem:[#allocation7 + $0x1400] sm:$0xff]  ;;  %v12364_v23 = vcombine.low %v1883_v28, %v1887_v29  ;;  %v1907_v21 = vld [vmem:[#allocation7 + $0x1548] sm:$0xff] }
 0x255   :  { %7925 = vmatpush1.bf16.msra.mxu1 %v12300_v58  ;;  %7598 = vmatprep.subr.bf16.mxu0 %v12307_v61  ;;  %v1870_v58 = vld [vmem:[#allocation7 + $0x1420] sm:$0xff]  ;;  %v1108_v61 = vadd.f32 %v14286_v48, %v260_v40 }
 0x256   :  { %7926 = vmatprep.subr.bf16.mxu1 %v12309_v62  ;;  %v1867_v62 = vld [vmem:[#allocation7 + $0x1408] sm:$0xff]  ;;  %v12346_v54 = vcombine.low %v1866_v57, %v1870_v58 }
 0x257   :  { %v12349_v59 = vcombine.high %v1867_v62, %v1871_v63  ;;  %v12348_v48 = vcombine.low %v1867_v62, %v1871_v63  ;;  %v1906_v63 = vld [vmem:[#allocation7 + $0x1540] sm:$0xff] }
 0x258   :  { %7599 = vmatpush1.bf16.msra.mxu0 %v12306_v6  ;;  %v12347_v6 = vcombine.high %v1866_v57, %v1870_v58  ;;  %v12372_v58 = vcombine.low %v1891_v37, %v1895_v38 }
 0x259   :  { %7927 = vmatpush1.bf16.msra.mxu1 %v12308_v7  ;;  %7600 = vmatprep.subr.bf16.mxu0 %v12315_v52  ;;  %v1205_v7 = vmax.f32 %v1108_v61, 0.0  ;;  %v1874_v52 = vld [vmem:[#allocation7 + $0x1440] sm:$0xff] }
 0x25a   :  { %7928 = vmatprep.subr.bf16.mxu1 %v12317_v8  ;;  %v1878_v8 = vld [vmem:[#allocation7 + $0x1460] sm:$0xff] }
 0x25b   :  { %v12354_v26 = vcombine.low %v1874_v52, %v1878_v8 }
 0x25c   :  { %7601 = vmatpush1.bf16.msra.mxu0 %v12314_v18  ;;  %v12355_v18 = vcombine.high %v1874_v52, %v1878_v8  ;;  %v1914_v8 = vld [vmem:[#allocation7 + $0x1580] sm:$0xff] }
 0x25d   :  { %7929 = vmatpush1.bf16.msra.mxu1 %v12316_v19  ;;  %7602 = vmatprep.subr.bf16.mxu0 %v12323_v20  ;;  %v1882_v19 = vld [vmem:[#allocation7 + $0x1480] sm:$0xff] }
 0x25e   :  { %7930 = vmatprep.subr.bf16.mxu1 %v12325_v25  ;;  %v1886_v20 = vld [vmem:[#allocation7 + $0x14a0] sm:$0xff]  ;;  %v14338_v25 = vpack.c.bf16 %v1205_v7, %v1205_v7 }
 0x25f   :  { %v12363_v4 = vcombine.high %v1882_v19, %v1886_v20  ;;  %v12362_v40 = vcombine.low %v1882_v19, %v1886_v20 }
 0x260   :  { %7603 = vmatpush1.bf16.msra.mxu0 %v12322_v60  ;;  %v12356_v60 = vcombine.low %v1875_v14, %v1879_v15  ;;  %v1915_v14 = vld [vmem:[#allocation7 + $0x1588] sm:$0xff] }
 0x261   :  { %7931 = vmatpush1.bf16.msra.mxu1 %v12324_v33  ;;  %7604 = vmatprep.subr.bf16.mxu0 %v12331_v34  ;;  %v12365_v33 = vcombine.high %v1883_v28, %v1887_v29  ;;  %v1890_v34 = vld [vmem:[#allocation7 + $0x14c0] sm:$0xff]  ;;  %v1919_v15 = vld [vmem:[#allocation7 + $0x15a8] sm:$0xff] }
 0x262   :  { %7932 = vmatprep.subr.bf16.mxu1 %v12333_v35  ;;  %v1894_v35 = vld [vmem:[#allocation7 + $0x14e0] sm:$0xff]  ;;  %v12397_v20 = vcombine.high %v1915_v14, %v1919_v15  ;;  %v1923_v29 = vld [vmem:[#allocation7 + $0x15c8] sm:$0xff] }
 0x263   :  { %v12371_v41 = vcombine.high %v1890_v34, %v1894_v35  ;;  %v12370_v57 = vcombine.low %v1890_v34, %v1894_v35  ;;  %v1926_v28 = vld [vmem:[#allocation7 + $0x15e0] sm:$0xff] }
 0x264   :  { %7605 = vmatpush1.bf16.msra.mxu0 %v12330_v42  ;;  %v12373_v42 = vcombine.high %v1891_v37, %v1895_v38  ;;  %v1930_v35 = vld [vmem:[#allocation7 + $0x1600] sm:$0xff]  ;;  %v1931_v38 = vld [vmem:[#allocation7 + $0x1608] sm:$0xff] }
 0x265   :  { %7933 = vmatpush1.bf16.msra.mxu1 %v12332_v44  ;;  %7606 = vmatprep.subr.bf16.mxu0 %v12339_v31  ;;  %v1902_v44 = vld [vmem:[#allocation7 + $0x1520] sm:$0xff]  ;;  %v1899_v31 = vld [vmem:[#allocation7 + $0x1508] sm:$0xff] }
 0x266   :  { %7934 = vmatprep.subr.bf16.mxu1 %v12341_v3  ;;  %v1903_v3 = vld [vmem:[#allocation7 + $0x1528] sm:$0xff]  ;;  %v12379_v61 = vcombine.high %v1898_v43, %v1902_v44  ;;  %v1934_v37 = vld [vmem:[#allocation7 + $0x1620] sm:$0xff] }
 0x267   :  { %v12381_v62 = vcombine.high %v1899_v31, %v1903_v3 }
 0x268   :  { %7607 = vmatpush1.bf16.msra.mxu0 %v12338_v1  ;;  %v1910_v1 = vld [vmem:[#allocation7 + $0x1560] sm:$0xff] }
 0x269   :  { %7935 = vmatpush1.bf16.msra.mxu1 %v12340_v5  ;;  %7617 = vmatprep.subr.bf16.mxu0 %v12347_v6  ;;  %v1911_v5 = vld [vmem:[#allocation7 + $0x1568] sm:$0xff]  ;;  %v12378_v6 = vcombine.low %v1898_v43, %v1902_v44  ;;  %v12387_v7 = vcombine.high %v1906_v63, %v1910_v1  ;;  %v1938_v44 = vld [vmem:[#allocation7 + $0x1640] sm:$0xff] }
 0x26a   :  { %7945 = vmatprep.subr.bf16.mxu1 %v12349_v59  ;;  %v12380_v59 = vcombine.low %v1899_v31, %v1903_v3  ;;  %v12389_v52 = vcombine.high %v1907_v21, %v1911_v5  ;;  %v1942_v31 = vld [vmem:[#allocation7 + $0x1660] sm:$0xff]  ;;  %v1939_v3 = vld [vmem:[#allocation7 + $0x1648] sm:$0xff] }
 0x26b   :  { %7609 = vmatmul.mubr.bf16.vlgmr.msra.gmra.mrb[12].mxu0 %v14336_v17 }
 0x26c   :  { %7937 = vmatmul.mubr.bf16.vlgmr.msra.gmra.mrb[20].mxu1 %v14336_v17  ;;  %7618 = vmatpush1.bf16.msra.mxu0 %v12346_v54  ;;  %v1918_v54 = vld [vmem:[#allocation7 + $0x15a0] sm:$0xff] }
 0x26d   :  { %7649 = vmatprep.mubr.bf16.mxu0 %v14338_v25  ;;  %7946 = vmatpush1.bf16.msra.mxu1 %v12348_v48  ;;  %v12386_v48 = vcombine.low %v1906_v63, %v1910_v1  ;;  %v12395_v19 = vcombine.high %v1914_v8, %v1918_v54  ;;  %v1946_v1 = vld [vmem:[#allocation7 + $0x1680] sm:$0xff] }
 0x26e   :  { %7977 = vmatprep.mubr.bf16.mxu1 %v14338_v25  ;;  %7619 = vmatprep.subr.bf16.mxu0 %v12355_v18  ;;  %v12388_v18 = vcombine.low %v1907_v21, %v1911_v5  ;;  %v1950_v21 = vld [vmem:[#allocation7 + $0x16a0] sm:$0xff]  ;;  %v1947_v5 = vld [vmem:[#allocation7 + $0x1688] sm:$0xff] }
 0x26f   :  { %7947 = vmatprep.subr.bf16.mxu1 %v12357_v27  ;;  %v1922_v27 = vld [vmem:[#allocation7 + $0x15c0] sm:$0xff] }
 0x270   :  { %7620 = vmatpush1.bf16.msra.mxu0 %v12354_v26  ;;  %v1927_v26 = vld [vmem:[#allocation7 + $0x15e8] sm:$0xff] }
 0x271   :  { %7948 = vmatpush1.bf16.msra.mxu1 %v12356_v60  ;;  %7621 = vmatprep.subr.bf16.mxu0 %v12363_v4  ;;  %v12394_v60 = vcombine.low %v1914_v8, %v1918_v54  ;;  %v12396_v4 = vcombine.low %v1915_v14, %v1919_v15  ;;  %v12405_v34 = vcombine.high %v1923_v29, %v1927_v26  ;;  %v1954_v54 = vld [vmem:[#allocation7 + $0x16c0] sm:$0xff]  ;;  %v1955_v15 = vld [vmem:[#allocation7 + $0x16c8] sm:$0xff] }
 0x272   :  { %7949 = vmatprep.subr.bf16.mxu1 %v12365_v33  ;;  %v12403_v33 = vcombine.high %v1922_v27, %v1926_v28  ;;  %v1958_v14 = vld [vmem:[#allocation7 + $0x16e0] sm:$0xff] }
 0x274   :  { %7622 = vmatpush1.bf16.msra.mxu0 %v12362_v40  ;;  %v1935_v40 = vld [vmem:[#allocation7 + $0x1628] sm:$0xff] }
 0x275   :  { %7950 = vmatpush1.bf16.msra.mxu1 %v12364_v23  ;;  %7623 = vmatprep.subr.bf16.mxu0 %v12371_v41  ;;  %v12402_v23 = vcombine.low %v1922_v27, %v1926_v28  ;;  %v12404_v41 = vcombine.low %v1923_v29, %v1927_v26  ;;  %v12413_v43 = vcombine.high %v1931_v38, %v1935_v40  ;;  %v1962_v28 = vld [vmem:[#allocation7 + $0x1700] sm:$0xff]  ;;  %v1963_v26 = vld [vmem:[#allocation7 + $0x1708] sm:$0xff] }
 0x276   :  { %7951 = vmatprep.subr.bf16.mxu1 %v12373_v42  ;;  %v12411_v42 = vcombine.high %v1930_v35, %v1934_v37  ;;  %v1966_v29 = vld [vmem:[#allocation7 + $0x1720] sm:$0xff] }
 0x278   :  { %7624 = vmatpush1.bf16.msra.mxu0 %v12370_v57  ;;  %v1943_v57 = vld [vmem:[#allocation7 + $0x1668] sm:$0xff] }
 0x279   :  { %7952 = vmatpush1.bf16.msra.mxu1 %v12372_v58  ;;  %7625 = vmatprep.subr.bf16.mxu0 %v12379_v61  ;;  %v12410_v58 = vcombine.low %v1930_v35, %v1934_v37  ;;  %v12412_v61 = vcombine.low %v1931_v38, %v1935_v40  ;;  %v12421_v63 = vcombine.high %v1939_v3, %v1943_v57  ;;  %v1970_v37 = vld [vmem:[#allocation7 + $0x1740] sm:$0xff]  ;;  %v1971_v40 = vld [vmem:[#allocation7 + $0x1748] sm:$0xff] }
 0x27a   :  { %7953 = vmatprep.subr.bf16.mxu1 %v12381_v62  ;;  %v12419_v62 = vcombine.high %v1938_v44, %v1942_v31  ;;  %v1974_v38 = vld [vmem:[#allocation7 + $0x1760] sm:$0xff] }
 0x27c   :  { %7626 = vmatpush1.bf16.msra.mxu0 %v12378_v6  ;;  %v1951_v6 = vld [vmem:[#allocation7 + $0x16a8] sm:$0xff] }
 0x27d   :  { %7954 = vmatpush1.bf16.msra.mxu1 %v12380_v59  ;;  %7627 = vmatprep.subr.bf16.mxu0 %v12387_v7  ;;  %v12418_v59 = vcombine.low %v1938_v44, %v1942_v31  ;;  %v12420_v7 = vcombine.low %v1939_v3, %v1943_v57  ;;  %v12429_v8 = vcombine.high %v1947_v5, %v1951_v6  ;;  %v1978_v31 = vld [vmem:[#allocation7 + $0x1780] sm:$0xff]  ;;  %v1979_v57 = vld [vmem:[#allocation7 + $0x1788] sm:$0xff] }
 0x27e   :  { %7955 = vmatprep.subr.bf16.mxu1 %v12389_v52  ;;  %v12427_v52 = vcombine.high %v1946_v1, %v1950_v21  ;;  %v1982_v3 = vld [vmem:[#allocation7 + $0x17a0] sm:$0xff] }
 0x280   :  { %7628 = vmatpush1.bf16.msra.mxu0 %v12386_v48  ;;  %v1959_v48 = vld [vmem:[#allocation7 + $0x16e8] sm:$0xff] }
 0x281   :  { %7956 = vmatpush1.bf16.msra.mxu1 %v12388_v18  ;;  %7629 = vmatprep.subr.bf16.mxu0 %v12395_v19  ;;  %v12426_v18 = vcombine.low %v1946_v1, %v1950_v21  ;;  %v12428_v19 = vcombine.low %v1947_v5, %v1951_v6  ;;  %v12437_v27 = vcombine.high %v1955_v15, %v1959_v48  ;;  %v1986_v5 = vld [vmem:[#allocation7 + $0x17c0] sm:$0xff] }
 0x282   :  { %7957 = vmatprep.subr.bf16.mxu1 %v12397_v20  ;;  %v12435_v20 = vcombine.high %v1954_v54, %v1958_v14  ;;  %v12459_v1 = vcombine.high %v1978_v31, %v1982_v3  ;;  %v1990_v6 = vld [vmem:[#allocation7 + $0x17e0] sm:$0xff] }
 0x284   :  { %7630 = vmatpush1.bf16.msra.mxu0 %v12394_v60  ;;  %v1967_v60 = vld [vmem:[#allocation7 + $0x1728] sm:$0xff] }
 0x285   :  { %7958 = vmatpush1.bf16.msra.mxu1 %v12396_v4  ;;  %7631 = vmatprep.subr.bf16.mxu0 %v12403_v33  ;;  %v12434_v4 = vcombine.low %v1954_v54, %v1958_v14  ;;  %v12436_v33 = vcombine.low %v1955_v15, %v1959_v48  ;;  %v12445_v35 = vcombine.high %v1963_v26, %v1967_v60 }
 0x286   :  { %7959 = vmatprep.subr.bf16.mxu1 %v12405_v34  ;;  %v12443_v34 = vcombine.high %v1962_v28, %v1966_v29  ;;  %v12467_v15 = vcombine.high %v1986_v5, %v1990_v6 }
 0x288   :  { %7632 = vmatpush1.bf16.msra.mxu0 %v12402_v23  ;;  %v1975_v23 = vld [vmem:[#allocation7 + $0x1768] sm:$0xff] }
 0x289   :  { %7960 = vmatpush1.bf16.msra.mxu1 %v12404_v41  ;;  %7633 = vmatprep.subr.bf16.mxu0 %v12411_v42  ;;  %v12442_v41 = vcombine.low %v1962_v28, %v1966_v29  ;;  %v12444_v42 = vcombine.low %v1963_v26, %v1967_v60  ;;  %v12453_v44 = vcombine.high %v1971_v40, %v1975_v23  ;;  %v1999_v28 = vld [vmem:[#allocation7 + $0x1828] sm:$0xff] }
 0x28a   :  { %7961 = vmatprep.subr.bf16.mxu1 %v12413_v43  ;;  %v12451_v43 = vcombine.high %v1970_v37, %v1974_v38 }
 0x28c   :  { %7634 = vmatpush1.bf16.msra.mxu0 %v12410_v58  ;;  %v1983_v58 = vld [vmem:[#allocation7 + $0x17a8] sm:$0xff] }
 0x28d   :  { %7962 = vmatpush1.bf16.msra.mxu1 %v12412_v61  ;;  %7635 = vmatprep.subr.bf16.mxu0 %v12419_v62  ;;  %v12450_v61 = vcombine.low %v1970_v37, %v1974_v38  ;;  %v256_v62 = vrot.slane %v14315_v0, %v14257_v10  ;;  %v12461_v21 = vcombine.high %v1979_v57, %v1983_v58  ;;  %v2003_v37 = vld [vmem:[#allocation7 + $0x1848] sm:$0xff] }
 0x28e   :  { %7963 = vmatprep.subr.bf16.mxu1 %v12421_v63  ;;  %v12452_v63 = vcombine.low %v1971_v40, %v1975_v23  ;;  %v12460_v14 = vcombine.low %v1979_v57, %v1983_v58  ;;  %v2007_v38 = vld [vmem:[#allocation7 + $0x1868] sm:$0xff] }
 0x28f   :  { %v1106_v54 = vadd.f32 %v14284_v47, %v256_v62  ;;  %v12484_v58 = vcombine.low %v2003_v37, %v2007_v38 }
 0x290   :  { %7636 = vmatpush1.bf16.msra.mxu0 %v12418_v59  ;;  %v268_v59 = vrot.slane %v14315_v0, %v14260_v22  ;;  %v12466_v0 = vcombine.low %v1986_v5, %v1990_v6  ;;  %v2023_v5 = vld [vmem:[#allocation7 + $0x18e8] sm:$0xff] }
 0x291   :  { %7964 = vmatpush1.bf16.msra.mxu1 %v12420_v7  ;;  %7637 = vmatprep.subr.bf16.mxu0 %v12427_v52  ;;  %v1987_v7 = vld [vmem:[#allocation7 + $0x17c8] sm:$0xff]  ;;  %v1204_v29 = vmax.f32 %v1106_v54, 0.0  ;;  %v2030_v54 = vld [vmem:[#allocation7 + $0x1920] sm:$0xff] }
 0x292   :  { %7965 = vmatprep.subr.bf16.mxu1 %v12429_v8  ;;  %v1991_v52 = vld [vmem:[#allocation7 + $0x17e8] sm:$0xff]  ;;  %v12458_v8 = vcombine.low %v1978_v31, %v1982_v3 }
 0x293   :  { %v12469_v48 = vcombine.high %v1987_v7, %v1991_v52  ;;  %v12468_v26 = vcombine.low %v1987_v7, %v1991_v52  ;;  %v14350_v40 = vpack.c.bf16 %v1204_v29, %v1204_v29  ;;  %v2011_v31 = vld [vmem:[#allocation7 + $0x1888] sm:$0xff] }
 0x294   :  { %7638 = vmatpush1.bf16.msra.mxu0 %v12426_v18  ;;  %v1994_v18 = vld [vmem:[#allocation7 + $0x1800] sm:$0xff]  ;;  %v2015_v3 = vld [vmem:[#allocation7 + $0x18a8] sm:$0xff] }
 0x295   :  { %7966 = vmatpush1.bf16.msra.mxu1 %v12428_v19  ;;  %7639 = vmatprep.subr.bf16.mxu0 %v12435_v20  ;;  %v1998_v19 = vld [vmem:[#allocation7 + $0x1820] sm:$0xff]  ;;  %v1149_v20 = vadd.f32 %v14274_v51, %v268_v59  ;;  %v12493_v62 = vcombine.high %v2011_v31, %v2015_v3  ;;  %v12492_v59 = vcombine.low %v2011_v31, %v2015_v3  ;;  %v2039_v29 = vld [vmem:[#allocation7 + $0x1968] sm:$0xff] }
 0x296   :  { %7967 = vmatprep.subr.bf16.mxu1 %v12437_v27  ;;  %v1995_v27 = vld [vmem:[#allocation7 + $0x1808] sm:$0xff]  ;;  %v12475_v60 = vcombine.high %v1994_v18, %v1998_v19 }
 0x297   :  { %v12477_v47 = vcombine.high %v1995_v27, %v1999_v28  ;;  %v12476_v51 = vcombine.low %v1995_v27, %v1999_v28  ;;  %v2034_v27 = vld [vmem:[#allocation7 + $0x1940] sm:$0xff]  ;;  %v2051_v31 = vld [vmem:[#allocation7 + $0x19c8] sm:$0xff] }
 0x298   :  { %7640 = vmatpush1.bf16.msra.mxu0 %v12434_v4  ;;  %v1207_v4 = vmax.f32 %v1149_v20, 0.0  ;;  %v2038_v28 = vld [vmem:[#allocation7 + $0x1960] sm:$0xff]  ;;  %v2055_v3 = vld [vmem:[#allocation7 + $0x19e8] sm:$0xff] }
 0x299   :  { %7968 = vmatpush1.bf16.msra.mxu1 %v12436_v33  ;;  %7641 = vmatprep.subr.bf16.mxu0 %v12443_v34  ;;  %v2002_v33 = vld [vmem:[#allocation7 + $0x1840] sm:$0xff] }
 0x29a   :  { %7969 = vmatprep.subr.bf16.mxu1 %v12445_v35  ;;  %v2006_v34 = vld [vmem:[#allocation7 + $0x1860] sm:$0xff]  ;;  %v12474_v35 = vcombine.low %v1994_v18, %v1998_v19 }
 0x29b   :  { %v12483_v23 = vcombine.high %v2002_v33, %v2006_v34  ;;  %v12482_v57 = vcombine.low %v2002_v33, %v2006_v34  ;;  %v2042_v33 = vld [vmem:[#allocation7 + $0x1980] sm:$0xff] }
 0x29c   :  { %7642 = vmatpush1.bf16.msra.mxu0 %v12442_v41  ;;  %v2010_v41 = vld [vmem:[#allocation7 + $0x1880] sm:$0xff] }
 0x29d   :  { %7970 = vmatpush1.bf16.msra.mxu1 %v12444_v42  ;;  %7643 = vmatprep.subr.bf16.mxu0 %v12451_v43  ;;  %v2014_v42 = vld [vmem:[#allocation7 + $0x18a0] sm:$0xff]  ;;  %v14352_v43 = vpack.c.bf16 %v1207_v4, %v1207_v4 }
 0x29e   :  { %7971 = vmatprep.subr.bf16.mxu1 %v12453_v44  ;;  %v12485_v44 = vcombine.high %v2003_v37, %v2007_v38  ;;  %v12490_v6 = vcombine.low %v2010_v41, %v2014_v42  ;;  %v2046_v34 = vld [vmem:[#allocation7 + $0x19a0] sm:$0xff]  ;;  %v2047_v37 = vld [vmem:[#allocation7 + $0x19a8] sm:$0xff]  ;;  %v12514_v38 = vcombine.low %v2034_v27, %v2038_v28 }
 0x2a0   :  { %7644 = vmatpush1.bf16.msra.mxu0 %v12450_v61  ;;  %v12491_v61 = vcombine.high %v2010_v41, %v2014_v42  ;;  %v2050_v42 = vld [vmem:[#allocation7 + $0x19c0] sm:$0xff] }
 0x2a1   :  { %7972 = vmatpush1.bf16.msra.mxu1 %v12452_v63  ;;  %7645 = vmatprep.subr.bf16.mxu0 %v12459_v1  ;;  %v2018_v63 = vld [vmem:[#allocation7 + $0x18c0] sm:$0xff] }
 0x2a2   :  { %7973 = vmatprep.subr.bf16.mxu1 %v12461_v21  ;;  %v2022_v1 = vld [vmem:[#allocation7 + $0x18e0] sm:$0xff]  ;;  %v2019_v21 = vld [vmem:[#allocation7 + $0x18c8] sm:$0xff] }
 0x2a3   :  { %v12499_v7 = vcombine.high %v2018_v63, %v2022_v1  ;;  %v12501_v52 = vcombine.high %v2019_v21, %v2023_v5  ;;  %v12500_v18 = vcombine.low %v2019_v21, %v2023_v5  ;;  %v2059_v21 = vld [vmem:[#allocation7 + $0x1a08] sm:$0xff] }
 0x2a4   :  { %7646 = vmatpush1.bf16.msra.mxu0 %v12458_v8  ;;  %v2026_v8 = vld [vmem:[#allocation7 + $0x1900] sm:$0xff]  ;;  %v2063_v5 = vld [vmem:[#allocation7 + $0x1a28] sm:$0xff] }
 0x2a5   :  { %7974 = vmatpush1.bf16.msra.mxu1 %v12460_v14  ;;  %7647 = vmatprep.subr.bf16.mxu0 %v12467_v15  ;;  %v2027_v14 = vld [vmem:[#allocation7 + $0x1908] sm:$0xff]  ;;  %v12507_v19 = vcombine.high %v2026_v8, %v2030_v54 }
 0x2a6   :  { %7975 = vmatprep.subr.bf16.mxu1 %v12469_v48  ;;  %v2031_v15 = vld [vmem:[#allocation7 + $0x1928] sm:$0xff]  ;;  %v12498_v48 = vcombine.low %v2018_v63, %v2022_v1  ;;  %v2058_v63 = vld [vmem:[#allocation7 + $0x1a00] sm:$0xff] }
 0x2a7   :  { %v12509_v20 = vcombine.high %v2027_v14, %v2031_v15  ;;  %v2062_v1 = vld [vmem:[#allocation7 + $0x1a20] sm:$0xff] }
 0x2a8   :  { %7648 = vmatpush1.bf16.msra.mxu0 %v12466_v0  ;;  %v2035_v0 = vld [vmem:[#allocation7 + $0x1948] sm:$0xff] }
 0x2a9   :  { %7976 = vmatpush1.bf16.msra.mxu1 %v12468_v26  ;;  %7658 = vmatprep.subr.bf16.mxu0 %v12475_v60  ;;  %v12506_v26 = vcombine.low %v2026_v8, %v2030_v54  ;;  %v12508_v60 = vcombine.low %v2027_v14, %v2031_v15  ;;  %v12517_v4 = vcombine.high %v2035_v0, %v2039_v29  ;;  %v2066_v8 = vld [vmem:[#allocation7 + $0x1a40] sm:$0xff]  ;;  %v2067_v14 = vld [vmem:[#allocation7 + $0x1a48] sm:$0xff] }
 0x2aa   :  { %7986 = vmatprep.subr.bf16.mxu1 %v12477_v47  ;;  %v12515_v47 = vcombine.high %v2034_v27, %v2038_v28  ;;  %v2070_v54 = vld [vmem:[#allocation7 + $0x1a60] sm:$0xff]  ;;  %v2071_v15 = vld [vmem:[#allocation7 + $0x1a68] sm:$0xff] }
 0x2ab   :  { %7650 = vmatmul.mubr.bf16.vlgmr.msra.gmra.mrb[12].mxu0 %v14350_v40  ;;  %v2074_v27 = vld [vmem:[#allocation7 + $0x1a80] sm:$0xff] }
 0x2ac   :  { %7978 = vmatmul.mubr.bf16.vlgmr.msra.gmra.mrb[20].mxu1 %v14350_v40  ;;  %7659 = vmatpush1.bf16.msra.mxu0 %v12474_v35  ;;  %v2043_v35 = vld [vmem:[#allocation7 + $0x1988] sm:$0xff]  ;;  %v2078_v28 = vld [vmem:[#allocation7 + $0x1aa0] sm:$0xff] }
 0x2ad   :  { %7690 = vmatprep.mubr.bf16.mxu0 %v14352_v43  ;;  %7987 = vmatpush1.bf16.msra.mxu1 %v12476_v51  ;;  %v12516_v51 = vcombine.low %v2035_v0, %v2039_v29  ;;  %v12525_v41 = vcombine.high %v2043_v35, %v2047_v37  ;;  %v2075_v0 = vld [vmem:[#allocation7 + $0x1a88] sm:$0xff] }
 0x2ae   :  { %8018 = vmatprep.mubr.bf16.mxu1 %v14352_v43  ;;  %7660 = vmatprep.subr.bf16.mxu0 %v12483_v23  ;;  %v12523_v23 = vcombine.high %v2042_v33, %v2046_v34  ;;  %v2079_v29 = vld [vmem:[#allocation7 + $0x1aa8] sm:$0xff] }
 0x2af   :  { %7988 = vmatprep.subr.bf16.mxu1 %v12485_v44  ;;  %v2054_v44 = vld [vmem:[#allocation7 + $0x19e0] sm:$0xff] }
 0x2b0   :  { %7661 = vmatpush1.bf16.msra.mxu0 %v12482_v57  ;;  %v12522_v57 = vcombine.low %v2042_v33, %v2046_v34  ;;  %v2082_v33 = vld [vmem:[#allocation7 + $0x1ac0] sm:$0xff] }
 0x2b1   :  { %7989 = vmatpush1.bf16.msra.mxu1 %v12484_v58  ;;  %7662 = vmatprep.subr.bf16.mxu0 %v12491_v61  ;;  %v12524_v58 = vcombine.low %v2043_v35, %v2047_v37  ;;  %v12531_v61 = vcombine.high %v2050_v42, %v2054_v44  ;;  %v2086_v34 = vld [vmem:[#allocation7 + $0x1ae0] sm:$0xff]  ;;  %v2083_v35 = vld [vmem:[#allocation7 + $0x1ac8] sm:$0xff] }
 0x2b2   :  { %7990 = vmatprep.subr.bf16.mxu1 %v12493_v62  ;;  %v12533_v62 = vcombine.high %v2051_v31, %v2055_v3  ;;  %v2087_v37 = vld [vmem:[#allocation7 + $0x1ae8] sm:$0xff] }
 0x2b4   :  { %7663 = vmatpush1.bf16.msra.mxu0 %v12490_v6  ;;  %v12530_v6 = vcombine.low %v2050_v42, %v2054_v44  ;;  %v2090_v42 = vld [vmem:[#allocation7 + $0x1b00] sm:$0xff] }
 0x2b5   :  { %7991 = vmatpush1.bf16.msra.mxu1 %v12492_v59  ;;  %7664 = vmatprep.subr.bf16.mxu0 %v12499_v7  ;;  %v12532_v59 = vcombine.low %v2051_v31, %v2055_v3  ;;  %v12539_v7 = vcombine.high %v2058_v63, %v2062_v1  ;;  %v2094_v44 = vld [vmem:[#allocation7 + $0x1b20] sm:$0xff]  ;;  %v2091_v31 = vld [vmem:[#allocation7 + $0x1b08] sm:$0xff] }
 0x2b6   :  { %7992 = vmatprep.subr.bf16.mxu1 %v12501_v52  ;;  %v12541_v52 = vcombine.high %v2059_v21, %v2063_v5  ;;  %v2095_v3 = vld [vmem:[#allocation7 + $0x1b28] sm:$0xff] }
 0x2b8   :  { %7665 = vmatpush1.bf16.msra.mxu0 %v12498_v48  ;;  %v12538_v48 = vcombine.low %v2058_v63, %v2062_v1  ;;  %v2098_v63 = vld [vmem:[#allocation7 + $0x1b40] sm:$0xff] }
 0x2b9   :  { %7993 = vmatpush1.bf16.msra.mxu1 %v12500_v18  ;;  %7666 = vmatprep.subr.bf16.mxu0 %v12507_v19  ;;  %v12540_v18 = vcombine.low %v2059_v21, %v2063_v5  ;;  %v12547_v19 = vcombine.high %v2066_v8, %v2070_v54  ;;  %v2102_v1 = vld [vmem:[#allocation7 + $0x1b60] sm:$0xff]  ;;  %v2099_v21 = vld [vmem:[#allocation7 + $0x1b48] sm:$0xff] }
 0x2ba   :  { %7994 = vmatprep.subr.bf16.mxu1 %v12509_v20  ;;  %v12549_v20 = vcombine.high %v2067_v14, %v2071_v15  ;;  %v2103_v5 = vld [vmem:[#allocation7 + $0x1b68] sm:$0xff] }
 0x2bc   :  { %7667 = vmatpush1.bf16.msra.mxu0 %v12506_v26  ;;  %v12546_v26 = vcombine.low %v2066_v8, %v2070_v54  ;;  %v2106_v8 = vld [vmem:[#allocation7 + $0x1b80] sm:$0xff] }
 0x2bd   :  { %7995 = vmatpush1.bf16.msra.mxu1 %v12508_v60  ;;  %7668 = vmatprep.subr.bf16.mxu0 %v12515_v47  ;;  %v12548_v60 = vcombine.low %v2067_v14, %v2071_v15  ;;  %v12555_v47 = vcombine.high %v2074_v27, %v2078_v28  ;;  %v2110_v54 = vld [vmem:[#allocation7 + $0x1ba0] sm:$0xff]  ;;  %v2107_v14 = vld [vmem:[#allocation7 + $0x1b88] sm:$0xff] }
 0x2be   :  { %7996 = vmatprep.subr.bf16.mxu1 %v12517_v4  ;;  %v12557_v4 = vcombine.high %v2075_v0, %v2079_v29  ;;  %v2111_v15 = vld [vmem:[#allocation7 + $0x1ba8] sm:$0xff] }
 0x2c0   :  { %7669 = vmatpush1.bf16.msra.mxu0 %v12514_v38  ;;  %v12554_v38 = vcombine.low %v2074_v27, %v2078_v28  ;;  %v12587_v27 = vcombine.high %v2106_v8, %v2110_v54  ;;  %v12589_v28 = vcombine.high %v2107_v14, %v2111_v15 }
 0x2c1   :  { %7997 = vmatpush1.bf16.msra.mxu1 %v12516_v51  ;;  %7670 = vmatprep.subr.bf16.mxu0 %v12523_v23  ;;  %v12556_v51 = vcombine.low %v2075_v0, %v2079_v29  ;;  %v12563_v23 = vcombine.high %v2082_v33, %v2086_v34  ;;  %v2114_v0 = vld [vmem:[#allocation7 + $0x1bc0] sm:$0xff] }
 0x2c2   :  { %7998 = vmatprep.subr.bf16.mxu1 %v12525_v41  ;;  %v12565_v41 = vcombine.high %v2083_v35, %v2087_v37  ;;  %v2118_v29 = vld [vmem:[#allocation7 + $0x1be0] sm:$0xff] }
 0x2c4   :  { %7671 = vmatpush1.bf16.msra.mxu0 %v12522_v57  ;;  %v12562_v57 = vcombine.low %v2082_v33, %v2086_v34  ;;  %v12588_v34 = vcombine.low %v2107_v14, %v2111_v15  ;;  %v2143_v14 = vld [vmem:[#allocation7 + $0x1ca8] sm:$0xff] }
 0x2c5   :  { %7999 = vmatpush1.bf16.msra.mxu1 %v12524_v58  ;;  %7672 = vmatprep.subr.bf16.mxu0 %v12531_v61  ;;  %v12564_v58 = vcombine.low %v2083_v35, %v2087_v37  ;;  %v12571_v61 = vcombine.high %v2090_v42, %v2094_v44  ;;  %v12595_v35 = vcombine.high %v2114_v0, %v2118_v29 }
 0x2c6   :  { %8000 = vmatprep.subr.bf16.mxu1 %v12533_v62  ;;  %v12573_v62 = vcombine.high %v2091_v31, %v2095_v3 }
 0x2c8   :  { %7673 = vmatpush1.bf16.msra.mxu0 %v12530_v6  ;;  %v12570_v6 = vcombine.low %v2090_v42, %v2094_v44  ;;  %v2127_v42 = vld [vmem:[#allocation7 + $0x1c28] sm:$0xff]  ;;  %v12594_v44 = vcombine.low %v2114_v0, %v2118_v29 }
 0x2c9   :  { %8001 = vmatpush1.bf16.msra.mxu1 %v12532_v59  ;;  %7674 = vmatprep.subr.bf16.mxu0 %v12539_v7  ;;  %v12572_v59 = vcombine.low %v2091_v31, %v2095_v3  ;;  %v12579_v7 = vcombine.high %v2098_v63, %v2102_v1  ;;  %v2147_v0 = vld [vmem:[#allocation7 + $0x1cc8] sm:$0xff] }
 0x2ca   :  { %8002 = vmatprep.subr.bf16.mxu1 %v12541_v52  ;;  %v12581_v52 = vcombine.high %v2099_v21, %v2103_v5  ;;  %v2151_v29 = vld [vmem:[#allocation7 + $0x1ce8] sm:$0xff] }
 0x2cc   :  { %7675 = vmatpush1.bf16.msra.mxu0 %v12538_v48  ;;  %v12578_v48 = vcombine.low %v2098_v63, %v2102_v1  ;;  %v2131_v1 = vld [vmem:[#allocation7 + $0x1c48] sm:$0xff] }
 0x2cd   :  { %8003 = vmatpush1.bf16.msra.mxu1 %v12540_v18  ;;  %7676 = vmatprep.subr.bf16.mxu0 %v12547_v19  ;;  %v14358_v18 = vld [vmem:[#allocation11 + $0x8] sm:$0xff] }
 0x2ce   :  { %8004 = vmatprep.subr.bf16.mxu1 %v12549_v20  ;;  %v264_v19 = vrot.slane %v14358_v18, %v14293_v32  ;;  %v12580_v20 = vcombine.low %v2099_v21, %v2103_v5  ;;  %v2135_v21 = vld [vmem:[#allocation7 + $0x1c68] sm:$0xff] }
 0x2d0   :  { %7677 = vmatpush1.bf16.msra.mxu0 %v12546_v26  ;;  %v276_v26 = vrot.slane %v14358_v18, %v14296_v39  ;;  %v1147_v33 = vadd.f32 %v14272_v49, %v264_v19 }
 0x2d1   :  { %8005 = vmatpush1.bf16.msra.mxu1 %v12548_v60  ;;  %7678 = vmatprep.subr.bf16.mxu0 %v12555_v47  ;;  %v2115_v60 = vld [vmem:[#allocation7 + $0x1bc8] sm:$0xff] }
 0x2d2   :  { %8006 = vmatprep.subr.bf16.mxu1 %v12557_v4  ;;  %v2119_v47 = vld [vmem:[#allocation7 + $0x1be8] sm:$0xff]  ;;  %v12586_v4 = vcombine.low %v2106_v8, %v2110_v54  ;;  %v1206_v31 = vmax.f32 %v1147_v33, 0.0  ;;  %v12613_v8 = vcombine.high %v2131_v1, %v2135_v21  ;;  %v2154_v33 = vld [vmem:[#allocation7 + $0x1d00] sm:$0xff] }
 0x2d3   :  { %v12597_v37 = vcombine.high %v2115_v60, %v2119_v47  ;;  %v12596_v3 = vcombine.low %v2115_v60, %v2119_v47  ;;  %v2139_v54 = vld [vmem:[#allocation7 + $0x1c88] sm:$0xff] }
 0x2d4   :  { %7679 = vmatpush1.bf16.msra.mxu0 %v12554_v38  ;;  %v2122_v38 = vld [vmem:[#allocation7 + $0x1c00] sm:$0xff]  ;;  %v14366_v5 = vpack.c.bf16 %v1206_v31, %v1206_v31  ;;  %v12620_v60 = vcombine.low %v2139_v54, %v2143_v14  ;;  %v2163_v31 = vld [vmem:[#allocation7 + $0x1d48] sm:$0xff] }
 0x2d5   :  { %8007 = vmatpush1.bf16.msra.mxu1 %v12556_v51  ;;  %7680 = vmatprep.subr.bf16.mxu0 %v12563_v23  ;;  %v2126_v51 = vld [vmem:[#allocation7 + $0x1c20] sm:$0xff]  ;;  %v1190_v23 = vadd.f32 %v14290_v13, %v276_v26 }
 0x2d6   :  { %8008 = vmatprep.subr.bf16.mxu1 %v12565_v41  ;;  %v2123_v41 = vld [vmem:[#allocation7 + $0x1c08] sm:$0xff]  ;;  %v12602_v63 = vcombine.low %v2122_v38, %v2126_v51 }
 0x2d7   :  { %v12605_v49 = vcombine.high %v2123_v41, %v2127_v42  ;;  %v12604_v13 = vcombine.low %v2123_v41, %v2127_v42  ;;  %v2162_v42 = vld [vmem:[#allocation7 + $0x1d40] sm:$0xff] }
 0x2d8   :  { %7681 = vmatpush1.bf16.msra.mxu0 %v12562_v57  ;;  %v12603_v57 = vcombine.high %v2122_v38, %v2126_v51  ;;  %v12628_v51 = vcombine.low %v2147_v0, %v2151_v29 }
 0x2d9   :  { %8009 = vmatpush1.bf16.msra.mxu1 %v12564_v58  ;;  %7682 = vmatprep.subr.bf16.mxu0 %v12571_v61  ;;  %v1209_v58 = vmax.f32 %v1190_v23, 0.0  ;;  %v2130_v61 = vld [vmem:[#allocation7 + $0x1c40] sm:$0xff] }
 0x2da   :  { %8010 = vmatprep.subr.bf16.mxu1 %v12573_v62  ;;  %v2134_v62 = vld [vmem:[#allocation7 + $0x1c60] sm:$0xff] }
 0x2db   :  { %v12610_v15 = vcombine.low %v2130_v61, %v2134_v62 }
 0x2dc   :  { %7683 = vmatpush1.bf16.msra.mxu0 %v12570_v6  ;;  %v12611_v6 = vcombine.high %v2130_v61, %v2134_v62  ;;  %v2170_v62 = vld [vmem:[#allocation7 + $0x1d80] sm:$0xff] }
 0x2dd   :  { %8011 = vmatpush1.bf16.msra.mxu1 %v12572_v59  ;;  %7684 = vmatprep.subr.bf16.mxu0 %v12579_v7  ;;  %v2138_v59 = vld [vmem:[#allocation7 + $0x1c80] sm:$0xff] }
 0x2de   :  { %8012 = vmatprep.subr.bf16.mxu1 %v12581_v52  ;;  %v2142_v7 = vld [vmem:[#allocation7 + $0x1ca0] sm:$0xff]  ;;  %v14368_v52 = vpack.c.bf16 %v1209_v58, %v1209_v58 }
 0x2df   :  { %v12619_v19 = vcombine.high %v2138_v59, %v2142_v7  ;;  %v12618_v26 = vcombine.low %v2138_v59, %v2142_v7 }
 0x2e0   :  { %7685 = vmatpush1.bf16.msra.mxu0 %v12578_v48  ;;  %v12612_v48 = vcombine.low %v2131_v1, %v2135_v21  ;;  %v2171_v1 = vld [vmem:[#allocation7 + $0x1d88] sm:$0xff] }
 0x2e1   :  { %8013 = vmatpush1.bf16.msra.mxu1 %v12580_v20  ;;  %7686 = vmatprep.subr.bf16.mxu0 %v12587_v27  ;;  %v12621_v20 = vcombine.high %v2139_v54, %v2143_v14  ;;  %v2146_v27 = vld [vmem:[#allocation7 + $0x1cc0] sm:$0xff]  ;;  %v2175_v21 = vld [vmem:[#allocation7 + $0x1da8] sm:$0xff] }
 0x2e2   :  { %8014 = vmatprep.subr.bf16.mxu1 %v12589_v28  ;;  %v2150_v28 = vld [vmem:[#allocation7 + $0x1ce0] sm:$0xff]  ;;  %v12653_v7 = vcombine.high %v2171_v1, %v2175_v21  ;;  %v2179_v14 = vld [vmem:[#allocation7 + $0x1dc8] sm:$0xff] }
 0x2e3   :  { %v12627_v47 = vcombine.high %v2146_v27, %v2150_v28  ;;  %v12626_v38 = vcombine.low %v2146_v27, %v2150_v28  ;;  %v2182_v54 = vld [vmem:[#allocation7 + $0x1de0] sm:$0xff] }
 0x2e4   :  { %7687 = vmatpush1.bf16.msra.mxu0 %v12586_v4  ;;  %v12629_v4 = vcombine.high %v2147_v0, %v2151_v29  ;;  %v2186_v28 = vld [vmem:[#allocation7 + $0x1e00] sm:$0xff]  ;;  %v2187_v29 = vld [vmem:[#allocation7 + $0x1e08] sm:$0xff] }
 0x2e5   :  { %8015 = vmatpush1.bf16.msra.mxu1 %v12588_v34  ;;  %7688 = vmatprep.subr.bf16.mxu0 %v12595_v35  ;;  %v2158_v34 = vld [vmem:[#allocation7 + $0x1d20] sm:$0xff]  ;;  %v2155_v35 = vld [vmem:[#allocation7 + $0x1d08] sm:$0xff] }
 0x2e6   :  { %8016 = vmatprep.subr.bf16.mxu1 %v12597_v37  ;;  %v2159_v37 = vld [vmem:[#allocation7 + $0x1d28] sm:$0xff]  ;;  %v12635_v23 = vcombine.high %v2154_v33, %v2158_v34  ;;  %v2190_v0 = vld [vmem:[#allocation7 + $0x1e20] sm:$0xff] }
 0x2e7   :  { %v12637_v41 = vcombine.high %v2155_v35, %v2159_v37 }
 0x2e8   :  { %7689 = vmatpush1.bf16.msra.mxu0 %v12594_v44  ;;  %v2166_v44 = vld [vmem:[#allocation7 + $0x1d60] sm:$0xff] }
 0x2e9   :  { %8017 = vmatpush1.bf16.msra.mxu1 %v12596_v3  ;;  %7699 = vmatprep.subr.bf16.mxu0 %v12603_v57  ;;  %v2167_v3 = vld [vmem:[#allocation7 + $0x1d68] sm:$0xff]  ;;  %v12634_v57 = vcombine.low %v2154_v33, %v2158_v34  ;;  %v12643_v58 = vcombine.high %v2162_v42, %v2166_v44  ;;  %v2194_v34 = vld [vmem:[#allocation7 + $0x1e40] sm:$0xff] }
 0x2ea   :  { %8027 = vmatprep.subr.bf16.mxu1 %v12605_v49  ;;  %v12636_v49 = vcombine.low %v2155_v35, %v2159_v37  ;;  %v12645_v61 = vcombine.high %v2163_v31, %v2167_v3  ;;  %v2198_v35 = vld [vmem:[#allocation7 + $0x1e60] sm:$0xff]  ;;  %v2195_v37 = vld [vmem:[#allocation7 + $0x1e48] sm:$0xff] }
 0x2eb   :  { %7691 = vmatmul.mubr.bf16.vlgmr.msra.gmra.mrb[12].mxu0 %v14366_v5 }
 0x2ec   :  { %8019 = vmatmul.mubr.bf16.vlgmr.msra.gmra.mrb[20].mxu1 %v14366_v5  ;;  %7700 = vmatpush1.bf16.msra.mxu0 %v12602_v63  ;;  %v2174_v63 = vld [vmem:[#allocation7 + $0x1da0] sm:$0xff] }
 0x2ed   :  { %7731 = vmatprep.mubr.bf16.mxu0 %v14368_v52  ;;  %8028 = vmatpush1.bf16.msra.mxu1 %v12604_v13  ;;  %v12642_v13 = vcombine.low %v2162_v42, %v2166_v44  ;;  %v12651_v59 = vcombine.high %v2170_v62, %v2174_v63  ;;  %v2202_v44 = vld [vmem:[#allocation7 + $0x1e80] sm:$0xff] }
 0x2ee   :  { %8059 = vmatprep.mubr.bf16.mxu1 %v14368_v52  ;;  %7701 = vmatprep.subr.bf16.mxu0 %v12611_v6  ;;  %v12644_v6 = vcombine.low %v2163_v31, %v2167_v3  ;;  %v2206_v31 = vld [vmem:[#allocation7 + $0x1ea0] sm:$0xff]  ;;  %v2203_v3 = vld [vmem:[#allocation7 + $0x1e88] sm:$0xff] }
 0x2ef   :  { %8029 = vmatprep.subr.bf16.mxu1 %v12613_v8  ;;  %v2178_v8 = vld [vmem:[#allocation7 + $0x1dc0] sm:$0xff] }
 0x2f0   :  { %7702 = vmatpush1.bf16.msra.mxu0 %v12610_v15  ;;  %v2183_v15 = vld [vmem:[#allocation7 + $0x1de8] sm:$0xff] }
 0x2f1   :  { %8030 = vmatpush1.bf16.msra.mxu1 %v12612_v48  ;;  %7703 = vmatprep.subr.bf16.mxu0 %v12619_v19  ;;  %v12650_v48 = vcombine.low %v2170_v62, %v2174_v63  ;;  %v12652_v19 = vcombine.low %v2171_v1, %v2175_v21  ;;  %v12661_v27 = vcombine.high %v2179_v14, %v2183_v15  ;;  %v2210_v63 = vld [vmem:[#allocation7 + $0x1ec0] sm:$0xff]  ;;  %v2211_v21 = vld [vmem:[#allocation7 + $0x1ec8] sm:$0xff] }
 0x2f2   :  { %8031 = vmatprep.subr.bf16.mxu1 %v12621_v20  ;;  %v12659_v20 = vcombine.high %v2178_v8, %v2182_v54  ;;  %v2214_v1 = vld [vmem:[#allocation7 + $0x1ee0] sm:$0xff] }
 0x2f4   :  { %7704 = vmatpush1.bf16.msra.mxu0 %v12618_v26  ;;  %v2191_v26 = vld [vmem:[#allocation7 + $0x1e28] sm:$0xff] }
 0x2f5   :  { %8032 = vmatpush1.bf16.msra.mxu1 %v12620_v60  ;;  %7705 = vmatprep.subr.bf16.mxu0 %v12627_v47  ;;  %v12658_v60 = vcombine.low %v2178_v8, %v2182_v54  ;;  %v12660_v47 = vcombine.low %v2179_v14, %v2183_v15  ;;  %v12669_v33 = vcombine.high %v2187_v29, %v2191_v26  ;;  %v2218_v54 = vld [vmem:[#allocation7 + $0x1f00] sm:$0xff]  ;;  %v2219_v15 = vld [vmem:[#allocation7 + $0x1f08] sm:$0xff] }
 0x2f6   :  { %8033 = vmatprep.subr.bf16.mxu1 %v12629_v4  ;;  %v12667_v4 = vcombine.high %v2186_v28, %v2190_v0  ;;  %v2222_v14 = vld [vmem:[#allocation7 + $0x1f20] sm:$0xff] }
 0x2f8   :  { %7706 = vmatpush1.bf16.msra.mxu0 %v12626_v38  ;;  %v2199_v38 = vld [vmem:[#allocation7 + $0x1e68] sm:$0xff] }
 0x2f9   :  { %8034 = vmatpush1.bf16.msra.mxu1 %v12628_v51  ;;  %7707 = vmatprep.subr.bf16.mxu0 %v12635_v23  ;;  %v12666_v51 = vcombine.low %v2186_v28, %v2190_v0  ;;  %v12668_v23 = vcombine.low %v2187_v29, %v2191_v26  ;;  %v12677_v42 = vcombine.high %v2195_v37, %v2199_v38  ;;  %v2226_v0 = vld [vmem:[#allocation7 + $0x1f40] sm:$0xff]  ;;  %v2227_v26 = vld [vmem:[#allocation7 + $0x1f48] sm:$0xff] }
 0x2fa   :  { %8035 = vmatprep.subr.bf16.mxu1 %v12637_v41  ;;  %v12675_v41 = vcombine.high %v2194_v34, %v2198_v35  ;;  %v2230_v29 = vld [vmem:[#allocation7 + $0x1f60] sm:$0xff] }
 0x2fc   :  { %7708 = vmatpush1.bf16.msra.mxu0 %v12634_v57  ;;  %v2207_v57 = vld [vmem:[#allocation7 + $0x1ea8] sm:$0xff] }
 0x2fd   :  { %8036 = vmatpush1.bf16.msra.mxu1 %v12636_v49  ;;  %7709 = vmatprep.subr.bf16.mxu0 %v12643_v58  ;;  %v12674_v49 = vcombine.low %v2194_v34, %v2198_v35  ;;  %v12676_v58 = vcombine.low %v2195_v37, %v2199_v38  ;;  %v12685_v62 = vcombine.high %v2203_v3, %v2207_v57  ;;  %v2234_v35 = vld [vmem:[#allocation7 + $0x1f80] sm:$0xff]  ;;  %v2235_v38 = vld [vmem:[#allocation7 + $0x1f88] sm:$0xff] }
 0x2fe   :  { %8037 = vmatprep.subr.bf16.mxu1 %v12645_v61  ;;  %v12683_v61 = vcombine.high %v2202_v44, %v2206_v31  ;;  %v2238_v37 = vld [vmem:[#allocation7 + $0x1fa0] sm:$0xff] }
 0x300   :  { %7710 = vmatpush1.bf16.msra.mxu0 %v12642_v13  ;;  %v2215_v13 = vld [vmem:[#allocation7 + $0x1ee8] sm:$0xff] }
 0x301   :  { %8038 = vmatpush1.bf16.msra.mxu1 %v12644_v6  ;;  %7711 = vmatprep.subr.bf16.mxu0 %v12651_v59  ;;  %v12682_v6 = vcombine.low %v2202_v44, %v2206_v31  ;;  %v12684_v59 = vcombine.low %v2203_v3, %v2207_v57  ;;  %v12693_v8 = vcombine.high %v2211_v21, %v2215_v13  ;;  %v2242_v3 = vld [vmem:[#allocation7 + $0x1fc0] sm:$0xff] }
 0x302   :  { %8039 = vmatprep.subr.bf16.mxu1 %v12653_v7  ;;  %v12691_v7 = vcombine.high %v2210_v63, %v2214_v1  ;;  %v12715_v44 = vcombine.high %v2234_v35, %v2238_v37  ;;  %v2246_v57 = vld [vmem:[#allocation7 + $0x1fe0] sm:$0xff] }
 0x304   :  { %7712 = vmatpush1.bf16.msra.mxu0 %v12650_v48  ;;  %v2223_v48 = vld [vmem:[#allocation7 + $0x1f28] sm:$0xff] }
 0x305   :  { %8040 = vmatpush1.bf16.msra.mxu1 %v12652_v19  ;;  %7713 = vmatprep.subr.bf16.mxu0 %v12659_v20  ;;  %v12690_v19 = vcombine.low %v2210_v63, %v2214_v1  ;;  %v12692_v20 = vcombine.low %v2211_v21, %v2215_v13  ;;  %v12701_v28 = vcombine.high %v2219_v15, %v2223_v48  ;;  %v1228_v21 = vld [vmem:[#allocation7 + $0x10] sm:$0xff] }
 0x306   :  { %8041 = vmatprep.subr.bf16.mxu1 %v12661_v27  ;;  %v12699_v27 = vcombine.high %v2218_v54, %v2222_v14  ;;  %v12723_v1 = vcombine.high %v2242_v3, %v2246_v57  ;;  %v1232_v13 = vld [vmem:[#allocation7 + $0x30] sm:$0xff] }
 0x308   :  { %7714 = vmatpush1.bf16.msra.mxu0 %v12658_v60  ;;  %v2231_v60 = vld [vmem:[#allocation7 + $0x1f68] sm:$0xff] }
 0x309   :  { %8042 = vmatpush1.bf16.msra.mxu1 %v12660_v47  ;;  %7715 = vmatprep.subr.bf16.mxu0 %v12667_v4  ;;  %v12698_v47 = vcombine.low %v2218_v54, %v2222_v14  ;;  %v12700_v4 = vcombine.low %v2219_v15, %v2223_v48  ;;  %v12709_v34 = vcombine.high %v2227_v26, %v2231_v60  ;;  %v1240_v48 = vld [vmem:[#allocation7 + $0x70] sm:$0xff] }
 0x30a   :  { %8043 = vmatprep.subr.bf16.mxu1 %v12669_v33  ;;  %v12707_v33 = vcombine.high %v2226_v0, %v2230_v29  ;;  %v11711_v14 = vcombine.high %v1228_v21, %v1232_v13 }
 0x30c   :  { %7716 = vmatpush1.bf16.msra.mxu0 %v12666_v51  ;;  %v2239_v51 = vld [vmem:[#allocation7 + $0x1fa8] sm:$0xff] }
 0x30d   :  { %8044 = vmatpush1.bf16.msra.mxu1 %v12668_v23  ;;  %7717 = vmatprep.subr.bf16.mxu0 %v12675_v41  ;;  %v12706_v23 = vcombine.low %v2226_v0, %v2230_v29  ;;  %v272_v41 = vrot.slane %v14358_v18, %v14313_v56  ;;  %v12717_v31 = vcombine.high %v2235_v38, %v2239_v51 }
 0x30e   :  { %8045 = vmatprep.subr.bf16.mxu1 %v12677_v42  ;;  %v12708_v42 = vcombine.low %v2227_v26, %v2231_v60  ;;  %v12716_v63 = vcombine.low %v2235_v38, %v2239_v51  ;;  %v1244_v26 = vld [vmem:[#allocation7 + $0x90] sm:$0xff] }
 0x30f   :  { %v1248_v60 = vld [vmem:[#allocation7 + $0xb0] sm:$0xff] }
 0x310   :  { %7718 = vmatpush1.bf16.msra.mxu0 %v12674_v49  ;;  %v2243_v49 = vld [vmem:[#allocation7 + $0x1fc8] sm:$0xff]  ;;  %v1252_v51 = vld [vmem:[#allocation7 + $0xd0] sm:$0xff] }
 0x311   :  { %8046 = vmatpush1.bf16.msra.mxu1 %v12676_v58  ;;  %7719 = vmatprep.subr.bf16.mxu0 %v12683_v61  ;;  %v2247_v58 = vld [vmem:[#allocation7 + $0x1fe8] sm:$0xff]  ;;  %v12714_v61 = vcombine.low %v2234_v35, %v2238_v37  ;;  %v11727_v37 = vcombine.high %v1244_v26, %v1248_v60 }
 0x312   :  { %8047 = vmatprep.subr.bf16.mxu1 %v12685_v62  ;;  %v1188_v62 = vadd.f32 %v14288_v12, %v272_v41  ;;  %v12725_v18 = vcombine.high %v2243_v49, %v2247_v58  ;;  %v12724_v54 = vcombine.low %v2243_v49, %v2247_v58  ;;  %v1236_v12 = vld [vmem:[#allocation7 + $0x50] sm:$0xff]  ;;  %v1253_v41 = vld [vmem:[#allocation7 + $0xd8] sm:$0xff] }
 0x313   :  { %v11719_v29 = vcombine.high %v1236_v12, %v1240_v48  ;;  %v1260_v49 = vld [vmem:[#allocation7 + $0x110] sm:$0xff] }
 0x314   :  { %7720 = vmatpush1.bf16.msra.mxu0 %v12682_v6  ;;  %v1229_v6 = vld [vmem:[#allocation7 + $0x18] sm:$0xff]  ;;  %v1264_v58 = vld [vmem:[#allocation7 + $0x130] sm:$0xff] }
 0x315   :  { %8048 = vmatpush1.bf16.msra.mxu1 %v12684_v59  ;;  %7721 = vmatprep.subr.bf16.mxu0 %v12691_v7  ;;  %v1233_v59 = vld [vmem:[#allocation7 + $0x38] sm:$0xff]  ;;  %v12722_v7 = vcombine.low %v2242_v3, %v2246_v57 }
 0x316   :  { %8049 = vmatprep.subr.bf16.mxu1 %v12693_v8  ;;  %v1208_v8 = vmax.f32 %v1188_v62, 0.0  ;;  %v11713_v15 = vcombine.high %v1229_v6, %v1233_v59  ;;  %v11712_v0 = vcombine.low %v1229_v6, %v1233_v59  ;;  %v1265_v62 = vld [vmem:[#allocation7 + $0x138] sm:$0xff] }
 0x317   :  { %v1269_v6 = vld [vmem:[#allocation7 + $0x158] sm:$0xff] }
 0x318   :  { %7722 = vmatpush1.bf16.msra.mxu0 %v12690_v19  ;;  %v11710_v19 = vcombine.low %v1228_v21, %v1232_v13  ;;  %v1268_v21 = vld [vmem:[#allocation7 + $0x150] sm:$0xff]  ;;  %v1273_v59 = vld [vmem:[#allocation7 + $0x178] sm:$0xff] }
 0x319   :  { %8050 = vmatpush1.bf16.msra.mxu1 %v12692_v20  ;;  %7723 = vmatprep.subr.bf16.mxu0 %v12699_v27  ;;  %v1237_v20 = vld [vmem:[#allocation7 + $0x58] sm:$0xff]  ;;  %v1272_v13 = vld [vmem:[#allocation7 + $0x170] sm:$0xff] }
 0x31a   :  { %8051 = vmatprep.subr.bf16.mxu1 %v12701_v28  ;;  %v1241_v27 = vld [vmem:[#allocation7 + $0x78] sm:$0xff]  ;;  %v14377_v28 = vpack.c.bf16 %v1208_v8, %v1208_v8 }
 0x31b   :  { %v11720_v35 = vcombine.low %v1237_v20, %v1241_v27 }
 0x31c   :  { %7724 = vmatpush1.bf16.msra.mxu0 %v12698_v47  ;;  %v11721_v47 = vcombine.high %v1237_v20, %v1241_v27  ;;  %v11750_v20 = vcombine.low %v1268_v21, %v1272_v13  ;;  %v11752_v27 = vcombine.low %v1269_v6, %v1273_v59 }
 0x31d   :  { %8052 = vmatpush1.bf16.msra.mxu1 %v12700_v4  ;;  %7725 = vmatprep.subr.bf16.mxu0 %v12707_v33  ;;  %v1245_v4 = vld [vmem:[#allocation7 + $0x98] sm:$0xff] }
 0x31e   :  { %8053 = vmatprep.subr.bf16.mxu1 %v12709_v34  ;;  %v1249_v33 = vld [vmem:[#allocation7 + $0xb8] sm:$0xff]  ;;  %v11718_v34 = vcombine.low %v1236_v12, %v1240_v48  ;;  %v1280_v12 = vld [vmem:[#allocation7 + $0x1b0] sm:$0xff] }
 0x31f   :  { %v11729_v38 = vcombine.high %v1245_v4, %v1249_v33  ;;  %v1277_v48 = vld [vmem:[#allocation7 + $0x198] sm:$0xff] }
 0x320   :  { %7726 = vmatpush1.bf16.msra.mxu0 %v12706_v23  ;;  %v1256_v23 = vld [vmem:[#allocation7 + $0xf0] sm:$0xff] }
 0x321   :  { %8054 = vmatpush1.bf16.msra.mxu1 %v12708_v42  ;;  %7727 = vmatprep.subr.bf16.mxu0 %v12715_v44  ;;  %v1257_v42 = vld [vmem:[#allocation7 + $0xf8] sm:$0xff]  ;;  %v11726_v44 = vcombine.low %v1244_v26, %v1248_v60  ;;  %v11735_v3 = vcombine.high %v1252_v51, %v1256_v23  ;;  %v1284_v26 = vld [vmem:[#allocation7 + $0x1d0] sm:$0xff] }
 0x322   :  { %8055 = vmatprep.subr.bf16.mxu1 %v12717_v31  ;;  %v11728_v31 = vcombine.low %v1245_v4, %v1249_v33  ;;  %v11737_v57 = vcombine.high %v1253_v41, %v1257_v42  ;;  %v1288_v60 = vld [vmem:[#allocation7 + $0x1f0] sm:$0xff]  ;;  %v1289_v4 = vld [vmem:[#allocation7 + $0x1f8] sm:$0xff] }
 0x324   :  { %7728 = vmatpush1.bf16.msra.mxu0 %v12714_v61  ;;  %v1261_v61 = vld [vmem:[#allocation7 + $0x118] sm:$0xff] }
 0x325   :  { %8056 = vmatpush1.bf16.msra.mxu1 %v12716_v63  ;;  %7729 = vmatprep.subr.bf16.mxu0 %v12723_v1  ;;  %v11736_v63 = vcombine.low %v1253_v41, %v1257_v42  ;;  %v11743_v1 = vcombine.high %v1260_v49, %v1264_v58  ;;  %v11744_v8 = vcombine.low %v1261_v61, %v1265_v62  ;;  %v1297_v41 = vld [vmem:[#allocation7 + $0x238] sm:$0xff] }
 0x326   :  { %8057 = vmatprep.subr.bf16.mxu1 %v12725_v18  ;;  %v11745_v18 = vcombine.high %v1261_v61, %v1265_v62  ;;  %v11766_v42 = vcombine.low %v1284_v26, %v1288_v60  ;;  %v1305_v61 = vld [vmem:[#allocation7 + $0x278] sm:$0xff] }
 0x328   :  { %7730 = vmatpush1.bf16.msra.mxu0 %v12722_v7  ;;  %v11742_v7 = vcombine.low %v1260_v49, %v1264_v58  ;;  %v1304_v49 = vld [vmem:[#allocation7 + $0x270] sm:$0xff]  ;;  %v1301_v58 = vld [vmem:[#allocation7 + $0x258] sm:$0xff] }
 0x329   :  { %8058 = vmatpush1.bf16.msra.mxu1 %v12724_v54  ;;  %8068 = vmatprep.subr.bf16.mxu0 %v11711_v14  ;;  %v11751_v54 = vcombine.high %v1268_v21, %v1272_v13  ;;  %v11753_v14 = vcombine.high %v1269_v6, %v1273_v59  ;;  %v1312_v21 = vld [vmem:[#allocation7 + $0x2b0] sm:$0xff]  ;;  %v1309_v13 = vld [vmem:[#allocation7 + $0x298] sm:$0xff] }
 0x32a   :  { %8396 = vmatprep.subr.bf16.mxu1 %v11713_v15  ;;  %v1276_v15 = vld [vmem:[#allocation7 + $0x190] sm:$0xff]  ;;  %v1313_v6 = vld [vmem:[#allocation7 + $0x2b8] sm:$0xff] }
 0x32b   :  { %7732 = vmatmul.mubr.bf16.vlgmr.msra.gmra.mrb[12].mxu0 %v14377_v28  ;;  %v11758_v33 = vcombine.low %v1276_v15, %v1280_v12 }
 0x32c   :  { %8060 = vmatmul.mubr.bf16.vlgmr.msra.gmra.mrb[20].mxu1 %v14377_v28  ;;  %8069 = vmatpush1.bf16.msra.mxu0 %v11710_v19  ;;  %v1281_v19 = vld [vmem:[#allocation7 + $0x1b8] sm:$0xff] }
 0x32d   :  { %8100 = vmatprep.mubr.bf16.mxu0 %v14226_v9  ;;  %8397 = vmatpush1.bf16.msra.mxu1 %v11712_v0  ;;  %v11759_v0 = vcombine.high %v1276_v15, %v1280_v12  ;;  %v1320_v15 = vld [vmem:[#allocation7 + $0x2f0] sm:$0xff]  ;;  %v1317_v12 = vld [vmem:[#allocation7 + $0x2d8] sm:$0xff] }
 0x32e   :  { %8428 = vmatprep.mubr.bf16.mxu1 %v14226_v9  ;;  %8070 = vmatprep.subr.bf16.mxu0 %v11719_v29  ;;  %v11734_v9 = vcombine.low %v1252_v51, %v1256_v23  ;;  %v11761_v29 = vcombine.high %v1277_v48, %v1281_v19  ;;  %v1296_v51 = vld [vmem:[#allocation7 + $0x230] sm:$0xff]  ;;  %v1293_v23 = vld [vmem:[#allocation7 + $0x218] sm:$0xff] }
 0x32f   :  { %8398 = vmatprep.subr.bf16.mxu1 %v11721_v47  ;;  %v1285_v47 = vld [vmem:[#allocation7 + $0x1d8] sm:$0xff] }
 0x330   :  { %8071 = vmatpush1.bf16.msra.mxu0 %v11718_v34  ;;  %v11760_v34 = vcombine.low %v1277_v48, %v1281_v19  ;;  %v1321_v48 = vld [vmem:[#allocation7 + $0x2f8] sm:$0xff] }
 0x331   :  { %8399 = vmatpush1.bf16.msra.mxu1 %v11720_v35  ;;  %8072 = vmatprep.subr.bf16.mxu0 %v11727_v37  ;;  %v11767_v35 = vcombine.high %v1284_v26, %v1288_v60  ;;  %v11769_v37 = vcombine.high %v1285_v47, %v1289_v4  ;;  %v1328_v26 = vld [vmem:[#allocation7 + $0x330] sm:$0xff]  ;;  %v1325_v60 = vld [vmem:[#allocation7 + $0x318] sm:$0xff] }
 0x332   :  { %8400 = vmatprep.subr.bf16.mxu1 %v11729_v38  ;;  %v1292_v38 = vld [vmem:[#allocation7 + $0x210] sm:$0xff] }
 0x333   :  { %v11774_v62 = vcombine.low %v1292_v38, %v1296_v51 }
 0x334   :  { %8073 = vmatpush1.bf16.msra.mxu0 %v11726_v44  ;;  %v11768_v44 = vcombine.low %v1285_v47, %v1289_v4  ;;  %v1329_v47 = vld [vmem:[#allocation7 + $0x338] sm:$0xff] }
 0x335   :  { %8401 = vmatpush1.bf16.msra.mxu1 %v11728_v31  ;;  %8074 = vmatprep.subr.bf16.mxu0 %v11735_v3  ;;  %v11775_v31 = vcombine.high %v1292_v38, %v1296_v51  ;;  %v11777_v3 = vcombine.high %v1293_v23, %v1297_v41  ;;  %v1336_v38 = vld [vmem:[#allocation7 + $0x370] sm:$0xff]  ;;  %v1333_v51 = vld [vmem:[#allocation7 + $0x358] sm:$0xff] }
 0x336   :  { %8402 = vmatprep.subr.bf16.mxu1 %v11737_v57  ;;  %v1300_v57 = vld [vmem:[#allocation7 + $0x250] sm:$0xff] }
 0x337   :  { %v11782_v59 = vcombine.low %v1300_v57, %v1304_v49 }
 0x338   :  { %8075 = vmatpush1.bf16.msra.mxu0 %v11734_v9  ;;  %v11776_v9 = vcombine.low %v1293_v23, %v1297_v41  ;;  %v1337_v23 = vld [vmem:[#allocation7 + $0x378] sm:$0xff] }
 0x339   :  { %8403 = vmatpush1.bf16.msra.mxu1 %v11736_v63  ;;  %8076 = vmatprep.subr.bf16.mxu0 %v11743_v1  ;;  %v11783_v63 = vcombine.high %v1300_v57, %v1304_v49  ;;  %v11785_v1 = vcombine.high %v1301_v58, %v1305_v61  ;;  %v1344_v57 = vld [vmem:[#allocation7 + $0x3b0] sm:$0xff]  ;;  %v1341_v49 = vld [vmem:[#allocation7 + $0x398] sm:$0xff] }
 0x33a   :  { %8404 = vmatprep.subr.bf16.mxu1 %v11745_v18  ;;  %v1308_v18 = vld [vmem:[#allocation7 + $0x290] sm:$0xff] }
 0x33b   :  { %v11790_v19 = vcombine.low %v1308_v18, %v1312_v21 }
 0x33c   :  { %8077 = vmatpush1.bf16.msra.mxu0 %v11742_v7  ;;  %v11784_v7 = vcombine.low %v1301_v58, %v1305_v61  ;;  %v1345_v58 = vld [vmem:[#allocation7 + $0x3b8] sm:$0xff] }
 0x33d   :  { %8405 = vmatpush1.bf16.msra.mxu1 %v11744_v8  ;;  %8078 = vmatprep.subr.bf16.mxu0 %v11751_v54  ;;  %v11791_v8 = vcombine.high %v1308_v18, %v1312_v21  ;;  %v11793_v54 = vcombine.high %v1309_v13, %v1313_v6  ;;  %v1352_v18 = vld [vmem:[#allocation7 + $0x3f0] sm:$0xff]  ;;  %v1349_v21 = vld [vmem:[#allocation7 + $0x3d8] sm:$0xff] }
 0x33e   :  { %8406 = vmatprep.subr.bf16.mxu1 %v11753_v14  ;;  %v1316_v14 = vld [vmem:[#allocation7 + $0x2d0] sm:$0xff] }
 0x33f   :  { %v11798_v4 = vcombine.low %v1316_v14, %v1320_v15 }
 0x340   :  { %8079 = vmatpush1.bf16.msra.mxu0 %v11750_v20  ;;  %v11792_v20 = vcombine.low %v1309_v13, %v1313_v6  ;;  %v1353_v13 = vld [vmem:[#allocation7 + $0x3f8] sm:$0xff] }
 0x341   :  { %8407 = vmatpush1.bf16.msra.mxu1 %v11752_v27  ;;  %8080 = vmatprep.subr.bf16.mxu0 %v11759_v0  ;;  %v11799_v27 = vcombine.high %v1316_v14, %v1320_v15  ;;  %v11801_v0 = vcombine.high %v1317_v12, %v1321_v48  ;;  %v1360_v14 = vld [vmem:[#allocation7 + $0x430] sm:$0xff]  ;;  %v1357_v15 = vld [vmem:[#allocation7 + $0x418] sm:$0xff] }
 0x342   :  { %8408 = vmatprep.subr.bf16.mxu1 %v11761_v29  ;;  %v1324_v29 = vld [vmem:[#allocation7 + $0x310] sm:$0xff] }
 0x343   :  { %v11806_v41 = vcombine.low %v1324_v29, %v1328_v26 }
 0x344   :  { %8081 = vmatpush1.bf16.msra.mxu0 %v11758_v33  ;;  %v11800_v33 = vcombine.low %v1317_v12, %v1321_v48  ;;  %v1361_v12 = vld [vmem:[#allocation7 + $0x438] sm:$0xff] }
 0x345   :  { %8409 = vmatpush1.bf16.msra.mxu1 %v11760_v34  ;;  %8082 = vmatprep.subr.bf16.mxu0 %v11767_v35  ;;  %v11807_v34 = vcombine.high %v1324_v29, %v1328_v26  ;;  %v11809_v35 = vcombine.high %v1325_v60, %v1329_v47  ;;  %v1368_v29 = vld [vmem:[#allocation7 + $0x470] sm:$0xff] }
 0x346   :  { %8410 = vmatprep.subr.bf16.mxu1 %v11769_v37  ;;  %v1332_v37 = vld [vmem:[#allocation7 + $0x350] sm:$0xff] }
 0x347   :  { %v11814_v61 = vcombine.low %v1332_v37, %v1336_v38 }
 0x348   :  { %8083 = vmatpush1.bf16.msra.mxu0 %v11766_v42  ;;  %v11808_v42 = vcombine.low %v1325_v60, %v1329_v47  ;;  %v1365_v60 = vld [vmem:[#allocation7 + $0x458] sm:$0xff] }
 0x349   :  { %8411 = vmatpush1.bf16.msra.mxu1 %v11768_v44  ;;  %8084 = vmatprep.subr.bf16.mxu0 %v11775_v31  ;;  %v11815_v44 = vcombine.high %v1332_v37, %v1336_v38  ;;  %v11817_v31 = vcombine.high %v1333_v51, %v1337_v23  ;;  %v1369_v47 = vld [vmem:[#allocation7 + $0x478] sm:$0xff] }
 0x34a   :  { %8412 = vmatprep.subr.bf16.mxu1 %v11777_v3  ;;  %v1340_v3 = vld [vmem:[#allocation7 + $0x390] sm:$0xff]  ;;  %v11849_v37 = vcombine.high %v1365_v60, %v1369_v47  ;;  %v1373_v38 = vld [vmem:[#allocation7 + $0x498] sm:$0xff] }
 0x34b   :  { %v11822_v6 = vcombine.low %v1340_v3, %v1344_v57 }
 0x34c   :  { %8085 = vmatpush1.bf16.msra.mxu0 %v11774_v62  ;;  %v11816_v62 = vcombine.low %v1333_v51, %v1337_v23  ;;  %v1377_v51 = vld [vmem:[#allocation7 + $0x4b8] sm:$0xff] }
 0x34d   :  { %8413 = vmatpush1.bf16.msra.mxu1 %v11776_v9  ;;  %8086 = vmatprep.subr.bf16.mxu0 %v11783_v63  ;;  %v11823_v9 = vcombine.high %v1340_v3, %v1344_v57  ;;  %v11825_v63 = vcombine.high %v1341_v49, %v1345_v58  ;;  %v1384_v3 = vld [vmem:[#allocation7 + $0x4f0] sm:$0xff]  ;;  %v1381_v57 = vld [vmem:[#allocation7 + $0x4d8] sm:$0xff] }
 0x34e   :  { %8414 = vmatprep.subr.bf16.mxu1 %v11785_v1  ;;  %v1348_v1 = vld [vmem:[#allocation7 + $0x3d0] sm:$0xff] }
 0x34f   :  { %v11830_v48 = vcombine.low %v1348_v1, %v1352_v18 }
 0x350   :  { %8087 = vmatpush1.bf16.msra.mxu0 %v11782_v59  ;;  %v11824_v59 = vcombine.low %v1341_v49, %v1345_v58  ;;  %v1385_v49 = vld [vmem:[#allocation7 + $0x4f8] sm:$0xff] }
 0x351   :  { %8415 = vmatpush1.bf16.msra.mxu1 %v11784_v7  ;;  %8088 = vmatprep.subr.bf16.mxu0 %v11791_v8  ;;  %v11831_v7 = vcombine.high %v1348_v1, %v1352_v18  ;;  %v11833_v8 = vcombine.high %v1349_v21, %v1353_v13  ;;  %v1389_v1 = vld [vmem:[#allocation7 + $0x518] sm:$0xff] }
 0x352   :  { %8416 = vmatprep.subr.bf16.mxu1 %v11793_v54  ;;  %v1356_v54 = vld [vmem:[#allocation7 + $0x410] sm:$0xff]  ;;  %v1393_v18 = vld [vmem:[#allocation7 + $0x538] sm:$0xff] }
 0x353   :  { %v11838_v26 = vcombine.low %v1356_v54, %v1360_v14 }
 0x354   :  { %8089 = vmatpush1.bf16.msra.mxu0 %v11790_v19  ;;  %v11832_v19 = vcombine.low %v1349_v21, %v1353_v13  ;;  %v11864_v21 = vcombine.low %v1381_v57, %v1385_v49 }
 0x355   :  { %8417 = vmatpush1.bf16.msra.mxu1 %v11792_v20  ;;  %8090 = vmatprep.subr.bf16.mxu0 %v11799_v27  ;;  %v11839_v20 = vcombine.high %v1356_v54, %v1360_v14  ;;  %v11841_v27 = vcombine.high %v1357_v15, %v1361_v12  ;;  %v1401_v54 = vld [vmem:[#allocation7 + $0x578] sm:$0xff] }
 0x356   :  { %8418 = vmatprep.subr.bf16.mxu1 %v11801_v0  ;;  %v1364_v0 = vld [vmem:[#allocation7 + $0x450] sm:$0xff] }
 0x357   :  { %v11846_v23 = vcombine.low %v1364_v0, %v1368_v29 }
 0x358   :  { %8091 = vmatpush1.bf16.msra.mxu0 %v11798_v4  ;;  %v11840_v4 = vcombine.low %v1357_v15, %v1361_v12  ;;  %v11872_v15 = vcombine.low %v1389_v1, %v1393_v18 }
 0x359   :  { %8419 = vmatpush1.bf16.msra.mxu1 %v11800_v33  ;;  %8092 = vmatprep.subr.bf16.mxu0 %v11807_v34  ;;  %v11847_v33 = vcombine.high %v1364_v0, %v1368_v29  ;;  %v1372_v34 = vld [vmem:[#allocation7 + $0x490] sm:$0xff]  ;;  %v1409_v0 = vld [vmem:[#allocation7 + $0x5b8] sm:$0xff] }
 0x35a   :  { %8420 = vmatprep.subr.bf16.mxu1 %v11809_v35  ;;  %v1376_v35 = vld [vmem:[#allocation7 + $0x4b0] sm:$0xff] }
 0x35b   :  { %v11854_v58 = vcombine.low %v1372_v34, %v1376_v35 }
 0x35c   :  { %8093 = vmatpush1.bf16.msra.mxu0 %v11806_v41  ;;  %v11848_v41 = vcombine.low %v1365_v60, %v1369_v47 }
 0x35d   :  { %8421 = vmatpush1.bf16.msra.mxu1 %v11808_v42  ;;  %8094 = vmatprep.subr.bf16.mxu0 %v11815_v44  ;;  %v11855_v42 = vcombine.high %v1372_v34, %v1376_v35  ;;  %v11857_v44 = vcombine.high %v1373_v38, %v1377_v51  ;;  %v1413_v34 = vld [vmem:[#allocation7 + $0x5d8] sm:$0xff] }
 0x35e   :  { %8422 = vmatprep.subr.bf16.mxu1 %v11817_v31  ;;  %v1380_v31 = vld [vmem:[#allocation7 + $0x4d0] sm:$0xff]  ;;  %v1417_v35 = vld [vmem:[#allocation7 + $0x5f8] sm:$0xff] }
 0x360   :  { %8095 = vmatpush1.bf16.msra.mxu0 %v11814_v61  ;;  %v11863_v61 = vcombine.high %v1380_v31, %v1384_v3 }
 0x361   :  { %8423 = vmatpush1.bf16.msra.mxu1 %v11816_v62  ;;  %8096 = vmatprep.subr.bf16.mxu0 %v11823_v9  ;;  %v11865_v62 = vcombine.high %v1381_v57, %v1385_v49  ;;  %v1388_v9 = vld [vmem:[#allocation7 + $0x510] sm:$0xff]  ;;  %v11896_v57 = vcombine.low %v1413_v34, %v1417_v35 }
 0x362   :  { %8424 = vmatprep.subr.bf16.mxu1 %v11825_v63  ;;  %v1392_v63 = vld [vmem:[#allocation7 + $0x530] sm:$0xff] }
 0x363   :  { %v11871_v13 = vcombine.high %v1388_v9, %v1392_v63  ;;  %v11870_v14 = vcombine.low %v1388_v9, %v1392_v63  ;;  %v1433_v9 = vld [vmem:[#allocation7 + $0x678] sm:$0xff] }
 0x364   :  { %8097 = vmatpush1.bf16.msra.mxu0 %v11822_v6  ;;  %v11873_v6 = vcombine.high %v1389_v1, %v1393_v18 }
 0x365   :  { %8425 = vmatpush1.bf16.msra.mxu1 %v11824_v59  ;;  %8098 = vmatprep.subr.bf16.mxu0 %v11831_v7  ;;  %v1396_v59 = vld [vmem:[#allocation7 + $0x550] sm:$0xff] }
 0x366   :  { %8426 = vmatprep.subr.bf16.mxu1 %v11833_v8  ;;  %v1400_v7 = vld [vmem:[#allocation7 + $0x570] sm:$0xff]  ;;  %v1397_v8 = vld [vmem:[#allocation7 + $0x558] sm:$0xff] }
 0x367   :  { %v11879_v12 = vcombine.high %v1396_v59, %v1400_v7  ;;  %v11878_v29 = vcombine.low %v1396_v59, %v1400_v7  ;;  %v1441_v59 = vld [vmem:[#allocation7 + $0x6b8] sm:$0xff] }
 0x368   :  { %8099 = vmatpush1.bf16.msra.mxu0 %v11830_v48  ;;  %v11881_v48 = vcombine.high %v1397_v8, %v1401_v54 }
 0x369   :  { %8427 = vmatpush1.bf16.msra.mxu1 %v11832_v19  ;;  %8109 = vmatprep.subr.bf16.mxu0 %v11839_v20  ;;  %v1404_v19 = vld [vmem:[#allocation7 + $0x590] sm:$0xff] }
 0x36a   :  { %8437 = vmatprep.subr.bf16.mxu1 %v11841_v27  ;;  %v1408_v20 = vld [vmem:[#allocation7 + $0x5b0] sm:$0xff]  ;;  %v1405_v27 = vld [vmem:[#allocation7 + $0x598] sm:$0xff] }
 0x36b   :  { %8101 = vmatmul.mubr.bf16.vlgmr.msra.gmra.mrb[16].mxu0 %v14228_v11  ;;  %v11887_v60 = vcombine.high %v1404_v19, %v1408_v20  ;;  %v11889_v47 = vcombine.high %v1405_v27, %v1409_v0 }
 0x36c   :  { %8429 = vmatmul.mubr.bf16.vlgmr.msra.gmra.mrb[24].mxu1 %v14228_v11  ;;  %8110 = vmatpush1.bf16.msra.mxu0 %v11838_v26  ;;  %v11856_v11 = vcombine.low %v1373_v38, %v1377_v51  ;;  %v11880_v26 = vcombine.low %v1397_v8, %v1401_v54  ;;  %v11888_v38 = vcombine.low %v1405_v27, %v1409_v0 }
 0x36d   :  { %8141 = vmatprep.mubr.bf16.mxu0 %v14248_v24  ;;  %8438 = vmatpush1.bf16.msra.mxu1 %v11840_v4  ;;  %v1412_v4 = vld [vmem:[#allocation7 + $0x5d0] sm:$0xff] }
 0x36e   :  { %8469 = vmatprep.mubr.bf16.mxu1 %v14248_v24  ;;  %8111 = vmatprep.subr.bf16.mxu0 %v11847_v33  ;;  %v11862_v24 = vcombine.low %v1380_v31, %v1384_v3  ;;  %v1416_v33 = vld [vmem:[#allocation7 + $0x5f0] sm:$0xff]  ;;  %v1425_v31 = vld [vmem:[#allocation7 + $0x638] sm:$0xff] }
 0x36f   :  { %8439 = vmatprep.subr.bf16.mxu1 %v11849_v37  ;;  %v11886_v37 = vcombine.low %v1404_v19, %v1408_v20  ;;  %v11895_v51 = vcombine.high %v1412_v4, %v1416_v33  ;;  %v11894_v3 = vcombine.low %v1412_v4, %v1416_v33  ;;  %v1449_v19 = vld [vmem:[#allocation7 + $0x6f8] sm:$0xff] }
 0x370   :  { %8112 = vmatpush1.bf16.msra.mxu0 %v11846_v23  ;;  %v11897_v23 = vcombine.high %v1413_v34, %v1417_v35  ;;  %v1457_v4 = vld [vmem:[#allocation7 + $0x738] sm:$0xff] }
 0x371   :  { %8440 = vmatpush1.bf16.msra.mxu1 %v11848_v41  ;;  %8113 = vmatprep.subr.bf16.mxu0 %v11855_v42  ;;  %v1420_v41 = vld [vmem:[#allocation7 + $0x610] sm:$0xff] }
 0x372   :  { %8441 = vmatprep.subr.bf16.mxu1 %v11857_v44  ;;  %v1424_v42 = vld [vmem:[#allocation7 + $0x630] sm:$0xff]  ;;  %v1421_v44 = vld [vmem:[#allocation7 + $0x618] sm:$0xff] }
 0x373   :  { %v11903_v49 = vcombine.high %v1420_v41, %v1424_v42  ;;  %v11902_v63 = vcombine.low %v1420_v41, %v1424_v42  ;;  %v11904_v1 = vcombine.low %v1421_v44, %v1425_v31  ;;  %v1465_v41 = vld [vmem:[#allocation7 + $0x778] sm:$0xff] }
 0x374   :  { %8114 = vmatpush1.bf16.msra.mxu0 %v11854_v58  ;;  %v11905_v58 = vcombine.high %v1421_v44, %v1425_v31 }
 0x375   :  { %8442 = vmatpush1.bf16.msra.mxu1 %v11856_v11  ;;  %8115 = vmatprep.subr.bf16.mxu0 %v11863_v61  ;;  %v1428_v11 = vld [vmem:[#allocation7 + $0x650] sm:$0xff] }
 0x376   :  { %8443 = vmatprep.subr.bf16.mxu1 %v11865_v62  ;;  %v1432_v61 = vld [vmem:[#allocation7 + $0x670] sm:$0xff]  ;;  %v1429_v62 = vld [vmem:[#allocation7 + $0x658] sm:$0xff] }
 0x377   :  { %v11911_v18 = vcombine.high %v1428_v11, %v1432_v61  ;;  %v11910_v7 = vcombine.low %v1428_v11, %v1432_v61  ;;  %v11912_v8 = vcombine.low %v1429_v62, %v1433_v9  ;;  %v1473_v11 = vld [vmem:[#allocation7 + $0x7b8] sm:$0xff] }
 0x378   :  { %8116 = vmatpush1.bf16.msra.mxu0 %v11862_v24  ;;  %v11913_v24 = vcombine.high %v1429_v62, %v1433_v9 }
 0x379   :  { %8444 = vmatpush1.bf16.msra.mxu1 %v11864_v21  ;;  %8117 = vmatprep.subr.bf16.mxu0 %v11871_v13  ;;  %v1436_v21 = vld [vmem:[#allocation7 + $0x690] sm:$0xff] }
 0x37a   :  { %8445 = vmatprep.subr.bf16.mxu1 %v11873_v6  ;;  %v1440_v13 = vld [vmem:[#allocation7 + $0x6b0] sm:$0xff]  ;;  %v1437_v6 = vld [vmem:[#allocation7 + $0x698] sm:$0xff] }
 0x37b   :  { %v11919_v54 = vcombine.high %v1436_v21, %v1440_v13  ;;  %v11918_v20 = vcombine.low %v1436_v21, %v1440_v13  ;;  %v11920_v27 = vcombine.low %v1437_v6, %v1441_v59  ;;  %v1481_v21 = vld [vmem:[#allocation7 + $0x7f8] sm:$0xff] }
 0x37c   :  { %8118 = vmatpush1.bf16.msra.mxu0 %v11870_v14  ;;  %v11921_v14 = vcombine.high %v1437_v6, %v1441_v59 }
 0x37d   :  { %8446 = vmatpush1.bf16.msra.mxu1 %v11872_v15  ;;  %8119 = vmatprep.subr.bf16.mxu0 %v11879_v12  ;;  %v1444_v15 = vld [vmem:[#allocation7 + $0x6d0] sm:$0xff] }
 0x37e   :  { %8447 = vmatprep.subr.bf16.mxu1 %v11881_v48  ;;  %v1448_v12 = vld [vmem:[#allocation7 + $0x6f0] sm:$0xff]  ;;  %v1445_v48 = vld [vmem:[#allocation7 + $0x6d8] sm:$0xff] }
 0x37f   :  { %v11927_v0 = vcombine.high %v1444_v15, %v1448_v12  ;;  %v11926_v33 = vcombine.low %v1444_v15, %v1448_v12  ;;  %v11928_v34 = vcombine.low %v1445_v48, %v1449_v19  ;;  %v1489_v15 = vld [vmem:[#allocation7 + $0x838] sm:$0xff] }
 0x380   :  { %8120 = vmatpush1.bf16.msra.mxu0 %v11878_v29  ;;  %v11929_v29 = vcombine.high %v1445_v48, %v1449_v19 }
 0x381   :  { %8448 = vmatpush1.bf16.msra.mxu1 %v11880_v26  ;;  %8121 = vmatprep.subr.bf16.mxu0 %v11887_v60  ;;  %v1452_v26 = vld [vmem:[#allocation7 + $0x710] sm:$0xff] }
 0x382   :  { %8449 = vmatprep.subr.bf16.mxu1 %v11889_v47  ;;  %v1456_v60 = vld [vmem:[#allocation7 + $0x730] sm:$0xff]  ;;  %v1453_v47 = vld [vmem:[#allocation7 + $0x718] sm:$0xff] }
 0x383   :  { %v11935_v35 = vcombine.high %v1452_v26, %v1456_v60  ;;  %v11934_v42 = vcombine.low %v1452_v26, %v1456_v60  ;;  %v11936_v44 = vcombine.low %v1453_v47, %v1457_v4  ;;  %v1493_v26 = vld [vmem:[#allocation7 + $0x858] sm:$0xff] }
 0x384   :  { %8122 = vmatpush1.bf16.msra.mxu0 %v11886_v37  ;;  %v11937_v37 = vcombine.high %v1453_v47, %v1457_v4  ;;  %v1497_v60 = vld [vmem:[#allocation7 + $0x878] sm:$0xff] }
 0x385   :  { %8450 = vmatpush1.bf16.msra.mxu1 %v11888_v38  ;;  %8123 = vmatprep.subr.bf16.mxu0 %v11895_v51  ;;  %v1460_v38 = vld [vmem:[#allocation7 + $0x750] sm:$0xff] }
 0x386   :  { %8451 = vmatprep.subr.bf16.mxu1 %v11897_v23  ;;  %v1464_v51 = vld [vmem:[#allocation7 + $0x770] sm:$0xff]  ;;  %v1461_v23 = vld [vmem:[#allocation7 + $0x758] sm:$0xff] }
 0x387   :  { %v11943_v31 = vcombine.high %v1460_v38, %v1464_v51  ;;  %v11942_v61 = vcombine.low %v1460_v38, %v1464_v51  ;;  %v11944_v62 = vcombine.low %v1461_v23, %v1465_v41  ;;  %v1505_v38 = vld [vmem:[#allocation7 + $0x8b8] sm:$0xff] }
 0x388   :  { %8124 = vmatpush1.bf16.msra.mxu0 %v11894_v3  ;;  %v11945_v3 = vcombine.high %v1461_v23, %v1465_v41  ;;  %v11976_v23 = vcombine.low %v1493_v26, %v1497_v60 }
 0x389   :  { %8452 = vmatpush1.bf16.msra.mxu1 %v11896_v57  ;;  %8125 = vmatprep.subr.bf16.mxu0 %v11903_v49  ;;  %v1468_v57 = vld [vmem:[#allocation7 + $0x790] sm:$0xff] }
 0x38a   :  { %8453 = vmatprep.subr.bf16.mxu1 %v11905_v58  ;;  %v1472_v49 = vld [vmem:[#allocation7 + $0x7b0] sm:$0xff]  ;;  %v1469_v58 = vld [vmem:[#allocation7 + $0x798] sm:$0xff] }
 0x38b   :  { %v11951_v9 = vcombine.high %v1468_v57, %v1472_v49  ;;  %v11950_v13 = vcombine.low %v1468_v57, %v1472_v49  ;;  %v11952_v6 = vcombine.low %v1469_v58, %v1473_v11  ;;  %v1513_v57 = vld [vmem:[#allocation7 + $0x8f8] sm:$0xff] }
 0x38c   :  { %8126 = vmatpush1.bf16.msra.mxu0 %v11902_v63  ;;  %v11953_v63 = vcombine.high %v1469_v58, %v1473_v11 }
 0x38d   :  { %8454 = vmatpush1.bf16.msra.mxu1 %v11904_v1  ;;  %8127 = vmatprep.subr.bf16.mxu0 %v11911_v18  ;;  %v1476_v1 = vld [vmem:[#allocation7 + $0x7d0] sm:$0xff] }
 0x38e   :  { %8455 = vmatprep.subr.bf16.mxu1 %v11913_v24  ;;  %v1480_v18 = vld [vmem:[#allocation7 + $0x7f0] sm:$0xff]  ;;  %v1477_v24 = vld [vmem:[#allocation7 + $0x7d8] sm:$0xff] }
 0x38f   :  { %v11959_v59 = vcombine.high %v1476_v1, %v1480_v18  ;;  %v11958_v12 = vcombine.low %v1476_v1, %v1480_v18  ;;  %v11960_v48 = vcombine.low %v1477_v24, %v1481_v21 }
 0x390   :  { %8128 = vmatpush1.bf16.msra.mxu0 %v11910_v7  ;;  %v11961_v7 = vcombine.high %v1477_v24, %v1481_v21  ;;  %v1524_v21 = vld [vmem:[#allocation7 + $0x950] sm:$0xff] }
 0x391   :  { %8456 = vmatpush1.bf16.msra.mxu1 %v11912_v8  ;;  %8129 = vmatprep.subr.bf16.mxu0 %v11919_v54  ;;  %v1484_v8 = vld [vmem:[#allocation7 + $0x810] sm:$0xff] }
 0x392   :  { %8457 = vmatprep.subr.bf16.mxu1 %v11921_v14  ;;  %v1488_v54 = vld [vmem:[#allocation7 + $0x830] sm:$0xff]  ;;  %v1485_v14 = vld [vmem:[#allocation7 + $0x818] sm:$0xff] }
 0x393   :  { %v11967_v19 = vcombine.high %v1484_v8, %v1488_v54  ;;  %v11968_v47 = vcombine.low %v1485_v14, %v1489_v15 }
 0x394   :  { %8130 = vmatpush1.bf16.msra.mxu0 %v11918_v20  ;;  %v11969_v20 = vcombine.high %v1485_v14, %v1489_v15  ;;  %v1532_v15 = vld [vmem:[#allocation7 + $0x990] sm:$0xff] }
 0x395   :  { %8458 = vmatpush1.bf16.msra.mxu1 %v11920_v27  ;;  %8131 = vmatprep.subr.bf16.mxu0 %v11927_v0  ;;  %v1492_v27 = vld [vmem:[#allocation7 + $0x850] sm:$0xff] }
 0x396   :  { %8459 = vmatprep.subr.bf16.mxu1 %v11929_v29  ;;  %v1496_v0 = vld [vmem:[#allocation7 + $0x870] sm:$0xff]  ;;  %v11966_v29 = vcombine.low %v1484_v8, %v1488_v54 }
 0x397   :  { %v11975_v4 = vcombine.high %v1492_v27, %v1496_v0  ;;  %v11974_v51 = vcombine.low %v1492_v27, %v1496_v0 }
 0x398   :  { %8132 = vmatpush1.bf16.msra.mxu0 %v11926_v33  ;;  %v1500_v33 = vld [vmem:[#allocation7 + $0x890] sm:$0xff] }
 0x399   :  { %8460 = vmatpush1.bf16.msra.mxu1 %v11928_v34  ;;  %8133 = vmatprep.subr.bf16.mxu0 %v11935_v35  ;;  %v1504_v34 = vld [vmem:[#allocation7 + $0x8b0] sm:$0xff]  ;;  %v11977_v35 = vcombine.high %v1493_v26, %v1497_v60 }
 0x39a   :  { %8461 = vmatprep.subr.bf16.mxu1 %v11937_v37  ;;  %v1501_v37 = vld [vmem:[#allocation7 + $0x898] sm:$0xff]  ;;  %v11983_v41 = vcombine.high %v1500_v33, %v1504_v34  ;;  %v11982_v49 = vcombine.low %v1500_v33, %v1504_v34  ;;  %v1540_v26 = vld [vmem:[#allocation7 + $0x9d0] sm:$0xff] }
 0x39b   :  { %v1544_v60 = vld [vmem:[#allocation7 + $0x9f0] sm:$0xff] }
 0x39c   :  { %8134 = vmatpush1.bf16.msra.mxu0 %v11934_v42  ;;  %v11985_v42 = vcombine.high %v1501_v37, %v1505_v38 }
 0x39d   :  { %8462 = vmatpush1.bf16.msra.mxu1 %v11936_v44  ;;  %8135 = vmatprep.subr.bf16.mxu0 %v11943_v31  ;;  %v1508_v44 = vld [vmem:[#allocation7 + $0x8d0] sm:$0xff] }
 0x39e   :  { %8463 = vmatprep.subr.bf16.mxu1 %v11945_v3  ;;  %v1512_v31 = vld [vmem:[#allocation7 + $0x8f0] sm:$0xff]  ;;  %v1509_v3 = vld [vmem:[#allocation7 + $0x8d8] sm:$0xff] }
 0x39f   :  { %v11991_v58 = vcombine.high %v1508_v44, %v1512_v31  ;;  %v11993_v11 = vcombine.high %v1509_v3, %v1513_v57  ;;  %v11992_v1 = vcombine.low %v1509_v3, %v1513_v57  ;;  %v1556_v57 = vld [vmem:[#allocation7 + $0xa50] sm:$0xff] }
 0x3a0   :  { %8136 = vmatpush1.bf16.msra.mxu0 %v11942_v61  ;;  %v1516_v61 = vld [vmem:[#allocation7 + $0x910] sm:$0xff] }
 0x3a1   :  { %8464 = vmatpush1.bf16.msra.mxu1 %v11944_v62  ;;  %8137 = vmatprep.subr.bf16.mxu0 %v11951_v9  ;;  %v1520_v62 = vld [vmem:[#allocation7 + $0x930] sm:$0xff]  ;;  %v1517_v9 = vld [vmem:[#allocation7 + $0x918] sm:$0xff] }
 0x3a2   :  { %8465 = vmatprep.subr.bf16.mxu1 %v11953_v63  ;;  %v1521_v63 = vld [vmem:[#allocation7 + $0x938] sm:$0xff]  ;;  %v11999_v18 = vcombine.high %v1516_v61, %v1520_v62 }
 0x3a3   :  { %v12001_v24 = vcombine.high %v1517_v9, %v1521_v63  ;;  %v12000_v8 = vcombine.low %v1517_v9, %v1521_v63  ;;  %v1564_v63 = vld [vmem:[#allocation7 + $0xa90] sm:$0xff] }
 0x3a4   :  { %8138 = vmatpush1.bf16.msra.mxu0 %v11950_v13  ;;  %v1528_v13 = vld [vmem:[#allocation7 + $0x970] sm:$0xff] }
 0x3a5   :  { %8466 = vmatpush1.bf16.msra.mxu1 %v11952_v6  ;;  %8139 = vmatprep.subr.bf16.mxu0 %v11959_v59  ;;  %v1525_v6 = vld [vmem:[#allocation7 + $0x958] sm:$0xff]  ;;  %v12007_v54 = vcombine.high %v1524_v21, %v1528_v13 }
 0x3a6   :  { %8467 = vmatprep.subr.bf16.mxu1 %v11961_v7  ;;  %v1529_v59 = vld [vmem:[#allocation7 + $0x978] sm:$0xff]  ;;  %v11998_v7 = vcombine.low %v1516_v61, %v1520_v62 }
 0x3a7   :  { %v12009_v14 = vcombine.high %v1525_v6, %v1529_v59  ;;  %v12008_v27 = vcombine.low %v1525_v6, %v1529_v59  ;;  %v1572_v59 = vld [vmem:[#allocation7 + $0xad0] sm:$0xff] }
 0x3a8   :  { %8140 = vmatpush1.bf16.msra.mxu0 %v11958_v12  ;;  %v1536_v12 = vld [vmem:[#allocation7 + $0x9b0] sm:$0xff] }
 0x3a9   :  { %8468 = vmatpush1.bf16.msra.mxu1 %v11960_v48  ;;  %8150 = vmatprep.subr.bf16.mxu0 %v11967_v19  ;;  %v1533_v48 = vld [vmem:[#allocation7 + $0x998] sm:$0xff]  ;;  %v12015_v0 = vcombine.high %v1532_v15, %v1536_v12  ;;  %v12014_v33 = vcombine.low %v1532_v15, %v1536_v12 }
 0x3aa   :  { %8478 = vmatprep.subr.bf16.mxu1 %v11969_v20  ;;  %v1537_v19 = vld [vmem:[#allocation7 + $0x9b8] sm:$0xff]  ;;  %v12006_v20 = vcombine.low %v1524_v21, %v1528_v13 }
 0x3ab   :  { %8142 = vmatmul.mubr.bf16.vlgmr.msra.gmra.mrb[16].mxu0 %v14276_v2  ;;  %v12016_v34 = vcombine.low %v1533_v48, %v1537_v19 }
 0x3ac   :  { %8470 = vmatmul.mubr.bf16.vlgmr.msra.gmra.mrb[24].mxu1 %v14276_v2  ;;  %8151 = vmatpush1.bf16.msra.mxu0 %v11966_v29  ;;  %v11984_v2 = vcombine.low %v1501_v37, %v1505_v38  ;;  %v12017_v29 = vcombine.high %v1533_v48, %v1537_v19  ;;  %v1548_v38 = vld [vmem:[#allocation7 + $0xa10] sm:$0xff] }
 0x3ad   :  { %8182 = vmatprep.mubr.bf16.mxu0 %v14278_v16  ;;  %8479 = vmatpush1.bf16.msra.mxu1 %v11968_v47  ;;  %v1541_v47 = vld [vmem:[#allocation7 + $0x9d8] sm:$0xff]  ;;  %v1580_v19 = vld [vmem:[#allocation7 + $0xb10] sm:$0xff] }
 0x3ae   :  { %8510 = vmatprep.mubr.bf16.mxu1 %v14278_v16  ;;  %8152 = vmatprep.subr.bf16.mxu0 %v11975_v4  ;;  %v11990_v16 = vcombine.low %v1508_v44, %v1512_v31  ;;  %v1545_v4 = vld [vmem:[#allocation7 + $0x9f8] sm:$0xff] }
 0x3af   :  { %8480 = vmatprep.subr.bf16.mxu1 %v11977_v35  ;;  %v12023_v35 = vcombine.high %v1540_v26, %v1544_v60  ;;  %v12025_v37 = vcombine.high %v1541_v47, %v1545_v4  ;;  %v12024_v44 = vcombine.low %v1541_v47, %v1545_v4  ;;  %v1588_v4 = vld [vmem:[#allocation7 + $0xb50] sm:$0xff] }
 0x3b0   :  { %8153 = vmatpush1.bf16.msra.mxu0 %v11974_v51  ;;  %v1552_v51 = vld [vmem:[#allocation7 + $0xa30] sm:$0xff] }
 0x3b1   :  { %8481 = vmatpush1.bf16.msra.mxu1 %v11976_v23  ;;  %8154 = vmatprep.subr.bf16.mxu0 %v11983_v41  ;;  %v1549_v23 = vld [vmem:[#allocation7 + $0xa18] sm:$0xff]  ;;  %v12031_v31 = vcombine.high %v1548_v38, %v1552_v51 }
 0x3b2   :  { %8482 = vmatprep.subr.bf16.mxu1 %v11985_v42  ;;  %v1553_v41 = vld [vmem:[#allocation7 + $0xa38] sm:$0xff]  ;;  %v12022_v42 = vcombine.low %v1540_v26, %v1544_v60 }
 0x3b3   :  { %v12033_v3 = vcombine.high %v1549_v23, %v1553_v41  ;;  %v12032_v61 = vcombine.low %v1549_v23, %v1553_v41  ;;  %v1596_v41 = vld [vmem:[#allocation7 + $0xb90] sm:$0xff] }
 0x3b4   :  { %8155 = vmatpush1.bf16.msra.mxu0 %v11982_v49  ;;  %v1560_v49 = vld [vmem:[#allocation7 + $0xa70] sm:$0xff] }
 0x3b5   :  { %8483 = vmatpush1.bf16.msra.mxu1 %v11984_v2  ;;  %8156 = vmatprep.subr.bf16.mxu0 %v11991_v58  ;;  %v1557_v2 = vld [vmem:[#allocation7 + $0xa58] sm:$0xff]  ;;  %v12039_v62 = vcombine.high %v1556_v57, %v1560_v49 }
 0x3b6   :  { %8484 = vmatprep.subr.bf16.mxu1 %v11993_v11  ;;  %v1561_v58 = vld [vmem:[#allocation7 + $0xa78] sm:$0xff]  ;;  %v12030_v11 = vcombine.low %v1548_v38, %v1552_v51 }
 0x3b7   :  { %v12041_v9 = vcombine.high %v1557_v2, %v1561_v58  ;;  %v12040_v21 = vcombine.low %v1557_v2, %v1561_v58  ;;  %v1604_v58 = vld [vmem:[#allocation7 + $0xbd0] sm:$0xff] }
 0x3b8   :  { %8157 = vmatpush1.bf16.msra.mxu0 %v11990_v16  ;;  %v1568_v16 = vld [vmem:[#allocation7 + $0xab0] sm:$0xff] }
 0x3b9   :  { %8485 = vmatpush1.bf16.msra.mxu1 %v11992_v1  ;;  %8158 = vmatprep.subr.bf16.mxu0 %v11999_v18  ;;  %v1565_v1 = vld [vmem:[#allocation7 + $0xa98] sm:$0xff]  ;;  %v12047_v13 = vcombine.high %v1564_v63, %v1568_v16 }
 0x3ba   :  { %8486 = vmatprep.subr.bf16.mxu1 %v12001_v24  ;;  %v1569_v18 = vld [vmem:[#allocation7 + $0xab8] sm:$0xff]  ;;  %v12038_v24 = vcombine.low %v1556_v57, %v1560_v49 }
 0x3bb   :  { %v12049_v6 = vcombine.high %v1565_v1, %v1569_v18  ;;  %v12048_v15 = vcombine.low %v1565_v1, %v1569_v18  ;;  %v1612_v18 = vld [vmem:[#allocation7 + $0xc10] sm:$0xff] }
 0x3bc   :  { %8159 = vmatpush1.bf16.msra.mxu0 %v11998_v7  ;;  %v1576_v7 = vld [vmem:[#allocation7 + $0xaf0] sm:$0xff] }
 0x3bd   :  { %8487 = vmatpush1.bf16.msra.mxu1 %v12000_v8  ;;  %8160 = vmatprep.subr.bf16.mxu0 %v12007_v54  ;;  %v1573_v8 = vld [vmem:[#allocation7 + $0xad8] sm:$0xff]  ;;  %v12055_v12 = vcombine.high %v1572_v59, %v1576_v7 }
 0x3be   :  { %8488 = vmatprep.subr.bf16.mxu1 %v12009_v14  ;;  %v1577_v54 = vld [vmem:[#allocation7 + $0xaf8] sm:$0xff]  ;;  %v12046_v14 = vcombine.low %v1564_v63, %v1568_v16 }
 0x3bf   :  { %v12057_v48 = vcombine.high %v1573_v8, %v1577_v54  ;;  %v12056_v26 = vcombine.low %v1573_v8, %v1577_v54  ;;  %v1620_v54 = vld [vmem:[#allocation7 + $0xc50] sm:$0xff] }
 0x3c0   :  { %8161 = vmatpush1.bf16.msra.mxu0 %v12006_v20  ;;  %v1584_v20 = vld [vmem:[#allocation7 + $0xb30] sm:$0xff] }
 0x3c1   :  { %8489 = vmatpush1.bf16.msra.mxu1 %v12008_v27  ;;  %8162 = vmatprep.subr.bf16.mxu0 %v12015_v0  ;;  %v1581_v27 = vld [vmem:[#allocation7 + $0xb18] sm:$0xff]  ;;  %v12063_v60 = vcombine.high %v1580_v19, %v1584_v20 }
 0x3c2   :  { %8490 = vmatprep.subr.bf16.mxu1 %v12017_v29  ;;  %v1585_v0 = vld [vmem:[#allocation7 + $0xb38] sm:$0xff]  ;;  %v12054_v29 = vcombine.low %v1572_v59, %v1576_v7 }
 0x3c3   :  { %v12065_v47 = vcombine.high %v1581_v27, %v1585_v0  ;;  %v12064_v38 = vcombine.low %v1581_v27, %v1585_v0  ;;  %v1628_v27 = vld [vmem:[#allocation7 + $0xc90] sm:$0xff] }
 0x3c4   :  { %8163 = vmatpush1.bf16.msra.mxu0 %v12014_v33  ;;  %v1592_v33 = vld [vmem:[#allocation7 + $0xb70] sm:$0xff] }
 0x3c5   :  { %8491 = vmatpush1.bf16.msra.mxu1 %v12016_v34  ;;  %8164 = vmatprep.subr.bf16.mxu0 %v12023_v35  ;;  %v1589_v34 = vld [vmem:[#allocation7 + $0xb58] sm:$0xff]  ;;  %v12071_v51 = vcombine.high %v1588_v4, %v1592_v33  ;;  %v1632_v0 = vld [vmem:[#allocation7 + $0xcb0] sm:$0xff] }
 0x3c6   :  { %8492 = vmatprep.subr.bf16.mxu1 %v12025_v37  ;;  %v1593_v35 = vld [vmem:[#allocation7 + $0xb78] sm:$0xff]  ;;  %v12062_v37 = vcombine.low %v1580_v19, %v1584_v20 }
 0x3c7   :  { %v12073_v23 = vcombine.high %v1589_v34, %v1593_v35  ;;  %v12072_v57 = vcombine.low %v1589_v34, %v1593_v35  ;;  %v1636_v35 = vld [vmem:[#allocation7 + $0xcd0] sm:$0xff] }
 0x3c8   :  { %8165 = vmatpush1.bf16.msra.mxu0 %v12022_v42  ;;  %v1600_v42 = vld [vmem:[#allocation7 + $0xbb0] sm:$0xff] }
 0x3c9   :  { %8493 = vmatpush1.bf16.msra.mxu1 %v12024_v44  ;;  %8166 = vmatprep.subr.bf16.mxu0 %v12031_v31  ;;  %v1597_v44 = vld [vmem:[#allocation7 + $0xb98] sm:$0xff]  ;;  %v12079_v49 = vcombine.high %v1596_v41, %v1600_v42 }
 0x3ca   :  { %8494 = vmatprep.subr.bf16.mxu1 %v12033_v3  ;;  %v1601_v31 = vld [vmem:[#allocation7 + $0xbb8] sm:$0xff]  ;;  %v12070_v3 = vcombine.low %v1588_v4, %v1592_v33  ;;  %v12111_v33 = vcombine.high %v1628_v27, %v1632_v0 }
 0x3cb   :  { %v12081_v2 = vcombine.high %v1597_v44, %v1601_v31  ;;  %v12080_v63 = vcombine.low %v1597_v44, %v1601_v31  ;;  %v1644_v44 = vld [vmem:[#allocation7 + $0xd10] sm:$0xff] }
 0x3cc   :  { %8167 = vmatpush1.bf16.msra.mxu0 %v12030_v11  ;;  %v1608_v11 = vld [vmem:[#allocation7 + $0xbf0] sm:$0xff] }
 0x3cd   :  { %8495 = vmatpush1.bf16.msra.mxu1 %v12032_v61  ;;  %8168 = vmatprep.subr.bf16.mxu0 %v12039_v62  ;;  %v1605_v61 = vld [vmem:[#allocation7 + $0xbd8] sm:$0xff]  ;;  %v12087_v16 = vcombine.high %v1604_v58, %v1608_v11  ;;  %v1648_v31 = vld [vmem:[#allocation7 + $0xd30] sm:$0xff] }
 0x3ce   :  { %8496 = vmatprep.subr.bf16.mxu1 %v12041_v9  ;;  %v1609_v62 = vld [vmem:[#allocation7 + $0xbf8] sm:$0xff]  ;;  %v12078_v9 = vcombine.low %v1596_v41, %v1600_v42 }
 0x3cf   :  { %v12089_v1 = vcombine.high %v1605_v61, %v1609_v62  ;;  %v12088_v59 = vcombine.low %v1605_v61, %v1609_v62  ;;  %v1656_v61 = vld [vmem:[#allocation7 + $0xd70] sm:$0xff]  ;;  %v1653_v62 = vld [vmem:[#allocation7 + $0xd58] sm:$0xff] }
 0x3d0   :  { %8169 = vmatpush1.bf16.msra.mxu0 %v12038_v24  ;;  %v1616_v24 = vld [vmem:[#allocation7 + $0xc30] sm:$0xff] }
 0x3d1   :  { %8497 = vmatpush1.bf16.msra.mxu1 %v12040_v21  ;;  %8170 = vmatprep.subr.bf16.mxu0 %v12047_v13  ;;  %v1613_v21 = vld [vmem:[#allocation7 + $0xc18] sm:$0xff]  ;;  %v12095_v7 = vcombine.high %v1612_v18, %v1616_v24 }
 0x3d2   :  { %8498 = vmatprep.subr.bf16.mxu1 %v12049_v6  ;;  %v1617_v13 = vld [vmem:[#allocation7 + $0xc38] sm:$0xff]  ;;  %v12086_v6 = vcombine.low %v1604_v58, %v1608_v11  ;;  %v1652_v11 = vld [vmem:[#allocation7 + $0xd50] sm:$0xff] }
 0x3d3   :  { %v12097_v8 = vcombine.high %v1613_v21, %v1617_v13  ;;  %v12096_v19 = vcombine.low %v1613_v21, %v1617_v13  ;;  %v1664_v21 = vld [vmem:[#allocation7 + $0xdb0] sm:$0xff]  ;;  %v1661_v13 = vld [vmem:[#allocation7 + $0xd98] sm:$0xff] }
 0x3d4   :  { %8171 = vmatpush1.bf16.msra.mxu0 %v12046_v14  ;;  %v1624_v14 = vld [vmem:[#allocation7 + $0xc70] sm:$0xff] }
 0x3d5   :  { %8499 = vmatpush1.bf16.msra.mxu1 %v12048_v15  ;;  %8172 = vmatprep.subr.bf16.mxu0 %v12055_v12  ;;  %v12094_v15 = vcombine.low %v1612_v18, %v1616_v24  ;;  %v1621_v12 = vld [vmem:[#allocation7 + $0xc58] sm:$0xff]  ;;  %v12103_v20 = vcombine.high %v1620_v54, %v1624_v14  ;;  %v1660_v24 = vld [vmem:[#allocation7 + $0xd90] sm:$0xff] }
 0x3d6   :  { %8500 = vmatprep.subr.bf16.mxu1 %v12057_v48  ;;  %v1625_v48 = vld [vmem:[#allocation7 + $0xc78] sm:$0xff] }
 0x3d7   :  { %v12104_v4 = vcombine.low %v1621_v12, %v1625_v48 }
 0x3d8   :  { %8173 = vmatpush1.bf16.msra.mxu0 %v12054_v29  ;;  %v12105_v29 = vcombine.high %v1621_v12, %v1625_v48  ;;  %v1672_v12 = vld [vmem:[#allocation7 + $0xdf0] sm:$0xff] }
 0x3d9   :  { %8501 = vmatpush1.bf16.msra.mxu1 %v12056_v26  ;;  %8174 = vmatprep.subr.bf16.mxu0 %v12063_v60  ;;  %v1629_v26 = vld [vmem:[#allocation7 + $0xc98] sm:$0xff] }
 0x3da   :  { %8502 = vmatprep.subr.bf16.mxu1 %v12065_v47  ;;  %v1633_v60 = vld [vmem:[#allocation7 + $0xcb8] sm:$0xff]  ;;  %v12102_v47 = vcombine.low %v1620_v54, %v1624_v14 }
 0x3db   :  { %v12113_v34 = vcombine.high %v1629_v26, %v1633_v60 }
 0x3dc   :  { %8175 = vmatpush1.bf16.msra.mxu0 %v12062_v37  ;;  %v1640_v37 = vld [vmem:[#allocation7 + $0xcf0] sm:$0xff] }
 0x3dd   :  { %8503 = vmatpush1.bf16.msra.mxu1 %v12064_v38  ;;  %8176 = vmatprep.subr.bf16.mxu0 %v12071_v51  ;;  %v1637_v38 = vld [vmem:[#allocation7 + $0xcd8] sm:$0xff]  ;;  %v12119_v41 = vcombine.high %v1636_v35, %v1640_v37 }
 0x3de   :  { %8504 = vmatprep.subr.bf16.mxu1 %v12073_v23  ;;  %v1641_v51 = vld [vmem:[#allocation7 + $0xcf8] sm:$0xff]  ;;  %v12110_v23 = vcombine.low %v1628_v27, %v1632_v0 }
 0x3df   :  { %v12121_v42 = vcombine.high %v1637_v38, %v1641_v51  ;;  %v1673_v27 = vld [vmem:[#allocation7 + $0xdf8] sm:$0xff] }
 0x3e0   :  { %8177 = vmatpush1.bf16.msra.mxu0 %v12070_v3  ;;  %v1645_v3 = vld [vmem:[#allocation7 + $0xd18] sm:$0xff] }
 0x3e1   :  { %8505 = vmatpush1.bf16.msra.mxu1 %v12072_v57  ;;  %8178 = vmatprep.subr.bf16.mxu0 %v12079_v49  ;;  %v1649_v57 = vld [vmem:[#allocation7 + $0xd38] sm:$0xff]  ;;  %v12120_v49 = vcombine.low %v1637_v38, %v1641_v51  ;;  %v1680_v38 = vld [vmem:[#allocation7 + $0xe30] sm:$0xff] }
 0x3e2   :  { %8506 = vmatprep.subr.bf16.mxu1 %v12081_v2  ;;  %v12127_v2 = vcombine.high %v1644_v44, %v1648_v31  ;;  %v12129_v58 = vcombine.high %v1645_v3, %v1649_v57  ;;  %v1677_v51 = vld [vmem:[#allocation7 + $0xe18] sm:$0xff] }
 0x3e4   :  { %8179 = vmatpush1.bf16.msra.mxu0 %v12078_v9  ;;  %v1657_v9 = vld [vmem:[#allocation7 + $0xd78] sm:$0xff] }
 0x3e5   :  { %8507 = vmatpush1.bf16.msra.mxu1 %v12080_v63  ;;  %8180 = vmatprep.subr.bf16.mxu0 %v12087_v16  ;;  %v12126_v63 = vcombine.low %v1644_v44, %v1648_v31  ;;  %v12128_v16 = vcombine.low %v1645_v3, %v1649_v57  ;;  %v12137_v18 = vcombine.high %v1653_v62, %v1657_v9  ;;  %v1684_v31 = vld [vmem:[#allocation7 + $0xe50] sm:$0xff]  ;;  %v1685_v57 = vld [vmem:[#allocation7 + $0xe58] sm:$0xff] }
 0x3e6   :  { %8508 = vmatprep.subr.bf16.mxu1 %v12089_v1  ;;  %v12135_v1 = vcombine.high %v1652_v11, %v1656_v61  ;;  %v1688_v3 = vld [vmem:[#allocation7 + $0xe70] sm:$0xff] }
 0x3e8   :  { %8181 = vmatpush1.bf16.msra.mxu0 %v12086_v6  ;;  %v1665_v6 = vld [vmem:[#allocation7 + $0xdb8] sm:$0xff] }
 0x3e9   :  { %8509 = vmatpush1.bf16.msra.mxu1 %v12088_v59  ;;  %8191 = vmatprep.subr.bf16.mxu0 %v12095_v7  ;;  %v12134_v59 = vcombine.low %v1652_v11, %v1656_v61  ;;  %v12136_v7 = vcombine.low %v1653_v62, %v1657_v9  ;;  %v12145_v14 = vcombine.high %v1661_v13, %v1665_v6  ;;  %v1692_v61 = vld [vmem:[#allocation7 + $0xe90] sm:$0xff]  ;;  %v1693_v9 = vld [vmem:[#allocation7 + $0xe98] sm:$0xff] }
 0x3ea   :  { %8519 = vmatprep.subr.bf16.mxu1 %v12097_v8  ;;  %v12143_v8 = vcombine.high %v1660_v24, %v1664_v21  ;;  %v1696_v62 = vld [vmem:[#allocation7 + $0xeb0] sm:$0xff] }
 0x3eb   :  { %8183 = vmatmul.mubr.bf16.vlgmr.msra.gmra.mrb[16].mxu0 %v14304_v30 }
 0x3ec   :  { %8511 = vmatmul.mubr.bf16.vlgmr.msra.gmra.mrb[24].mxu1 %v14304_v30  ;;  %8192 = vmatpush1.bf16.msra.mxu0 %v12094_v15  ;;  %v12112_v30 = vcombine.low %v1629_v26, %v1633_v60  ;;  %v1668_v15 = vld [vmem:[#allocation7 + $0xdd0] sm:$0xff]  ;;  %v12142_v26 = vcombine.low %v1660_v24, %v1664_v21 }
 0x3ed   :  { %8223 = vmatprep.mubr.bf16.mxu0 %v14306_v36  ;;  %8520 = vmatpush1.bf16.msra.mxu1 %v12096_v19  ;;  %v1700_v21 = vld [vmem:[#allocation7 + $0xed0] sm:$0xff] }
 0x3ee   :  { %8551 = vmatprep.mubr.bf16.mxu1 %v14306_v36  ;;  %8193 = vmatprep.subr.bf16.mxu0 %v12103_v20  ;;  %v12118_v36 = vcombine.low %v1636_v35, %v1640_v37  ;;  %v1669_v20 = vld [vmem:[#allocation7 + $0xdd8] sm:$0xff]  ;;  %v1676_v37 = vld [vmem:[#allocation7 + $0xe10] sm:$0xff] }
 0x3ef   :  { %8521 = vmatprep.subr.bf16.mxu1 %v12105_v29  ;;  %v12153_v35 = vcombine.high %v1669_v20, %v1673_v27 }
 0x3f0   :  { %8194 = vmatpush1.bf16.msra.mxu0 %v12102_v47 }
 0x3f1   :  { %8522 = vmatpush1.bf16.msra.mxu1 %v12104_v4  ;;  %8195 = vmatprep.subr.bf16.mxu0 %v12111_v33  ;;  %v12144_v4 = vcombine.low %v1661_v13, %v1665_v6  ;;  %v12151_v33 = vcombine.high %v1668_v15, %v1672_v12  ;;  %v1704_v13 = vld [vmem:[#allocation7 + $0xef0] sm:$0xff]  ;;  %v1701_v6 = vld [vmem:[#allocation7 + $0xed8] sm:$0xff] }
 0x3f2   :  { %8523 = vmatprep.subr.bf16.mxu1 %v12113_v34 }
 0x3f4   :  { %8196 = vmatpush1.bf16.msra.mxu0 %v12110_v23  ;;  %v1681_v23 = vld [vmem:[#allocation7 + $0xe38] sm:$0xff] }
 0x3f5   :  { %8524 = vmatpush1.bf16.msra.mxu1 %v12112_v30  ;;  %8197 = vmatprep.subr.bf16.mxu0 %v12119_v41  ;;  %v12150_v30 = vcombine.low %v1668_v15, %v1672_v12  ;;  %v12152_v41 = vcombine.low %v1669_v20, %v1673_v27  ;;  %v12161_v44 = vcombine.high %v1677_v51, %v1681_v23  ;;  %v1708_v12 = vld [vmem:[#allocation7 + $0xf10] sm:$0xff]  ;;  %v1709_v27 = vld [vmem:[#allocation7 + $0xf18] sm:$0xff] }
 0x3f6   :  { %8525 = vmatprep.subr.bf16.mxu1 %v12121_v42  ;;  %v12159_v42 = vcombine.high %v1676_v37, %v1680_v38  ;;  %v1712_v20 = vld [vmem:[#allocation7 + $0xf30] sm:$0xff] }
 0x3f8   :  { %8198 = vmatpush1.bf16.msra.mxu0 %v12118_v36  ;;  %v1689_v36 = vld [vmem:[#allocation7 + $0xe78] sm:$0xff] }
 0x3f9   :  { %8526 = vmatpush1.bf16.msra.mxu1 %v12120_v49  ;;  %8199 = vmatprep.subr.bf16.mxu0 %v12127_v2  ;;  %v12158_v49 = vcombine.low %v1676_v37, %v1680_v38  ;;  %v12160_v2 = vcombine.low %v1677_v51, %v1681_v23  ;;  %v12169_v11 = vcombine.high %v1685_v57, %v1689_v36  ;;  %v1721_v37 = vld [vmem:[#allocation7 + $0xf78] sm:$0xff] }
 0x3fa   :  { %8527 = vmatprep.subr.bf16.mxu1 %v12129_v58  ;;  %v12167_v58 = vcombine.high %v1684_v31, %v1688_v3  ;;  %v12190_v38 = vcombine.low %v1708_v12, %v1712_v20 }
 0x3fc   :  { %8200 = vmatpush1.bf16.msra.mxu0 %v12126_v63  ;;  %v1697_v63 = vld [vmem:[#allocation7 + $0xeb8] sm:$0xff] }
 0x3fd   :  { %8528 = vmatpush1.bf16.msra.mxu1 %v12128_v16  ;;  %8201 = vmatprep.subr.bf16.mxu0 %v12135_v1  ;;  %v12166_v16 = vcombine.low %v1684_v31, %v1688_v3  ;;  %v12168_v1 = vcombine.low %v1685_v57, %v1689_v36  ;;  %v12177_v24 = vcombine.high %v1693_v9, %v1697_v63  ;;  %v1729_v31 = vld [vmem:[#allocation7 + $0xfb8] sm:$0xff] }
 0x3fe   :  { %v14395_v54 = vpop.f32.mrb[12].mxu0  ;;  %8529 = vmatprep.subr.bf16.mxu1 %v12137_v18  ;;  %v12175_v18 = vcombine.high %v1692_v61, %v1696_v62 }
 0x3ff   :  { %v14397_v48 = vpop.f32.mrb[20].mxu1  ;;  %v14399_v19 = vpop.f32.mrb[13].mxu0 }
 0x400   :  { %v14401_v0 = vpop.f32.mrb[21].mxu1  ;;  %v7737_v29 = vpop.f32.mrb[14].mxu0  ;;  %8202 = vmatpush1.bf16.msra.mxu0 %v12134_v59  ;;  %v1705_v59 = vld [vmem:[#allocation7 + $0xef8] sm:$0xff] }
 0x401   :  { %v8065_v60 = vpop.f32.mrb[22].mxu1  ;;  %8530 = vmatpush1.bf16.msra.mxu1 %v12136_v7  ;;  %v7738_v47 = vpop.f32.mrb[15].mxu0  ;;  %8203 = vmatprep.subr.bf16.mxu0 %v12143_v8  ;;  %v12174_v7 = vcombine.low %v1692_v61, %v1696_v62  ;;  %v12176_v8 = vcombine.low %v1693_v9, %v1697_v63  ;;  %v12185_v15 = vcombine.high %v1701_v6, %v1705_v59  ;;  %v1713_v29 = vld [vmem:[#allocation7 + $0xf38] sm:$0xff] }
 0x402   :  { %v8066_v34 = vpop.f32.mrb[23].mxu1  ;;  %8531 = vmatprep.subr.bf16.mxu1 %v12145_v14  ;;  %v12183_v14 = vcombine.high %v1700_v21, %v1704_v13  ;;  %v12184_v60 = vcombine.low %v1701_v6, %v1705_v59  ;;  %v12191_v47 = vcombine.high %v1708_v12, %v1712_v20  ;;  %v12192_v51 = vcombine.low %v1709_v27, %v1713_v29  ;;  %v1737_v61 = vld [vmem:[#allocation7 + $0xff8] sm:$0xff] }
 0x403   :  { %v1720_v34 = vld [vmem:[#allocation7 + $0xf70] sm:$0xff]  ;;  %v1749_v12 = vld [vmem:[#allocation7 + $0x1058] sm:$0xff] }
 0x404   :  { %8204 = vmatpush1.bf16.msra.mxu0 %v12142_v26  ;;  %v12182_v26 = vcombine.low %v1700_v21, %v1704_v13  ;;  %v1745_v21 = vld [vmem:[#allocation7 + $0x1038] sm:$0xff] }
 0x405   :  { %8532 = vmatpush1.bf16.msra.mxu1 %v12144_v4  ;;  %8205 = vmatprep.subr.bf16.mxu0 %v12151_v33  ;;  %v12193_v4 = vcombine.high %v1709_v27, %v1713_v29  ;;  %v1716_v33 = vld [vmem:[#allocation7 + $0xf50] sm:$0xff]  ;;  %v1753_v20 = vld [vmem:[#allocation7 + $0x1078] sm:$0xff] }
 0x406   :  { %8533 = vmatprep.subr.bf16.mxu1 %v12153_v35  ;;  %v1717_v35 = vld [vmem:[#allocation7 + $0xf58] sm:$0xff]  ;;  %v12199_v23 = vcombine.high %v1716_v33, %v1720_v34  ;;  %v12198_v3 = vcombine.low %v1716_v33, %v1720_v34 }
 0x407   :  { %v12200_v57 = vcombine.low %v1717_v35, %v1721_v37  ;;  %v1761_v33 = vld [vmem:[#allocation7 + $0x10b8] sm:$0xff] }
 0x408   :  { %8206 = vmatpush1.bf16.msra.mxu0 %v12150_v30  ;;  %v12201_v30 = vcombine.high %v1717_v35, %v1721_v37  ;;  %v12232_v35 = vcombine.low %v1749_v12, %v1753_v20 }
 0x409   :  { %8534 = vmatpush1.bf16.msra.mxu1 %v12152_v41  ;;  %8207 = vmatprep.subr.bf16.mxu0 %v12159_v42  ;;  %v1724_v41 = vld [vmem:[#allocation7 + $0xf90] sm:$0xff] }
 0x40a   :  { %8535 = vmatprep.subr.bf16.mxu1 %v12161_v44  ;;  %v1728_v42 = vld [vmem:[#allocation7 + $0xfb0] sm:$0xff]  ;;  %v1725_v44 = vld [vmem:[#allocation7 + $0xf98] sm:$0xff] }
 0x40b   :  { %v12207_v36 = vcombine.high %v1724_v41, %v1728_v42  ;;  %v12206_v62 = vcombine.low %v1724_v41, %v1728_v42  ;;  %v12208_v9 = vcombine.low %v1725_v44, %v1729_v31  ;;  %v1769_v41 = vld [vmem:[#allocation7 + $0x10f8] sm:$0xff] }
 0x40c   :  { %8208 = vmatpush1.bf16.msra.mxu0 %v12158_v49  ;;  %v12209_v49 = vcombine.high %v1725_v44, %v1729_v31 }
 0x40d   :  { %8536 = vmatpush1.bf16.msra.mxu1 %v12160_v2  ;;  %8209 = vmatprep.subr.bf16.mxu0 %v12167_v58  ;;  %v1732_v2 = vld [vmem:[#allocation7 + $0xfd0] sm:$0xff] }
 0x40e   :  { %8537 = vmatprep.subr.bf16.mxu1 %v12169_v11  ;;  %v1736_v58 = vld [vmem:[#allocation7 + $0xff0] sm:$0xff]  ;;  %v1733_v11 = vld [vmem:[#allocation7 + $0xfd8] sm:$0xff] }
 0x40f   :  { %v12215_v63 = vcombine.high %v1732_v2, %v1736_v58  ;;  %v12214_v13 = vcombine.low %v1732_v2, %v1736_v58  ;;  %v12216_v6 = vcombine.low %v1733_v11, %v1737_v61 }
 0x410   :  { %8210 = vmatpush1.bf16.msra.mxu0 %v12166_v16  ;;  %v12217_v16 = vcombine.high %v1733_v11, %v1737_v61  ;;  %v1780_v61 = vld [vmem:[#allocation7 + $0x1150] sm:$0xff] }
 0x411   :  { %8538 = vmatpush1.bf16.msra.mxu1 %v12168_v1  ;;  %8211 = vmatprep.subr.bf16.mxu0 %v12175_v18  ;;  %v1740_v1 = vld [vmem:[#allocation7 + $0x1010] sm:$0xff] }
 0x412   :  { %8539 = vmatprep.subr.bf16.mxu1 %v12177_v24  ;;  %v1744_v18 = vld [vmem:[#allocation7 + $0x1030] sm:$0xff]  ;;  %v1741_v24 = vld [vmem:[#allocation7 + $0x1018] sm:$0xff] }
 0x413   :  { %v12223_v59 = vcombine.high %v1740_v1, %v1744_v18  ;;  %v12224_v27 = vcombine.low %v1741_v24, %v1745_v21 }
 0x414   :  { %8212 = vmatpush1.bf16.msra.mxu0 %v12174_v7  ;;  %v12225_v7 = vcombine.high %v1741_v24, %v1745_v21  ;;  %v1788_v21 = vld [vmem:[#allocation7 + $0x1190] sm:$0xff] }
 0x415   :  { %8540 = vmatpush1.bf16.msra.mxu1 %v12176_v8  ;;  %8213 = vmatprep.subr.bf16.mxu0 %v12183_v14  ;;  %v1748_v8 = vld [vmem:[#allocation7 + $0x1050] sm:$0xff] }
 0x416   :  { %8541 = vmatprep.subr.bf16.mxu1 %v12185_v15  ;;  %v1752_v14 = vld [vmem:[#allocation7 + $0x1070] sm:$0xff]  ;;  %v12222_v15 = vcombine.low %v1740_v1, %v1744_v18 }
 0x417   :  { %v12231_v29 = vcombine.high %v1748_v8, %v1752_v14  ;;  %v12230_v34 = vcombine.low %v1748_v8, %v1752_v14 }
 0x418   :  { %8214 = vmatpush1.bf16.msra.mxu0 %v12182_v26  ;;  %v1756_v26 = vld [vmem:[#allocation7 + $0x1090] sm:$0xff] }
 0x419   :  { %8542 = vmatpush1.bf16.msra.mxu1 %v12184_v60  ;;  %8215 = vmatprep.subr.bf16.mxu0 %v12191_v47  ;;  %v1760_v60 = vld [vmem:[#allocation7 + $0x10b0] sm:$0xff]  ;;  %v12233_v47 = vcombine.high %v1749_v12, %v1753_v20 }
 0x41a   :  { %8543 = vmatprep.subr.bf16.mxu1 %v12193_v4  ;;  %v1757_v4 = vld [vmem:[#allocation7 + $0x1098] sm:$0xff]  ;;  %v12239_v37 = vcombine.high %v1756_v26, %v1760_v60  ;;  %v12238_v42 = vcombine.low %v1756_v26, %v1760_v60  ;;  %v1796_v12 = vld [vmem:[#allocation7 + $0x11d0] sm:$0xff] }
 0x41b   :  { %v1800_v20 = vld [vmem:[#allocation7 + $0x11f0] sm:$0xff] }
 0x41c   :  { %8216 = vmatpush1.bf16.msra.mxu0 %v12190_v38  ;;  %v12241_v38 = vcombine.high %v1757_v4, %v1761_v33 }
 0x41d   :  { %8544 = vmatpush1.bf16.msra.mxu1 %v12192_v51  ;;  %8217 = vmatprep.subr.bf16.mxu0 %v12199_v23  ;;  %v1764_v51 = vld [vmem:[#allocation7 + $0x10d0] sm:$0xff] }
 0x41e   :  { %8545 = vmatprep.subr.bf16.mxu1 %v12201_v30  ;;  %v1768_v23 = vld [vmem:[#allocation7 + $0x10f0] sm:$0xff]  ;;  %v1765_v30 = vld [vmem:[#allocation7 + $0x10d8] sm:$0xff] }
 0x41f   :  { %v12247_v44 = vcombine.high %v1764_v51, %v1768_v23  ;;  %v12249_v31 = vcombine.high %v1765_v30, %v1769_v41  ;;  %v12248_v2 = vcombine.low %v1765_v30, %v1769_v41  ;;  %v1812_v41 = vld [vmem:[#allocation7 + $0x1250] sm:$0xff] }
 0x420   :  { %8218 = vmatpush1.bf16.msra.mxu0 %v12198_v3  ;;  %v1772_v3 = vld [vmem:[#allocation7 + $0x1110] sm:$0xff] }
 0x421   :  { %8546 = vmatpush1.bf16.msra.mxu1 %v12200_v57  ;;  %8219 = vmatprep.subr.bf16.mxu0 %v12207_v36  ;;  %v1776_v57 = vld [vmem:[#allocation7 + $0x1130] sm:$0xff]  ;;  %v1773_v36 = vld [vmem:[#allocation7 + $0x1118] sm:$0xff] }
 0x422   :  { %8547 = vmatprep.subr.bf16.mxu1 %v12209_v49  ;;  %v1777_v49 = vld [vmem:[#allocation7 + $0x1138] sm:$0xff]  ;;  %v12255_v58 = vcombine.high %v1772_v3, %v1776_v57 }
 0x423   :  { %v12257_v11 = vcombine.high %v1773_v36, %v1777_v49  ;;  %v12256_v1 = vcombine.low %v1773_v36, %v1777_v49  ;;  %v1820_v49 = vld [vmem:[#allocation7 + $0x1290] sm:$0xff] }
 0x424   :  { %8220 = vmatpush1.bf16.msra.mxu0 %v12206_v62  ;;  %v1784_v62 = vld [vmem:[#allocation7 + $0x1170] sm:$0xff] }
 0x425   :  { %8548 = vmatpush1.bf16.msra.mxu1 %v12208_v9  ;;  %8221 = vmatprep.subr.bf16.mxu0 %v12215_v63  ;;  %v1781_v9 = vld [vmem:[#allocation7 + $0x1158] sm:$0xff]  ;;  %v12263_v18 = vcombine.high %v1780_v61, %v1784_v62 }
 0x426   :  { %8549 = vmatprep.subr.bf16.mxu1 %v12217_v16  ;;  %v1785_v63 = vld [vmem:[#allocation7 + $0x1178] sm:$0xff]  ;;  %v12254_v16 = vcombine.low %v1772_v3, %v1776_v57 }
 0x427   :  { %v12265_v24 = vcombine.high %v1781_v9, %v1785_v63  ;;  %v12264_v8 = vcombine.low %v1781_v9, %v1785_v63  ;;  %v1828_v63 = vld [vmem:[#allocation7 + $0x12d0] sm:$0xff] }
 0x428   :  { %8222 = vmatpush1.bf16.msra.mxu0 %v12214_v13  ;;  %v1792_v13 = vld [vmem:[#allocation7 + $0x11b0] sm:$0xff] }
 0x429   :  { %8550 = vmatpush1.bf16.msra.mxu1 %v12216_v6  ;;  %8232 = vmatprep.subr.bf16.mxu0 %v12223_v59  ;;  %v1789_v6 = vld [vmem:[#allocation7 + $0x1198] sm:$0xff]  ;;  %v12271_v14 = vcombine.high %v1788_v21, %v1792_v13  ;;  %v12270_v26 = vcombine.low %v1788_v21, %v1792_v13 }
 0x42a   :  { %8560 = vmatprep.subr.bf16.mxu1 %v12225_v7  ;;  %v1793_v59 = vld [vmem:[#allocation7 + $0x11b8] sm:$0xff]  ;;  %v12262_v7 = vcombine.low %v1780_v61, %v1784_v62 }
 0x42b   :  { %8224 = vmatmul.mubr.bf16.vlgmr.msra.gmra.mrb[16].mxu0 %v14322_v46  ;;  %v12272_v60 = vcombine.low %v1789_v6, %v1793_v59 }
 0x42c   :  { %8552 = vmatmul.mubr.bf16.vlgmr.msra.gmra.mrb[24].mxu1 %v14322_v46  ;;  %8233 = vmatpush1.bf16.msra.mxu0 %v12222_v15  ;;  %v12240_v46 = vcombine.low %v1757_v4, %v1761_v33  ;;  %v12273_v15 = vcombine.high %v1789_v6, %v1793_v59  ;;  %v1804_v33 = vld [vmem:[#allocation7 + $0x1210] sm:$0xff] }
 0x42d   :  { %8264 = vmatprep.mubr.bf16.mxu0 %v14324_v50  ;;  %8561 = vmatpush1.bf16.msra.mxu1 %v12224_v27  ;;  %v1797_v27 = vld [vmem:[#allocation7 + $0x11d8] sm:$0xff]  ;;  %v1836_v59 = vld [vmem:[#allocation7 + $0x1310] sm:$0xff] }
 0x42e   :  { %8592 = vmatprep.mubr.bf16.mxu1 %v14324_v50  ;;  %8234 = vmatprep.subr.bf16.mxu0 %v12231_v29  ;;  %v12246_v50 = vcombine.low %v1764_v51, %v1768_v23  ;;  %v1801_v29 = vld [vmem:[#allocation7 + $0x11f8] sm:$0xff] }
 0x42f   :  { %8562 = vmatprep.subr.bf16.mxu1 %v12233_v47  ;;  %v12279_v47 = vcombine.high %v1796_v12, %v1800_v20  ;;  %v12281_v4 = vcombine.high %v1797_v27, %v1801_v29  ;;  %v12280_v51 = vcombine.low %v1797_v27, %v1801_v29  ;;  %v1844_v29 = vld [vmem:[#allocation7 + $0x1350] sm:$0xff] }
 0x430   :  { %8235 = vmatpush1.bf16.msra.mxu0 %v12230_v34  ;;  %v1808_v34 = vld [vmem:[#allocation7 + $0x1230] sm:$0xff] }
 0x431   :  { %8563 = vmatpush1.bf16.msra.mxu1 %v12232_v35  ;;  %8236 = vmatprep.subr.bf16.mxu0 %v12239_v37  ;;  %v1805_v35 = vld [vmem:[#allocation7 + $0x1218] sm:$0xff]  ;;  %v12287_v23 = vcombine.high %v1804_v33, %v1808_v34 }
 0x432   :  { %8564 = vmatprep.subr.bf16.mxu1 %v12241_v38  ;;  %v1809_v37 = vld [vmem:[#allocation7 + $0x1238] sm:$0xff]  ;;  %v12278_v38 = vcombine.low %v1796_v12, %v1800_v20 }
 0x433   :  { %v12289_v30 = vcombine.high %v1805_v35, %v1809_v37  ;;  %v12288_v3 = vcombine.low %v1805_v35, %v1809_v37  ;;  %v1852_v37 = vld [vmem:[#allocation7 + $0x1390] sm:$0xff] }
 0x434   :  { %8237 = vmatpush1.bf16.msra.mxu0 %v12238_v42  ;;  %v1816_v42 = vld [vmem:[#allocation7 + $0x1270] sm:$0xff] }
 0x435   :  { %8565 = vmatpush1.bf16.msra.mxu1 %v12240_v46  ;;  %8238 = vmatprep.subr.bf16.mxu0 %v12247_v44  ;;  %v1813_v46 = vld [vmem:[#allocation7 + $0x1258] sm:$0xff]  ;;  %v12295_v57 = vcombine.high %v1812_v41, %v1816_v42 }
 0x436   :  { %8566 = vmatprep.subr.bf16.mxu1 %v12249_v31  ;;  %v1817_v44 = vld [vmem:[#allocation7 + $0x1278] sm:$0xff]  ;;  %v12286_v31 = vcombine.low %v1804_v33, %v1808_v34 }
 0x437   :  { %v12297_v36 = vcombine.high %v1813_v46, %v1817_v44  ;;  %v12296_v61 = vcombine.low %v1813_v46, %v1817_v44  ;;  %v1860_v44 = vld [vmem:[#allocation7 + $0x13d0] sm:$0xff] }
 0x438   :  { %8239 = vmatpush1.bf16.msra.mxu0 %v12246_v50  ;;  %v1824_v50 = vld [vmem:[#allocation7 + $0x12b0] sm:$0xff] }
 0x439   :  { %8567 = vmatpush1.bf16.msra.mxu1 %v12248_v2  ;;  %8240 = vmatprep.subr.bf16.mxu0 %v12255_v58  ;;  %v1821_v2 = vld [vmem:[#allocation7 + $0x1298] sm:$0xff]  ;;  %v12303_v62 = vcombine.high %v1820_v49, %v1824_v50 }
 0x43a   :  { %8568 = vmatprep.subr.bf16.mxu1 %v12257_v11  ;;  %v1825_v58 = vld [vmem:[#allocation7 + $0x12b8] sm:$0xff]  ;;  %v12294_v11 = vcombine.low %v1812_v41, %v1816_v42 }
 0x43b   :  { %v12305_v9 = vcombine.high %v1821_v2, %v1825_v58  ;;  %v12304_v21 = vcombine.low %v1821_v2, %v1825_v58  ;;  %v1868_v58 = vld [vmem:[#allocation7 + $0x1410] sm:$0xff] }
 0x43c   :  { %8241 = vmatpush1.bf16.msra.mxu0 %v12254_v16  ;;  %v1832_v16 = vld [vmem:[#allocation7 + $0x12f0] sm:$0xff] }
 0x43d   :  { %8569 = vmatpush1.bf16.msra.mxu1 %v12256_v1  ;;  %8242 = vmatprep.subr.bf16.mxu0 %v12263_v18  ;;  %v1829_v1 = vld [vmem:[#allocation7 + $0x12d8] sm:$0xff]  ;;  %v12311_v13 = vcombine.high %v1828_v63, %v1832_v16 }
 0x43e   :  { %8570 = vmatprep.subr.bf16.mxu1 %v12265_v24  ;;  %v1833_v18 = vld [vmem:[#allocation7 + $0x12f8] sm:$0xff]  ;;  %v12302_v24 = vcombine.low %v1820_v49, %v1824_v50 }
 0x43f   :  { %v12313_v6 = vcombine.high %v1829_v1, %v1833_v18  ;;  %v12312_v12 = vcombine.low %v1829_v1, %v1833_v18  ;;  %v1876_v18 = vld [vmem:[#allocation7 + $0x1450] sm:$0xff] }
 0x440   :  { %8243 = vmatpush1.bf16.msra.mxu0 %v12262_v7  ;;  %v1840_v7 = vld [vmem:[#allocation7 + $0x1330] sm:$0xff] }
 0x441   :  { %8571 = vmatpush1.bf16.msra.mxu1 %v12264_v8  ;;  %8244 = vmatprep.subr.bf16.mxu0 %v12271_v14  ;;  %v1837_v8 = vld [vmem:[#allocation7 + $0x1318] sm:$0xff]  ;;  %v12319_v20 = vcombine.high %v1836_v59, %v1840_v7 }
 0x442   :  { %8572 = vmatprep.subr.bf16.mxu1 %v12273_v15  ;;  %v1841_v14 = vld [vmem:[#allocation7 + $0x1338] sm:$0xff]  ;;  %v12310_v15 = vcombine.low %v1828_v63, %v1832_v16 }
 0x443   :  { %v12321_v27 = vcombine.high %v1837_v8, %v1841_v14  ;;  %v12320_v33 = vcombine.low %v1837_v8, %v1841_v14  ;;  %v1884_v8 = vld [vmem:[#allocation7 + $0x1490] sm:$0xff] }
 0x444   :  { %8245 = vmatpush1.bf16.msra.mxu0 %v12270_v26  ;;  %v1848_v26 = vld [vmem:[#allocation7 + $0x1370] sm:$0xff] }
 0x445   :  { %8573 = vmatpush1.bf16.msra.mxu1 %v12272_v60  ;;  %8246 = vmatprep.subr.bf16.mxu0 %v12279_v47  ;;  %v1845_v60 = vld [vmem:[#allocation7 + $0x1358] sm:$0xff]  ;;  %v12327_v34 = vcombine.high %v1844_v29, %v1848_v26  ;;  %v1888_v14 = vld [vmem:[#allocation7 + $0x14b0] sm:$0xff] }
 0x446   :  { %8574 = vmatprep.subr.bf16.mxu1 %v12281_v4  ;;  %v1849_v47 = vld [vmem:[#allocation7 + $0x1378] sm:$0xff]  ;;  %v12318_v4 = vcombine.low %v1836_v59, %v1840_v7 }
 0x447   :  { %v12329_v35 = vcombine.high %v1845_v60, %v1849_v47  ;;  %v12328_v41 = vcombine.low %v1845_v60, %v1849_v47  ;;  %v1892_v47 = vld [vmem:[#allocation7 + $0x14d0] sm:$0xff] }
 0x448   :  { %8247 = vmatpush1.bf16.msra.mxu0 %v12278_v38  ;;  %v1856_v38 = vld [vmem:[#allocation7 + $0x13b0] sm:$0xff] }
 0x449   :  { %8575 = vmatpush1.bf16.msra.mxu1 %v12280_v51  ;;  %8248 = vmatprep.subr.bf16.mxu0 %v12287_v23  ;;  %v1853_v51 = vld [vmem:[#allocation7 + $0x1398] sm:$0xff]  ;;  %v12335_v42 = vcombine.high %v1852_v37, %v1856_v38 }
 0x44a   :  { %8576 = vmatprep.subr.bf16.mxu1 %v12289_v30  ;;  %v1857_v23 = vld [vmem:[#allocation7 + $0x13b8] sm:$0xff]  ;;  %v12326_v30 = vcombine.low %v1844_v29, %v1848_v26  ;;  %v12367_v26 = vcombine.high %v1884_v8, %v1888_v14 }
 0x44b   :  { %v12337_v46 = vcombine.high %v1853_v51, %v1857_v23  ;;  %v12336_v49 = vcombine.low %v1853_v51, %v1857_v23  ;;  %v1900_v51 = vld [vmem:[#allocation7 + $0x1510] sm:$0xff] }
 0x44c   :  { %8249 = vmatpush1.bf16.msra.mxu0 %v12286_v31  ;;  %v1864_v31 = vld [vmem:[#allocation7 + $0x13f0] sm:$0xff] }
 0x44d   :  { %8577 = vmatpush1.bf16.msra.mxu1 %v12288_v3  ;;  %8250 = vmatprep.subr.bf16.mxu0 %v12295_v57  ;;  %v1861_v3 = vld [vmem:[#allocation7 + $0x13d8] sm:$0xff]  ;;  %v12343_v50 = vcombine.high %v1860_v44, %v1864_v31  ;;  %v1904_v23 = vld [vmem:[#allocation7 + $0x1530] sm:$0xff] }
 0x44e   :  { %8578 = vmatprep.subr.bf16.mxu1 %v12297_v36  ;;  %v1865_v57 = vld [vmem:[#allocation7 + $0x13f8] sm:$0xff]  ;;  %v12334_v36 = vcombine.low %v1852_v37, %v1856_v38 }
 0x44f   :  { %v12345_v2 = vcombine.high %v1861_v3, %v1865_v57  ;;  %v12344_v63 = vcombine.low %v1861_v3, %v1865_v57  ;;  %v1912_v3 = vld [vmem:[#allocation7 + $0x1570] sm:$0xff]  ;;  %v1909_v57 = vld [vmem:[#allocation7 + $0x1558] sm:$0xff] }
 0x450   :  { %8251 = vmatpush1.bf16.msra.mxu0 %v12294_v11  ;;  %v1872_v11 = vld [vmem:[#allocation7 + $0x1430] sm:$0xff] }
 0x451   :  { %8579 = vmatpush1.bf16.msra.mxu1 %v12296_v61  ;;  %8252 = vmatprep.subr.bf16.mxu0 %v12303_v62  ;;  %v1869_v61 = vld [vmem:[#allocation7 + $0x1418] sm:$0xff]  ;;  %v12351_v16 = vcombine.high %v1868_v58, %v1872_v11 }
 0x452   :  { %8580 = vmatprep.subr.bf16.mxu1 %v12305_v9  ;;  %v1873_v62 = vld [vmem:[#allocation7 + $0x1438] sm:$0xff]  ;;  %v12342_v9 = vcombine.low %v1860_v44, %v1864_v31  ;;  %v1908_v31 = vld [vmem:[#allocation7 + $0x1550] sm:$0xff] }
 0x453   :  { %v12353_v1 = vcombine.high %v1869_v61, %v1873_v62  ;;  %v12352_v59 = vcombine.low %v1869_v61, %v1873_v62  ;;  %v1920_v61 = vld [vmem:[#allocation7 + $0x15b0] sm:$0xff]  ;;  %v1917_v62 = vld [vmem:[#allocation7 + $0x1598] sm:$0xff] }
 0x454   :  { %8253 = vmatpush1.bf16.msra.mxu0 %v12302_v24  ;;  %v1880_v24 = vld [vmem:[#allocation7 + $0x1470] sm:$0xff] }
 0x455   :  { %8581 = vmatpush1.bf16.msra.mxu1 %v12304_v21  ;;  %8254 = vmatprep.subr.bf16.mxu0 %v12311_v13  ;;  %v12350_v21 = vcombine.low %v1868_v58, %v1872_v11  ;;  %v1877_v13 = vld [vmem:[#allocation7 + $0x1458] sm:$0xff]  ;;  %v12359_v7 = vcombine.high %v1876_v18, %v1880_v24  ;;  %v1916_v11 = vld [vmem:[#allocation7 + $0x1590] sm:$0xff] }
 0x456   :  { %8582 = vmatprep.subr.bf16.mxu1 %v12313_v6  ;;  %v1881_v6 = vld [vmem:[#allocation7 + $0x1478] sm:$0xff] }
 0x457   :  { %v12360_v29 = vcombine.low %v1877_v13, %v1881_v6 }
 0x458   :  { %8255 = vmatpush1.bf16.msra.mxu0 %v12310_v15  ;;  %v12361_v15 = vcombine.high %v1877_v13, %v1881_v6  ;;  %v1925_v13 = vld [vmem:[#allocation7 + $0x15d8] sm:$0xff] }
 0x459   :  { %8583 = vmatpush1.bf16.msra.mxu1 %v12312_v12  ;;  %8256 = vmatprep.subr.bf16.mxu0 %v12319_v20  ;;  %v1885_v12 = vld [vmem:[#allocation7 + $0x1498] sm:$0xff] }
 0x45a   :  { %8584 = vmatprep.subr.bf16.mxu1 %v12321_v27  ;;  %v1889_v20 = vld [vmem:[#allocation7 + $0x14b8] sm:$0xff]  ;;  %v12358_v27 = vcombine.low %v1876_v18, %v1880_v24  ;;  %v1924_v24 = vld [vmem:[#allocation7 + $0x15d0] sm:$0xff] }
 0x45b   :  { %v12369_v60 = vcombine.high %v1885_v12, %v1889_v20  ;;  %v1929_v6 = vld [vmem:[#allocation7 + $0x15f8] sm:$0xff] }
 0x45c   :  { %8257 = vmatpush1.bf16.msra.mxu0 %v12318_v4  ;;  %v1896_v4 = vld [vmem:[#allocation7 + $0x14f0] sm:$0xff] }
 0x45d   :  { %8585 = vmatpush1.bf16.msra.mxu1 %v12320_v33  ;;  %8258 = vmatprep.subr.bf16.mxu0 %v12327_v34  ;;  %v1893_v33 = vld [vmem:[#allocation7 + $0x14d8] sm:$0xff]  ;;  %v12375_v37 = vcombine.high %v1892_v47, %v1896_v4 }
 0x45e   :  { %8586 = vmatprep.subr.bf16.mxu1 %v12329_v35  ;;  %v1897_v34 = vld [vmem:[#allocation7 + $0x14f8] sm:$0xff]  ;;  %v12366_v35 = vcombine.low %v1884_v8, %v1888_v14  ;;  %v12409_v14 = vcombine.high %v1925_v13, %v1929_v6 }
 0x45f   :  { %v12377_v38 = vcombine.high %v1893_v33, %v1897_v34 }
 0x460   :  { %8259 = vmatpush1.bf16.msra.mxu0 %v12326_v30  ;;  %v1901_v30 = vld [vmem:[#allocation7 + $0x1518] sm:$0xff] }
 0x461   :  { %8587 = vmatpush1.bf16.msra.mxu1 %v12328_v41  ;;  %8260 = vmatprep.subr.bf16.mxu0 %v12335_v42  ;;  %v1905_v41 = vld [vmem:[#allocation7 + $0x1538] sm:$0xff]  ;;  %v12376_v42 = vcombine.low %v1893_v33, %v1897_v34  ;;  %v1944_v33 = vld [vmem:[#allocation7 + $0x1670] sm:$0xff] }
 0x462   :  { %8588 = vmatprep.subr.bf16.mxu1 %v12337_v46  ;;  %v12383_v46 = vcombine.high %v1900_v51, %v1904_v23  ;;  %v12385_v44 = vcombine.high %v1901_v30, %v1905_v41  ;;  %v1941_v34 = vld [vmem:[#allocation7 + $0x1658] sm:$0xff] }
 0x464   :  { %8261 = vmatpush1.bf16.msra.mxu0 %v12334_v36  ;;  %v1913_v36 = vld [vmem:[#allocation7 + $0x1578] sm:$0xff] }
 0x465   :  { %8589 = vmatpush1.bf16.msra.mxu1 %v12336_v49  ;;  %8262 = vmatprep.subr.bf16.mxu0 %v12343_v50  ;;  %v12382_v49 = vcombine.low %v1900_v51, %v1904_v23  ;;  %v12384_v50 = vcombine.low %v1901_v30, %v1905_v41  ;;  %v12393_v58 = vcombine.high %v1909_v57, %v1913_v36  ;;  %v1948_v23 = vld [vmem:[#allocation7 + $0x1690] sm:$0xff]  ;;  %v1949_v41 = vld [vmem:[#allocation7 + $0x1698] sm:$0xff] }
 0x466   :  { %8590 = vmatprep.subr.bf16.mxu1 %v12345_v2  ;;  %v12391_v2 = vcombine.high %v1908_v31, %v1912_v3  ;;  %v1952_v30 = vld [vmem:[#allocation7 + $0x16b0] sm:$0xff] }
 0x468   :  { %8263 = vmatpush1.bf16.msra.mxu0 %v12342_v9  ;;  %v1921_v9 = vld [vmem:[#allocation7 + $0x15b8] sm:$0xff] }
 0x469   :  { %8591 = vmatpush1.bf16.msra.mxu1 %v12344_v63  ;;  %8273 = vmatprep.subr.bf16.mxu0 %v12351_v16  ;;  %v12390_v63 = vcombine.low %v1908_v31, %v1912_v3  ;;  %v12392_v16 = vcombine.low %v1909_v57, %v1913_v36  ;;  %v12401_v18 = vcombine.high %v1917_v62, %v1921_v9  ;;  %v1956_v3 = vld [vmem:[#allocation7 + $0x16d0] sm:$0xff]  ;;  %v1957_v36 = vld [vmem:[#allocation7 + $0x16d8] sm:$0xff] }
 0x46a   :  { %8601 = vmatprep.subr.bf16.mxu1 %v12353_v1  ;;  %v12399_v1 = vcombine.high %v1916_v11, %v1920_v61  ;;  %v1960_v57 = vld [vmem:[#allocation7 + $0x16f0] sm:$0xff] }
 0x46b   :  { %8265 = vmatmul.mubr.bf16.vlgmr.msra.gmra.mrb[16].mxu0 %v14336_v17 }
 0x46c   :  { %8593 = vmatmul.mubr.bf16.vlgmr.msra.gmra.mrb[24].mxu1 %v14336_v17  ;;  %8274 = vmatpush1.bf16.msra.mxu0 %v12350_v21  ;;  %v12368_v17 = vcombine.low %v1885_v12, %v1889_v20  ;;  %v1928_v21 = vld [vmem:[#allocation7 + $0x15f0] sm:$0xff]  ;;  %v1933_v20 = vld [vmem:[#allocation7 + $0x1618] sm:$0xff] }
 0x46d   :  { %8305 = vmatprep.mubr.bf16.mxu0 %v14338_v25  ;;  %8602 = vmatpush1.bf16.msra.mxu1 %v12352_v59  ;;  %v12398_v59 = vcombine.low %v1916_v11, %v1920_v61  ;;  %v12407_v8 = vcombine.high %v1924_v24, %v1928_v21  ;;  %v1936_v12 = vld [vmem:[#allocation7 + $0x1630] sm:$0xff] }
 0x46e   :  { %8633 = vmatprep.mubr.bf16.mxu1 %v14338_v25  ;;  %8275 = vmatprep.subr.bf16.mxu0 %v12359_v7  ;;  %v12374_v25 = vcombine.low %v1892_v47, %v1896_v4  ;;  %v12400_v7 = vcombine.low %v1917_v62, %v1921_v9  ;;  %v1940_v4 = vld [vmem:[#allocation7 + $0x1650] sm:$0xff]  ;;  %v1965_v9 = vld [vmem:[#allocation7 + $0x1718] sm:$0xff] }
 0x46f   :  { %8603 = vmatprep.subr.bf16.mxu1 %v12361_v15  ;;  %v1932_v15 = vld [vmem:[#allocation7 + $0x1610] sm:$0xff] }
 0x470   :  { %8276 = vmatpush1.bf16.msra.mxu0 %v12358_v27  ;;  %v1937_v27 = vld [vmem:[#allocation7 + $0x1638] sm:$0xff]  ;;  %v1964_v61 = vld [vmem:[#allocation7 + $0x1710] sm:$0xff] }
 0x471   :  { %8604 = vmatpush1.bf16.msra.mxu1 %v12360_v29  ;;  %8277 = vmatprep.subr.bf16.mxu0 %v12367_v26  ;;  %v12406_v29 = vcombine.low %v1924_v24, %v1928_v21  ;;  %v12408_v26 = vcombine.low %v1925_v13, %v1929_v6  ;;  %v12417_v47 = vcombine.high %v1933_v20, %v1937_v27  ;;  %v1968_v62 = vld [vmem:[#allocation7 + $0x1730] sm:$0xff]  ;;  %v1973_v6 = vld [vmem:[#allocation7 + $0x1758] sm:$0xff] }
 0x472   :  { %8605 = vmatprep.subr.bf16.mxu1 %v12369_v60  ;;  %v12415_v60 = vcombine.high %v1932_v15, %v1936_v12  ;;  %v1972_v21 = vld [vmem:[#allocation7 + $0x1750] sm:$0xff] }
 0x473   :  { %v1976_v13 = vld [vmem:[#allocation7 + $0x1770] sm:$0xff] }
 0x474   :  { %8278 = vmatpush1.bf16.msra.mxu0 %v12366_v35  ;;  %v1945_v35 = vld [vmem:[#allocation7 + $0x1678] sm:$0xff] }
 0x475   :  { %8606 = vmatpush1.bf16.msra.mxu1 %v12368_v17  ;;  %8279 = vmatprep.subr.bf16.mxu0 %v12375_v37  ;;  %v12414_v17 = vcombine.low %v1932_v15, %v1936_v12  ;;  %v12416_v37 = vcombine.low %v1933_v20, %v1937_v27  ;;  %v12425_v51 = vcombine.high %v1941_v34, %v1945_v35  ;;  %v1980_v12 = vld [vmem:[#allocation7 + $0x1790] sm:$0xff]  ;;  %v1981_v27 = vld [vmem:[#allocation7 + $0x1798] sm:$0xff] }
 0x476   :  { %8607 = vmatprep.subr.bf16.mxu1 %v12377_v38  ;;  %v12423_v38 = vcombine.high %v1940_v4, %v1944_v33  ;;  %v1984_v20 = vld [vmem:[#allocation7 + $0x17b0] sm:$0xff] }
 0x478   :  { %8280 = vmatpush1.bf16.msra.mxu0 %v12374_v25  ;;  %v1953_v25 = vld [vmem:[#allocation7 + $0x16b8] sm:$0xff] }
 0x479   :  { %8608 = vmatpush1.bf16.msra.mxu1 %v12376_v42  ;;  %8281 = vmatprep.subr.bf16.mxu0 %v12383_v46  ;;  %v12422_v42 = vcombine.low %v1940_v4, %v1944_v33  ;;  %v12424_v46 = vcombine.low %v1941_v34, %v1945_v35  ;;  %v12433_v31 = vcombine.high %v1949_v41, %v1953_v25  ;;  %v1988_v33 = vld [vmem:[#allocation7 + $0x17d0] sm:$0xff]  ;;  %v1989_v35 = vld [vmem:[#allocation7 + $0x17d8] sm:$0xff] }
 0x47a   :  { %8609 = vmatprep.subr.bf16.mxu1 %v12385_v44  ;;  %v12431_v44 = vcombine.high %v1948_v23, %v1952_v30  ;;  %v1992_v34 = vld [vmem:[#allocation7 + $0x17f0] sm:$0xff] }
 0x47c   :  { %8282 = vmatpush1.bf16.msra.mxu0 %v12382_v49  ;;  %v1961_v49 = vld [vmem:[#allocation7 + $0x16f8] sm:$0xff] }
 0x47d   :  { %8610 = vmatpush1.bf16.msra.mxu1 %v12384_v50  ;;  %8283 = vmatprep.subr.bf16.mxu0 %v12391_v2  ;;  %v12430_v50 = vcombine.low %v1948_v23, %v1952_v30  ;;  %v12432_v2 = vcombine.low %v1949_v41, %v1953_v25  ;;  %v12441_v11 = vcombine.high %v1957_v36, %v1961_v49  ;;  %v1996_v30 = vld [vmem:[#allocation7 + $0x1810] sm:$0xff]  ;;  %v1997_v25 = vld [vmem:[#allocation7 + $0x1818] sm:$0xff] }
 0x47e   :  { %8611 = vmatprep.subr.bf16.mxu1 %v12393_v58  ;;  %v12439_v58 = vcombine.high %v1956_v3, %v1960_v57  ;;  %v2000_v41 = vld [vmem:[#allocation7 + $0x1830] sm:$0xff] }
 0x480   :  { %8284 = vmatpush1.bf16.msra.mxu0 %v12390_v63  ;;  %v1969_v63 = vld [vmem:[#allocation7 + $0x1738] sm:$0xff] }
 0x481   :  { %8612 = vmatpush1.bf16.msra.mxu1 %v12392_v16  ;;  %8285 = vmatprep.subr.bf16.mxu0 %v12399_v1  ;;  %v12438_v16 = vcombine.low %v1956_v3, %v1960_v57  ;;  %v12440_v1 = vcombine.low %v1957_v36, %v1961_v49  ;;  %v12449_v24 = vcombine.high %v1965_v9, %v1969_v63  ;;  %v2004_v57 = vld [vmem:[#allocation7 + $0x1850] sm:$0xff] }
 0x482   :  { %8613 = vmatprep.subr.bf16.mxu1 %v12401_v18  ;;  %v12447_v18 = vcombine.high %v1964_v61, %v1968_v62  ;;  %v2008_v36 = vld [vmem:[#allocation7 + $0x1870] sm:$0xff]  ;;  %v12478_v49 = vcombine.low %v1996_v30, %v2000_v41 }
 0x484   :  { %8286 = vmatpush1.bf16.msra.mxu0 %v12398_v59  ;;  %v1977_v59 = vld [vmem:[#allocation7 + $0x1778] sm:$0xff] }
 0x485   :  { %8614 = vmatpush1.bf16.msra.mxu1 %v12400_v7  ;;  %8287 = vmatprep.subr.bf16.mxu0 %v12407_v8  ;;  %v12446_v7 = vcombine.low %v1964_v61, %v1968_v62  ;;  %v12448_v8 = vcombine.low %v1965_v9, %v1969_v63  ;;  %v12457_v15 = vcombine.high %v1973_v6, %v1977_v59  ;;  %v2012_v61 = vld [vmem:[#allocation7 + $0x1890] sm:$0xff]  ;;  %v2013_v63 = vld [vmem:[#allocation7 + $0x1898] sm:$0xff] }
 0x486   :  { %8615 = vmatprep.subr.bf16.mxu1 %v12409_v14  ;;  %v12455_v14 = vcombine.high %v1972_v21, %v1976_v13  ;;  %v2016_v62 = vld [vmem:[#allocation7 + $0x18b0] sm:$0xff] }
 0x488   :  { %8288 = vmatpush1.bf16.msra.mxu0 %v12406_v29  ;;  %v1985_v29 = vld [vmem:[#allocation7 + $0x17b8] sm:$0xff] }
 0x489   :  { %8616 = vmatpush1.bf16.msra.mxu1 %v12408_v26  ;;  %8289 = vmatprep.subr.bf16.mxu0 %v12415_v60  ;;  %v12454_v26 = vcombine.low %v1972_v21, %v1976_v13  ;;  %v12456_v60 = vcombine.low %v1973_v6, %v1977_v59  ;;  %v12465_v4 = vcombine.high %v1981_v27, %v1985_v29  ;;  %v2020_v13 = vld [vmem:[#allocation7 + $0x18d0] sm:$0xff]  ;;  %v2021_v59 = vld [vmem:[#allocation7 + $0x18d8] sm:$0xff] }
 0x48a   :  { %8617 = vmatprep.subr.bf16.mxu1 %v12417_v47  ;;  %v12463_v47 = vcombine.high %v1980_v12, %v1984_v20  ;;  %v2024_v6 = vld [vmem:[#allocation7 + $0x18f0] sm:$0xff] }
 0x48c   :  { %8290 = vmatpush1.bf16.msra.mxu0 %v12414_v17  ;;  %v1993_v17 = vld [vmem:[#allocation7 + $0x17f8] sm:$0xff] }
 0x48d   :  { %8618 = vmatpush1.bf16.msra.mxu1 %v12416_v37  ;;  %8291 = vmatprep.subr.bf16.mxu0 %v12423_v38  ;;  %v12462_v37 = vcombine.low %v1980_v12, %v1984_v20  ;;  %v12464_v38 = vcombine.low %v1981_v27, %v1985_v29  ;;  %v12473_v23 = vcombine.high %v1989_v35, %v1993_v17  ;;  %v2028_v12 = vld [vmem:[#allocation7 + $0x1910] sm:$0xff]  ;;  %v2029_v27 = vld [vmem:[#allocation7 + $0x1918] sm:$0xff] }
 0x48e   :  { %8619 = vmatprep.subr.bf16.mxu1 %v12425_v51  ;;  %v12471_v51 = vcombine.high %v1988_v33, %v1992_v34  ;;  %v2032_v20 = vld [vmem:[#allocation7 + $0x1930] sm:$0xff]  ;;  %v2033_v29 = vld [vmem:[#allocation7 + $0x1938] sm:$0xff] }
 0x490   :  { %8292 = vmatpush1.bf16.msra.mxu0 %v12422_v42  ;;  %v2001_v42 = vld [vmem:[#allocation7 + $0x1838] sm:$0xff] }
 0x491   :  { %8620 = vmatpush1.bf16.msra.mxu1 %v12424_v46  ;;  %8293 = vmatprep.subr.bf16.mxu0 %v12431_v44  ;;  %v12470_v46 = vcombine.low %v1988_v33, %v1992_v34  ;;  %v12472_v44 = vcombine.low %v1989_v35, %v1993_v17  ;;  %v12481_v3 = vcombine.high %v1997_v25, %v2001_v42  ;;  %v2040_v33 = vld [vmem:[#allocation7 + $0x1970] sm:$0xff]  ;;  %v2037_v34 = vld [vmem:[#allocation7 + $0x1958] sm:$0xff] }
 0x492   :  { %8621 = vmatprep.subr.bf16.mxu1 %v12433_v31  ;;  %v12479_v31 = vcombine.high %v1996_v30, %v2000_v41  ;;  %v2041_v35 = vld [vmem:[#allocation7 + $0x1978] sm:$0xff]  ;;  %v12510_v17 = vcombine.low %v2028_v12, %v2032_v20  ;;  %v2048_v30 = vld [vmem:[#allocation7 + $0x19b0] sm:$0xff] }
 0x493   :  { %v2045_v41 = vld [vmem:[#allocation7 + $0x1998] sm:$0xff] }
 0x494   :  { %8294 = vmatpush1.bf16.msra.mxu0 %v12430_v50  ;;  %v2005_v50 = vld [vmem:[#allocation7 + $0x1858] sm:$0xff] }
 0x495   :  { %8622 = vmatpush1.bf16.msra.mxu1 %v12432_v2  ;;  %8295 = vmatprep.subr.bf16.mxu0 %v12439_v58  ;;  %v2009_v2 = vld [vmem:[#allocation7 + $0x1878] sm:$0xff]  ;;  %v12480_v58 = vcombine.low %v1997_v25, %v2001_v42 }
 0x496   :  { %8623 = vmatprep.subr.bf16.mxu1 %v12441_v11  ;;  %v12487_v11 = vcombine.high %v2004_v57, %v2008_v36  ;;  %v12489_v9 = vcombine.high %v2005_v50, %v2009_v2  ;;  %v2049_v25 = vld [vmem:[#allocation7 + $0x19b8] sm:$0xff] }
 0x498   :  { %8296 = vmatpush1.bf16.msra.mxu0 %v12438_v16  ;;  %v2017_v16 = vld [vmem:[#allocation7 + $0x18b8] sm:$0xff] }
 0x499   :  { %8624 = vmatpush1.bf16.msra.mxu1 %v12440_v1  ;;  %8297 = vmatprep.subr.bf16.mxu0 %v12447_v18  ;;  %v12486_v1 = vcombine.low %v2004_v57, %v2008_v36  ;;  %v12488_v18 = vcombine.low %v2005_v50, %v2009_v2  ;;  %v12497_v21 = vcombine.high %v2013_v63, %v2017_v16  ;;  %v2056_v57 = vld [vmem:[#allocation7 + $0x19f0] sm:$0xff]  ;;  %v2053_v36 = vld [vmem:[#allocation7 + $0x19d8] sm:$0xff] }
 0x49a   :  { %8625 = vmatprep.subr.bf16.mxu1 %v12449_v24  ;;  %v12495_v24 = vcombine.high %v2012_v61, %v2016_v62  ;;  %v12528_v2 = vcombine.low %v2045_v41, %v2049_v25 }
 0x49c   :  { %8298 = vmatpush1.bf16.msra.mxu0 %v12446_v7  ;;  %v2025_v7 = vld [vmem:[#allocation7 + $0x18f8] sm:$0xff] }
 0x49d   :  { %8626 = vmatpush1.bf16.msra.mxu1 %v12448_v8  ;;  %8299 = vmatprep.subr.bf16.mxu0 %v12455_v14  ;;  %v12494_v8 = vcombine.low %v2012_v61, %v2016_v62  ;;  %v12503_v14 = vcombine.high %v2020_v13, %v2024_v6  ;;  %v2060_v61 = vld [vmem:[#allocation7 + $0x1a10] sm:$0xff] }
 0x49e   :  { %8627 = vmatprep.subr.bf16.mxu1 %v12457_v15  ;;  %v12505_v15 = vcombine.high %v2021_v59, %v2025_v7  ;;  %v2064_v62 = vld [vmem:[#allocation7 + $0x1a30] sm:$0xff] }
 0x4a0   :  { %8300 = vmatpush1.bf16.msra.mxu0 %v12454_v26  ;;  %v12504_v26 = vcombine.low %v2021_v59, %v2025_v7  ;;  %v2073_v59 = vld [vmem:[#allocation7 + $0x1a78] sm:$0xff]  ;;  %v12542_v7 = vcombine.low %v2060_v61, %v2064_v62 }
 0x4a1   :  { %8628 = vmatpush1.bf16.msra.mxu1 %v12456_v60  ;;  %8301 = vmatprep.subr.bf16.mxu0 %v12463_v47  ;;  %v12511_v60 = vcombine.high %v2028_v12, %v2032_v20  ;;  %v12513_v47 = vcombine.high %v2029_v27, %v2033_v29  ;;  %v2080_v12 = vld [vmem:[#allocation7 + $0x1ab0] sm:$0xff]  ;;  %v2077_v20 = vld [vmem:[#allocation7 + $0x1a98] sm:$0xff] }
 0x4a2   :  { %8629 = vmatprep.subr.bf16.mxu1 %v12465_v4  ;;  %v2036_v4 = vld [vmem:[#allocation7 + $0x1950] sm:$0xff] }
 0x4a3   :  { %v12518_v42 = vcombine.low %v2036_v4, %v2040_v33 }
 0x4a4   :  { %8302 = vmatpush1.bf16.msra.mxu0 %v12462_v37  ;;  %v12512_v37 = vcombine.low %v2029_v27, %v2033_v29  ;;  %v2081_v27 = vld [vmem:[#allocation7 + $0x1ab8] sm:$0xff] }
 0x4a5   :  { %8630 = vmatpush1.bf16.msra.mxu1 %v12464_v38  ;;  %8303 = vmatprep.subr.bf16.mxu0 %v12471_v51  ;;  %v12519_v38 = vcombine.high %v2036_v4, %v2040_v33  ;;  %v12521_v51 = vcombine.high %v2037_v34, %v2041_v35  ;;  %v2088_v4 = vld [vmem:[#allocation7 + $0x1af0] sm:$0xff]  ;;  %v2085_v33 = vld [vmem:[#allocation7 + $0x1ad8] sm:$0xff] }
 0x4a6   :  { %8631 = vmatprep.subr.bf16.mxu1 %v12473_v23  ;;  %v2044_v23 = vld [vmem:[#allocation7 + $0x1990] sm:$0xff] }
 0x4a7   :  { %v12526_v50 = vcombine.low %v2044_v23, %v2048_v30 }
 0x4a8   :  { %8304 = vmatpush1.bf16.msra.mxu0 %v12470_v46  ;;  %v12520_v46 = vcombine.low %v2037_v34, %v2041_v35  ;;  %v2089_v34 = vld [vmem:[#allocation7 + $0x1af8] sm:$0xff] }
 0x4a9   :  { %8632 = vmatpush1.bf16.msra.mxu1 %v12472_v44  ;;  %8314 = vmatprep.subr.bf16.mxu0 %v12479_v31  ;;  %v12527_v44 = vcombine.high %v2044_v23, %v2048_v30  ;;  %v12529_v31 = vcombine.high %v2045_v41, %v2049_v25  ;;  %v2096_v23 = vld [vmem:[#allocation7 + $0x1b30] sm:$0xff]  ;;  %v2093_v30 = vld [vmem:[#allocation7 + $0x1b18] sm:$0xff] }
 0x4aa   :  { %8642 = vmatprep.subr.bf16.mxu1 %v12481_v3  ;;  %v2052_v3 = vld [vmem:[#allocation7 + $0x19d0] sm:$0xff]  ;;  %v2097_v41 = vld [vmem:[#allocation7 + $0x1b38] sm:$0xff] }
 0x4ab   :  { %8306 = vmatmul.mubr.bf16.vlgmr.msra.gmra.mrb[16].mxu0 %v14350_v40 }
 0x4ac   :  { %8634 = vmatmul.mubr.bf16.vlgmr.msra.gmra.mrb[24].mxu1 %v14350_v40  ;;  %8315 = vmatpush1.bf16.msra.mxu0 %v12478_v49  ;;  %v12496_v40 = vcombine.low %v2013_v63, %v2017_v16  ;;  %v2057_v49 = vld [vmem:[#allocation7 + $0x19f8] sm:$0xff]  ;;  %v12534_v16 = vcombine.low %v2052_v3, %v2056_v57 }
 0x4ad   :  { %8346 = vmatprep.mubr.bf16.mxu0 %v14352_v43  ;;  %8643 = vmatpush1.bf16.msra.mxu1 %v12480_v58  ;;  %v12535_v58 = vcombine.high %v2052_v3, %v2056_v57  ;;  %v2065_v63 = vld [vmem:[#allocation7 + $0x1a38] sm:$0xff]  ;;  %v2104_v3 = vld [vmem:[#allocation7 + $0x1b70] sm:$0xff] }
 0x4ae   :  { %8674 = vmatprep.mubr.bf16.mxu1 %v14352_v43  ;;  %8316 = vmatprep.subr.bf16.mxu0 %v12487_v11  ;;  %v12502_v43 = vcombine.low %v2020_v13, %v2024_v6  ;;  %v12537_v11 = vcombine.high %v2053_v36, %v2057_v49  ;;  %v2072_v13 = vld [vmem:[#allocation7 + $0x1a70] sm:$0xff]  ;;  %v2069_v6 = vld [vmem:[#allocation7 + $0x1a58] sm:$0xff] }
 0x4af   :  { %8644 = vmatprep.subr.bf16.mxu1 %v12489_v9  ;;  %v2061_v9 = vld [vmem:[#allocation7 + $0x1a18] sm:$0xff] }
 0x4b0   :  { %8317 = vmatpush1.bf16.msra.mxu0 %v12486_v1  ;;  %v12536_v1 = vcombine.low %v2053_v36, %v2057_v49  ;;  %v2101_v57 = vld [vmem:[#allocation7 + $0x1b58] sm:$0xff] }
 0x4b1   :  { %8645 = vmatpush1.bf16.msra.mxu1 %v12488_v18  ;;  %8318 = vmatprep.subr.bf16.mxu0 %v12495_v24  ;;  %v12543_v18 = vcombine.high %v2060_v61, %v2064_v62  ;;  %v12545_v24 = vcombine.high %v2061_v9, %v2065_v63  ;;  %v2105_v36 = vld [vmem:[#allocation7 + $0x1b78] sm:$0xff]  ;;  %v2112_v61 = vld [vmem:[#allocation7 + $0x1bb0] sm:$0xff] }
 0x4b2   :  { %8646 = vmatprep.subr.bf16.mxu1 %v12497_v21  ;;  %v2068_v21 = vld [vmem:[#allocation7 + $0x1a50] sm:$0xff]  ;;  %v2109_v62 = vld [vmem:[#allocation7 + $0x1b98] sm:$0xff] }
 0x4b3   :  { %v12550_v29 = vcombine.low %v2068_v21, %v2072_v13 }
 0x4b4   :  { %8319 = vmatpush1.bf16.msra.mxu0 %v12494_v8  ;;  %v12544_v8 = vcombine.low %v2061_v9, %v2065_v63  ;;  %v2113_v9 = vld [vmem:[#allocation7 + $0x1bb8] sm:$0xff] }
 0x4b5   :  { %8647 = vmatpush1.bf16.msra.mxu1 %v12496_v40  ;;  %8320 = vmatprep.subr.bf16.mxu0 %v12503_v14  ;;  %v12551_v40 = vcombine.high %v2068_v21, %v2072_v13  ;;  %v12553_v14 = vcombine.high %v2069_v6, %v2073_v59  ;;  %v2120_v21 = vld [vmem:[#allocation7 + $0x1bf0] sm:$0xff]  ;;  %v2117_v13 = vld [vmem:[#allocation7 + $0x1bd8] sm:$0xff] }
 0x4b6   :  { %8648 = vmatprep.subr.bf16.mxu1 %v12505_v15  ;;  %v2076_v15 = vld [vmem:[#allocation7 + $0x1a90] sm:$0xff] }
 0x4b7   :  { %v12558_v35 = vcombine.low %v2076_v15, %v2080_v12 }
 0x4b8   :  { %8321 = vmatpush1.bf16.msra.mxu0 %v12502_v43  ;;  %v12552_v43 = vcombine.low %v2069_v6, %v2073_v59  ;;  %v2121_v6 = vld [vmem:[#allocation7 + $0x1bf8] sm:$0xff] }
 0x4b9   :  { %8649 = vmatpush1.bf16.msra.mxu1 %v12504_v26  ;;  %8322 = vmatprep.subr.bf16.mxu0 %v12511_v60  ;;  %v12559_v26 = vcombine.high %v2076_v15, %v2080_v12  ;;  %v12561_v60 = vcombine.high %v2077_v20, %v2081_v27  ;;  %v2128_v15 = vld [vmem:[#allocation7 + $0x1c30] sm:$0xff]  ;;  %v2125_v12 = vld [vmem:[#allocation7 + $0x1c18] sm:$0xff] }
 0x4ba   :  { %8650 = vmatprep.subr.bf16.mxu1 %v12513_v47  ;;  %v2084_v47 = vld [vmem:[#allocation7 + $0x1ad0] sm:$0xff] }
 0x4bb   :  { %v12566_v25 = vcombine.low %v2084_v47, %v2088_v4 }
 0x4bc   :  { %8323 = vmatpush1.bf16.msra.mxu0 %v12510_v17  ;;  %v12560_v17 = vcombine.low %v2077_v20, %v2081_v27  ;;  %v2129_v20 = vld [vmem:[#allocation7 + $0x1c38] sm:$0xff] }
 0x4bd   :  { %8651 = vmatpush1.bf16.msra.mxu1 %v12512_v37  ;;  %8324 = vmatprep.subr.bf16.mxu0 %v12519_v38  ;;  %v12567_v37 = vcombine.high %v2084_v47, %v2088_v4  ;;  %v12569_v38 = vcombine.high %v2085_v33, %v2089_v34  ;;  %v2136_v47 = vld [vmem:[#allocation7 + $0x1c70] sm:$0xff] }
 0x4be   :  { %8652 = vmatprep.subr.bf16.mxu1 %v12521_v51  ;;  %v2092_v51 = vld [vmem:[#allocation7 + $0x1b10] sm:$0xff] }
 0x4bf   :  { %v12574_v49 = vcombine.low %v2092_v51, %v2096_v23 }
 0x4c0   :  { %8325 = vmatpush1.bf16.msra.mxu0 %v12518_v42  ;;  %v12568_v42 = vcombine.low %v2085_v33, %v2089_v34  ;;  %v2133_v33 = vld [vmem:[#allocation7 + $0x1c58] sm:$0xff] }
 0x4c1   :  { %8653 = vmatpush1.bf16.msra.mxu1 %v12520_v46  ;;  %8326 = vmatprep.subr.bf16.mxu0 %v12527_v44  ;;  %v12575_v46 = vcombine.high %v2092_v51, %v2096_v23  ;;  %v12577_v44 = vcombine.high %v2093_v30, %v2097_v41  ;;  %v2137_v34 = vld [vmem:[#allocation7 + $0x1c78] sm:$0xff] }
 0x4c2   :  { %8654 = vmatprep.subr.bf16.mxu1 %v12529_v31  ;;  %v2100_v31 = vld [vmem:[#allocation7 + $0x1b50] sm:$0xff]  ;;  %v12617_v51 = vcombine.high %v2133_v33, %v2137_v34  ;;  %v2141_v23 = vld [vmem:[#allocation7 + $0x1c98] sm:$0xff] }
 0x4c3   :  { %v12582_v63 = vcombine.low %v2100_v31, %v2104_v3 }
 0x4c4   :  { %8327 = vmatpush1.bf16.msra.mxu0 %v12526_v50  ;;  %v12576_v50 = vcombine.low %v2093_v30, %v2097_v41  ;;  %v2145_v30 = vld [vmem:[#allocation7 + $0x1cb8] sm:$0xff] }
 0x4c5   :  { %8655 = vmatpush1.bf16.msra.mxu1 %v12528_v2  ;;  %8328 = vmatprep.subr.bf16.mxu0 %v12535_v58  ;;  %v12583_v2 = vcombine.high %v2100_v31, %v2104_v3  ;;  %v12585_v58 = vcombine.high %v2101_v57, %v2105_v36  ;;  %v2152_v31 = vld [vmem:[#allocation7 + $0x1cf0] sm:$0xff]  ;;  %v2149_v3 = vld [vmem:[#allocation7 + $0x1cd8] sm:$0xff] }
 0x4c6   :  { %8656 = vmatprep.subr.bf16.mxu1 %v12537_v11  ;;  %v2108_v11 = vld [vmem:[#allocation7 + $0x1b90] sm:$0xff] }
 0x4c7   :  { %v12590_v59 = vcombine.low %v2108_v11, %v2112_v61 }
 0x4c8   :  { %8329 = vmatpush1.bf16.msra.mxu0 %v12534_v16  ;;  %v12584_v16 = vcombine.low %v2101_v57, %v2105_v36  ;;  %v2153_v57 = vld [vmem:[#allocation7 + $0x1cf8] sm:$0xff] }
 0x4c9   :  { %8657 = vmatpush1.bf16.msra.mxu1 %v12536_v1  ;;  %8330 = vmatprep.subr.bf16.mxu0 %v12543_v18  ;;  %v12591_v1 = vcombine.high %v2108_v11, %v2112_v61  ;;  %v12593_v18 = vcombine.high %v2109_v62, %v2113_v9  ;;  %v2157_v11 = vld [vmem:[#allocation7 + $0x1d18] sm:$0xff] }
 0x4ca   :  { %8658 = vmatprep.subr.bf16.mxu1 %v12545_v24  ;;  %v2116_v24 = vld [vmem:[#allocation7 + $0x1bd0] sm:$0xff]  ;;  %v2161_v61 = vld [vmem:[#allocation7 + $0x1d38] sm:$0xff] }
 0x4cb   :  { %v12598_v27 = vcombine.low %v2116_v24, %v2120_v21 }
 0x4cc   :  { %8331 = vmatpush1.bf16.msra.mxu0 %v12542_v7  ;;  %v12592_v7 = vcombine.low %v2109_v62, %v2113_v9  ;;  %v12632_v62 = vcombine.low %v2149_v3, %v2153_v57 }
 0x4cd   :  { %8659 = vmatpush1.bf16.msra.mxu1 %v12544_v8  ;;  %8332 = vmatprep.subr.bf16.mxu0 %v12551_v40  ;;  %v12599_v8 = vcombine.high %v2116_v24, %v2120_v21  ;;  %v12601_v40 = vcombine.high %v2117_v13, %v2121_v6  ;;  %v2169_v24 = vld [vmem:[#allocation7 + $0x1d78] sm:$0xff] }
 0x4ce   :  { %8660 = vmatprep.subr.bf16.mxu1 %v12553_v14  ;;  %v2124_v14 = vld [vmem:[#allocation7 + $0x1c10] sm:$0xff] }
 0x4cf   :  { %v12606_v4 = vcombine.low %v2124_v14, %v2128_v15 }
 0x4d0   :  { %8333 = vmatpush1.bf16.msra.mxu0 %v12550_v29  ;;  %v12600_v29 = vcombine.low %v2117_v13, %v2121_v6  ;;  %v12640_v13 = vcombine.low %v2157_v11, %v2161_v61 }
 0x4d1   :  { %8661 = vmatpush1.bf16.msra.mxu1 %v12552_v43  ;;  %8334 = vmatprep.subr.bf16.mxu0 %v12559_v26  ;;  %v12607_v43 = vcombine.high %v2124_v14, %v2128_v15  ;;  %v12609_v26 = vcombine.high %v2125_v12, %v2129_v20  ;;  %v2177_v14 = vld [vmem:[#allocation7 + $0x1db8] sm:$0xff] }
 0x4d2   :  { %8662 = vmatprep.subr.bf16.mxu1 %v12561_v60  ;;  %v2132_v60 = vld [vmem:[#allocation7 + $0x1c50] sm:$0xff] }
 0x4d3   :  { %v12614_v41 = vcombine.low %v2132_v60, %v2136_v47 }
 0x4d4   :  { %8335 = vmatpush1.bf16.msra.mxu0 %v12558_v35  ;;  %v12608_v35 = vcombine.low %v2125_v12, %v2129_v20 }
 0x4d5   :  { %8663 = vmatpush1.bf16.msra.mxu1 %v12560_v17  ;;  %8336 = vmatprep.subr.bf16.mxu0 %v12567_v37  ;;  %v12615_v17 = vcombine.high %v2132_v60, %v2136_v47  ;;  %v2140_v37 = vld [vmem:[#allocation7 + $0x1c90] sm:$0xff]  ;;  %v2185_v60 = vld [vmem:[#allocation7 + $0x1df8] sm:$0xff] }
 0x4d6   :  { %8664 = vmatprep.subr.bf16.mxu1 %v12569_v38  ;;  %v2144_v38 = vld [vmem:[#allocation7 + $0x1cb0] sm:$0xff] }
 0x4d7   :  { %v12622_v36 = vcombine.low %v2140_v37, %v2144_v38 }
 0x4d8   :  { %8337 = vmatpush1.bf16.msra.mxu0 %v12566_v25  ;;  %v12616_v25 = vcombine.low %v2133_v33, %v2137_v34 }
 0x4d9   :  { %8665 = vmatpush1.bf16.msra.mxu1 %v12568_v42  ;;  %8338 = vmatprep.subr.bf16.mxu0 %v12575_v46  ;;  %v12623_v42 = vcombine.high %v2140_v37, %v2144_v38  ;;  %v12625_v46 = vcombine.high %v2141_v23, %v2145_v30  ;;  %v2189_v37 = vld [vmem:[#allocation7 + $0x1e18] sm:$0xff] }
 0x4da   :  { %8666 = vmatprep.subr.bf16.mxu1 %v12577_v44  ;;  %v2148_v44 = vld [vmem:[#allocation7 + $0x1cd0] sm:$0xff]  ;;  %v2193_v38 = vld [vmem:[#allocation7 + $0x1e38] sm:$0xff] }
 0x4dc   :  { %8339 = vmatpush1.bf16.msra.mxu0 %v12574_v49  ;;  %v12631_v49 = vcombine.high %v2148_v44, %v2152_v31 }
 0x4dd   :  { %8667 = vmatpush1.bf16.msra.mxu1 %v12576_v50  ;;  %8340 = vmatprep.subr.bf16.mxu0 %v12583_v2  ;;  %v12633_v50 = vcombine.high %v2149_v3, %v2153_v57  ;;  %v2156_v2 = vld [vmem:[#allocation7 + $0x1d10] sm:$0xff]  ;;  %v12672_v3 = vcombine.low %v2189_v37, %v2193_v38 }
 0x4de   :  { %8668 = vmatprep.subr.bf16.mxu1 %v12585_v58  ;;  %v2160_v58 = vld [vmem:[#allocation7 + $0x1d30] sm:$0xff] }
 0x4df   :  { %v12639_v9 = vcombine.high %v2156_v2, %v2160_v58  ;;  %v12638_v21 = vcombine.low %v2156_v2, %v2160_v58  ;;  %v2209_v2 = vld [vmem:[#allocation7 + $0x1eb8] sm:$0xff] }
 0x4e0   :  { %8341 = vmatpush1.bf16.msra.mxu0 %v12582_v63  ;;  %v12641_v63 = vcombine.high %v2157_v11, %v2161_v61 }
 0x4e1   :  { %8669 = vmatpush1.bf16.msra.mxu1 %v12584_v16  ;;  %8342 = vmatprep.subr.bf16.mxu0 %v12591_v1  ;;  %v2164_v16 = vld [vmem:[#allocation7 + $0x1d50] sm:$0xff] }
 0x4e2   :  { %8670 = vmatprep.subr.bf16.mxu1 %v12593_v18  ;;  %v2168_v1 = vld [vmem:[#allocation7 + $0x1d70] sm:$0xff]  ;;  %v2165_v18 = vld [vmem:[#allocation7 + $0x1d58] sm:$0xff] }
 0x4e3   :  { %v12647_v6 = vcombine.high %v2164_v16, %v2168_v1  ;;  %v12646_v15 = vcombine.low %v2164_v16, %v2168_v1  ;;  %v12648_v12 = vcombine.low %v2165_v18, %v2169_v24  ;;  %v2217_v16 = vld [vmem:[#allocation7 + $0x1ef8] sm:$0xff] }
 0x4e4   :  { %8343 = vmatpush1.bf16.msra.mxu0 %v12590_v59  ;;  %v12649_v59 = vcombine.high %v2165_v18, %v2169_v24 }
 0x4e5   :  { %8671 = vmatpush1.bf16.msra.mxu1 %v12592_v7  ;;  %8344 = vmatprep.subr.bf16.mxu0 %v12599_v8  ;;  %v2172_v7 = vld [vmem:[#allocation7 + $0x1d90] sm:$0xff] }
 0x4e6   :  { %8672 = vmatprep.subr.bf16.mxu1 %v12601_v40  ;;  %v2176_v8 = vld [vmem:[#allocation7 + $0x1db0] sm:$0xff]  ;;  %v2173_v40 = vld [vmem:[#allocation7 + $0x1d98] sm:$0xff] }
 0x4e7   :  { %v12655_v20 = vcombine.high %v2172_v7, %v2176_v8  ;;  %v12654_v47 = vcombine.low %v2172_v7, %v2176_v8  ;;  %v2225_v7 = vld [vmem:[#allocation7 + $0x1f38] sm:$0xff] }
 0x4e8   :  { %8345 = vmatpush1.bf16.msra.mxu0 %v12598_v27  ;;  %v12657_v27 = vcombine.high %v2173_v40, %v2177_v14 }
 0x4e9   :  { %8673 = vmatpush1.bf16.msra.mxu1 %v12600_v29  ;;  %8355 = vmatprep.subr.bf16.mxu0 %v12607_v43  ;;  %v2180_v29 = vld [vmem:[#allocation7 + $0x1dd0] sm:$0xff] }
 0x4ea   :  { %8683 = vmatprep.subr.bf16.mxu1 %v12609_v26  ;;  %v2184_v43 = vld [vmem:[#allocation7 + $0x1df0] sm:$0xff]  ;;  %v2181_v26 = vld [vmem:[#allocation7 + $0x1dd8] sm:$0xff] }
 0x4eb   :  { %8347 = vmatmul.mubr.bf16.vlgmr.msra.gmra.mrb[16].mxu0 %v14366_v5  ;;  %v12663_v33 = vcombine.high %v2180_v29, %v2184_v43  ;;  %v12665_v34 = vcombine.high %v2181_v26, %v2185_v60 }
 0x4ec   :  { %8675 = vmatmul.mubr.bf16.vlgmr.msra.gmra.mrb[24].mxu1 %v14366_v5  ;;  %8356 = vmatpush1.bf16.msra.mxu0 %v12606_v4  ;;  %v12624_v5 = vcombine.low %v2141_v23, %v2145_v30  ;;  %v12656_v4 = vcombine.low %v2173_v40, %v2177_v14  ;;  %v12664_v23 = vcombine.low %v2181_v26, %v2185_v60 }
 0x4ed   :  { %8387 = vmatprep.mubr.bf16.mxu0 %v14368_v52  ;;  %8684 = vmatpush1.bf16.msra.mxu1 %v12608_v35  ;;  %v2188_v35 = vld [vmem:[#allocation7 + $0x1e10] sm:$0xff] }
 0x4ee   :  { %8715 = vmatprep.mubr.bf16.mxu1 %v14368_v52  ;;  %8357 = vmatprep.subr.bf16.mxu0 %v12615_v17  ;;  %v12630_v52 = vcombine.low %v2148_v44, %v2152_v31  ;;  %v2192_v17 = vld [vmem:[#allocation7 + $0x1e30] sm:$0xff]  ;;  %v2201_v44 = vld [vmem:[#allocation7 + $0x1e78] sm:$0xff] }
 0x4ef   :  { %8685 = vmatprep.subr.bf16.mxu1 %v12617_v51  ;;  %v12662_v51 = vcombine.low %v2180_v29, %v2184_v43  ;;  %v12671_v30 = vcombine.high %v2188_v35, %v2192_v17  ;;  %v12670_v31 = vcombine.low %v2188_v35, %v2192_v17  ;;  %v2233_v29 = vld [vmem:[#allocation7 + $0x1f78] sm:$0xff]  ;;  %v14419_v17 = vld [vmem:[#allocation11 + $0x10] sm:$0xff] }
 0x4f0   :  { %8358 = vmatpush1.bf16.msra.mxu0 %v12614_v41  ;;  %v12673_v41 = vcombine.high %v2189_v37, %v2193_v38  ;;  %v2241_v35 = vld [vmem:[#allocation7 + $0x1fb8] sm:$0xff] }
 0x4f1   :  { %8686 = vmatpush1.bf16.msra.mxu1 %v12616_v25  ;;  %8359 = vmatprep.subr.bf16.mxu0 %v12623_v42  ;;  %v2196_v25 = vld [vmem:[#allocation7 + $0x1e50] sm:$0xff] }
 0x4f2   :  { %8687 = vmatprep.subr.bf16.mxu1 %v12625_v46  ;;  %v2200_v42 = vld [vmem:[#allocation7 + $0x1e70] sm:$0xff]  ;;  %v2197_v46 = vld [vmem:[#allocation7 + $0x1e58] sm:$0xff] }
 0x4f3   :  { %v12679_v57 = vcombine.high %v2196_v25, %v2200_v42  ;;  %v12678_v58 = vcombine.low %v2196_v25, %v2200_v42  ;;  %v12680_v11 = vcombine.low %v2197_v46, %v2201_v44  ;;  %v2259_v25 = vrot.slane %v14419_v17, %v14220_v55  ;;  %v2245_v42 = vld [vmem:[#allocation7 + $0x1fd8] sm:$0xff] }
 0x4f4   :  { %8360 = vmatpush1.bf16.msra.mxu0 %v12622_v36  ;;  %v12681_v36 = vcombine.high %v2197_v46, %v2201_v44  ;;  %v2249_v46 = vld [vmem:[#allocation7 + $0x1ff8] sm:$0xff] }
 0x4f5   :  { %8688 = vmatpush1.bf16.msra.mxu1 %v12624_v5  ;;  %8361 = vmatprep.subr.bf16.mxu0 %v12631_v49  ;;  %v2204_v5 = vld [vmem:[#allocation7 + $0x1e90] sm:$0xff] }
 0x4f6   :  { %8689 = vmatprep.subr.bf16.mxu1 %v12633_v50  ;;  %v2208_v49 = vld [vmem:[#allocation7 + $0x1eb0] sm:$0xff]  ;;  %v2205_v50 = vld [vmem:[#allocation7 + $0x1e98] sm:$0xff] }
 0x4f7   :  { %v12687_v61 = vcombine.high %v2204_v5, %v2208_v49  ;;  %v12686_v1 = vcombine.low %v2204_v5, %v2208_v49  ;;  %v12688_v18 = vcombine.low %v2205_v50, %v2209_v2  ;;  %v12728_v49 = vcombine.low %v2245_v42, %v2249_v46 }
 0x4f8   :  { %8362 = vmatpush1.bf16.msra.mxu0 %v12630_v52  ;;  %v12689_v52 = vcombine.high %v2205_v50, %v2209_v2  ;;  %v13355_v50 = vld [vmem:[#allocation8 + $0x4] ss:$16 sps:$4 sm:$0xff]   ;;  %v13358_v2 = vld [vmem:[#allocation8 + $0xc] ss:$16 sps:$4 sm:$0xff]  }
 0x4f9   :  { %8690 = vmatpush1.bf16.msra.mxu1 %v12632_v62  ;;  %8363 = vmatprep.subr.bf16.mxu0 %v12639_v9  ;;  %v2212_v62 = vld [vmem:[#allocation7 + $0x1ed0] sm:$0xff] }
 0x4fa   :  { %8691 = vmatprep.subr.bf16.mxu1 %v12641_v63  ;;  %v2216_v9 = vld [vmem:[#allocation7 + $0x1ef0] sm:$0xff]  ;;  %v2213_v63 = vld [vmem:[#allocation7 + $0x1ed8] sm:$0xff] }
 0x4fb   :  { %v12695_v24 = vcombine.high %v2212_v62, %v2216_v9  ;;  %v12694_v8 = vcombine.low %v2212_v62, %v2216_v9  ;;  %v12696_v40 = vcombine.low %v2213_v63, %v2217_v16  ;;  %v13359_v9 = vld [vmem:[#allocation8 + $0x20] ss:$16 sps:$4 sm:$0xff]  }
 0x4fc   :  { %8364 = vmatpush1.bf16.msra.mxu0 %v12638_v21  ;;  %v12697_v21 = vcombine.high %v2213_v63, %v2217_v16  ;;  %v13362_v63 = vld [vmem:[#allocation8 + $0x28] ss:$16 sps:$4 sm:$0xff]   ;;  %v13367_v16 = vld [vmem:[#allocation8 + $0x44] ss:$16 sps:$4 sm:$0xff]  }
 0x4fd   :  { %8692 = vmatpush1.bf16.msra.mxu1 %v12640_v13  ;;  %8365 = vmatprep.subr.bf16.mxu0 %v12647_v6  ;;  %v2220_v13 = vld [vmem:[#allocation7 + $0x1f10] sm:$0xff] }
 0x4fe   :  { %8693 = vmatprep.subr.bf16.mxu1 %v12649_v59  ;;  %v2224_v6 = vld [vmem:[#allocation7 + $0x1f30] sm:$0xff]  ;;  %v2221_v59 = vld [vmem:[#allocation7 + $0x1f18] sm:$0xff] }
 0x4ff   :  { %v12703_v14 = vcombine.high %v2220_v13, %v2224_v6  ;;  %v12702_v43 = vcombine.low %v2220_v13, %v2224_v6  ;;  %v12704_v26 = vcombine.low %v2221_v59, %v2225_v7  ;;  %v13376_v13 = vld [vmem:[#allocation8 + $0x6c] ss:$16 sps:$4 sm:$0xff]   ;;  %v13374_v6 = vld [vmem:[#allocation8 + $0x68] ss:$16 sps:$4 sm:$0xff]  }
 0x500   :  { %8366 = vmatpush1.bf16.msra.mxu0 %v12646_v15  ;;  %v12705_v15 = vcombine.high %v2221_v59, %v2225_v7  ;;  %v13379_v59 = vld [vmem:[#allocation8 + $0x84] ss:$16 sps:$4 sm:$0xff]   ;;  %v13382_v7 = vld [vmem:[#allocation8 + $0x8c] ss:$16 sps:$4 sm:$0xff]  }
 0x501   :  { %8694 = vmatpush1.bf16.msra.mxu1 %v12648_v12  ;;  %8367 = vmatprep.subr.bf16.mxu0 %v12655_v20  ;;  %v2228_v12 = vld [vmem:[#allocation7 + $0x1f50] sm:$0xff] }
 0x502   :  { %8695 = vmatprep.subr.bf16.mxu1 %v12657_v27  ;;  %v2232_v20 = vld [vmem:[#allocation7 + $0x1f70] sm:$0xff]  ;;  %v2229_v27 = vld [vmem:[#allocation7 + $0x1f58] sm:$0xff] }
 0x503   :  { %v12711_v60 = vcombine.high %v2228_v12, %v2232_v20  ;;  %v12710_v37 = vcombine.low %v2228_v12, %v2232_v20  ;;  %v12712_v38 = vcombine.low %v2229_v27, %v2233_v29  ;;  %v13383_v12 = vld [vmem:[#allocation8 + $0xa0] ss:$16 sps:$4 sm:$0xff]   ;;  %v13386_v20 = vld [vmem:[#allocation8 + $0xa8] ss:$16 sps:$4 sm:$0xff]  }
 0x504   :  { %8368 = vmatpush1.bf16.msra.mxu0 %v12654_v47  ;;  %v12713_v47 = vcombine.high %v2229_v27, %v2233_v29  ;;  %v13391_v27 = vld [vmem:[#allocation8 + $0xc4] ss:$16 sps:$4 sm:$0xff]   ;;  %v13394_v29 = vld [vmem:[#allocation8 + $0xcc] ss:$16 sps:$4 sm:$0xff]  }
 0x505   :  { %8696 = vmatpush1.bf16.msra.mxu1 %v12656_v4  ;;  %8369 = vmatprep.subr.bf16.mxu0 %v12663_v33  ;;  %v2236_v4 = vld [vmem:[#allocation7 + $0x1f90] sm:$0xff] }
 0x506   :  { %8697 = vmatprep.subr.bf16.mxu1 %v12665_v34  ;;  %v2240_v33 = vld [vmem:[#allocation7 + $0x1fb0] sm:$0xff]  ;;  %v2237_v34 = vld [vmem:[#allocation7 + $0x1f98] sm:$0xff] }
 0x507   :  { %v12718_v44 = vcombine.low %v2236_v4, %v2240_v33 }
 0x508   :  { %8370 = vmatpush1.bf16.msra.mxu0 %v12662_v51  ;;  %v12719_v51 = vcombine.high %v2236_v4, %v2240_v33  ;;  %v13395_v4 = vld [vmem:[#allocation8 + $0xe0] ss:$16 sps:$4 sm:$0xff]   ;;  %v13398_v33 = vld [vmem:[#allocation8 + $0xe8] ss:$16 sps:$4 sm:$0xff]  }
 0x509   :  { %8698 = vmatpush1.bf16.msra.mxu1 %v12664_v23  ;;  %8371 = vmatprep.subr.bf16.mxu0 %v12671_v30  ;;  %v12721_v23 = vcombine.high %v2237_v34, %v2241_v35  ;;  %v2244_v30 = vld [vmem:[#allocation7 + $0x1fd0] sm:$0xff] }
 0x50a   :  { %8699 = vmatprep.subr.bf16.mxu1 %v12673_v41  ;;  %v2248_v41 = vld [vmem:[#allocation7 + $0x1ff0] sm:$0xff] }
 0x50b   :  { %v12726_v5 = vcombine.low %v2244_v30, %v2248_v41 }
 0x50c   :  { %8372 = vmatpush1.bf16.msra.mxu0 %v12670_v31  ;;  %v12720_v31 = vcombine.low %v2237_v34, %v2241_v35  ;;  %v13403_v34 = vld [vmem:[#allocation8 + $0x104] ss:$16 sps:$4 sm:$0xff]   ;;  %v13406_v35 = vld [vmem:[#allocation8 + $0x10c] ss:$16 sps:$4 sm:$0xff]  }
 0x50d   :  { %8700 = vmatpush1.bf16.msra.mxu1 %v12672_v3  ;;  %8373 = vmatprep.subr.bf16.mxu0 %v12679_v57  ;;  %v12727_v3 = vcombine.high %v2244_v30, %v2248_v41  ;;  %v12729_v57 = vcombine.high %v2245_v42, %v2249_v46  ;;  %v13407_v30 = vld [vmem:[#allocation8 + $0x120] ss:$16 sps:$4 sm:$0xff]   ;;  %v13410_v41 = vld [vmem:[#allocation8 + $0x128] ss:$16 sps:$4 sm:$0xff]   ;;  %v13418_v42 = vld [vmem:[#allocation8 + $0x14c] ss:$16 sps:$4 sm:$0xff]  }
 0x50e   :  { %8701 = vmatprep.subr.bf16.mxu1 %v12681_v36  ;;  %v13166_v36 = vadd.f32 %v14399_v19, %v2259_v25  ;;  %v13364_v19 = vld [vmem:[#allocation8 + $0x2c] ss:$16 sps:$4 sm:$0xff]   ;;  %v13415_v25 = vld [vmem:[#allocation8 + $0x144] ss:$16 sps:$4 sm:$0xff]   ;;  %v13413_v46 = vld [vmem:[#allocation8 + $0x140] ss:$16 sps:$4 sm:$0xff]  }
 0x510   :  { %8374 = vmatpush1.bf16.msra.mxu0 %v12678_v58  ;;  %v8725_v58 = vmax.f32 %v13166_v36, 0.0  ;;  %v13422_v36 = vld [vmem:[#allocation8 + $0x168] ss:$16 sps:$4 sm:$0xff]  }
 0x511   :  { %8702 = vmatpush1.bf16.msra.mxu1 %v12680_v11  ;;  %8375 = vmatprep.subr.bf16.mxu0 %v12687_v61  ;;  %v13353_v11 = vld [vmem:[#allocation8] ss:$16 sps:$4 sm:$0xff]   ;;  %v13356_v61 = vld [vmem:[#allocation8 + $0x8] ss:$16 sps:$4 sm:$0xff]  }
 0x512   :  { %8703 = vmatprep.subr.bf16.mxu1 %v12689_v52  ;;  %v13361_v52 = vld [vmem:[#allocation8 + $0x24] ss:$16 sps:$4 sm:$0xff]   ;;  %v8733_v62 = vpack.c.bf16 %v8725_v58, %v8725_v58 }
 0x513   :  { %v13433_v58 = vld [vmem:[#allocation8 + $0x1a4] ss:$16 sps:$4 sm:$0xff]  }
 0x514   :  { %8376 = vmatpush1.bf16.msra.mxu0 %v12686_v1  ;;  %v13370_v1 = vld [vmem:[#allocation8 + $0x4c] ss:$16 sps:$4 sm:$0xff]  }
 0x515   :  { %8704 = vmatpush1.bf16.msra.mxu1 %v12688_v18  ;;  %8377 = vmatprep.subr.bf16.mxu0 %v12695_v24  ;;  %v13365_v18 = vld [vmem:[#allocation8 + $0x40] ss:$16 sps:$4 sm:$0xff]   ;;  %v13368_v24 = vld [vmem:[#allocation8 + $0x48] ss:$16 sps:$4 sm:$0xff]  }
 0x516   :  { %8705 = vmatprep.subr.bf16.mxu1 %v12697_v21  ;;  %v13373_v21 = vld [vmem:[#allocation8 + $0x64] ss:$16 sps:$4 sm:$0xff]  }
 0x518   :  { %8378 = vmatpush1.bf16.msra.mxu0 %v12694_v8  ;;  %v13377_v8 = vld [vmem:[#allocation8 + $0x80] ss:$16 sps:$4 sm:$0xff]  }
 0x519   :  { %8706 = vmatpush1.bf16.msra.mxu1 %v12696_v40  ;;  %8379 = vmatprep.subr.bf16.mxu0 %v12703_v14  ;;  %v13380_v40 = vld [vmem:[#allocation8 + $0x88] ss:$16 sps:$4 sm:$0xff]   ;;  %v13385_v14 = vld [vmem:[#allocation8 + $0xa4] ss:$16 sps:$4 sm:$0xff]  }
 0x51a   :  { %8707 = vmatprep.subr.bf16.mxu1 %v12705_v15  ;;  %v13388_v15 = vld [vmem:[#allocation8 + $0xac] ss:$16 sps:$4 sm:$0xff]  }
 0x51c   :  { %8380 = vmatpush1.bf16.msra.mxu0 %v12702_v43  ;;  %v13389_v43 = vld [vmem:[#allocation8 + $0xc0] ss:$16 sps:$4 sm:$0xff]  }
 0x51d   :  { %8708 = vmatpush1.bf16.msra.mxu1 %v12704_v26  ;;  %8381 = vmatprep.subr.bf16.mxu0 %v12711_v60  ;;  %v13392_v26 = vld [vmem:[#allocation8 + $0xc8] ss:$16 sps:$4 sm:$0xff]   ;;  %v13397_v60 = vld [vmem:[#allocation8 + $0xe4] ss:$16 sps:$4 sm:$0xff]  }
 0x51e   :  { %8709 = vmatprep.subr.bf16.mxu1 %v12713_v47  ;;  %v13400_v47 = vld [vmem:[#allocation8 + $0xec] ss:$16 sps:$4 sm:$0xff]  }
 0x520   :  { %8382 = vmatpush1.bf16.msra.mxu0 %v12710_v37  ;;  %v13401_v37 = vld [vmem:[#allocation8 + $0x100] ss:$16 sps:$4 sm:$0xff]  }
 0x521   :  { %8710 = vmatpush1.bf16.msra.mxu1 %v12712_v38  ;;  %8383 = vmatprep.subr.bf16.mxu0 %v12719_v51  ;;  %v13404_v38 = vld [vmem:[#allocation8 + $0x108] ss:$16 sps:$4 sm:$0xff]   ;;  %v13409_v51 = vld [vmem:[#allocation8 + $0x124] ss:$16 sps:$4 sm:$0xff]  }
 0x522   :  { %8711 = vmatprep.subr.bf16.mxu1 %v12721_v23  ;;  %v13412_v23 = vld [vmem:[#allocation8 + $0x12c] ss:$16 sps:$4 sm:$0xff]  }
 0x524   :  { %8384 = vmatpush1.bf16.msra.mxu0 %v12718_v44  ;;  %v13416_v44 = vld [vmem:[#allocation8 + $0x148] ss:$16 sps:$4 sm:$0xff]  }
 0x525   :  { %8712 = vmatpush1.bf16.msra.mxu1 %v12720_v31  ;;  %8385 = vmatprep.subr.bf16.mxu0 %v12727_v3  ;;  %v13421_v31 = vld [vmem:[#allocation8 + $0x164] ss:$16 sps:$4 sm:$0xff]   ;;  %v13424_v3 = vld [vmem:[#allocation8 + $0x16c] ss:$16 sps:$4 sm:$0xff]  }
 0x526   :  { %8713 = vmatprep.subr.bf16.mxu1 %v12729_v57  ;;  %v13419_v57 = vld [vmem:[#allocation8 + $0x160] ss:$16 sps:$4 sm:$0xff]  }
 0x528   :  { %8386 = vmatpush1.bf16.msra.mxu0 %v12726_v5  ;;  %v13427_v5 = vld [vmem:[#allocation8 + $0x184] ss:$16 sps:$4 sm:$0xff]  }
 0x529   :  { %8714 = vmatpush1.bf16.msra.mxu1 %v12728_v49  ;;  %10298 = vmatprep.subr.bf16.mxu0 %v13355_v50  ;;  %v13430_v49 = vld [vmem:[#allocation8 + $0x18c] ss:$16 sps:$4 sm:$0xff]   ;;  %v13425_v50 = vld [vmem:[#allocation8 + $0x180] ss:$16 sps:$4 sm:$0xff]  }
 0x52a   :  { %10462 = vmatprep.subr.bf16.mxu1 %v13358_v2  ;;  %v13428_v2 = vld [vmem:[#allocation8 + $0x188] ss:$16 sps:$4 sm:$0xff]  }
 0x52b   :  { %8388 = vmatmul.mubr.bf16.vlgmr.msra.gmra.mrb[16].mxu0 %v14377_v28 }
 0x52c   :  { %8716 = vmatmul.mubr.bf16.vlgmr.msra.gmra.mrb[24].mxu1 %v14377_v28  ;;  %10299 = vmatpush1.bf16.msra.mxu0 %v13353_v11  ;;  %v13371_v28 = vld [vmem:[#allocation8 + $0x60] ss:$16 sps:$4 sm:$0xff]   ;;  %v13436_v11 = vld [vmem:[#allocation8 + $0x1ac] ss:$16 sps:$4 sm:$0xff]  }
 0x52d   :  { %10330 = vmatprep.mubr.bf16.mxu0 %v8733_v62  ;;  %10463 = vmatpush1.bf16.msra.mxu1 %v13356_v61  ;;  %v13431_v61 = vld [vmem:[#allocation8 + $0x1a0] ss:$16 sps:$4 sm:$0xff]  }
 0x52e   :  { %10494 = vmatprep.mubr.bf16.mxu1 %v8733_v62  ;;  %10300 = vmatprep.subr.bf16.mxu0 %v13361_v52  ;;  %v2255_v52 = vrot.slane %v14419_v17, %v14215_v53  ;;  %v13434_v62 = vld [vmem:[#allocation8 + $0x1a8] ss:$16 sps:$4 sm:$0xff]  }
 0x52f   :  { %10464 = vmatprep.subr.bf16.mxu1 %v13364_v19  ;;  %v13439_v19 = vld [vmem:[#allocation8 + $0x1c4] ss:$16 sps:$4 sm:$0xff]  }
 0x530   :  { %10301 = vmatpush1.bf16.msra.mxu0 %v13359_v9  ;;  %v13442_v9 = vld [vmem:[#allocation8 + $0x1cc] ss:$16 sps:$4 sm:$0xff]  }
 0x531   :  { %10465 = vmatpush1.bf16.msra.mxu1 %v13362_v63  ;;  %10302 = vmatprep.subr.bf16.mxu0 %v13367_v16  ;;  %v2267_v63 = vrot.slane %v14419_v17, %v14242_v45  ;;  %v13437_v16 = vld [vmem:[#allocation8 + $0x1c0] ss:$16 sps:$4 sm:$0xff]  }
 0x532   :  { %10466 = vmatprep.subr.bf16.mxu1 %v13370_v1  ;;  %v13165_v1 = vadd.f32 %v14395_v54, %v2255_v52  ;;  %v13449_v54 = vld [vmem:[#allocation8 + $0x200] ss:$16 sps:$4 sm:$0xff]   ;;  %v13508_v52 = vld [vmem:[#allocation8 + $0x32c] ss:$16 sps:$4 sm:$0xff]  }
 0x534   :  { %10303 = vmatpush1.bf16.msra.mxu0 %v13365_v18  ;;  %v13440_v18 = vld [vmem:[#allocation8 + $0x1c8] ss:$16 sps:$4 sm:$0xff]  }
 0x535   :  { %10467 = vmatpush1.bf16.msra.mxu1 %v13368_v24  ;;  %10304 = vmatprep.subr.bf16.mxu0 %v13373_v21  ;;  %v13445_v24 = vld [vmem:[#allocation8 + $0x1e4] ss:$16 sps:$4 sm:$0xff]   ;;  %v13448_v21 = vld [vmem:[#allocation8 + $0x1ec] ss:$16 sps:$4 sm:$0xff]  }
 0x536   :  { %10468 = vmatprep.subr.bf16.mxu1 %v13376_v13  ;;  %v13168_v13 = vadd.f32 %v14401_v0, %v2267_v63  ;;  %v13460_v0 = vld [vmem:[#allocation8 + $0x22c] ss:$16 sps:$4 sm:$0xff]  }
 0x537   :  { %v13514_v63 = vld [vmem:[#allocation8 + $0x34c] ss:$16 sps:$4 sm:$0xff]  }
 0x538   :  { %10305 = vmatpush1.bf16.msra.mxu0 %v13371_v28  ;;  %v13443_v28 = vld [vmem:[#allocation8 + $0x1e0] ss:$16 sps:$4 sm:$0xff]  }
 0x539   :  { %10469 = vmatpush1.bf16.msra.mxu1 %v13374_v6  ;;  %10306 = vmatprep.subr.bf16.mxu0 %v13379_v59  ;;  %v8724_v6 = vmax.f32 %v13165_v1, 0.0  ;;  %v13446_v59 = vld [vmem:[#allocation8 + $0x1e8] ss:$16 sps:$4 sm:$0xff]  }
 0x53a   :  { %10470 = vmatprep.subr.bf16.mxu1 %v13382_v7  ;;  %v13451_v7 = vld [vmem:[#allocation8 + $0x204] ss:$16 sps:$4 sm:$0xff]   ;;  %v13512_v1 = vld [vmem:[#allocation8 + $0x348] ss:$16 sps:$4 sm:$0xff]  }
 0x53c   :  { %10307 = vmatpush1.bf16.msra.mxu0 %v13377_v8  ;;  %v13454_v8 = vld [vmem:[#allocation8 + $0x20c] ss:$16 sps:$4 sm:$0xff]  }
 0x53d   :  { %10471 = vmatpush1.bf16.msra.mxu1 %v13380_v40  ;;  %10308 = vmatprep.subr.bf16.mxu0 %v13385_v14  ;;  %v8727_v40 = vmax.f32 %v13168_v13, 0.0  ;;  %v8732_v14 = vpack.c.bf16 %v8724_v6, %v8724_v6  ;;  %v13518_v13 = vld [vmem:[#allocation8 + $0x368] ss:$16 sps:$4 sm:$0xff]   ;;  %v13526_v6 = vld [vmem:[#allocation8 + $0x38c] ss:$16 sps:$4 sm:$0xff]  }
 0x53e   :  { %10472 = vmatprep.subr.bf16.mxu1 %v13388_v15  ;;  %v13452_v15 = vld [vmem:[#allocation8 + $0x208] ss:$16 sps:$4 sm:$0xff]  }
 0x540   :  { %10309 = vmatpush1.bf16.msra.mxu0 %v13383_v12  ;;  %v13457_v12 = vld [vmem:[#allocation8 + $0x224] ss:$16 sps:$4 sm:$0xff]  }
 0x541   :  { %10473 = vmatpush1.bf16.msra.mxu1 %v13386_v20  ;;  %10310 = vmatprep.subr.bf16.mxu0 %v13391_v27  ;;  %v8735_v20 = vpack.c.bf16 %v8727_v40, %v8727_v40  ;;  %v13455_v27 = vld [vmem:[#allocation8 + $0x220] ss:$16 sps:$4 sm:$0xff]   ;;  %v13532_v40 = vld [vmem:[#allocation8 + $0x3ac] ss:$16 sps:$4 sm:$0xff]  }
 0x542   :  { %10474 = vmatprep.subr.bf16.mxu1 %v13394_v29  ;;  %v13458_v29 = vld [vmem:[#allocation8 + $0x228] ss:$16 sps:$4 sm:$0xff]  }
 0x544   :  { %10311 = vmatpush1.bf16.msra.mxu0 %v13389_v43  ;;  %v13463_v43 = vld [vmem:[#allocation8 + $0x244] ss:$16 sps:$4 sm:$0xff]  }
 0x545   :  { %10475 = vmatpush1.bf16.msra.mxu1 %v13392_v26  ;;  %10312 = vmatprep.subr.bf16.mxu0 %v13397_v60  ;;  %v13466_v26 = vld [vmem:[#allocation8 + $0x24c] ss:$16 sps:$4 sm:$0xff]   ;;  %v13461_v60 = vld [vmem:[#allocation8 + $0x240] ss:$16 sps:$4 sm:$0xff]  }
 0x546   :  { %10476 = vmatprep.subr.bf16.mxu1 %v13400_v47  ;;  %v13464_v47 = vld [vmem:[#allocation8 + $0x248] ss:$16 sps:$4 sm:$0xff]  }
 0x548   :  { %10313 = vmatpush1.bf16.msra.mxu0 %v13395_v4  ;;  %v13469_v4 = vld [vmem:[#allocation8 + $0x264] ss:$16 sps:$4 sm:$0xff]  }
 0x549   :  { %10477 = vmatpush1.bf16.msra.mxu1 %v13398_v33  ;;  %10314 = vmatprep.subr.bf16.mxu0 %v13403_v34  ;;  %v13472_v33 = vld [vmem:[#allocation8 + $0x26c] ss:$16 sps:$4 sm:$0xff]   ;;  %v13467_v34 = vld [vmem:[#allocation8 + $0x260] ss:$16 sps:$4 sm:$0xff]  }
 0x54a   :  { %10478 = vmatprep.subr.bf16.mxu1 %v13406_v35  ;;  %v13470_v35 = vld [vmem:[#allocation8 + $0x268] ss:$16 sps:$4 sm:$0xff]  }
 0x54c   :  { %10315 = vmatpush1.bf16.msra.mxu0 %v13401_v37  ;;  %v13475_v37 = vld [vmem:[#allocation8 + $0x284] ss:$16 sps:$4 sm:$0xff]  }
 0x54d   :  { %10479 = vmatpush1.bf16.msra.mxu1 %v13404_v38  ;;  %10316 = vmatprep.subr.bf16.mxu0 %v13409_v51  ;;  %v13478_v38 = vld [vmem:[#allocation8 + $0x28c] ss:$16 sps:$4 sm:$0xff]   ;;  %v13473_v51 = vld [vmem:[#allocation8 + $0x280] ss:$16 sps:$4 sm:$0xff]  }
 0x54e   :  { %10480 = vmatprep.subr.bf16.mxu1 %v13412_v23  ;;  %v13476_v23 = vld [vmem:[#allocation8 + $0x288] ss:$16 sps:$4 sm:$0xff]  }
 0x550   :  { %10317 = vmatpush1.bf16.msra.mxu0 %v13407_v30  ;;  %v13481_v30 = vld [vmem:[#allocation8 + $0x2a4] ss:$16 sps:$4 sm:$0xff]  }
 0x551   :  { %10481 = vmatpush1.bf16.msra.mxu1 %v13410_v41  ;;  %10318 = vmatprep.subr.bf16.mxu0 %v13415_v25  ;;  %v13484_v41 = vld [vmem:[#allocation8 + $0x2ac] ss:$16 sps:$4 sm:$0xff]   ;;  %v13479_v25 = vld [vmem:[#allocation8 + $0x2a0] ss:$16 sps:$4 sm:$0xff]  }
 0x552   :  { %10482 = vmatprep.subr.bf16.mxu1 %v13418_v42  ;;  %v13482_v42 = vld [vmem:[#allocation8 + $0x2a8] ss:$16 sps:$4 sm:$0xff]  }
 0x554   :  { %10319 = vmatpush1.bf16.msra.mxu0 %v13413_v46  ;;  %v13487_v46 = vld [vmem:[#allocation8 + $0x2c4] ss:$16 sps:$4 sm:$0xff]  }
 0x555   :  { %10483 = vmatpush1.bf16.msra.mxu1 %v13416_v44  ;;  %10320 = vmatprep.subr.bf16.mxu0 %v13421_v31  ;;  %v13490_v44 = vld [vmem:[#allocation8 + $0x2cc] ss:$16 sps:$4 sm:$0xff]   ;;  %v13485_v31 = vld [vmem:[#allocation8 + $0x2c0] ss:$16 sps:$4 sm:$0xff]  }
 0x556   :  { %10484 = vmatprep.subr.bf16.mxu1 %v13424_v3  ;;  %v13488_v3 = vld [vmem:[#allocation8 + $0x2c8] ss:$16 sps:$4 sm:$0xff]  }
 0x558   :  { %10321 = vmatpush1.bf16.msra.mxu0 %v13419_v57  ;;  %v13493_v57 = vld [vmem:[#allocation8 + $0x2e4] ss:$16 sps:$4 sm:$0xff]  }
 0x559   :  { %10485 = vmatpush1.bf16.msra.mxu1 %v13422_v36  ;;  %10322 = vmatprep.subr.bf16.mxu0 %v13427_v5  ;;  %v13496_v36 = vld [vmem:[#allocation8 + $0x2ec] ss:$16 sps:$4 sm:$0xff]   ;;  %v13491_v5 = vld [vmem:[#allocation8 + $0x2e0] ss:$16 sps:$4 sm:$0xff]  }
 0x55a   :  { %10486 = vmatprep.subr.bf16.mxu1 %v13430_v49  ;;  %v13494_v49 = vld [vmem:[#allocation8 + $0x2e8] ss:$16 sps:$4 sm:$0xff]  }
 0x55c   :  { %10323 = vmatpush1.bf16.msra.mxu0 %v13425_v50  ;;  %v13499_v50 = vld [vmem:[#allocation8 + $0x304] ss:$16 sps:$4 sm:$0xff]  }
 0x55d   :  { %10487 = vmatpush1.bf16.msra.mxu1 %v13428_v2  ;;  %10324 = vmatprep.subr.bf16.mxu0 %v13433_v58  ;;  %v13502_v2 = vld [vmem:[#allocation8 + $0x30c] ss:$16 sps:$4 sm:$0xff]   ;;  %v13497_v58 = vld [vmem:[#allocation8 + $0x300] ss:$16 sps:$4 sm:$0xff]  }
 0x55e   :  { %10488 = vmatprep.subr.bf16.mxu1 %v13436_v11  ;;  %v13500_v11 = vld [vmem:[#allocation8 + $0x308] ss:$16 sps:$4 sm:$0xff]  }
 0x560   :  { %10325 = vmatpush1.bf16.msra.mxu0 %v13431_v61  ;;  %v13505_v61 = vld [vmem:[#allocation8 + $0x324] ss:$16 sps:$4 sm:$0xff]  }
 0x561   :  { %10489 = vmatpush1.bf16.msra.mxu1 %v13434_v62  ;;  %10326 = vmatprep.subr.bf16.mxu0 %v13439_v19  ;;  %v13503_v62 = vld [vmem:[#allocation8 + $0x320] ss:$16 sps:$4 sm:$0xff]   ;;  %v13506_v19 = vld [vmem:[#allocation8 + $0x328] ss:$16 sps:$4 sm:$0xff]  }
 0x562   :  { %10490 = vmatprep.subr.bf16.mxu1 %v13442_v9  ;;  %v13511_v9 = vld [vmem:[#allocation8 + $0x344] ss:$16 sps:$4 sm:$0xff]  }
 0x564   :  { %10327 = vmatpush1.bf16.msra.mxu0 %v13437_v16  ;;  %v13509_v16 = vld [vmem:[#allocation8 + $0x340] ss:$16 sps:$4 sm:$0xff]  }
 0x565   :  { %10491 = vmatpush1.bf16.msra.mxu1 %v13440_v18  ;;  %10328 = vmatprep.subr.bf16.mxu0 %v13445_v24  ;;  %v13517_v18 = vld [vmem:[#allocation8 + $0x364] ss:$16 sps:$4 sm:$0xff]   ;;  %v13520_v24 = vld [vmem:[#allocation8 + $0x36c] ss:$16 sps:$4 sm:$0xff]  }
 0x566   :  { %10492 = vmatprep.subr.bf16.mxu1 %v13448_v21  ;;  %v13515_v21 = vld [vmem:[#allocation8 + $0x360] ss:$16 sps:$4 sm:$0xff]  }
 0x568   :  { %10329 = vmatpush1.bf16.msra.mxu0 %v13443_v28  ;;  %v13523_v28 = vld [vmem:[#allocation8 + $0x384] ss:$16 sps:$4 sm:$0xff]  }
 0x569   :  { %10493 = vmatpush1.bf16.msra.mxu1 %v13446_v59  ;;  %10339 = vmatprep.subr.bf16.mxu0 %v13451_v7  ;;  %v13521_v59 = vld [vmem:[#allocation8 + $0x380] ss:$16 sps:$4 sm:$0xff]   ;;  %v13524_v7 = vld [vmem:[#allocation8 + $0x388] ss:$16 sps:$4 sm:$0xff]  }
 0x56a   :  { %10503 = vmatprep.subr.bf16.mxu1 %v13454_v8  ;;  %v13529_v8 = vld [vmem:[#allocation8 + $0x3a4] ss:$16 sps:$4 sm:$0xff]  }
 0x56b   :  { %10331 = vmatmul.mubr.bf16.vlgmr.msra.gmra.mrb[20].mxu0 %v8732_v14 }
 0x56c   :  { %10495 = vmatmul.mubr.bf16.vlgmr.msra.gmra.mrb[28].mxu1 %v8732_v14  ;;  %10340 = vmatpush1.bf16.msra.mxu0 %v13449_v54  ;;  %v13527_v54 = vld [vmem:[#allocation8 + $0x3a0] ss:$16 sps:$4 sm:$0xff]   ;;  %v2263_v14 = vrot.slane %v14419_v17, %v14257_v10 }
 0x56d   :  { %10371 = vmatprep.mubr.bf16.mxu0 %v8735_v20  ;;  %10504 = vmatpush1.bf16.msra.mxu1 %v13452_v15  ;;  %v13530_v15 = vld [vmem:[#allocation8 + $0x3a8] ss:$16 sps:$4 sm:$0xff]  }
 0x56e   :  { %10535 = vmatprep.mubr.bf16.mxu1 %v8735_v20  ;;  %10341 = vmatprep.subr.bf16.mxu0 %v13457_v12  ;;  %v13535_v12 = vld [vmem:[#allocation8 + $0x3c4] ss:$16 sps:$4 sm:$0xff]   ;;  %v13538_v20 = vld [vmem:[#allocation8 + $0x3cc] ss:$16 sps:$4 sm:$0xff]  }
 0x56f   :  { %10505 = vmatprep.subr.bf16.mxu1 %v13460_v0  ;;  %v13533_v0 = vld [vmem:[#allocation8 + $0x3c0] ss:$16 sps:$4 sm:$0xff]  }
 0x570   :  { %10342 = vmatpush1.bf16.msra.mxu0 %v13455_v27  ;;  %v13167_v27 = vadd.f32 %v14397_v48, %v2263_v14  ;;  %v13548_v48 = vld [vmem:[#allocation8 + $0x408] ss:$16 sps:$4 sm:$0xff]   ;;  %v13605_v14 = vld [vmem:[#allocation8 + $0x540] ss:$16 sps:$4 sm:$0xff]  }
 0x571   :  { %10506 = vmatpush1.bf16.msra.mxu1 %v13458_v29  ;;  %10343 = vmatprep.subr.bf16.mxu0 %v13463_v43  ;;  %v13536_v29 = vld [vmem:[#allocation8 + $0x3c8] ss:$16 sps:$4 sm:$0xff]   ;;  %v13541_v43 = vld [vmem:[#allocation8 + $0x3e4] ss:$16 sps:$4 sm:$0xff]  }
 0x572   :  { %10507 = vmatprep.subr.bf16.mxu1 %v13466_v26  ;;  %v13544_v26 = vld [vmem:[#allocation8 + $0x3ec] ss:$16 sps:$4 sm:$0xff]  }
 0x574   :  { %10344 = vmatpush1.bf16.msra.mxu0 %v13461_v60  ;;  %v13539_v60 = vld [vmem:[#allocation8 + $0x3e0] ss:$16 sps:$4 sm:$0xff]  }
 0x575   :  { %10508 = vmatpush1.bf16.msra.mxu1 %v13464_v47  ;;  %10345 = vmatprep.subr.bf16.mxu0 %v13469_v4  ;;  %v8726_v47 = vmax.f32 %v13167_v27, 0.0  ;;  %v13542_v4 = vld [vmem:[#allocation8 + $0x3e8] ss:$16 sps:$4 sm:$0xff]  }
 0x576   :  { %10509 = vmatprep.subr.bf16.mxu1 %v13472_v33  ;;  %v13547_v33 = vld [vmem:[#allocation8 + $0x404] ss:$16 sps:$4 sm:$0xff]   ;;  %v13614_v27 = vld [vmem:[#allocation8 + $0x568] ss:$16 sps:$4 sm:$0xff]  }
 0x578   :  { %10346 = vmatpush1.bf16.msra.mxu0 %v13467_v34  ;;  %v13550_v34 = vld [vmem:[#allocation8 + $0x40c] ss:$16 sps:$4 sm:$0xff]  }
 0x579   :  { %10510 = vmatpush1.bf16.msra.mxu1 %v13470_v35  ;;  %10347 = vmatprep.subr.bf16.mxu0 %v13475_v37  ;;  %v13545_v35 = vld [vmem:[#allocation8 + $0x400] ss:$16 sps:$4 sm:$0xff]   ;;  %v8734_v37 = vpack.c.bf16 %v8726_v47, %v8726_v47  ;;  %v13625_v47 = vld [vmem:[#allocation8 + $0x5a4] ss:$16 sps:$4 sm:$0xff]  }
 0x57a   :  { %10511 = vmatprep.subr.bf16.mxu1 %v13478_v38  ;;  %v13553_v38 = vld [vmem:[#allocation8 + $0x424] ss:$16 sps:$4 sm:$0xff]  }
 0x57c   :  { %10348 = vmatpush1.bf16.msra.mxu0 %v13473_v51  ;;  %v13556_v51 = vld [vmem:[#allocation8 + $0x42c] ss:$16 sps:$4 sm:$0xff]  }
 0x57d   :  { %10512 = vmatpush1.bf16.msra.mxu1 %v13476_v23  ;;  %10349 = vmatprep.subr.bf16.mxu0 %v13481_v30  ;;  %v13551_v23 = vld [vmem:[#allocation8 + $0x420] ss:$16 sps:$4 sm:$0xff]   ;;  %v13554_v30 = vld [vmem:[#allocation8 + $0x428] ss:$16 sps:$4 sm:$0xff]  }
 0x57e   :  { %10513 = vmatprep.subr.bf16.mxu1 %v13484_v41  ;;  %v13559_v41 = vld [vmem:[#allocation8 + $0x444] ss:$16 sps:$4 sm:$0xff]  }
 0x580   :  { %10350 = vmatpush1.bf16.msra.mxu0 %v13479_v25  ;;  %v13562_v25 = vld [vmem:[#allocation8 + $0x44c] ss:$16 sps:$4 sm:$0xff]  }
 0x581   :  { %10514 = vmatpush1.bf16.msra.mxu1 %v13482_v42  ;;  %10351 = vmatprep.subr.bf16.mxu0 %v13487_v46  ;;  %v13557_v42 = vld [vmem:[#allocation8 + $0x440] ss:$16 sps:$4 sm:$0xff]   ;;  %v13560_v46 = vld [vmem:[#allocation8 + $0x448] ss:$16 sps:$4 sm:$0xff]  }
 0x582   :  { %10515 = vmatprep.subr.bf16.mxu1 %v13490_v44  ;;  %v13565_v44 = vld [vmem:[#allocation8 + $0x464] ss:$16 sps:$4 sm:$0xff]  }
 0x584   :  { %10352 = vmatpush1.bf16.msra.mxu0 %v13485_v31  ;;  %v13568_v31 = vld [vmem:[#allocation8 + $0x46c] ss:$16 sps:$4 sm:$0xff]  }
 0x585   :  { %10516 = vmatpush1.bf16.msra.mxu1 %v13488_v3  ;;  %10353 = vmatprep.subr.bf16.mxu0 %v13493_v57  ;;  %v13563_v3 = vld [vmem:[#allocation8 + $0x460] ss:$16 sps:$4 sm:$0xff]   ;;  %v13566_v57 = vld [vmem:[#allocation8 + $0x468] ss:$16 sps:$4 sm:$0xff]  }
 0x586   :  { %10517 = vmatprep.subr.bf16.mxu1 %v13496_v36  ;;  %v13571_v36 = vld [vmem:[#allocation8 + $0x484] ss:$16 sps:$4 sm:$0xff]  }
 0x588   :  { %10354 = vmatpush1.bf16.msra.mxu0 %v13491_v5  ;;  %v13574_v5 = vld [vmem:[#allocation8 + $0x48c] ss:$16 sps:$4 sm:$0xff]  }
 0x589   :  { %10518 = vmatpush1.bf16.msra.mxu1 %v13494_v49  ;;  %10355 = vmatprep.subr.bf16.mxu0 %v13499_v50  ;;  %v13569_v49 = vld [vmem:[#allocation8 + $0x480] ss:$16 sps:$4 sm:$0xff]   ;;  %v13572_v50 = vld [vmem:[#allocation8 + $0x488] ss:$16 sps:$4 sm:$0xff]  }
 0x58a   :  { %10519 = vmatprep.subr.bf16.mxu1 %v13502_v2  ;;  %v13577_v2 = vld [vmem:[#allocation8 + $0x4a4] ss:$16 sps:$4 sm:$0xff]  }
 0x58c   :  { %10356 = vmatpush1.bf16.msra.mxu0 %v13497_v58  ;;  %v13580_v58 = vld [vmem:[#allocation8 + $0x4ac] ss:$16 sps:$4 sm:$0xff]  }
 0x58d   :  { %10520 = vmatpush1.bf16.msra.mxu1 %v13500_v11  ;;  %10357 = vmatprep.subr.bf16.mxu0 %v13505_v61  ;;  %v13575_v11 = vld [vmem:[#allocation8 + $0x4a0] ss:$16 sps:$4 sm:$0xff]   ;;  %v13578_v61 = vld [vmem:[#allocation8 + $0x4a8] ss:$16 sps:$4 sm:$0xff]  }
 0x58e   :  { %10521 = vmatprep.subr.bf16.mxu1 %v13508_v52  ;;  %v13583_v52 = vld [vmem:[#allocation8 + $0x4c4] ss:$16 sps:$4 sm:$0xff]  }
 0x590   :  { %10358 = vmatpush1.bf16.msra.mxu0 %v13503_v62  ;;  %v13586_v62 = vld [vmem:[#allocation8 + $0x4cc] ss:$16 sps:$4 sm:$0xff]  }
 0x591   :  { %10522 = vmatpush1.bf16.msra.mxu1 %v13506_v19  ;;  %10359 = vmatprep.subr.bf16.mxu0 %v13511_v9  ;;  %v13581_v19 = vld [vmem:[#allocation8 + $0x4c0] ss:$16 sps:$4 sm:$0xff]   ;;  %v13584_v9 = vld [vmem:[#allocation8 + $0x4c8] ss:$16 sps:$4 sm:$0xff]  }
 0x592   :  { %10523 = vmatprep.subr.bf16.mxu1 %v13514_v63  ;;  %v13589_v63 = vld [vmem:[#allocation8 + $0x4e4] ss:$16 sps:$4 sm:$0xff]  }
 0x594   :  { %10360 = vmatpush1.bf16.msra.mxu0 %v13509_v16  ;;  %v13592_v16 = vld [vmem:[#allocation8 + $0x4ec] ss:$16 sps:$4 sm:$0xff]  }
 0x595   :  { %10524 = vmatpush1.bf16.msra.mxu1 %v13512_v1  ;;  %10361 = vmatprep.subr.bf16.mxu0 %v13517_v18  ;;  %v13587_v1 = vld [vmem:[#allocation8 + $0x4e0] ss:$16 sps:$4 sm:$0xff]   ;;  %v13590_v18 = vld [vmem:[#allocation8 + $0x4e8] ss:$16 sps:$4 sm:$0xff]  }
 0x596   :  { %10525 = vmatprep.subr.bf16.mxu1 %v13520_v24  ;;  %v13595_v24 = vld [vmem:[#allocation8 + $0x504] ss:$16 sps:$4 sm:$0xff]  }
 0x598   :  { %10362 = vmatpush1.bf16.msra.mxu0 %v13515_v21  ;;  %v13598_v21 = vld [vmem:[#allocation8 + $0x50c] ss:$16 sps:$4 sm:$0xff]  }
 0x599   :  { %10526 = vmatpush1.bf16.msra.mxu1 %v13518_v13  ;;  %10363 = vmatprep.subr.bf16.mxu0 %v13523_v28  ;;  %v13593_v13 = vld [vmem:[#allocation8 + $0x500] ss:$16 sps:$4 sm:$0xff]   ;;  %v13596_v28 = vld [vmem:[#allocation8 + $0x508] ss:$16 sps:$4 sm:$0xff]  }
 0x59a   :  { %10527 = vmatprep.subr.bf16.mxu1 %v13526_v6  ;;  %v13601_v6 = vld [vmem:[#allocation8 + $0x524] ss:$16 sps:$4 sm:$0xff]  }
 0x59c   :  { %10364 = vmatpush1.bf16.msra.mxu0 %v13521_v59  ;;  %v13604_v59 = vld [vmem:[#allocation8 + $0x52c] ss:$16 sps:$4 sm:$0xff]  }
 0x59d   :  { %10528 = vmatpush1.bf16.msra.mxu1 %v13524_v7  ;;  %10365 = vmatprep.subr.bf16.mxu0 %v13529_v8  ;;  %v13599_v7 = vld [vmem:[#allocation8 + $0x520] ss:$16 sps:$4 sm:$0xff]   ;;  %v13602_v8 = vld [vmem:[#allocation8 + $0x528] ss:$16 sps:$4 sm:$0xff]  }
 0x59e   :  { %10529 = vmatprep.subr.bf16.mxu1 %v13532_v40  ;;  %v13607_v40 = vld [vmem:[#allocation8 + $0x544] ss:$16 sps:$4 sm:$0xff]  }
 0x5a0   :  { %10366 = vmatpush1.bf16.msra.mxu0 %v13527_v54  ;;  %v13610_v54 = vld [vmem:[#allocation8 + $0x54c] ss:$16 sps:$4 sm:$0xff]  }
 0x5a1   :  { %10530 = vmatpush1.bf16.msra.mxu1 %v13530_v15  ;;  %10367 = vmatprep.subr.bf16.mxu0 %v13535_v12  ;;  %v13608_v15 = vld [vmem:[#allocation8 + $0x548] ss:$16 sps:$4 sm:$0xff]   ;;  %v13613_v12 = vld [vmem:[#allocation8 + $0x564] ss:$16 sps:$4 sm:$0xff]  }
 0x5a2   :  { %10531 = vmatprep.subr.bf16.mxu1 %v13538_v20  ;;  %v13616_v20 = vld [vmem:[#allocation8 + $0x56c] ss:$16 sps:$4 sm:$0xff]  }
 0x5a4   :  { %10368 = vmatpush1.bf16.msra.mxu0 %v13533_v0  ;;  %v13611_v0 = vld [vmem:[#allocation8 + $0x560] ss:$16 sps:$4 sm:$0xff]  }
 0x5a5   :  { %10532 = vmatpush1.bf16.msra.mxu1 %v13536_v29  ;;  %10369 = vmatprep.subr.bf16.mxu0 %v13541_v43  ;;  %v13619_v29 = vld [vmem:[#allocation8 + $0x584] ss:$16 sps:$4 sm:$0xff]   ;;  %v13622_v43 = vld [vmem:[#allocation8 + $0x58c] ss:$16 sps:$4 sm:$0xff]  }
 0x5a6   :  { %10533 = vmatprep.subr.bf16.mxu1 %v13544_v26  ;;  %v13617_v26 = vld [vmem:[#allocation8 + $0x580] ss:$16 sps:$4 sm:$0xff]  }
 0x5a8   :  { %10370 = vmatpush1.bf16.msra.mxu0 %v13539_v60  ;;  %v13620_v60 = vld [vmem:[#allocation8 + $0x588] ss:$16 sps:$4 sm:$0xff]  }
 0x5a9   :  { %10534 = vmatpush1.bf16.msra.mxu1 %v13542_v4  ;;  %10380 = vmatprep.subr.bf16.mxu0 %v13547_v33  ;;  %v13628_v4 = vld [vmem:[#allocation8 + $0x5ac] ss:$16 sps:$4 sm:$0xff]   ;;  %v13623_v33 = vld [vmem:[#allocation8 + $0x5a0] ss:$16 sps:$4 sm:$0xff]  }
 0x5aa   :  { %10544 = vmatprep.subr.bf16.mxu1 %v13550_v34  ;;  %v13626_v34 = vld [vmem:[#allocation8 + $0x5a8] ss:$16 sps:$4 sm:$0xff]  }
 0x5ab   :  { %10372 = vmatmul.mubr.bf16.vlgmr.msra.gmra.mrb[20].mxu0 %v8734_v37 }
 0x5ac   :  { %10536 = vmatmul.mubr.bf16.vlgmr.msra.gmra.mrb[28].mxu1 %v8734_v37  ;;  %10381 = vmatpush1.bf16.msra.mxu0 %v13545_v35  ;;  %v13631_v35 = vld [vmem:[#allocation8 + $0x5c4] ss:$16 sps:$4 sm:$0xff]   ;;  %v13634_v37 = vld [vmem:[#allocation8 + $0x5cc] ss:$16 sps:$4 sm:$0xff]  }
 0x5ad   :  { %10545 = vmatpush1.bf16.msra.mxu1 %v13548_v48  ;;  %10382 = vmatprep.subr.bf16.mxu0 %v13553_v38  ;;  %v13629_v48 = vld [vmem:[#allocation8 + $0x5c0] ss:$16 sps:$4 sm:$0xff]   ;;  %v13632_v38 = vld [vmem:[#allocation8 + $0x5c8] ss:$16 sps:$4 sm:$0xff]  }
 0x5ae   :  { %10546 = vmatprep.subr.bf16.mxu1 %v13556_v51  ;;  %v13637_v51 = vld [vmem:[#allocation8 + $0x5e4] ss:$16 sps:$4 sm:$0xff]  }
 0x5b0   :  { %10383 = vmatpush1.bf16.msra.mxu0 %v13551_v23  ;;  %v13640_v23 = vld [vmem:[#allocation8 + $0x5ec] ss:$16 sps:$4 sm:$0xff]  }
 0x5b1   :  { %10547 = vmatpush1.bf16.msra.mxu1 %v13554_v30  ;;  %10384 = vmatprep.subr.bf16.mxu0 %v13559_v41  ;;  %v13635_v30 = vld [vmem:[#allocation8 + $0x5e0] ss:$16 sps:$4 sm:$0xff]   ;;  %v13638_v41 = vld [vmem:[#allocation8 + $0x5e8] ss:$16 sps:$4 sm:$0xff]  }
 0x5b2   :  { %10548 = vmatprep.subr.bf16.mxu1 %v13562_v25  ;;  %v13643_v25 = vld [vmem:[#allocation8 + $0x604] ss:$16 sps:$4 sm:$0xff]  }
 0x5b4   :  { %10385 = vmatpush1.bf16.msra.mxu0 %v13557_v42  ;;  %v13646_v42 = vld [vmem:[#allocation8 + $0x60c] ss:$16 sps:$4 sm:$0xff]  }
 0x5b5   :  { %10549 = vmatpush1.bf16.msra.mxu1 %v13560_v46  ;;  %10386 = vmatprep.subr.bf16.mxu0 %v13565_v44  ;;  %v2271_v46 = vrot.slane %v14419_v17, %v14293_v32  ;;  %v2275_v44 = vrot.slane %v14419_v17, %v14260_v22  ;;  %v13641_v22 = vld [vmem:[#allocation8 + $0x600] ss:$16 sps:$4 sm:$0xff]  }
 0x5b6   :  { %10550 = vmatprep.subr.bf16.mxu1 %v13568_v31  ;;  %v2283_v31 = vrot.slane %v14419_v17, %v14296_v39  ;;  %v13649_v39 = vld [vmem:[#allocation8 + $0x624] ss:$16 sps:$4 sm:$0xff]   ;;  %v13652_v17 = vld [vmem:[#allocation8 + $0x62c] ss:$16 sps:$4 sm:$0xff]  }
 0x5b8   :  { %10387 = vmatpush1.bf16.msra.mxu0 %v13563_v3 }
 0x5b9   :  { %10551 = vmatpush1.bf16.msra.mxu1 %v13566_v57  ;;  %10388 = vmatprep.subr.bf16.mxu0 %v13571_v36 }
 0x5ba   :  { %10552 = vmatprep.subr.bf16.mxu1 %v13574_v5 }
 0x5bc   :  { %10389 = vmatpush1.bf16.msra.mxu0 %v13569_v49 }
 0x5bd   :  { %10553 = vmatpush1.bf16.msra.mxu1 %v13572_v50  ;;  %10390 = vmatprep.subr.bf16.mxu0 %v13577_v2 }
 0x5be   :  { %10554 = vmatprep.subr.bf16.mxu1 %v13580_v58 }
 0x5c0   :  { %10391 = vmatpush1.bf16.msra.mxu0 %v13575_v11 }
 0x5c1   :  { %10555 = vmatpush1.bf16.msra.mxu1 %v13578_v61  ;;  %10392 = vmatprep.subr.bf16.mxu0 %v13583_v52 }
 0x5c2   :  { %10556 = vmatprep.subr.bf16.mxu1 %v13586_v62 }
 0x5c4   :  { %10393 = vmatpush1.bf16.msra.mxu0 %v13581_v19 }
 0x5c5   :  { %10557 = vmatpush1.bf16.msra.mxu1 %v13584_v9  ;;  %10394 = vmatprep.subr.bf16.mxu0 %v13589_v63  ;;  %v13644_v63 = vld [vmem:[#allocation8 + $0x608] ss:$16 sps:$4 sm:$0xff]  }
 0x5c6   :  { %10558 = vmatprep.subr.bf16.mxu1 %v13592_v16 }
 0x5c8   :  { %10395 = vmatpush1.bf16.msra.mxu0 %v13587_v1 }
 0x5c9   :  { %10559 = vmatpush1.bf16.msra.mxu1 %v13590_v18  ;;  %10396 = vmatprep.subr.bf16.mxu0 %v13595_v24  ;;  %v13647_v18 = vld [vmem:[#allocation8 + $0x620] ss:$16 sps:$4 sm:$0xff]   ;;  %v13650_v24 = vld [vmem:[#allocation8 + $0x628] ss:$16 sps:$4 sm:$0xff]  }
 0x5ca   :  { %10560 = vmatprep.subr.bf16.mxu1 %v13598_v21  ;;  %v13655_v21 = vld [vmem:[#allocation8 + $0x644] ss:$16 sps:$4 sm:$0xff]  }
 0x5cc   :  { %10397 = vmatpush1.bf16.msra.mxu0 %v13593_v13  ;;  %v13658_v13 = vld [vmem:[#allocation8 + $0x64c] ss:$16 sps:$4 sm:$0xff]  }
 0x5cd   :  { %10561 = vmatpush1.bf16.msra.mxu1 %v13596_v28  ;;  %10398 = vmatprep.subr.bf16.mxu0 %v13601_v6  ;;  %v13653_v28 = vld [vmem:[#allocation8 + $0x640] ss:$16 sps:$4 sm:$0xff]   ;;  %v13656_v6 = vld [vmem:[#allocation8 + $0x648] ss:$16 sps:$4 sm:$0xff]  }
 0x5ce   :  { %10562 = vmatprep.subr.bf16.mxu1 %v13604_v59  ;;  %v13661_v59 = vld [vmem:[#allocation8 + $0x664] ss:$16 sps:$4 sm:$0xff]  }
 0x5d0   :  { %10399 = vmatpush1.bf16.msra.mxu0 %v13599_v7  ;;  %v13664_v7 = vld [vmem:[#allocation8 + $0x66c] ss:$16 sps:$4 sm:$0xff]  }
 0x5d1   :  { %10563 = vmatpush1.bf16.msra.mxu1 %v13602_v8  ;;  %10400 = vmatprep.subr.bf16.mxu0 %v13607_v40  ;;  %v13659_v8 = vld [vmem:[#allocation8 + $0x660] ss:$16 sps:$4 sm:$0xff]   ;;  %v13662_v40 = vld [vmem:[#allocation8 + $0x668] ss:$16 sps:$4 sm:$0xff]  }
 0x5d2   :  { %10564 = vmatprep.subr.bf16.mxu1 %v13610_v54  ;;  %v13667_v54 = vld [vmem:[#allocation8 + $0x684] ss:$16 sps:$4 sm:$0xff]  }
 0x5d4   :  { %10401 = vmatpush1.bf16.msra.mxu0 %v13605_v14  ;;  %v13670_v14 = vld [vmem:[#allocation8 + $0x68c] ss:$16 sps:$4 sm:$0xff]  }
 0x5d5   :  { %10565 = vmatpush1.bf16.msra.mxu1 %v13608_v15  ;;  %10402 = vmatprep.subr.bf16.mxu0 %v13613_v12  ;;  %v13665_v15 = vld [vmem:[#allocation8 + $0x680] ss:$16 sps:$4 sm:$0xff]   ;;  %v13668_v12 = vld [vmem:[#allocation8 + $0x688] ss:$16 sps:$4 sm:$0xff]  }
 0x5d6   :  { %10566 = vmatprep.subr.bf16.mxu1 %v13616_v20  ;;  %v13673_v20 = vld [vmem:[#allocation8 + $0x6a4] ss:$16 sps:$4 sm:$0xff]  }
 0x5d8   :  { %10403 = vmatpush1.bf16.msra.mxu0 %v13611_v0  ;;  %v13676_v0 = vld [vmem:[#allocation8 + $0x6ac] ss:$16 sps:$4 sm:$0xff]  }
 0x5d9   :  { %10567 = vmatpush1.bf16.msra.mxu1 %v13614_v27  ;;  %10404 = vmatprep.subr.bf16.mxu0 %v13619_v29  ;;  %v13671_v27 = vld [vmem:[#allocation8 + $0x6a0] ss:$16 sps:$4 sm:$0xff]   ;;  %v13674_v29 = vld [vmem:[#allocation8 + $0x6a8] ss:$16 sps:$4 sm:$0xff]  }
 0x5da   :  { %10568 = vmatprep.subr.bf16.mxu1 %v13622_v43  ;;  %v13679_v43 = vld [vmem:[#allocation8 + $0x6c4] ss:$16 sps:$4 sm:$0xff]  }
 0x5dc   :  { %10405 = vmatpush1.bf16.msra.mxu0 %v13617_v26  ;;  %v13682_v26 = vld [vmem:[#allocation8 + $0x6cc] ss:$16 sps:$4 sm:$0xff]  }
 0x5dd   :  { %10569 = vmatpush1.bf16.msra.mxu1 %v13620_v60  ;;  %10406 = vmatprep.subr.bf16.mxu0 %v13625_v47  ;;  %v13677_v60 = vld [vmem:[#allocation8 + $0x6c0] ss:$16 sps:$4 sm:$0xff]   ;;  %v13680_v47 = vld [vmem:[#allocation8 + $0x6c8] ss:$16 sps:$4 sm:$0xff]  }
 0x5de   :  { %10570 = vmatprep.subr.bf16.mxu1 %v13628_v4  ;;  %v13685_v4 = vld [vmem:[#allocation8 + $0x6e4] ss:$16 sps:$4 sm:$0xff]  }
 0x5e0   :  { %10407 = vmatpush1.bf16.msra.mxu0 %v13623_v33  ;;  %v13688_v33 = vld [vmem:[#allocation8 + $0x6ec] ss:$16 sps:$4 sm:$0xff]  }
 0x5e1   :  { %10571 = vmatpush1.bf16.msra.mxu1 %v13626_v34  ;;  %10408 = vmatprep.subr.bf16.mxu0 %v13631_v35  ;;  %v13683_v34 = vld [vmem:[#allocation8 + $0x6e0] ss:$16 sps:$4 sm:$0xff]   ;;  %v13686_v35 = vld [vmem:[#allocation8 + $0x6e8] ss:$16 sps:$4 sm:$0xff]  }
 0x5e2   :  { %10572 = vmatprep.subr.bf16.mxu1 %v13634_v37  ;;  %v13691_v37 = vld [vmem:[#allocation8 + $0x704] ss:$16 sps:$4 sm:$0xff]  }
 0x5e4   :  { %10409 = vmatpush1.bf16.msra.mxu0 %v13629_v48  ;;  %v13694_v48 = vld [vmem:[#allocation8 + $0x70c] ss:$16 sps:$4 sm:$0xff]  }
 0x5e5   :  { %10573 = vmatpush1.bf16.msra.mxu1 %v13632_v38  ;;  %10410 = vmatprep.subr.bf16.mxu0 %v13637_v51  ;;  %v13689_v38 = vld [vmem:[#allocation8 + $0x700] ss:$16 sps:$4 sm:$0xff]   ;;  %v13692_v51 = vld [vmem:[#allocation8 + $0x708] ss:$16 sps:$4 sm:$0xff]  }
 0x5e6   :  { %10574 = vmatprep.subr.bf16.mxu1 %v13640_v23  ;;  %v13697_v23 = vld [vmem:[#allocation8 + $0x724] ss:$16 sps:$4 sm:$0xff]  }
 0x5e8   :  { %10411 = vmatpush1.bf16.msra.mxu0 %v13635_v30  ;;  %v13700_v30 = vld [vmem:[#allocation8 + $0x72c] ss:$16 sps:$4 sm:$0xff]  }
 0x5e9   :  { %10575 = vmatpush1.bf16.msra.mxu1 %v13638_v41  ;;  %10421 = vmatprep.subr.bf16.mxu0 %v13643_v25  ;;  %v13695_v41 = vld [vmem:[#allocation8 + $0x720] ss:$16 sps:$4 sm:$0xff]   ;;  %v13698_v25 = vld [vmem:[#allocation8 + $0x728] ss:$16 sps:$4 sm:$0xff]  }
 0x5ea   :  { %10585 = vmatprep.subr.bf16.mxu1 %v13646_v42  ;;  %v13703_v42 = vld [vmem:[#allocation8 + $0x744] ss:$16 sps:$4 sm:$0xff]  }
 0x5fe   :  { %v8389_v3 = vpop.f32.mrb[16].mxu0 }
 0x5ff   :  { %v13169_v57 = vadd.f32 %v8389_v3, %v2271_v46  ;;  %v14441_v36 = vpop.f32.mrb[24].mxu1  ;;  %v8391_v5 = vpop.f32.mrb[17].mxu0  ;;  %v13706_v46 = vld [vmem:[#allocation8 + $0x74c] ss:$16 sps:$4 sm:$0xff]   ;;  %v13709_v3 = vld [vmem:[#allocation8 + $0x764] ss:$16 sps:$4 sm:$0xff]  }
 0x600   :  { %v13170_v49 = vadd.f32 %v8391_v5, %v2275_v44  ;;  %v8719_v50 = vpop.f32.mrb[25].mxu1  ;;  %v8393_v2 = vpop.f32.mrb[18].mxu0  ;;  %v13701_v44 = vld [vmem:[#allocation8 + $0x740] ss:$16 sps:$4 sm:$0xff]  }
 0x601   :  { %v8728_v58 = vmax.f32 %v13169_v57, 0.0  ;;  %v13172_v11 = vadd.f32 %v8719_v50, %v2283_v31  ;;  %v8721_v61 = vpop.f32.mrb[26].mxu1  ;;  %v8394_v52 = vpop.f32.mrb[19].mxu0  ;;  %v13704_v31 = vld [vmem:[#allocation8 + $0x748] ss:$16 sps:$4 sm:$0xff]  }
 0x602   :  { %v8729_v62 = vmax.f32 %v13170_v49, 0.0  ;;  %v8722_v32 = vpop.f32.mrb[27].mxu1  ;;  %v13712_v57 = vld [vmem:[#allocation8 + $0x76c] ss:$16 sps:$4 sm:$0xff]   ;;  %v13707_v5 = vld [vmem:[#allocation8 + $0x760] ss:$16 sps:$4 sm:$0xff]  }
 0x603   :  { %v8731_v19 = vmax.f32 %v13172_v11, 0.0  ;;  %v8736_v16 = vpack.c.bf16 %v8728_v58, %v8728_v58  ;;  %v13710_v49 = vld [vmem:[#allocation8 + $0x768] ss:$16 sps:$4 sm:$0xff]   ;;  %v13715_v50 = vld [vmem:[#allocation8 + $0x784] ss:$16 sps:$4 sm:$0xff]  }
 0x604   :  { %v8737_v9 = vpack.c.bf16 %v8729_v62, %v8729_v62  ;;  %v13718_v2 = vld [vmem:[#allocation8 + $0x78c] ss:$16 sps:$4 sm:$0xff]   ;;  %v13713_v58 = vld [vmem:[#allocation8 + $0x780] ss:$16 sps:$4 sm:$0xff]   ;;  %v13716_v11 = vld [vmem:[#allocation8 + $0x788] ss:$16 sps:$4 sm:$0xff]  }
 0x605   :  { %v8739_v1 = vpack.c.bf16 %v8731_v19, %v8731_v19  ;;  %v13721_v61 = vld [vmem:[#allocation8 + $0x7a4] ss:$16 sps:$4 sm:$0xff]   ;;  %v13724_v52 = vld [vmem:[#allocation8 + $0x7ac] ss:$16 sps:$4 sm:$0xff]   ;;  %v13719_v62 = vld [vmem:[#allocation8 + $0x7a0] ss:$16 sps:$4 sm:$0xff]  }
 0x606   :  { %10412 = vmatprep.mubr.bf16.mxu0 %v8737_v9  ;;  %10576 = vmatprep.mubr.bf16.mxu1 %v8737_v9  ;;  %v13722_v32 = vld [vmem:[#allocation8 + $0x7a8] ss:$16 sps:$4 sm:$0xff]   ;;  %v13865_v19 = vld [vmem:[#allocation11 + $0x10] sm:$0xff] }
 0x607   :  { %10413 = vmatmul.mubr.bf16.vlgmr.msra.gmra.mrb[20].mxu0 %v8736_v16  ;;  %10577 = vmatmul.mubr.bf16.vlgmr.msra.gmra.mrb[28].mxu1 %v8736_v16  ;;  %v2279_v9 = vrot.slane %v13865_v19, %v14313_v56  ;;  %v13725_v16 = vld [vmem:[#allocation8 + $0x7c0] ss:$16 sps:$4 sm:$0xff]   ;;  %v13739_v56 = vld [vmem:[#allocation10 + $0x4] ss:$8 sps:$4 sm:$0xff]  }
 0x608   :  { %10422 = vmatpush1.bf16.msra.mxu0 %v13641_v22  ;;  %10586 = vmatpush1.bf16.msra.mxu1 %v13644_v63  ;;  %v13727_v22 = vld [vmem:[#allocation8 + $0x7c4] ss:$16 sps:$4 sm:$0xff]   ;;  %v13730_v63 = vld [vmem:[#allocation8 + $0x7cc] ss:$16 sps:$4 sm:$0xff]  }
 0x609   :  { %10453 = vmatprep.mubr.bf16.mxu0 %v8739_v1  ;;  %10617 = vmatprep.mubr.bf16.mxu1 %v8739_v1  ;;  %v13733_v1 = vld [vmem:[#allocation8 + $0x7e4] ss:$16 sps:$4 sm:$0xff]  }
 0x60a   :  { %10423 = vmatprep.subr.bf16.mxu0 %v13649_v39  ;;  %10587 = vmatprep.subr.bf16.mxu1 %v13652_v17  ;;  %v13728_v39 = vld [vmem:[#allocation8 + $0x7c8] ss:$16 sps:$4 sm:$0xff]   ;;  %v13171_v17 = vadd.f32 %v14441_v36, %v2279_v9 }
 0x60b   :  { %v13740_v36 = vld [vmem:[#allocation10 + $0x10] ss:$8 sps:$4 sm:$0xff]  }
 0x60c   :  { %10424 = vmatpush1.bf16.msra.mxu0 %v13647_v18  ;;  %10588 = vmatpush1.bf16.msra.mxu1 %v13650_v24  ;;  %v13736_v18 = vld [vmem:[#allocation8 + $0x7ec] ss:$16 sps:$4 sm:$0xff]   ;;  %v13731_v24 = vld [vmem:[#allocation8 + $0x7e0] ss:$16 sps:$4 sm:$0xff]  }
 0x60d   :  { %10425 = vmatprep.subr.bf16.mxu0 %v13655_v21  ;;  %10589 = vmatprep.subr.bf16.mxu1 %v13658_v13  ;;  %v13734_v21 = vld [vmem:[#allocation8 + $0x7e8] ss:$16 sps:$4 sm:$0xff]   ;;  %v8730_v13 = vmax.f32 %v13171_v17, 0.0 }
 0x610   :  { %10426 = vmatpush1.bf16.msra.mxu0 %v13653_v28  ;;  %10590 = vmatpush1.bf16.msra.mxu1 %v13656_v6  ;;  %v13737_v28 = vld [vmem:[#allocation10] ss:$8 sps:$4 sm:$0xff]   ;;  %v8738_v6 = vpack.c.bf16 %v8730_v13, %v8730_v13 }
 0x611   :  { %10427 = vmatprep.subr.bf16.mxu0 %v13661_v59  ;;  %10591 = vmatprep.subr.bf16.mxu1 %v13664_v7  ;;  %v13742_v59 = vld [vmem:[#allocation10 + $0x14] ss:$8 sps:$4 sm:$0xff]   ;;  %v13745_v7 = vld [vmem:[#allocation10 + $0x24] ss:$8 sps:$4 sm:$0xff]  }
 0x614   :  { %10428 = vmatpush1.bf16.msra.mxu0 %v13659_v8  ;;  %10592 = vmatpush1.bf16.msra.mxu1 %v13662_v40  ;;  %v13743_v8 = vld [vmem:[#allocation10 + $0x20] ss:$8 sps:$4 sm:$0xff]   ;;  %v13748_v40 = vld [vmem:[#allocation10 + $0x34] ss:$8 sps:$4 sm:$0xff]  }
 0x615   :  { %10429 = vmatprep.subr.bf16.mxu0 %v13667_v54  ;;  %10593 = vmatprep.subr.bf16.mxu1 %v13670_v14  ;;  %v13746_v54 = vld [vmem:[#allocation10 + $0x30] ss:$8 sps:$4 sm:$0xff]   ;;  %v13751_v14 = vld [vmem:[#allocation10 + $0x44] ss:$8 sps:$4 sm:$0xff]  }
 0x618   :  { %10430 = vmatpush1.bf16.msra.mxu0 %v13665_v15  ;;  %10594 = vmatpush1.bf16.msra.mxu1 %v13668_v12  ;;  %v13749_v15 = vld [vmem:[#allocation10 + $0x40] ss:$8 sps:$4 sm:$0xff]   ;;  %v13754_v12 = vld [vmem:[#allocation10 + $0x54] ss:$8 sps:$4 sm:$0xff]  }
 0x619   :  { %10431 = vmatprep.subr.bf16.mxu0 %v13673_v20  ;;  %10595 = vmatprep.subr.bf16.mxu1 %v13676_v0  ;;  %v13752_v20 = vld [vmem:[#allocation10 + $0x50] ss:$8 sps:$4 sm:$0xff]   ;;  %v13757_v0 = vld [vmem:[#allocation10 + $0x64] ss:$8 sps:$4 sm:$0xff]  }
 0x61c   :  { %10432 = vmatpush1.bf16.msra.mxu0 %v13671_v27  ;;  %10596 = vmatpush1.bf16.msra.mxu1 %v13674_v29  ;;  %v13755_v27 = vld [vmem:[#allocation10 + $0x60] ss:$8 sps:$4 sm:$0xff]   ;;  %v13760_v29 = vld [vmem:[#allocation10 + $0x74] ss:$8 sps:$4 sm:$0xff]  }
 0x61d   :  { %10433 = vmatprep.subr.bf16.mxu0 %v13679_v43  ;;  %10597 = vmatprep.subr.bf16.mxu1 %v13682_v26  ;;  %v13758_v43 = vld [vmem:[#allocation10 + $0x70] ss:$8 sps:$4 sm:$0xff]   ;;  %v13763_v26 = vld [vmem:[#allocation10 + $0x84] ss:$8 sps:$4 sm:$0xff]  }
 0x620   :  { %10434 = vmatpush1.bf16.msra.mxu0 %v13677_v60  ;;  %10598 = vmatpush1.bf16.msra.mxu1 %v13680_v47  ;;  %v13761_v60 = vld [vmem:[#allocation10 + $0x80] ss:$8 sps:$4 sm:$0xff]   ;;  %v13766_v47 = vld [vmem:[#allocation10 + $0x94] ss:$8 sps:$4 sm:$0xff]  }
 0x621   :  { %10435 = vmatprep.subr.bf16.mxu0 %v13685_v4  ;;  %10599 = vmatprep.subr.bf16.mxu1 %v13688_v33  ;;  %v13764_v4 = vld [vmem:[#allocation10 + $0x90] ss:$8 sps:$4 sm:$0xff]   ;;  %v13769_v33 = vld [vmem:[#allocation10 + $0xa4] ss:$8 sps:$4 sm:$0xff]  }
 0x624   :  { %10436 = vmatpush1.bf16.msra.mxu0 %v13683_v34  ;;  %10600 = vmatpush1.bf16.msra.mxu1 %v13686_v35  ;;  %v13767_v34 = vld [vmem:[#allocation10 + $0xa0] ss:$8 sps:$4 sm:$0xff]   ;;  %v13772_v35 = vld [vmem:[#allocation10 + $0xb4] ss:$8 sps:$4 sm:$0xff]  }
 0x625   :  { %10437 = vmatprep.subr.bf16.mxu0 %v13691_v37  ;;  %10601 = vmatprep.subr.bf16.mxu1 %v13694_v48  ;;  %v13770_v37 = vld [vmem:[#allocation10 + $0xb0] ss:$8 sps:$4 sm:$0xff]   ;;  %v13775_v48 = vld [vmem:[#allocation10 + $0xc4] ss:$8 sps:$4 sm:$0xff]  }
 0x628   :  { %10438 = vmatpush1.bf16.msra.mxu0 %v13689_v38  ;;  %10602 = vmatpush1.bf16.msra.mxu1 %v13692_v51  ;;  %v13773_v38 = vld [vmem:[#allocation10 + $0xc0] ss:$8 sps:$4 sm:$0xff]   ;;  %v13778_v51 = vld [vmem:[#allocation10 + $0xd4] ss:$8 sps:$4 sm:$0xff]  }
 0x629   :  { %10439 = vmatprep.subr.bf16.mxu0 %v13697_v23  ;;  %10603 = vmatprep.subr.bf16.mxu1 %v13700_v30  ;;  %v13776_v23 = vld [vmem:[#allocation10 + $0xd0] ss:$8 sps:$4 sm:$0xff]   ;;  %v13781_v30 = vld [vmem:[#allocation10 + $0xe4] ss:$8 sps:$4 sm:$0xff]  }
 0x62c   :  { %10440 = vmatpush1.bf16.msra.mxu0 %v13695_v41  ;;  %10604 = vmatpush1.bf16.msra.mxu1 %v13698_v25  ;;  %v13779_v41 = vld [vmem:[#allocation10 + $0xe0] ss:$8 sps:$4 sm:$0xff]   ;;  %v13784_v25 = vld [vmem:[#allocation10 + $0xf4] ss:$8 sps:$4 sm:$0xff]  }
 0x62d   :  { %10441 = vmatprep.subr.bf16.mxu0 %v13703_v42  ;;  %10605 = vmatprep.subr.bf16.mxu1 %v13706_v46  ;;  %v13782_v42 = vld [vmem:[#allocation10 + $0xf0] ss:$8 sps:$4 sm:$0xff]   ;;  %v13787_v46 = vld [vmem:[#allocation10 + $0x104] ss:$8 sps:$4 sm:$0xff]  }
 0x630   :  { %10442 = vmatpush1.bf16.msra.mxu0 %v13701_v44  ;;  %10606 = vmatpush1.bf16.msra.mxu1 %v13704_v31  ;;  %v13833_v44 = vld [vmem:[#allocation10 + $0x280] ss:$8 sps:$4 sm:$0xff]  }
 0x631   :  { %10443 = vmatprep.subr.bf16.mxu0 %v13709_v3  ;;  %10607 = vmatprep.subr.bf16.mxu1 %v13712_v57  ;;  %v13834_v31 = vld [vmem:[#allocation10 + $0x200] ss:$8 sps:$4 sm:$0xff]   ;;  %v13835_v3 = vld [vmem:[#allocation10 + $0x290] ss:$8 sps:$4 sm:$0xff]  }
 0x632   :  { %v13836_v57 = vld [vmem:[#allocation10 + $0x210] ss:$8 sps:$4 sm:$0xff]  }
 0x634   :  { %10444 = vmatpush1.bf16.msra.mxu0 %v13707_v5  ;;  %10608 = vmatpush1.bf16.msra.mxu1 %v13710_v49  ;;  %v13837_v5 = vld [vmem:[#allocation10 + $0x2a0] ss:$8 sps:$4 sm:$0xff]  }
 0x635   :  { %10445 = vmatprep.subr.bf16.mxu0 %v13715_v50  ;;  %10609 = vmatprep.subr.bf16.mxu1 %v13718_v2  ;;  %v13838_v49 = vld [vmem:[#allocation10 + $0x220] ss:$8 sps:$4 sm:$0xff]   ;;  %v13839_v50 = vld [vmem:[#allocation10 + $0x2b0] ss:$8 sps:$4 sm:$0xff]  }
 0x636   :  { %v13840_v2 = vld [vmem:[#allocation10 + $0x230] ss:$8 sps:$4 sm:$0xff]  }
 0x638   :  { %10446 = vmatpush1.bf16.msra.mxu0 %v13713_v58  ;;  %10610 = vmatpush1.bf16.msra.mxu1 %v13716_v11  ;;  %v13841_v58 = vld [vmem:[#allocation10 + $0x2c0] ss:$8 sps:$4 sm:$0xff]  }
 0x639   :  { %10447 = vmatprep.subr.bf16.mxu0 %v13721_v61  ;;  %10611 = vmatprep.subr.bf16.mxu1 %v13724_v52  ;;  %v13842_v11 = vld [vmem:[#allocation10 + $0x240] ss:$8 sps:$4 sm:$0xff]   ;;  %v13843_v61 = vld [vmem:[#allocation10 + $0x2d0] ss:$8 sps:$4 sm:$0xff]  }
 0x63a   :  { %v13844_v52 = vld [vmem:[#allocation10 + $0x250] ss:$8 sps:$4 sm:$0xff]  }
 0x63c   :  { %10448 = vmatpush1.bf16.msra.mxu0 %v13719_v62  ;;  %10612 = vmatpush1.bf16.msra.mxu1 %v13722_v32  ;;  %v14445_v62 = vld [vmem:[#allocation11 + $0x18] sm:$0xf] }
 0x63d   :  { %10449 = vmatprep.subr.bf16.mxu0 %v13727_v22  ;;  %10613 = vmatprep.subr.bf16.mxu1 %v13730_v63  ;;  %v9001_v32 = vrot.slane %v14445_v62, %v14215_v53  ;;  %v9005_v19 = vrot.slane %v14445_v62, %v14220_v55  ;;  %v9013_v9 = vrot.slane %v14445_v62, %v14242_v45 }
 0x640   :  { %10450 = vmatpush1.bf16.msra.mxu0 %v13725_v16  ;;  %10614 = vmatpush1.bf16.msra.mxu1 %v13728_v39 }
 0x641   :  { %10451 = vmatprep.subr.bf16.mxu0 %v13733_v1  ;;  %10615 = vmatprep.subr.bf16.mxu1 %v13736_v18 }
 0x644   :  { %10452 = vmatpush1.bf16.msra.mxu0 %v13731_v24  ;;  %10616 = vmatpush1.bf16.msra.mxu1 %v13734_v21 }
 0x645   :  { %11030 = vmatprep.subr.bf16.mxu0 %v13739_v56  ;;  %13086 = vmatprep.subr.bf16.mxu1 %v13833_v44  ;;  %v13829_v44 = vld [vmem:[#allocation10 + $0x1e4] ss:$8 sps:$4 sm:$0xff]  }
 0x647   :  { %10454 = vmatmul.mubr.bf16.vlgmr.msra.gmra.mrb[20].mxu0 %v8738_v6  ;;  %10618 = vmatmul.mubr.bf16.vlgmr.msra.gmra.mrb[28].mxu1 %v8738_v6 }
 0x648   :  { %11031 = vmatpush1.bf16.msra.mxu0 %v13737_v28  ;;  %13087 = vmatpush3.bf16.msra.mxu1 %v13834_v31  ;;  %v13827_v31 = vld [vmem:[#allocation10 + $0x1e0] ss:$8 sps:$4 sm:$0xff]  }
 0x649   :  { %11032 = vmatprep.subr.bf16.mxu0 %v13742_v59  ;;  %13088 = vmatprep.subr.bf16.mxu1 %v13835_v3 }
 0x64c   :  { %11033 = vmatpush1.bf16.msra.mxu0 %v13740_v36  ;;  %13089 = vmatpush3.bf16.msra.mxu1 %v13836_v57  ;;  %v13832_v57 = vld [vmem:[#allocation10 + $0x1f4] ss:$8 sps:$4 sm:$0xff]  }
 0x64d   :  { %11034 = vmatprep.subr.bf16.mxu0 %v13745_v7  ;;  %13090 = vmatprep.subr.bf16.mxu1 %v13837_v5  ;;  %v13785_v7 = vld [vmem:[#allocation10 + $0x100] ss:$8 sps:$4 sm:$0xff]   ;;  %v13830_v5 = vld [vmem:[#allocation10 + $0x1f0] ss:$8 sps:$4 sm:$0xff]  }
 0x650   :  { %11035 = vmatpush1.bf16.msra.mxu0 %v13743_v8  ;;  %13091 = vmatpush3.bf16.msra.mxu1 %v13838_v49 }
 0x651   :  { %11036 = vmatprep.subr.bf16.mxu0 %v13748_v40  ;;  %13092 = vmatprep.subr.bf16.mxu1 %v13839_v50  ;;  %v13790_v40 = vld [vmem:[#allocation10 + $0x114] ss:$8 sps:$4 sm:$0xff]  }
 0x654   :  { %11037 = vmatpush1.bf16.msra.mxu0 %v13746_v54  ;;  %13093 = vmatpush3.bf16.msra.mxu1 %v13840_v2  ;;  %v13788_v54 = vld [vmem:[#allocation10 + $0x110] ss:$8 sps:$4 sm:$0xff]   ;;  %v13845_v2 = vld [vmem:[#allocation10 + $0x2e0] ss:$8 sps:$4 sm:$0xff]  }
 0x655   :  { %11038 = vmatprep.subr.bf16.mxu0 %v13751_v14  ;;  %13094 = vmatprep.subr.bf16.mxu1 %v13841_v58  ;;  %v13793_v14 = vld [vmem:[#allocation10 + $0x124] ss:$8 sps:$4 sm:$0xff]   ;;  %v13846_v58 = vld [vmem:[#allocation10 + $0x260] ss:$8 sps:$4 sm:$0xff]  }
 0x658   :  { %11039 = vmatpush1.bf16.msra.mxu0 %v13749_v15  ;;  %13095 = vmatpush3.bf16.msra.mxu1 %v13842_v11  ;;  %v13791_v15 = vld [vmem:[#allocation10 + $0x120] ss:$8 sps:$4 sm:$0xff]   ;;  %v13848_v11 = vld [vmem:[#allocation10 + $0x270] ss:$8 sps:$4 sm:$0xff]  }
 0x659   :  { %11040 = vmatprep.subr.bf16.mxu0 %v13754_v12  ;;  %13096 = vmatprep.subr.bf16.mxu1 %v13843_v61  ;;  %v13796_v12 = vld [vmem:[#allocation10 + $0x134] ss:$8 sps:$4 sm:$0xff]   ;;  %v14045_v61 = vmov 0.0  }
 0x65c   :  { %11041 = vmatpush1.bf16.msra.mxu0 %v13752_v20  ;;  %13097 = vmatpush3.bf16.msra.mxu1 %v13844_v52  ;;  %v13794_v20 = vld [vmem:[#allocation10 + $0x130] ss:$8 sps:$4 sm:$0xff]   ;;  %v10698_v52 = vld [vmem:[#allocation11 + $0x1c] sm:$0x3] }
 0x65d   :  { %11042 = vmatprep.subr.bf16.mxu0 %v13757_v0  ;;  %v13799_v0 = vld [vmem:[#allocation10 + $0x144] ss:$8 sps:$4 sm:$0xff]   ;;  %13098 = vmatprep.subr.bf16.mxu1 %v13845_v2 }
 0x660   :  { %11043 = vmatpush1.bf16.msra.mxu0 %v13755_v27  ;;  %v13797_v27 = vld [vmem:[#allocation10 + $0x140] ss:$8 sps:$4 sm:$0xff]   ;;  %13099 = vmatpush3.bf16.msra.mxu1 %v13846_v58 }
 0x661   :  { %11044 = vmatprep.subr.bf16.mxu0 %v13760_v29  ;;  %v13802_v29 = vld [vmem:[#allocation10 + $0x154] ss:$8 sps:$4 sm:$0xff]  }
 0x664   :  { %11045 = vmatpush1.bf16.msra.mxu0 %v13758_v43  ;;  %v13800_v43 = vld [vmem:[#allocation10 + $0x150] ss:$8 sps:$4 sm:$0xff]  }
 0x665   :  { %11046 = vmatprep.subr.bf16.mxu0 %v13763_v26  ;;  %v13805_v26 = vld [vmem:[#allocation10 + $0x164] ss:$8 sps:$4 sm:$0xff]  }
 0x668   :  { %11047 = vmatpush1.bf16.msra.mxu0 %v13761_v60  ;;  %v13803_v60 = vld [vmem:[#allocation10 + $0x160] ss:$8 sps:$4 sm:$0xff]  }
 0x669   :  { %11048 = vmatprep.subr.bf16.mxu0 %v13766_v47  ;;  %v13808_v47 = vld [vmem:[#allocation10 + $0x174] ss:$8 sps:$4 sm:$0xff]  }
 0x66c   :  { %11049 = vmatpush1.bf16.msra.mxu0 %v13764_v4  ;;  %v13806_v4 = vld [vmem:[#allocation10 + $0x170] ss:$8 sps:$4 sm:$0xff]  }
 0x66d   :  { %11050 = vmatprep.subr.bf16.mxu0 %v13769_v33  ;;  %v13811_v33 = vld [vmem:[#allocation10 + $0x184] ss:$8 sps:$4 sm:$0xff]  }
 0x670   :  { %11051 = vmatpush1.bf16.msra.mxu0 %v13767_v34  ;;  %v13809_v34 = vld [vmem:[#allocation10 + $0x180] ss:$8 sps:$4 sm:$0xff]  }
 0x671   :  { %11052 = vmatprep.subr.bf16.mxu0 %v13772_v35  ;;  %v13814_v35 = vld [vmem:[#allocation10 + $0x194] ss:$8 sps:$4 sm:$0xff]  }
 0x674   :  { %11053 = vmatpush1.bf16.msra.mxu0 %v13770_v37  ;;  %v13812_v37 = vld [vmem:[#allocation10 + $0x190] ss:$8 sps:$4 sm:$0xff]  }
 0x675   :  { %11054 = vmatprep.subr.bf16.mxu0 %v13775_v48  ;;  %v13817_v48 = vld [vmem:[#allocation10 + $0x1a4] ss:$8 sps:$4 sm:$0xff]  }
 0x678   :  { %11055 = vmatpush1.bf16.msra.mxu0 %v13773_v38  ;;  %v13815_v38 = vld [vmem:[#allocation10 + $0x1a0] ss:$8 sps:$4 sm:$0xff]  }
 0x679   :  { %11056 = vmatprep.subr.bf16.mxu0 %v13778_v51  ;;  %v13820_v51 = vld [vmem:[#allocation10 + $0x1b4] ss:$8 sps:$4 sm:$0xff]  }
 0x67c   :  { %11057 = vmatpush1.bf16.msra.mxu0 %v13776_v23  ;;  %v13818_v23 = vld [vmem:[#allocation10 + $0x1b0] ss:$8 sps:$4 sm:$0xff]  }
 0x67d   :  { %11058 = vmatprep.subr.bf16.mxu0 %v13781_v30  ;;  %v13823_v30 = vld [vmem:[#allocation10 + $0x1c4] ss:$8 sps:$4 sm:$0xff]  }
 0x680   :  { %11059 = vmatpush1.bf16.msra.mxu0 %v13779_v41  ;;  %v13821_v41 = vld [vmem:[#allocation10 + $0x1c0] ss:$8 sps:$4 sm:$0xff]  }
 0x681   :  { %11060 = vmatprep.subr.bf16.mxu0 %v13784_v25  ;;  %v13826_v25 = vld [vmem:[#allocation10 + $0x1d4] ss:$8 sps:$4 sm:$0xff]  }
 0x684   :  { %11061 = vmatpush1.bf16.msra.mxu0 %v13782_v42  ;;  %v13824_v42 = vld [vmem:[#allocation10 + $0x1d0] ss:$8 sps:$4 sm:$0xff]  }
 0x685   :  { %11071 = vmatprep.subr.bf16.mxu0 %v13787_v46  ;;  %v9009_v46 = vrot.slane %v14445_v62, %v14257_v10  ;;  %v13847_v10 = vld [vmem:[#allocation10 + $0x2f0] ss:$8 sps:$4 sm:$0xff]   ;;  %v10703_v62 = vrot.slane %v10698_v52, %v14215_v53  ;;  %v13851_v53 = vld [vmem:[#allocation10 + $0x320] ss:$8 sps:$4 sm:$0xff]  }
 0x686   :  { %13100 = vmatprep.subr.bf16.mxu1 %v13847_v10 }
 0x687   :  { %13101 = vmatpush3.bf16.msra.mxu1 %v13848_v11 }
 0x688   :  { %13125 = vmatprep.subr.bf16.mxu1 %v14045_v61 }
 0x71a   :  { %v10455_v22 = vpop.f32.mrb[20].mxu0  ;;  %v14453_v63 = vpop.f32.mrb[28].mxu1 }
 0x71b   :  { %v13173_v16 = vadd.f32 %v10455_v22, %v9001_v32  ;;  %v10457_v39 = vpop.f32.mrb[21].mxu0  ;;  %v10621_v17 = vpop.f32.mrb[29].mxu1  ;;  %v13175_v3 = vadd.f32 %v14453_v63, %v9009_v46  ;;  %v10707_v32 = vrot.slane %v10698_v52, %v14220_v55  ;;  %v13852_v55 = vld [vmem:[#allocation10 + $0x330] ss:$8 sps:$4 sm:$0xff]  }
 0x71c   :  { %v13174_v1 = vadd.f32 %v10457_v39, %v9005_v19  ;;  %v13176_v18 = vadd.f32 %v10621_v17, %v9013_v9  ;;  %v10459_v24 = vpop.f32.mrb[22].mxu0  ;;  %v10623_v21 = vpop.f32.mrb[30].mxu1 }
 0x71d   :  { %v10626_v13 = vmax.f32 %v13173_v16, 0.0  ;;  %v10460_v56 = vpop.f32.mrb[23].mxu0  ;;  %v10624_v28 = vpop.f32.mrb[31].mxu1  ;;  %v10628_v49 = vmax.f32 %v13175_v3, 0.0  ;;  %v13849_v24 = vld [vmem:[#allocation10 + $0x300] ss:$8 sps:$4 sm:$0xff]  }
 0x71e   :  { %v10627_v6 = vmax.f32 %v13174_v1, 0.0  ;;  %v10629_v59 = vmax.f32 %v13176_v18, 0.0  ;;  %v13853_v56 = vld [vmem:[#allocation10 + $0x340] ss:$8 sps:$4 sm:$0xff]   ;;  %v13854_v28 = vld [vmem:[#allocation10 + $0x350] ss:$8 sps:$4 sm:$0xff]  }
 0x71f   :  { %v10630_v8 = vpack.c.bf16 %v10626_v13, %v10626_v13  ;;  %v10632_v50 = vpack.c.bf16 %v10628_v49, %v10628_v49  ;;  %v13850_v13 = vld [vmem:[#allocation10 + $0x310] ss:$8 sps:$4 sm:$0xff]  }
 0x720   :  { %v10631_v36 = vpack.c.bf16 %v10627_v6, %v10627_v6  ;;  %v10633_v45 = vpack.c.bf16 %v10629_v59, %v10629_v59  ;;  %v13855_v6 = vld [vmem:[#allocation10 + $0x360] ss:$8 sps:$4 sm:$0xff]   ;;  %v13856_v59 = vld [vmem:[#allocation10 + $0x370] ss:$8 sps:$4 sm:$0xff]  }
 0x722   :  { %11062 = vmatprep.mubr.bf16.mxu0 %v10631_v36 }
 0x723   :  { %11063 = vmatmul.mubr.bf16.vlgmr.msra.gmra.mrb[24].mxu0 %v10630_v8 }
 0x724   :  { %11072 = vmatpush1.bf16.msra.mxu0 %v13785_v7  ;;  %11103 = vmatprep.mubr.bf16.mxu0 %v10633_v45  ;;  %v13050_v7 = vld [vmem:[#allocation11 + $0x1e] ss:$0 sm:$0xff] }
 0x725   :  { %11073 = vmatprep.subr.bf16.mxu0 %v13790_v40 }
 0x728   :  { %11074 = vmatpush1.bf16.msra.mxu0 %v13788_v54 }
 0x729   :  { %11075 = vmatprep.subr.bf16.mxu0 %v13793_v14 }
 0x72c   :  { %11076 = vmatpush1.bf16.msra.mxu0 %v13791_v15 }
 0x72d   :  { %11077 = vmatprep.subr.bf16.mxu0 %v13796_v12  ;;  %v13857_v12 = vld [vmem:[#allocation10 + $0x380] ss:$8 sps:$4 sm:$0xff]  }
 0x730   :  { %11078 = vmatpush1.bf16.msra.mxu0 %v13794_v20 }
 0x731   :  { %11079 = vmatprep.subr.bf16.mxu0 %v13799_v0  ;;  %v13858_v0 = vld [vmem:[#allocation10 + $0x390] ss:$8 sps:$4 sm:$0xff]  }
 0x734   :  { %11080 = vmatpush1.bf16.msra.mxu0 %v13797_v27  ;;  %v13859_v27 = vld [vmem:[#allocation10 + $0x3a0] ss:$8 sps:$4 sm:$0xff]  }
 0x735   :  { %11081 = vmatprep.subr.bf16.mxu0 %v13802_v29  ;;  %v13860_v29 = vld [vmem:[#allocation10 + $0x3b0] ss:$8 sps:$4 sm:$0xff]  }
 0x738   :  { %11082 = vmatpush1.bf16.msra.mxu0 %v13800_v43  ;;  %v13861_v43 = vld [vmem:[#allocation10 + $0x3c0] ss:$8 sps:$4 sm:$0xff]  }
 0x739   :  { %11083 = vmatprep.subr.bf16.mxu0 %v13805_v26  ;;  %v13067_v26 = vld [vmem:[#allocation11 + $0x1f] ss:$0 sm:$0xff] }
 0x73c   :  { %11084 = vmatpush1.bf16.msra.mxu0 %v13803_v60 }
 0x73d   :  { %11085 = vmatprep.subr.bf16.mxu0 %v13808_v47 }
 0x740   :  { %11086 = vmatpush1.bf16.msra.mxu0 %v13806_v4 }
 0x741   :  { %11087 = vmatprep.subr.bf16.mxu0 %v13811_v33 }
 0x744   :  { %11088 = vmatpush1.bf16.msra.mxu0 %v13809_v34 }
 0x745   :  { %11089 = vmatprep.subr.bf16.mxu0 %v13814_v35 }
 0x748   :  { %11090 = vmatpush1.bf16.msra.mxu0 %v13812_v37 }
 0x749   :  { %11091 = vmatprep.subr.bf16.mxu0 %v13817_v48  ;;  %v13862_v48 = vld [vmem:[#allocation10 + $0x3d0] ss:$8 sps:$4 sm:$0xff]  }
 0x74c   :  { %11092 = vmatpush1.bf16.msra.mxu0 %v13815_v38  ;;  %v13076_v38 = vld [vmem:[#allocation11 + $0x20] ss:$0 sm:$0xff] }
 0x74d   :  { %11093 = vmatprep.subr.bf16.mxu0 %v13820_v51 }
 0x750   :  { %11094 = vmatpush1.bf16.msra.mxu0 %v13818_v23 }
 0x751   :  { %11095 = vmatprep.subr.bf16.mxu0 %v13823_v30 }
 0x754   :  { %11096 = vmatpush1.bf16.msra.mxu0 %v13821_v41 }
 0x755   :  { %11097 = vmatprep.subr.bf16.mxu0 %v13826_v25 }
 0x758   :  { %11098 = vmatpush1.bf16.msra.mxu0 %v13824_v42 }
 0x759   :  { %11099 = vmatprep.subr.bf16.mxu0 %v13829_v44  ;;  %v13082_v44 = vld [vmem:[#allocation11 + $0x21] ss:$0 sm:$0xff] }
 0x75c   :  { %11100 = vmatpush1.bf16.msra.mxu0 %v13827_v31 }
 0x75d   :  { %11101 = vmatprep.subr.bf16.mxu0 %v13832_v57 }
 0x760   :  { %11102 = vmatpush1.bf16.msra.mxu0 %v13830_v5 }
 0x761   :  { %13157 = vmatprep.subr.bf16.mxu0 %v14045_v61 }
 0x763   :  { %11104 = vmatmul.mubr.bf16.vlgmr.msra.gmra.mrb[24].mxu0 %v10632_v50 }
 0x764   :  { %13161 = vmatprep.mubr.msk.bf16.mxu0 %vm14046_vm2, %v14045_v61  ;;  %13158 = vmatpush3.bf16.msra.mxu0 %v13861_v43 }
 0x765   :  { %13159 = vmatprep.subr.bf16.mxu0 %v14045_v61 }
 0x768   :  { %13160 = vmatpush3.bf16.msra.mxu0 %v13862_v48 }
 0x836   :  { %v11105_v19 = vpop.f32.mrb[24].mxu0 }
 0x837   :  { %v13177_v9 = vadd.f32 %v11105_v19, %v10703_v62  ;;  %v11107_v22 = vpop.f32.mrb[25].mxu0 }
 0x838   :  { %v13178_v63 = vadd.f32 %v11107_v22, %v10707_v32  ;;  %v11109_v16 = vpop.f32.mrb[26].mxu0 }
 0x839   :  { %v11112_v39 = vmax.f32 %v13177_v9, 0.0  ;;  %v11110_v17 = vpop.f32.mrb[27].mxu0 }
 0x83a   :  { %v11113_v1 = vmax.f32 %v13178_v63, 0.0 }
 0x83b   :  { %v11114_v21 = vpack.c.bf16 %v11112_v39, %v11112_v39 }
 0x83c   :  { %v11115_v18 = vpack.c.bf16 %v11113_v1, %v11113_v1 }
 0x83e   :  { %11283 = vmatprep.mubr.bf16.mxu1 %v11115_v18 }
 0x83f   :  { %11284 = vmatmul.mubr.bf16.vlgmr.msra.gmra.mrb[32].mxu1 %v11114_v21 }
 0x840   :  { %13126 = vmatpush3.bf16.msra.mxu1 %v13849_v24  ;;  %13141 = vmatprep.mubr.msk.bf16.mxu1 %vm14046_vm2, %v14045_v61 }
 0x841   :  { %13127 = vmatprep.subr.bf16.mxu1 %v14045_v61 }
 0x844   :  { %13128 = vmatpush3.bf16.msra.mxu1 %v13850_v13 }
 0x845   :  { %13129 = vmatprep.subr.bf16.mxu1 %v14045_v61 }
 0x848   :  { %13130 = vmatpush3.bf16.msra.mxu1 %v13851_v53 }
 0x849   :  { %13131 = vmatprep.subr.bf16.mxu1 %v14045_v61 }
 0x84c   :  { %13132 = vmatpush3.bf16.msra.mxu1 %v13852_v55 }
 0x84d   :  { %13133 = vmatprep.subr.bf16.mxu1 %v14045_v61 }
 0x850   :  { %13134 = vmatpush3.bf16.msra.mxu1 %v13853_v56 }
 0x851   :  { %13135 = vmatprep.subr.bf16.mxu1 %v14045_v61 }
 0x854   :  { %13136 = vmatpush3.bf16.msra.mxu1 %v13854_v28 }
 0x855   :  { %13137 = vmatprep.subr.bf16.mxu1 %v14045_v61 }
 0x858   :  { %13138 = vmatpush3.bf16.msra.mxu1 %v13855_v6 }
 0x859   :  { %13139 = vmatprep.subr.bf16.mxu1 %v14045_v61 }
 0x85c   :  { %13140 = vmatpush3.bf16.msra.mxu1 %v13856_v59 }
 0x85d   :  { %13145 = vmatprep.subr.bf16.mxu1 %v14045_v61 }
 0x912   :  { %v13102_v36 = vpop.f32.mrb[32].mxu1 }
 0x913   :  { %v13103_v8 = vpop.f32.mrb[33].mxu1 }
 0x914   :  { %v13104_v40 = vadd.f32 %v13103_v8, %v13102_v36  ;;  %v13105_v45 = vpop.f32.mrb[34].mxu1 }
 0x915   :  { %v13106_v54 = vpop.f32.mrb[35].mxu1 }
 0x916   :  { %v11286_v14 = vadd.f32 %v13104_v40, %v13050_v7 }
 0x918   :  { %v11291_v15 = vmax.f32 %v11286_v14, 0.0 }
 0x91a   :  { %v11292_v20 = vpack.c.bf16 %v11291_v15, %v11291_v15 }
 0x91c   :  { %13142 = vmatmul.mubr.bf16.vlgmr.msra.gmra.mrb[36].mxu1 %v11292_v20 }
 0x91d   :  { %13146 = vmatpush3.bf16.msra.mxu1 %v13857_v12  ;;  %13153 = vmatprep.mubr.msk.bf16.mxu1 %vm14046_vm2, %v14045_v61 }
 0x91e   :  { %13147 = vmatprep.subr.bf16.mxu1 %v14045_v61 }
 0x921   :  { %13148 = vmatpush3.bf16.msra.mxu1 %v13858_v0 }
 0x922   :  { %13149 = vmatprep.subr.bf16.mxu1 %v14045_v61 }
 0x925   :  { %13150 = vmatpush3.bf16.msra.mxu1 %v13859_v27 }
 0x926   :  { %13151 = vmatprep.subr.bf16.mxu1 %v14045_v61 }
 0x929   :  { %13152 = vmatpush3.bf16.msra.mxu1 %v13860_v29 }
 0x9ef   :  { %v11398_v60 = vpop.f32.mrb[36].mxu1 }
 0x9f0   :  { %v11399_v47 = vadd.f32 %v13067_v26, %v11398_v60  ;;  %v13143_v4 = vpop.f32.mrb[37].mxu1 }
 0x9f1   :  { %v11401_v33 = vpop.f32.mrb[38].mxu1 }
 0x9f2   :  { %v11404_v34 = vmax.f32 %v11399_v47, 0.0  ;;  %v13144_v35 = vpop.f32.mrb[39].mxu1 }
 0x9f4   :  { %v11405_v37 = vpack.c.bf16 %v11404_v34, %v11404_v34 }
 0x9f6   :  { %13154 = vmatmul.mubr.msk.bf16.vlgmr.msra.gmra.mrb[40].mxu1 %vm11445_vm3, %v11405_v37 }
 0xac9   :  { %v11483_v51 = vpop.f32.mrb[40].mxu1 }
 0xaca   :  { %v11484_v23 = vadd.f32 %v13076_v38, %v11483_v51  ;;  %v13155_v30 = vpop.f32.mrb[41].mxu1 }
 0xacb   :  { %v11486_v41 = vpop.f32.mrb[42].mxu1 }
 0xacc   :  { %v11489_v25 = vmax.f32 %v11484_v23, 0.0  ;;  %v13156_v42 = vpop.f32.mrb[43].mxu1 }
 0xace   :  { %v11490_v46 = vpack.c.bf16 %v11489_v25, %v11489_v25 }
 0xad0   :  { %13162 = vmatmul.mubr.msk.bf16.vlgmr.msra.gmra.mrb[28].mxu0 %vm11514_vm4, %v11490_v46 }
 0xba3   :  { %v11552_v31 = vpop.f32.mrb[28].mxu0 }
 0xba4   :  { %v11553_v3 = vadd.f32 %v13082_v44, %v11552_v31  ;;  %v13163_v57 = vpop.f32.mrb[29].mxu0 }
 0xba5   :  { %v11555_v5 = vpop.f32.mrb[30].mxu0 }
 0xba6   :  { %v13164_v49 = vpop.f32.mrb[31].mxu0  ;;  %11559 = vst.msk [vmem:[#allocation13] sm:$0x3] %vm11558_vm5, %v11553_v3 }
 0xba7   :  { %14009 = shalt.err (!%p14006_p10)
}
 0xba8   :  { %s14010_s24 = scalar_lea.hbm %s14498_s6, 32 }
 0xba9   :  { %p14011_p11 = scmp.ne.s32.totalorder %s14498_s6, %s14010_s24  ;;  %p14014_p12 = scmp.lt.u32.totalorder %s14010_s24, %s14498_s6 }
 0xbab   :  { %p14016_p13 = pnand %p14014_p12, %p14011_p11 }
 0xbad   :  { %14019 = shalt.err (!%p14016_p13)
}
 0xbae   :  { %11569 = dma.vmem_to_hbm [thread:$0]  %s11567_s1, 32, %s14498_s6, [#allocation4]  }
 0xbaf   :  { %14028 = dma.done.wait [#allocation4], 32  }
 0xbb0   :  { %14029 = vsyncadd [#allocation4], 4294967264 }
 0xbb1   :  { %11573 = vsyncpa [#allocation3], 1 }
 0xbb2   :  { %11574 = vsyncpa [#allocation6], 1 }
 0xbb3   :  { %11575 = vsyncpa [#allocation9], 1 }
 0xbb4   :  { %11576 = vsyncpa [#allocation12], 1 }
 0xbb5   :  { %11577 = vsyncpa [#allocation4], 1 }

</bundles_post_ra>
